<compile_context>
chip_gen: v5e
topology: v5e:2x2
jax: 0.10.0
libtpu: 0.0.40
codegen_flags: <defaults>
</compile_context>

<pallas_src>
import functools

import jax
import jax.numpy as jnp
from jax.experimental import pallas as pl
from jax.experimental.pallas import tpu as pltpu


_LANE = 128


def _round_up(x, m):
    return (x + m - 1) // m * m


def _double_conv_kernel(xp_ref, w1_ref, b1_ref, w2_ref, b2_ref, o_ref,
                        ypad_ref, *, H, W, Cp):
    """Fused Conv3x3 -> ReLU -> Conv3x3 -> ReLU for one image (NHWC, channels padded to Cp).

    xp_ref  : (1, H+2, W+2, Cp) bf16   zero-halo'd + channel-padded input
    w?_ref  : (9*Cp, Cp)        bf16   tap-blocked weights, row block k = 3*dy+dx
    b?_ref  : (1, Cp)           f32
    o_ref   : (1, H, W, Cp)     bf16
    ypad_ref: (H+2, W+2, Cp)    bf16   VMEM scratch: conv1 output w/ zero halo (never hits HBM)
    """

    def conv3x3_relu(load_tap, w_ref, b_ref):
        # 9 accumulated MXU matmuls (f32 accumulation); no im2col staging buffer.
        acc = None
        for dy in range(3):
            for dx in range(3):
                k = 3 * dy + dx
                tap = load_tap(dy, dx).reshape(H * W, Cp)              # bf16 (H*W, Cp)
                part = jnp.dot(tap, w_ref[k * Cp:(k + 1) * Cp, :],
                               preferred_element_type=jnp.float32)
                acc = part if acc is None else acc + part
        return jnp.maximum(acc + b_ref[...], 0.0)                      # bias + ReLU in f32

    # ---- conv1 + ReLU (input already carries the 1-pixel zero halo, stays bf16) ----
    y1 = conv3x3_relu(lambda dy, dx: xp_ref[0, dy:dy + H, dx:dx + W, :],
                      w1_ref, b1_ref)

    # ---- conv2 + ReLU, fused: intermediate stays in VMEM as bf16, never written to HBM ----
    # Zero only the halo ring; the interior is fully overwritten below.
    zrow = jnp.zeros((1, W + 2, Cp), dtype=ypad_ref.dtype)
    zcol = jnp.zeros((H + 2, 1, Cp), dtype=ypad_ref.dtype)
    ypad_ref[0:1, :, :] = zrow
    ypad_ref[H + 1:H + 2, :, :] = zrow
    ypad_ref[:, 0:1, :] = zcol
    ypad_ref[:, W + 1:W + 2, :] = zcol
    ypad_ref[1:H + 1, 1:W + 1, :] = y1.reshape(H, W, Cp).astype(jnp.bfloat16)

    y2 = conv3x3_relu(lambda dy, dx: ypad_ref[dy:dy + H, dx:dx + W, :],
                      w2_ref, b2_ref)

    o_ref[...] = y2.reshape(1, H, W, Cp).astype(o_ref.dtype)


def _pack_weights(w_oihw, cin, cout, cp):
    """(Cout, Cin, 3, 3) OIHW -> tap-blocked layout (9*Cp, Cp), zero-padded channels, bf16."""
    w = jnp.transpose(w_oihw, (2, 3, 1, 0))                            # (3, 3, Cin, Cout)
    w = jnp.pad(w, ((0, 0), (0, 0), (0, cp - cin), (0, cp - cout)))
    return w.reshape(9 * cp, cp).astype(jnp.bfloat16)


def double_conv(x_nchw, w1, b1, w2, b2):
    """DoubleConv.forward with norm=False, act=ReLU.

    x_nchw: (N, Cin, H, W); w1: (Cout, Cin, 3, 3); w2: (Cout, Cout, 3, 3)."""
    N, Cin, H, W = x_nchw.shape
    Cout = w1.shape[0]
    Cp = _round_up(max(Cin, Cout), _LANE)      # lane-dense channel count carried end-to-end

    # NCHW -> NHWC; fuse the spatial halo pad with the (mandatory) channel pad and the bf16
    # cast so the input is materialized exactly once in its kernel-ready form.
    x = jnp.transpose(x_nchw, (0, 2, 3, 1))
    xp = jnp.pad(x, ((0, 0), (1, 1), (1, 1), (0, Cp - Cin))).astype(jnp.bfloat16)

    w1p = _pack_weights(w1, Cin, Cout, Cp)
    w2p = _pack_weights(w2, Cout, Cout, Cp)
    b1p = jnp.pad(b1, (0, Cp - Cout)).reshape(1, Cp).astype(jnp.float32)
    b2p = jnp.pad(b2, (0, Cp - Cout)).reshape(1, Cp).astype(jnp.float32)

    kernel = functools.partial(_double_conv_kernel, H=H, W=W, Cp=Cp)

    # VMEM working set (double-buffered pipelined operands + scratch + f32 accumulator slack).
    elt = 2  # bf16
    vmem_working = (
        2 * (H + 2) * (W + 2) * Cp * elt          # input block (double-buffered)
        + 2 * H * W * Cp * elt                    # output block (double-buffered)
        + 2 * 2 * 9 * Cp * Cp * elt               # two weight operands (double-buffered)
        + 2 * 2 * Cp * 4                          # biases
        + (H + 2) * (W + 2) * Cp * elt            # ypad scratch
        + 2 * H * W * Cp * 4                      # f32 accumulator / value headroom
    )
    if vmem_working > 48 * 1024 * 1024:
        # TODO(synk): add a row-tile grid axis (halo rows recomputed per tile) so large U-Net
        # spatial sizes fit v7x's 64 MiB VMEM and feed both TensorCores even at N=1.
        raise ValueError(
            f"DoubleConv kernel working set ({vmem_working} bytes) exceeds the per-core "
            "VMEM budget; this spatial size needs a row-tiled variant.")
    vmem_limit = int(min(64 * 1024 * 1024, max(16 * 1024 * 1024, 2 * vmem_working)))

    # Real (unpadded) FLOPs; bytes are what actually moves through HBM (padded, bf16).
    flops = 2 * N * H * W * 9 * (Cin * Cout + Cout * Cout)
    bytes_accessed = (xp.size * 2 + w1p.size * 2 + w2p.size * 2
                      + b1p.size * 4 + b2p.size * 4 + N * H * W * Cp * 2)

    # TODO(synk): weights/biases are grid-invariant; pipeline_mode=pl.Buffered(1) on their
    # BlockSpecs would drop their second VMEM buffer (~2*9*Cp*Cp*2B) once needed.
    y = pl.pallas_call(
        kernel,
        out_shape=jax.ShapeDtypeStruct((N, H, W, Cp), jnp.bfloat16),
        grid_spec=pltpu.PrefetchScalarGridSpec(
            num_scalar_prefetch=0,
            grid=(N,),                                               # one image per grid step
            in_specs=[
                pl.BlockSpec((1, H + 2, W + 2, Cp), lambda n: (n, 0, 0, 0)),
                pl.BlockSpec((9 * Cp, Cp), lambda n: (0, 0)),
                pl.BlockSpec((1, Cp), lambda n: (0, 0)),
                pl.BlockSpec((9 * Cp, Cp), lambda n: (0, 0)),
                pl.BlockSpec((1, Cp), lambda n: (0, 0)),
            ],
            out_specs=pl.BlockSpec((1, H, W, Cp), lambda n: (n, 0, 0, 0)),
            scratch_shapes=[
                pltpu.VMEM((H + 2, W + 2, Cp), jnp.bfloat16),        # zero-halo'd conv1 output
            ],
        ),
        compiler_params=pltpu.CompilerParams(
            dimension_semantics=("parallel",),
            vmem_limit_bytes=vmem_limit,
        ),
        cost_estimate=pl.CostEstimate(flops=flops, transcendentals=0,
                                      bytes_accessed=bytes_accessed),
    )(xp, w1p, b1p, w2p, b2p)

    y = y[..., :Cout].astype(jnp.float32)                            # drop padded channels
    return jnp.transpose(y, (0, 3, 1, 2))                            # NHWC -> NCHW


# TODO(synk): norm=True branch (nn.BatchNorm2d) is not implemented; default (norm=False) path only.
# TODO(synk): for tiny Cin/Cout (e.g. U-Net stem, Cin=4) the contraction dim could pack all 9
#             taps densely (K = round_up(9*Cin, 128)) instead of 9*128, but building that LHS
#             needs wrapper-side cross-lane packing; not done here.


def _ref_double_conv(x, w1, b1, w2, b2):
    """Reference with the same bf16-input / f32-accumulate quantization as the kernel."""
    def conv_relu(x, w, b):
        y = jax.lax.conv_general_dilated(
            x.astype(jnp.bfloat16), w.astype(jnp.bfloat16),
            window_strides=(1, 1), padding=((1, 1), (1, 1)),
            dimension_numbers=("NCHW", "OIHW", "NCHW"),
            preferred_element_type=jnp.float32)
        return jnp.maximum(y + b[None, :, None, None], 0.0)
    return conv_relu(conv_relu(x, w1, b1), w2, b2)


if __name__ == "__main__":
    N, Cin, Cout, H, W = 2, 4, 8, 16, 16
    key = jax.random.PRNGKey(0)
    kx, k1, kb1, k2, kb2 = jax.random.split(key, 5)

    x = jax.random.normal(kx, (N, Cin, H, W), jnp.float32)
    w1 = jax.random.normal(k1, (Cout, Cin, 3, 3), jnp.float32) * 0.1
    b1 = jax.random.normal(kb1, (Cout,), jnp.float32) * 0.1
    w2 = jax.random.normal(k2, (Cout, Cout, 3, 3), jnp.float32) * 0.1
    b2 = jax.random.normal(kb2, (Cout,), jnp.float32) * 0.1

    out = jax.jit(double_conv)(x, w1, b1, w2, b2)
    out = jax.block_until_ready(out)

    ref = _ref_double_conv(x, w1, b1, w2, b2)
    assert out.shape == (N, Cout, H, W)
    max_err = float(jnp.max(jnp.abs(out - ref)))
    assert jnp.allclose(out, ref, rtol=2e-2, atol=2e-2), (
        f"mismatch vs reference conv (max abs err={max_err})")

    print("KERNEL_OK")
</pallas_src>

<mosaic_0001>
module attributes {stable_mosaic.version = 11 : i64} {
  func.func @_double_conv_kernel(%arg0: i32, %arg1: memref<1x18x18x128xbf16, #tpu.memory_space<vmem>>, %arg2: memref<1152x128xbf16, #tpu.memory_space<vmem>>, %arg3: memref<1x128xf32, #tpu.memory_space<vmem>>, %arg4: memref<1152x128xbf16, #tpu.memory_space<vmem>>, %arg5: memref<1x128xf32, #tpu.memory_space<vmem>>, %arg6: memref<1x16x16x128xbf16, #tpu.memory_space<vmem>>, %arg7: memref<18x18x128xbf16, #tpu.memory_space<vmem>>) attributes {dimension_semantics = [#tpu.dimension_semantics<parallel>], iteration_bounds = array<i64: 2>, scalar_prefetch = 0 : i64, scratch_operands = 1 : i64, tpu.core_type = #tpu.core_type<tc>, window_params = [{transform_indices = @transform_0, window_bounds = array<i64: 1, 18, 18, 128>}, {pipeline_mode = #tpu.pipeline_mode<synchronous>, transform_indices = @transform_1, window_bounds = array<i64: 1152, 128>}, {pipeline_mode = #tpu.pipeline_mode<synchronous>, transform_indices = @transform_2, window_bounds = array<i64: 1, 128>}, {pipeline_mode = #tpu.pipeline_mode<synchronous>, transform_indices = @transform_3, window_bounds = array<i64: 1152, 128>}, {pipeline_mode = #tpu.pipeline_mode<synchronous>, transform_indices = @transform_4, window_bounds = array<i64: 1, 128>}, {transform_indices = @transform_5, window_bounds = array<i64: 1, 16, 16, 128>}]} {
    %c0 = arith.constant 0 : index
    %c0_0 = arith.constant 0 : index
    %c0_1 = arith.constant 0 : index
    %c0_2 = arith.constant 0 : index
    %0 = vector.load %arg1[%c0, %c0_0, %c0_1, %c0_2] : memref<1x18x18x128xbf16, #tpu.memory_space<vmem>>, vector<1x16x16x128xbf16>
    %1 = vector.shape_cast %0 : vector<1x16x16x128xbf16> to vector<16x16x128xbf16>
    %2 = vector.shape_cast %1 : vector<16x16x128xbf16> to vector<256x128xbf16>
    %c0_3 = arith.constant 0 : index
    %c0_4 = arith.constant 0 : index
    %3 = vector.load %arg2[%c0_3, %c0_4] : memref<1152x128xbf16, #tpu.memory_space<vmem>>, vector<128x128xbf16>
    %cst = arith.constant dense<0.000000e+00> : vector<256x128xf32>
    %4 = tpu.matmul %2, %3, %cst {dimension_numbers = #tpu.dot_dimension_numbers<[1], [0], [0], [1], [0, 0, 1, 1], [], []>} : vector<256x128xbf16>, vector<128x128xbf16>, vector<256x128xf32> -> vector<256x128xf32>
    %c0_5 = arith.constant 0 : index
    %c0_6 = arith.constant 0 : index
    %c1 = arith.constant 1 : index
    %c0_7 = arith.constant 0 : index
    %5 = vector.load %arg1[%c0_5, %c0_6, %c1, %c0_7] : memref<1x18x18x128xbf16, #tpu.memory_space<vmem>>, vector<1x16x16x128xbf16>
    %6 = vector.shape_cast %5 : vector<1x16x16x128xbf16> to vector<16x16x128xbf16>
    %7 = vector.shape_cast %6 : vector<16x16x128xbf16> to vector<256x128xbf16>
    %c128 = arith.constant 128 : index
    %c0_8 = arith.constant 0 : index
    %8 = vector.load %arg2[%c128, %c0_8] : memref<1152x128xbf16, #tpu.memory_space<vmem>>, vector<128x128xbf16>
    %cst_9 = arith.constant dense<0.000000e+00> : vector<256x128xf32>
    %9 = tpu.matmul %7, %8, %cst_9 {dimension_numbers = #tpu.dot_dimension_numbers<[1], [0], [0], [1], [0, 0, 1, 1], [], []>} : vector<256x128xbf16>, vector<128x128xbf16>, vector<256x128xf32> -> vector<256x128xf32>
    %10 = arith.addf %4, %9 : vector<256x128xf32>
    %c0_10 = arith.constant 0 : index
    %c0_11 = arith.constant 0 : index
    %c2 = arith.constant 2 : index
    %c0_12 = arith.constant 0 : index
    %11 = vector.load %arg1[%c0_10, %c0_11, %c2, %c0_12] : memref<1x18x18x128xbf16, #tpu.memory_space<vmem>>, vector<1x16x16x128xbf16>
    %12 = vector.shape_cast %11 : vector<1x16x16x128xbf16> to vector<16x16x128xbf16>
    %13 = vector.shape_cast %12 : vector<16x16x128xbf16> to vector<256x128xbf16>
    %c256 = arith.constant 256 : index
    %c0_13 = arith.constant 0 : index
    %14 = vector.load %arg2[%c256, %c0_13] : memref<1152x128xbf16, #tpu.memory_space<vmem>>, vector<128x128xbf16>
    %cst_14 = arith.constant dense<0.000000e+00> : vector<256x128xf32>
    %15 = tpu.matmul %13, %14, %cst_14 {dimension_numbers = #tpu.dot_dimension_numbers<[1], [0], [0], [1], [0, 0, 1, 1], [], []>} : vector<256x128xbf16>, vector<128x128xbf16>, vector<256x128xf32> -> vector<256x128xf32>
    %16 = arith.addf %10, %15 : vector<256x128xf32>
    %c0_15 = arith.constant 0 : index
    %c1_16 = arith.constant 1 : index
    %c0_17 = arith.constant 0 : index
    %c0_18 = arith.constant 0 : index
    %17 = vector.load %arg1[%c0_15, %c1_16, %c0_17, %c0_18] : memref<1x18x18x128xbf16, #tpu.memory_space<vmem>>, vector<1x16x16x128xbf16>
    %18 = vector.shape_cast %17 : vector<1x16x16x128xbf16> to vector<16x16x128xbf16>
    %19 = vector.shape_cast %18 : vector<16x16x128xbf16> to vector<256x128xbf16>
    %c384 = arith.constant 384 : index
    %c0_19 = arith.constant 0 : index
    %20 = vector.load %arg2[%c384, %c0_19] : memref<1152x128xbf16, #tpu.memory_space<vmem>>, vector<128x128xbf16>
    %cst_20 = arith.constant dense<0.000000e+00> : vector<256x128xf32>
    %21 = tpu.matmul %19, %20, %cst_20 {dimension_numbers = #tpu.dot_dimension_numbers<[1], [0], [0], [1], [0, 0, 1, 1], [], []>} : vector<256x128xbf16>, vector<128x128xbf16>, vector<256x128xf32> -> vector<256x128xf32>
    %22 = arith.addf %16, %21 : vector<256x128xf32>
    %c0_21 = arith.constant 0 : index
    %c1_22 = arith.constant 1 : index
    %c1_23 = arith.constant 1 : index
    %c0_24 = arith.constant 0 : index
    %23 = vector.load %arg1[%c0_21, %c1_22, %c1_23, %c0_24] : memref<1x18x18x128xbf16, #tpu.memory_space<vmem>>, vector<1x16x16x128xbf16>
    %24 = vector.shape_cast %23 : vector<1x16x16x128xbf16> to vector<16x16x128xbf16>
    %25 = vector.shape_cast %24 : vector<16x16x128xbf16> to vector<256x128xbf16>
    %c512 = arith.constant 512 : index
    %c0_25 = arith.constant 0 : index
    %26 = vector.load %arg2[%c512, %c0_25] : memref<1152x128xbf16, #tpu.memory_space<vmem>>, vector<128x128xbf16>
    %cst_26 = arith.constant dense<0.000000e+00> : vector<256x128xf32>
    %27 = tpu.matmul %25, %26, %cst_26 {dimension_numbers = #tpu.dot_dimension_numbers<[1], [0], [0], [1], [0, 0, 1, 1], [], []>} : vector<256x128xbf16>, vector<128x128xbf16>, vector<256x128xf32> -> vector<256x128xf32>
    %28 = arith.addf %22, %27 : vector<256x128xf32>
    %c0_27 = arith.constant 0 : index
    %c1_28 = arith.constant 1 : index
    %c2_29 = arith.constant 2 : index
    %c0_30 = arith.constant 0 : index
    %29 = vector.load %arg1[%c0_27, %c1_28, %c2_29, %c0_30] : memref<1x18x18x128xbf16, #tpu.memory_space<vmem>>, vector<1x16x16x128xbf16>
    %30 = vector.shape_cast %29 : vector<1x16x16x128xbf16> to vector<16x16x128xbf16>
    %31 = vector.shape_cast %30 : vector<16x16x128xbf16> to vector<256x128xbf16>
    %c640 = arith.constant 640 : index
    %c0_31 = arith.constant 0 : index
    %32 = vector.load %arg2[%c640, %c0_31] : memref<1152x128xbf16, #tpu.memory_space<vmem>>, vector<128x128xbf16>
    %cst_32 = arith.constant dense<0.000000e+00> : vector<256x128xf32>
    %33 = tpu.matmul %31, %32, %cst_32 {dimension_numbers = #tpu.dot_dimension_numbers<[1], [0], [0], [1], [0, 0, 1, 1], [], []>} : vector<256x128xbf16>, vector<128x128xbf16>, vector<256x128xf32> -> vector<256x128xf32>
    %34 = arith.addf %28, %33 : vector<256x128xf32>
    %c0_33 = arith.constant 0 : index
    %c2_34 = arith.constant 2 : index
    %c0_35 = arith.constant 0 : index
    %c0_36 = arith.constant 0 : index
    %35 = vector.load %arg1[%c0_33, %c2_34, %c0_35, %c0_36] : memref<1x18x18x128xbf16, #tpu.memory_space<vmem>>, vector<1x16x16x128xbf16>
    %36 = vector.shape_cast %35 : vector<1x16x16x128xbf16> to vector<16x16x128xbf16>
    %37 = vector.shape_cast %36 : vector<16x16x128xbf16> to vector<256x128xbf16>
    %c768 = arith.constant 768 : index
    %c0_37 = arith.constant 0 : index
    %38 = vector.load %arg2[%c768, %c0_37] : memref<1152x128xbf16, #tpu.memory_space<vmem>>, vector<128x128xbf16>
    %cst_38 = arith.constant dense<0.000000e+00> : vector<256x128xf32>
    %39 = tpu.matmul %37, %38, %cst_38 {dimension_numbers = #tpu.dot_dimension_numbers<[1], [0], [0], [1], [0, 0, 1, 1], [], []>} : vector<256x128xbf16>, vector<128x128xbf16>, vector<256x128xf32> -> vector<256x128xf32>
    %40 = arith.addf %34, %39 : vector<256x128xf32>
    %c0_39 = arith.constant 0 : index
    %c2_40 = arith.constant 2 : index
    %c1_41 = arith.constant 1 : index
    %c0_42 = arith.constant 0 : index
    %41 = vector.load %arg1[%c0_39, %c2_40, %c1_41, %c0_42] : memref<1x18x18x128xbf16, #tpu.memory_space<vmem>>, vector<1x16x16x128xbf16>
    %42 = vector.shape_cast %41 : vector<1x16x16x128xbf16> to vector<16x16x128xbf16>
    %43 = vector.shape_cast %42 : vector<16x16x128xbf16> to vector<256x128xbf16>
    %c896 = arith.constant 896 : index
    %c0_43 = arith.constant 0 : index
    %44 = vector.load %arg2[%c896, %c0_43] : memref<1152x128xbf16, #tpu.memory_space<vmem>>, vector<128x128xbf16>
    %cst_44 = arith.constant dense<0.000000e+00> : vector<256x128xf32>
    %45 = tpu.matmul %43, %44, %cst_44 {dimension_numbers = #tpu.dot_dimension_numbers<[1], [0], [0], [1], [0, 0, 1, 1], [], []>} : vector<256x128xbf16>, vector<128x128xbf16>, vector<256x128xf32> -> vector<256x128xf32>
    %46 = arith.addf %40, %45 : vector<256x128xf32>
    %c0_45 = arith.constant 0 : index
    %c2_46 = arith.constant 2 : index
    %c2_47 = arith.constant 2 : index
    %c0_48 = arith.constant 0 : index
    %47 = vector.load %arg1[%c0_45, %c2_46, %c2_47, %c0_48] : memref<1x18x18x128xbf16, #tpu.memory_space<vmem>>, vector<1x16x16x128xbf16>
    %48 = vector.shape_cast %47 : vector<1x16x16x128xbf16> to vector<16x16x128xbf16>
    %49 = vector.shape_cast %48 : vector<16x16x128xbf16> to vector<256x128xbf16>
    %c1024 = arith.constant 1024 : index
    %c0_49 = arith.constant 0 : index
    %50 = vector.load %arg2[%c1024, %c0_49] : memref<1152x128xbf16, #tpu.memory_space<vmem>>, vector<128x128xbf16>
    %cst_50 = arith.constant dense<0.000000e+00> : vector<256x128xf32>
    %51 = tpu.matmul %49, %50, %cst_50 {dimension_numbers = #tpu.dot_dimension_numbers<[1], [0], [0], [1], [0, 0, 1, 1], [], []>} : vector<256x128xbf16>, vector<128x128xbf16>, vector<256x128xf32> -> vector<256x128xf32>
    %52 = arith.addf %46, %51 : vector<256x128xf32>
    %c0_51 = arith.constant 0 : index
    %c0_52 = arith.constant 0 : index
    %53 = vector.load %arg3[%c0_51, %c0_52] : memref<1x128xf32, #tpu.memory_space<vmem>>, vector<1x128xf32>
    %54 = vector.broadcast %53 : vector<1x128xf32> to vector<256x128xf32>
    %55 = arith.addf %52, %54 : vector<256x128xf32>
    %cst_53 = arith.constant 0.000000e+00 : f32
    %56 = vector.broadcast %cst_53 : f32 to vector<256x128xf32>
    %57 = arith.maximumf %55, %56 : vector<256x128xf32>
    %cst_54 = arith.constant 0.000000e+00 : bf16
    %58 = vector.broadcast %cst_54 : bf16 to vector<1x18x128xbf16>
    %cst_55 = arith.constant 0.000000e+00 : bf16
    %59 = vector.broadcast %cst_55 : bf16 to vector<18x1x128xbf16>
    %c0_56 = arith.constant 0 : index
    %c0_57 = arith.constant 0 : index
    %c0_58 = arith.constant 0 : index
    %60 = vector.load %arg7[%c0_56, %c0_57, %c0_58] : memref<18x18x128xbf16, #tpu.memory_space<vmem>>, vector<1x18x128xbf16>
    tpu.vector_store %arg7[%c0_56, %c0_57, %c0_58], %58 {strides = array<i32>} : memref<18x18x128xbf16, #tpu.memory_space<vmem>>, vector<1x18x128xbf16>,
    %c17 = arith.constant 17 : index
    %c0_59 = arith.constant 0 : index
    %c0_60 = arith.constant 0 : index
    %61 = vector.load %arg7[%c17, %c0_59, %c0_60] : memref<18x18x128xbf16, #tpu.memory_space<vmem>>, vector<1x18x128xbf16>
    tpu.vector_store %arg7[%c17, %c0_59, %c0_60], %58 {strides = array<i32>} : memref<18x18x128xbf16, #tpu.memory_space<vmem>>, vector<1x18x128xbf16>,
    %c0_61 = arith.constant 0 : index
    %c0_62 = arith.constant 0 : index
    %c0_63 = arith.constant 0 : index
    %62 = vector.load %arg7[%c0_61, %c0_62, %c0_63] : memref<18x18x128xbf16, #tpu.memory_space<vmem>>, vector<18x1x128xbf16>
    tpu.vector_store %arg7[%c0_61, %c0_62, %c0_63], %59 {strides = array<i32>} : memref<18x18x128xbf16, #tpu.memory_space<vmem>>, vector<18x1x128xbf16>,
    %c0_64 = arith.constant 0 : index
    %c17_65 = arith.constant 17 : index
    %c0_66 = arith.constant 0 : index
    %63 = vector.load %arg7[%c0_64, %c17_65, %c0_66] : memref<18x18x128xbf16, #tpu.memory_space<vmem>>, vector<18x1x128xbf16>
    tpu.vector_store %arg7[%c0_64, %c17_65, %c0_66], %59 {strides = array<i32>} : memref<18x18x128xbf16, #tpu.memory_space<vmem>>, vector<18x1x128xbf16>,
    %64 = vector.shape_cast %57 : vector<256x128xf32> to vector<16x16x128xf32>
    %65 = arith.truncf %64 : vector<16x16x128xf32> to vector<16x16x128xbf16>
    %c1_67 = arith.constant 1 : index
    %c1_68 = arith.constant 1 : index
    %c0_69 = arith.constant 0 : index
    %66 = vector.load %arg7[%c1_67, %c1_68, %c0_69] : memref<18x18x128xbf16, #tpu.memory_space<vmem>>, vector<16x16x128xbf16>
    tpu.vector_store %arg7[%c1_67, %c1_68, %c0_69], %65 {strides = array<i32>} : memref<18x18x128xbf16, #tpu.memory_space<vmem>>, vector<16x16x128xbf16>,
    %c0_70 = arith.constant 0 : index
    %c0_71 = arith.constant 0 : index
    %c0_72 = arith.constant 0 : index
    %67 = vector.load %arg7[%c0_70, %c0_71, %c0_72] : memref<18x18x128xbf16, #tpu.memory_space<vmem>>, vector<16x16x128xbf16>
    %68 = vector.shape_cast %67 : vector<16x16x128xbf16> to vector<256x128xbf16>
    %c0_73 = arith.constant 0 : index
    %c0_74 = arith.constant 0 : index
    %69 = vector.load %arg4[%c0_73, %c0_74] : memref<1152x128xbf16, #tpu.memory_space<vmem>>, vector<128x128xbf16>
    %cst_75 = arith.constant dense<0.000000e+00> : vector<256x128xf32>
    %70 = tpu.matmul %68, %69, %cst_75 {dimension_numbers = #tpu.dot_dimension_numbers<[1], [0], [0], [1], [0, 0, 1, 1], [], []>} : vector<256x128xbf16>, vector<128x128xbf16>, vector<256x128xf32> -> vector<256x128xf32>
    %c0_76 = arith.constant 0 : index
    %c1_77 = arith.constant 1 : index
    %c0_78 = arith.constant 0 : index
    %71 = vector.load %arg7[%c0_76, %c1_77, %c0_78] : memref<18x18x128xbf16, #tpu.memory_space<vmem>>, vector<16x16x128xbf16>
    %72 = vector.shape_cast %71 : vector<16x16x128xbf16> to vector<256x128xbf16>
    %c128_79 = arith.constant 128 : index
    %c0_80 = arith.constant 0 : index
    %73 = vector.load %arg4[%c128_79, %c0_80] : memref<1152x128xbf16, #tpu.memory_space<vmem>>, vector<128x128xbf16>
    %cst_81 = arith.constant dense<0.000000e+00> : vector<256x128xf32>
    %74 = tpu.matmul %72, %73, %cst_81 {dimension_numbers = #tpu.dot_dimension_numbers<[1], [0], [0], [1], [0, 0, 1, 1], [], []>} : vector<256x128xbf16>, vector<128x128xbf16>, vector<256x128xf32> -> vector<256x128xf32>
    %75 = arith.addf %70, %74 : vector<256x128xf32>
    %c0_82 = arith.constant 0 : index
    %c2_83 = arith.constant 2 : index
    %c0_84 = arith.constant 0 : index
    %76 = vector.load %arg7[%c0_82, %c2_83, %c0_84] : memref<18x18x128xbf16, #tpu.memory_space<vmem>>, vector<16x16x128xbf16>
    %77 = vector.shape_cast %76 : vector<16x16x128xbf16> to vector<256x128xbf16>
    %c256_85 = arith.constant 256 : index
    %c0_86 = arith.constant 0 : index
    %78 = vector.load %arg4[%c256_85, %c0_86] : memref<1152x128xbf16, #tpu.memory_space<vmem>>, vector<128x128xbf16>
    %cst_87 = arith.constant dense<0.000000e+00> : vector<256x128xf32>
    %79 = tpu.matmul %77, %78, %cst_87 {dimension_numbers = #tpu.dot_dimension_numbers<[1], [0], [0], [1], [0, 0, 1, 1], [], []>} : vector<256x128xbf16>, vector<128x128xbf16>, vector<256x128xf32> -> vector<256x128xf32>
    %80 = arith.addf %75, %79 : vector<256x128xf32>
    %c1_88 = arith.constant 1 : index
    %c0_89 = arith.constant 0 : index
    %c0_90 = arith.constant 0 : index
    %81 = vector.load %arg7[%c1_88, %c0_89, %c0_90] : memref<18x18x128xbf16, #tpu.memory_space<vmem>>, vector<16x16x128xbf16>
    %82 = vector.shape_cast %81 : vector<16x16x128xbf16> to vector<256x128xbf16>
    %c384_91 = arith.constant 384 : index
    %c0_92 = arith.constant 0 : index
    %83 = vector.load %arg4[%c384_91, %c0_92] : memref<1152x128xbf16, #tpu.memory_space<vmem>>, vector<128x128xbf16>
    %cst_93 = arith.constant dense<0.000000e+00> : vector<256x128xf32>
    %84 = tpu.matmul %82, %83, %cst_93 {dimension_numbers = #tpu.dot_dimension_numbers<[1], [0], [0], [1], [0, 0, 1, 1], [], []>} : vector<256x128xbf16>, vector<128x128xbf16>, vector<256x128xf32> -> vector<256x128xf32>
    %85 = arith.addf %80, %84 : vector<256x128xf32>
    %c1_94 = arith.constant 1 : index
    %c1_95 = arith.constant 1 : index
    %c0_96 = arith.constant 0 : index
    %86 = vector.load %arg7[%c1_94, %c1_95, %c0_96] : memref<18x18x128xbf16, #tpu.memory_space<vmem>>, vector<16x16x128xbf16>
    %87 = vector.shape_cast %86 : vector<16x16x128xbf16> to vector<256x128xbf16>
    %c512_97 = arith.constant 512 : index
    %c0_98 = arith.constant 0 : index
    %88 = vector.load %arg4[%c512_97, %c0_98] : memref<1152x128xbf16, #tpu.memory_space<vmem>>, vector<128x128xbf16>
    %cst_99 = arith.constant dense<0.000000e+00> : vector<256x128xf32>
    %89 = tpu.matmul %87, %88, %cst_99 {dimension_numbers = #tpu.dot_dimension_numbers<[1], [0], [0], [1], [0, 0, 1, 1], [], []>} : vector<256x128xbf16>, vector<128x128xbf16>, vector<256x128xf32> -> vector<256x128xf32>
    %90 = arith.addf %85, %89 : vector<256x128xf32>
    %c1_100 = arith.constant 1 : index
    %c2_101 = arith.constant 2 : index
    %c0_102 = arith.constant 0 : index
    %91 = vector.load %arg7[%c1_100, %c2_101, %c0_102] : memref<18x18x128xbf16, #tpu.memory_space<vmem>>, vector<16x16x128xbf16>
    %92 = vector.shape_cast %91 : vector<16x16x128xbf16> to vector<256x128xbf16>
    %c640_103 = arith.constant 640 : index
    %c0_104 = arith.constant 0 : index
    %93 = vector.load %arg4[%c640_103, %c0_104] : memref<1152x128xbf16, #tpu.memory_space<vmem>>, vector<128x128xbf16>
    %cst_105 = arith.constant dense<0.000000e+00> : vector<256x128xf32>
    %94 = tpu.matmul %92, %93, %cst_105 {dimension_numbers = #tpu.dot_dimension_numbers<[1], [0], [0], [1], [0, 0, 1, 1], [], []>} : vector<256x128xbf16>, vector<128x128xbf16>, vector<256x128xf32> -> vector<256x128xf32>
    %95 = arith.addf %90, %94 : vector<256x128xf32>
    %c2_106 = arith.constant 2 : index
    %c0_107 = arith.constant 0 : index
    %c0_108 = arith.constant 0 : index
    %96 = vector.load %arg7[%c2_106, %c0_107, %c0_108] : memref<18x18x128xbf16, #tpu.memory_space<vmem>>, vector<16x16x128xbf16>
    %97 = vector.shape_cast %96 : vector<16x16x128xbf16> to vector<256x128xbf16>
    %c768_109 = arith.constant 768 : index
    %c0_110 = arith.constant 0 : index
    %98 = vector.load %arg4[%c768_109, %c0_110] : memref<1152x128xbf16, #tpu.memory_space<vmem>>, vector<128x128xbf16>
    %cst_111 = arith.constant dense<0.000000e+00> : vector<256x128xf32>
    %99 = tpu.matmul %97, %98, %cst_111 {dimension_numbers = #tpu.dot_dimension_numbers<[1], [0], [0], [1], [0, 0, 1, 1], [], []>} : vector<256x128xbf16>, vector<128x128xbf16>, vector<256x128xf32> -> vector<256x128xf32>
    %100 = arith.addf %95, %99 : vector<256x128xf32>
    %c2_112 = arith.constant 2 : index
    %c1_113 = arith.constant 1 : index
    %c0_114 = arith.constant 0 : index
    %101 = vector.load %arg7[%c2_112, %c1_113, %c0_114] : memref<18x18x128xbf16, #tpu.memory_space<vmem>>, vector<16x16x128xbf16>
    %102 = vector.shape_cast %101 : vector<16x16x128xbf16> to vector<256x128xbf16>
    %c896_115 = arith.constant 896 : index
    %c0_116 = arith.constant 0 : index
    %103 = vector.load %arg4[%c896_115, %c0_116] : memref<1152x128xbf16, #tpu.memory_space<vmem>>, vector<128x128xbf16>
    %cst_117 = arith.constant dense<0.000000e+00> : vector<256x128xf32>
    %104 = tpu.matmul %102, %103, %cst_117 {dimension_numbers = #tpu.dot_dimension_numbers<[1], [0], [0], [1], [0, 0, 1, 1], [], []>} : vector<256x128xbf16>, vector<128x128xbf16>, vector<256x128xf32> -> vector<256x128xf32>
    %105 = arith.addf %100, %104 : vector<256x128xf32>
    %c2_118 = arith.constant 2 : index
    %c2_119 = arith.constant 2 : index
    %c0_120 = arith.constant 0 : index
    %106 = vector.load %arg7[%c2_118, %c2_119, %c0_120] : memref<18x18x128xbf16, #tpu.memory_space<vmem>>, vector<16x16x128xbf16>
    %107 = vector.shape_cast %106 : vector<16x16x128xbf16> to vector<256x128xbf16>
    %c1024_121 = arith.constant 1024 : index
    %c0_122 = arith.constant 0 : index
    %108 = vector.load %arg4[%c1024_121, %c0_122] : memref<1152x128xbf16, #tpu.memory_space<vmem>>, vector<128x128xbf16>
    %cst_123 = arith.constant dense<0.000000e+00> : vector<256x128xf32>
    %109 = tpu.matmul %107, %108, %cst_123 {dimension_numbers = #tpu.dot_dimension_numbers<[1], [0], [0], [1], [0, 0, 1, 1], [], []>} : vector<256x128xbf16>, vector<128x128xbf16>, vector<256x128xf32> -> vector<256x128xf32>
    %110 = arith.addf %105, %109 : vector<256x128xf32>
    %c0_124 = arith.constant 0 : index
    %c0_125 = arith.constant 0 : index
    %111 = vector.load %arg5[%c0_124, %c0_125] : memref<1x128xf32, #tpu.memory_space<vmem>>, vector<1x128xf32>
    %112 = vector.broadcast %111 : vector<1x128xf32> to vector<256x128xf32>
    %113 = arith.addf %110, %112 : vector<256x128xf32>
    %cst_126 = arith.constant 0.000000e+00 : f32
    %114 = vector.broadcast %cst_126 : f32 to vector<256x128xf32>
    %115 = arith.maximumf %113, %114 : vector<256x128xf32>
    %116 = vector.shape_cast %115 : vector<256x128xf32> to vector<1x16x16x128xf32>
    %117 = arith.truncf %116 : vector<1x16x16x128xf32> to vector<1x16x16x128xbf16>
    %c0_127 = arith.constant 0 : index
    %c0_128 = arith.constant 0 : index
    %c0_129 = arith.constant 0 : index
    %c0_130 = arith.constant 0 : index
    %118 = vector.load %arg6[%c0_127, %c0_128, %c0_129, %c0_130] : memref<1x16x16x128xbf16, #tpu.memory_space<vmem>>, vector<1x16x16x128xbf16>
    tpu.vector_store %arg6[%c0_127, %c0_128, %c0_129, %c0_130], %117 {strides = array<i32>} : memref<1x16x16x128xbf16, #tpu.memory_space<vmem>>, vector<1x16x16x128xbf16>,
    return
  }
  func.func @transform_0(%arg0: i32) -> (i32, i32, i32, i32) {
    %c0_i32 = arith.constant 0 : i32
    %c0_i32_0 = arith.constant 0 : i32
    %c0_i32_1 = arith.constant 0 : i32
    %c0_i32_2 = arith.constant 0 : i32
    return %arg0, %c0_i32, %c0_i32_0, %c0_i32_1 : i32, i32, i32, i32
  }
  func.func @transform_1(%arg0: i32) -> (i32, i32) {
    %c0_i32 = arith.constant 0 : i32
    %c0_i32_0 = arith.constant 0 : i32
    %c0_i32_1 = arith.constant 0 : i32
    return %c0_i32, %c0_i32_0 : i32, i32
  }
  func.func @transform_2(%arg0: i32) -> (i32, i32) {
    %c0_i32 = arith.constant 0 : i32
    %c0_i32_0 = arith.constant 0 : i32
    %c0_i32_1 = arith.constant 0 : i32
    return %c0_i32, %c0_i32_0 : i32, i32
  }
  func.func @transform_3(%arg0: i32) -> (i32, i32) {
    %c0_i32 = arith.constant 0 : i32
    %c0_i32_0 = arith.constant 0 : i32
    %c0_i32_1 = arith.constant 0 : i32
    return %c0_i32, %c0_i32_0 : i32, i32
  }
  func.func @transform_4(%arg0: i32) -> (i32, i32) {
    %c0_i32 = arith.constant 0 : i32
    %c0_i32_0 = arith.constant 0 : i32
    %c0_i32_1 = arith.constant 0 : i32
    return %c0_i32, %c0_i32_0 : i32, i32
  }
  func.func @transform_5(%arg0: i32) -> (i32, i32, i32, i32) {
    %c0_i32 = arith.constant 0 : i32
    %c0_i32_0 = arith.constant 0 : i32
    %c0_i32_1 = arith.constant 0 : i32
    %c0_i32_2 = arith.constant 0 : i32
    return %arg0, %c0_i32, %c0_i32_0, %c0_i32_1 : i32, i32, i32, i32
  }
}

</mosaic_0001>

<bundles_post_ra>
// kernel: double_conv.1
= control target key start
LH: loop header
LB: loop body
LE: loop exit
PB: predicated region body
PF: predicated region fallthrough
CT: control target
= control target key end

     0   :  { %s11060_s18 = smov 0   ;;  %s14694_s0 = inlined_call_operand.vmem [shape: bf16[2,18,18,128], index: 0, kind: input, shape index: {}]   ;;  %s14695_s1 = inlined_call_operand.vmem [shape: bf16[1152,128], index: 1, kind: input, shape index: {}]   ;;  %s14696_s2 = inlined_call_operand.vmem [shape: f32[1,128], index: 2, kind: input, shape index: {}]   ;;  %s14697_s3 = inlined_call_operand.vmem [shape: bf16[1152,128], index: 3, kind: input, shape index: {}]   ;;  %s14698_s4 = inlined_call_operand.vmem [shape: f32[1,128], index: 4, kind: input, shape index: {}]   ;;  %s14699_s5 = inlined_call_operand.vmem [shape: bf16[2,16,16,128], index: 5, kind: output, shape index: {}]  }
   0x1 LB: > { %s9369_s19 = sadd.s32 4294967295, %s11027_s18   ;;  %p9373_p0 = scmp.ge.s32.totalorder %s11027_s18, 1  ;;  %s11027_s18 = sphi %s11060_s18, %s15_s18  }
   0x2   : > { %p187_p1 = scmp.lt.s32.totalorder %s11027_s18, 3 }
   0x4   : > { %p188_p2 = pnand %p9373_p0, %p187_p1 }
   0x6   : > { %191 = sbr.rel (%p188_p2) target bundleno = 1492 (0x5d4), region = 40 }
   0xb   : > { %v10659_v0 = vld [vmem:[%s14695_s1 + $0x78] sm:$0xff]  ;;  %p215_p3 = scmp.lt.s32.totalorder %s9369_s19, 1  ;;  %v10658_v2 = vld [vmem:[%s14695_s1 + $0x70] sm:$0xff]  ;;  %v10657_v4 = vld [vmem:[%s14695_s1 + $0x68] sm:$0xff]  ;;  %vm290_vm0 = vsmask.f32 3328 }
   0xc   : > { %v10651_v1 = vld [vmem:[%s14695_s1 + $0x38] sm:$0xff]  ;;  %805 = vmatpush.bf16.msra.mxu0 %v10659_v0  ;;  %10963 = vmatpush.bf16.msra.mxu2 %v10659_v0  ;;  %v10650_v3 = vld [vmem:[%s14695_s1 + $0x30] sm:$0xff]  ;;  %v10649_v5 = vld [vmem:[%s14695_s1 + $0x28] sm:$0xff]  ;;  %vm291_vm1 = vsmask.f32 7440  ;;  %vm1175_vm3 = vcmask 1042432  }
   0xd   : > { %s14907_s19 = smov (!%p215_p3, %s9369_s19), 1  ;;  %10971 = vmatpush.bf16.msra.mxu3 %v10651_v1  ;;  %1038 = vmatpush.bf16.msra.mxu1 %v10651_v1  ;;  %v10656_v16 = vld [vmem:[%s14695_s1 + $0x60] sm:$0xff]  ;;  %v10655_v32 = vld [vmem:[%s14695_s1 + $0x58] sm:$0xff]  ;;  %vm11113_vm2 = vmor %vm290_vm0, %vm291_vm1  ;;  %vm1176_vm4 = vcmask 1046532   ;;  %vm4454_vm6 = vcmask 1040384   ;;  %vm4922_vm11 = vcmask 1043456  }
   0xe   : > { %s10979_s28 = smul.u32 216, %s14907_s19  ;;  %v10648_v21 = vld [vmem:[%s14695_s1 + $0x20] sm:$0xff]  ;;  %v10647_v35 = vld [vmem:[%s14695_s1 + $0x18] sm:$0xff]  ;;  %v10654_v45 = vld [vmem:[%s14695_s1 + $0x50] sm:$0xff]  ;;  %vm4455_vm7 = vsmask.f32 256 }
   0xf   : > { %v10646_v49 = vld [vmem:[%s14695_s1 + $0x10] sm:$0xff]  ;;  %v10653_v59 = vld [vmem:[%s14695_s1 + $0x48] sm:$0xff]  ;;  %vm11415_vm5 = vmor %vm1175_vm3, %vm1176_vm4  ;;  %vm4511_vm9 = vsmask.f32 7938  ;;  %vm4599_vm13 = vsmask.f32 4368 }
  0x10   : > { %806 = vmatpush.bf16.msra.mxu0 %v10658_v2  ;;  %10964 = vmatpush.bf16.msra.mxu2 %v10658_v2  ;;  %s11089_s8 = scalar_lea.vmem %s14694_s0, %s10979_s28  ;;  %v10645_v0 = vld [vmem:[%s14695_s1 + $0x8] sm:$0xff]  ;;  %vm12194_vm8 = vmand %vm4454_vm6, %vm4455_vm7  ;;  %s10627_s29 = sshll.u32 %s14907_s19, 7 }
  0x11   : > { %10972 = vmatpush.bf16.msra.mxu3 %v10650_v3  ;;  %1039 = vmatpush.bf16.msra.mxu1 %v10650_v3  ;;  %v226_v6 = vld [vmem:[%s11089_s8] sm:$0xf]  ;;  %v227_v7 = vld [vmem:[%s11089_s8 + $0x4] sm:$0xf]  ;;  %v274_v13 = vld [vmem:[%s11089_s8 + $0x8] sm:$0x1]  ;;  %s14586_s7 = scalar_lea.vmem %s14699_s5, %s10627_s29 }
  0x12   : > { %v294_v8 = vshrl.u32 %v226_v6, 16  ;;  %v297_v9 = vshll.u32 %v226_v6, 16  ;;  %v303_v10 = vshll.u32 %v227_v7, 16  ;;  %v307_v11 = vshrl.u32 %v227_v7, 16  ;;  %v242_v12 = vld [vmem:[%s11089_s8 + $0x60] sm:$0xf]  ;;  %vm12207_vm10 = vmand %vm4454_vm6, %vm4511_vm9 }
  0x13   : > { %v243_v14 = vld [vmem:[%s11089_s8 + $0x64] sm:$0xf]  ;;  %v486_v15 = vshrl.u32 %v242_v12, 16  ;;  %v282_v22 = vld [vmem:[%s11089_s8 + $0x68] sm:$0x1]  ;;  %v489_v24 = vshll.u32 %v242_v12, 16  ;;  %vm12342_vm12 = vmand %vm4922_vm11, %vm4511_vm9 }
  0x14   : > { %807 = vmatpush.bf16.msra.mxu0 %v10657_v4  ;;  %10965 = vmatpush.bf16.msra.mxu2 %v10657_v4  ;;  %v296_v17 = vrot.slane %v294_v8, 4  ;;  %v299_v18 = vrot.slane %v297_v9, 5  ;;  %v305_v19 = vrot.slane %v303_v10, 5  ;;  %v309_v20 = vrot.slane %v307_v11, 4  ;;  %v228_v43 = vld [vmem:[%s11089_s8 + $0xc] sm:$0xf]  ;;  %vm12392_vm14 = vmor %vm4455_vm7, %vm4599_vm13 }
  0x15   : > { %10973 = vmatpush.bf16.msra.mxu3 %v10649_v5  ;;  %1040 = vmatpush.bf16.msra.mxu1 %v10649_v5  ;;  %v488_v23 = vrot.slane %v486_v15, 4  ;;  %v495_v25 = vshll.u32 %v243_v14, 16  ;;  %v313_v27 = vshll.u32 %v274_v13, 16  ;;  %v499_v28 = vshrl.u32 %v243_v14, 16  ;;  %v229_v44 = vld [vmem:[%s11089_s8 + $0x10] sm:$0xf] }
  0x16   : > { %v300_v26 = vor.u32 %v299_v18, %v296_v17  ;;  %v310_v29 = vor.u32 %v309_v20, %v305_v19  ;;  %v491_v30 = vrot.slane %v489_v24, 5  ;;  %v505_v34 = vshll.u32 %v282_v22, 16  ;;  %v244_v48 = vld [vmem:[%s11089_s8 + $0x6c] sm:$0xf]  ;;  %v245_v50 = vld [vmem:[%s11089_s8 + $0x70] sm:$0xf] }
  0x17   : > { %v497_v31 = vrot.slane %v495_v25, 5  ;;  %v501_v33 = vrot.slane %v499_v28, 4  ;;  %v315_v38 = vrot.slane %v313_v27, 5  ;;  %v318_v52 = vshrl.u32 %v228_v43, 16  ;;  %v10652_v5 = vld [vmem:[%s14695_s1 + $0x40] sm:$0xff]  ;;  %v10667_v17 = vld [vmem:[%s14695_s1 + $0xb8] sm:$0xff] }
  0x18   : > { %808 = vmatpush.bf16.msra.mxu0 %v10656_v16  ;;  %10966 = vmatpush.bf16.msra.mxu2 %v10656_v16  ;;  %v492_v36 = vor.u32 %v491_v30, %v488_v23  ;;  %v301_v37 = vrot.slane %v300_v26, 4  ;;  %v311_v41 = vrot.slane %v310_v29, 4  ;;  %v507_v47 = vrot.slane %v505_v34, 5  ;;  %v11147_v10 = vld [vmem:[%s11089_s8 + $0x14] sm:$0x1]  ;;  %v10644_v15 = vld [vmem:[%s14695_s1] sm:$0xff] }
  0x19   : > { %10974 = vmatpush.bf16.msra.mxu3 %v10648_v21  ;;  %1041 = vmatpush.bf16.msra.mxu1 %v10648_v21  ;;  %v502_v39 = vor.u32 %v501_v33, %v497_v31  ;;  %v321_v53 = vshll.u32 %v228_v43, 16  ;;  %v327_v54 = vshll.u32 %v229_v44, 16  ;;  %v331_v57 = vshrl.u32 %v229_v44, 16  ;;  %v283_v16 = vld [vmem:[%s11089_s8 + $0x74] sm:$0x1]  ;;  %v10691_v18 = vld [vmem:[%s14695_s1 + $0xf8] sm:$0xff] }
  0x1a   : > { %v493_v42 = vrot.slane %v492_v36, 4  ;;  %v306_v51 = vsel %vm11113_vm2, %v301_v37, %v305_v19  ;;  %v316_v55 = vsel %vm11113_vm2, %v311_v41, %v315_v38  ;;  %v510_v58 = vshrl.u32 %v244_v48, 16  ;;  %v10636_v24 = vld [vmem:[%s11089_s8 + $0x60] sm:$0xff]  ;;  %v10699_v29 = vld [vmem:[%s14695_s1 + $0x138] sm:$0xff]  ;;  %v10666_v30 = vld [vmem:[%s14695_s1 + $0xb0] sm:$0xff] }
  0x1b   : > { %v503_v46 = vrot.slane %v502_v39, 4  ;;  %v513_v61 = vshll.u32 %v244_v48, 16  ;;  %v519_v62 = vshll.u32 %v245_v50, 16  ;;  %v523_v63 = vshrl.u32 %v245_v50, 16  ;;  %v10628_v25 = vld [vmem:[%s11089_s8] sm:$0xff]  ;;  %v10698_v43 = vld [vmem:[%s14695_s1 + $0x130] sm:$0xff] }
  0x1c   : > { %809 = vmatpush.bf16.msra.mxu0 %v10655_v32  ;;  %10967 = vmatpush.bf16.msra.mxu2 %v10655_v32  ;;  %v498_v56 = vsel %vm11113_vm2, %v493_v42, %v497_v31  ;;  %v693_v1 = vunpack.c.l.b16 %v306_v51  ;;  %v694_v2 = vunpack.c.l.b16 %v316_v55  ;;  %v320_v3 = vrot.slane %v318_v52, 4  ;;  %v10690_v31 = vld [vmem:[%s14695_s1 + $0xf0] sm:$0xff]  ;;  %v230_v32 = vld [vmem:[%s11089_s8 + $0x18] sm:$0xf]  ;;  %v11177_v33 = vld [vmem:[%s11089_s8 + $0x1c] sm:$0xf] }
  0x1d   : > { %10975 = vmatpush.bf16.msra.mxu3 %v10647_v35  ;;  %1042 = vmatpush.bf16.msra.mxu1 %v10647_v35  ;;  %v508_v60 = vsel %vm11113_vm2, %v503_v46, %v507_v47  ;;  %v323_v4 = vrot.slane %v321_v53, 5  ;;  %v709_v6 = vunpack.c.l.b16 %v498_v56  ;;  %v11144_v8 = vrot.slane %v327_v54, 5  ;;  %v246_v37 = vld [vmem:[%s11089_s8 + $0x78] sm:$0xf]  ;;  %v247_v42 = vld [vmem:[%s11089_s8 + $0x7c] sm:$0xf] }
  0x1e   : > { %v710_v7 = vunpack.c.l.b16 %v508_v60  ;;  %v333_v9 = vrot.slane %v331_v57, 4  ;;  %v512_v11 = vrot.slane %v510_v58, 4  ;;  %v515_v12 = vrot.slane %v513_v61, 5  ;;  %v10665_v50 = vld [vmem:[%s14695_s1 + $0xa8] sm:$0xff] }
  0x1f   : > { %v11149_v13 = vrot.slane %v519_v62, 5  ;;  %v525_v14 = vrot.slane %v523_v63, 4  ;;  %v324_v19 = vor.u32 %v323_v4, %v320_v3  ;;  %v725_v20 = vpack.c.b16 %v694_v2, %v693_v1  ;;  %v10689_v51 = vld [vmem:[%s14695_s1 + $0xe8] sm:$0xff]  ;;  %v11206_v1 = vld [vmem:[%s11089_s8 + $0x20] sm:$0x1] }
  0x20   : > { %810 = vmatpush.bf16.msra.mxu0 %v10654_v45  ;;  %10968 = vmatpush.bf16.msra.mxu2 %v10654_v45  ;;  %v733_v21 = vpack.c.b16 %v710_v7, %v709_v6  ;;  %v334_v22 = vor.u32 %v333_v9, %v11144_v8  ;;  %v337_v23 = vshll.u32 %v11147_v10, 16  ;;  %v516_v26 = vor.u32 %v515_v12, %v512_v11  ;;  %v10697_v62 = vld [vmem:[%s14695_s1 + $0x128] sm:$0xff] }
  0x21   : > { %10976 = vmatpush.bf16.msra.mxu3 %v10646_v49  ;;  %1043 = vmatpush.bf16.msra.mxu1 %v10646_v49  ;;  %v526_v27 = vor.u32 %v525_v14, %v11149_v13  ;;  %v529_v28 = vshll.u32 %v283_v16, 16  ;;  %v325_v34 = vrot.slane %v324_v19, 4  ;;  %v342_v44 = vshrl.u32 %v230_v32, 16  ;;  %v10629_v19 = vld [vmem:[%s11089_s8 + $0xc] sm:$0xff] }
  0x22   : > { %v335_v35 = vrot.slane %v334_v22, 4  ;;  %v339_v36 = vrot.slane %v337_v23, 5  ;;  %v517_v38 = vrot.slane %v516_v26, 4  ;;  %v345_v45 = vshll.u32 %v230_v32, 16 }
  0x23   : > { %v527_v39 = vrot.slane %v526_v27, 4  ;;  %v531_v41 = vrot.slane %v529_v28, 5  ;;  %v351_v46 = vshll.u32 %v11177_v33, 16  ;;  %v355_v47 = vshrl.u32 %v11177_v33, 16  ;;  %v11214_v27 = vld [vmem:[%s11089_s8 + $0x28] sm:$0xf] }
  0x24   : > { %811 = vmatpush.bf16.msra.mxu0 %v10653_v59  ;;  %10969 = vmatpush.bf16.msra.mxu2 %v10653_v59  ;;  %v534_v48 = vshrl.u32 %v246_v37, 16  ;;  %v537_v49 = vshll.u32 %v246_v37, 16  ;;  %v330_v52 = vsel %vm11113_vm2, %v325_v34, %v11144_v8  ;;  %v340_v53 = vsel %vm11113_vm2, %v335_v35, %v339_v36  ;;  %v284_v8 = vld [vmem:[%s11089_s8 + $0x80] sm:$0x1]  ;;  %v248_v28 = vld [vmem:[%s11089_s8 + $0x84] sm:$0xf] }
  0x25   : > { %10977 = vmatpush.bf16.msra.mxu3 %v10645_v0  ;;  %1044 = vmatpush.bf16.msra.mxu1 %v10645_v0  ;;  %v543_v54 = vshll.u32 %v247_v42, 16  ;;  %v547_v55 = vshrl.u32 %v247_v42, 16  ;;  %v522_v56 = vsel %vm11113_vm2, %v517_v38, %v11149_v13  ;;  %v532_v57 = vsel %vm11113_vm2, %v527_v39, %v531_v41  ;;  %v10696_v37 = vld [vmem:[%s14695_s1 + $0x120] sm:$0xff] }
  0x26   : > { %v344_v58 = vrot.slane %v342_v44, 4  ;;  %v347_v59 = vrot.slane %v345_v45, 5  ;;  %v353_v60 = vrot.slane %v351_v46, 5  ;;  %v357_v61 = vrot.slane %v355_v47, 4 }
  0x27   : > { %v695_v63 = vunpack.c.l.b16 %v330_v52  ;;  %v696_v0 = vunpack.c.l.b16 %v340_v53  ;;  %v536_v2 = vrot.slane %v534_v48, 4  ;;  %v539_v3 = vrot.slane %v537_v49, 5 }
  0x28   : > { %812 = vmatpush.bf16.msra.mxu0 %v10652_v5  ;;  %10970 = vmatpush.bf16.msra.mxu2 %v10652_v5  ;;  %v711_v4 = vunpack.c.l.b16 %v522_v56  ;;  %v712_v5 = vunpack.c.l.b16 %v532_v57  ;;  %v545_v6 = vrot.slane %v543_v54, 5  ;;  %v549_v7 = vrot.slane %v547_v55, 4  ;;  %v11238_v55 = vld [vmem:[%s11089_s8 + $0x2c] sm:$0x1] }
  0x29   : > { %10978 = vmatpush.bf16.msra.mxu3 %v10644_v15  ;;  %1045 = vmatpush.bf16.msra.mxu1 %v10644_v15  ;;  %v348_v9 = vor.u32 %v347_v59, %v344_v58  ;;  %v358_v11 = vor.u32 %v357_v61, %v353_v60  ;;  %v361_v12 = vshll.u32 %v11206_v1, 16  ;;  %v540_v13 = vor.u32 %v539_v3, %v536_v2 }
  0x2a   : > { %v726_v14 = vpack.c.b16 %v696_v0, %v695_v63  ;;  %v734_v15 = vpack.c.b16 %v712_v5, %v711_v4  ;;  %v550_v16 = vor.u32 %v549_v7, %v545_v6  ;;  %v375_v39 = vshll.u32 %v11214_v27, 16  ;;  %v10630_v7 = vld [vmem:[%s11089_s8 + $0x18] sm:$0xff] }
  0x2b   : > { %813 = vmatmul.bf16.vlgmr.msra.gmra.mxu0 %v725_v20  ;;  %853 = vmatmul.bf16.vlgmr.msra.gmra.mxu2 %v733_v21  ;;  %v349_v20 = vrot.slane %v348_v9, 4  ;;  %v359_v21 = vrot.slane %v358_v11, 4  ;;  %v363_v22 = vrot.slane %v361_v12, 5  ;;  %v541_v23 = vrot.slane %v540_v13, 4  ;;  %v235_v9 = vld [vmem:[%s11089_s8 + $0x34] sm:$0xf] }
  0x2c   : > { %1418 = vmatpush.bf16.msrb.mxu2 %v10667_v17  ;;  %1086 = vmatmul.bf16.vlgmr.msra.gmra.mxu3 %v10636_v24  ;;  %v553_v17 = vshll.u32 %v284_v8, 16  ;;  %v232_v24 = vld [vmem:[%s11089_s8 + $0x24] sm:$0xf]  ;;  %v379_v41 = vshrl.u32 %v11214_v27, 16  ;;  %v558_v42 = vshrl.u32 %v248_v28, 16  ;;  %v561_v44 = vshll.u32 %v248_v28, 16 }
  0x2d   : > { %1732 = vmatpush.bf16.msrb.mxu3 %v10691_v18  ;;  %1046 = vmatmul.bf16.vlgmr.msra.gmra.mxu1 %v10628_v25  ;;  %v10637_v18 = vld [vmem:[%s11089_s8 + $0x6c] sm:$0xff]  ;;  %v551_v25 = vrot.slane %v550_v16, 4  ;;  %v354_v32 = vsel %vm11113_vm2, %v349_v20, %v353_v60  ;;  %v364_v34 = vsel %vm11113_vm2, %v359_v21, %v363_v22  ;;  %v366_v35 = vshrl.u32 %v232_v24, 16 }
  0x2e   : > { %2413 = vmatpush.bf16.msrb.mxu0 %v10699_v29  ;;  %v555_v26 = vrot.slane %v553_v17, 5  ;;  %v249_v29 = vld [vmem:[%s11089_s8 + $0x88] sm:$0xf]  ;;  %v369_v36 = vshll.u32 %v232_v24, 16  ;;  %v546_v38 = vsel %vm11113_vm2, %v541_v23, %v545_v6  ;;  %v697_v47 = vunpack.c.l.b16 %v354_v32  ;;  %v285_v60 = vld [vmem:[%s11089_s8 + $0x8c] sm:$0x1] }
  0x2f   : > { %v567_v45 = vshll.u32 %v249_v29, 16  ;;  %v571_v46 = vshrl.u32 %v249_v29, 16  ;;  %v698_v48 = vunpack.c.l.b16 %v364_v34  ;;  %v713_v49 = vunpack.c.l.b16 %v546_v38  ;;  %v10638_v6 = vld [vmem:[%s11089_s8 + $0x78] sm:$0xff]  ;;  %v234_v8 = vld [vmem:[%s11089_s8 + $0x30] sm:$0xf] }
  0x30   : > { %1419 = vmatpush.bf16.msrb.mxu2 %v10666_v30  ;;  %v10664_v30 = vld [vmem:[%s14695_s1 + $0xa0] sm:$0xff]  ;;  %v371_v52 = vrot.slane %v369_v36, 5  ;;  %v377_v53 = vrot.slane %v375_v39, 5  ;;  %v381_v54 = vrot.slane %v379_v41, 4  ;;  %v560_v56 = vrot.slane %v558_v42, 4  ;;  %v10663_v23 = vld [vmem:[%s14695_s1 + $0x98] sm:$0xff] }
  0x31   : > { %1733 = vmatpush.bf16.msrb.mxu3 %v10690_v31  ;;  %v10688_v31 = vld [vmem:[%s14695_s1 + $0xe0] sm:$0xff]  ;;  %v563_v57 = vrot.slane %v561_v44, 5  ;;  %v569_v58 = vrot.slane %v567_v45, 5  ;;  %v573_v59 = vrot.slane %v571_v46, 4  ;;  %v727_v61 = vpack.c.b16 %v698_v48, %v697_v47  ;;  %v250_v13 = vld [vmem:[%s11089_s8 + $0x90] sm:$0xf] }
  0x32   : > { %2414 = vmatpush.bf16.msrb.mxu0 %v10698_v43  ;;  %v556_v43 = vsel %vm11113_vm2, %v551_v25, %v555_v26  ;;  %v382_v63 = vor.u32 %v381_v54, %v377_v53  ;;  %v385_v0 = vshll.u32 %v11238_v55, 16  ;;  %v577_v5 = vshll.u32 %v285_v60, 16  ;;  %v10687_v24 = vld [vmem:[%s14695_s1 + $0xd8] sm:$0xff]  ;;  %v10639_v60 = vld [vmem:[%s11089_s8 + $0x84] sm:$0xff] }
  0x33   : > { %v564_v3 = vor.u32 %v563_v57, %v560_v56  ;;  %v574_v4 = vor.u32 %v573_v59, %v569_v58  ;;  %v393_v20 = vshll.u32 %v234_v8, 16  ;;  %v399_v21 = vshll.u32 %v235_v9, 16  ;;  %v11266_v41 = vld [vmem:[%s11089_s8 + $0x38] sm:$0x1] }
  0x34   : > { %1420 = vmatpush.bf16.msrb.mxu2 %v10665_v50  ;;  %v368_v50 = vrot.slane %v366_v35, 4  ;;  %v387_v12 = vrot.slane %v385_v0, 5  ;;  %v403_v22 = vshrl.u32 %v235_v9, 16  ;;  %v582_v25 = vshrl.u32 %v250_v13, 16  ;;  %v286_v46 = vld [vmem:[%s11089_s8 + $0x98] sm:$0x1] }
  0x35   : > { %1734 = vmatpush.bf16.msrb.mxu3 %v10689_v51  ;;  %v714_v51 = vunpack.c.l.b16 %v556_v43  ;;  %v565_v16 = vrot.slane %v564_v3, 4  ;;  %v575_v17 = vrot.slane %v574_v4, 4  ;;  %v585_v26 = vshll.u32 %v250_v13, 16  ;;  %v10662_v9 = vld [vmem:[%s14695_s1 + $0x90] sm:$0xff] }
  0x36   : > { %2415 = vmatpush.bf16.msrb.mxu0 %v10697_v62  ;;  %v372_v62 = vor.u32 %v371_v52, %v368_v50  ;;  %v401_v38 = vrot.slane %v399_v21, 5  ;;  %v405_v39 = vrot.slane %v403_v22, 4  ;;  %v584_v42 = vrot.slane %v582_v25, 4 }
  0x37   : > { %v735_v2 = vpack.c.b16 %v714_v51, %v713_v49  ;;  %v570_v34 = vsel %vm11113_vm2, %v565_v16, %v569_v58  ;;  %v587_v43 = vrot.slane %v585_v26, 5  ;;  %v409_v52 = vshll.u32 %v11266_v41, 16  ;;  %v10694_v16 = vld [vmem:[%s14695_s1 + $0x110] sm:$0xff] }
  0x38   : > { %1421 = vmatpush.bf16.msrb.mxu2 %v10664_v30  ;;  %v373_v11 = vrot.slane %v372_v62, 4  ;;  %v10695_v30 = vld [vmem:[%s14695_s1 + $0x118] sm:$0xff]  ;;  %v715_v49 = vunpack.c.l.b16 %v570_v34  ;;  %v601_v57 = vshll.u32 %v286_v46, 16 }
  0x39   : > { %1735 = vmatpush.bf16.msrb.mxu3 %v10688_v31  ;;  %v588_v54 = vor.u32 %v587_v43, %v584_v42  ;;  %v287_v42 = vld [vmem:[%s11089_s8 + $0xa4] sm:$0x1] }
  0x3a   : > { %2416 = vmatpush.bf16.msrb.mxu0 %v10696_v37  ;;  %v378_v31 = vsel %vm11113_vm2, %v373_v11, %v377_v53  ;;  %v395_v37 = vrot.slane %v393_v20, 5  ;;  %v406_v53 = vor.u32 %v405_v39, %v401_v38  ;;  %v603_v4 = vrot.slane %v601_v57, 5  ;;  %v10686_v11 = vld [vmem:[%s14695_s1 + $0xd0] sm:$0xff] }
  0x3b   : > { %818 = vmatmul.bf16.gmra.mxu0 %v726_v14  ;;  %858 = vmatmul.bf16.gmra.mxu2 %v734_v15  ;;  %v251_v14 = vld [vmem:[%s11089_s8 + $0x94] sm:$0xf]  ;;  %v383_v15 = vrot.slane %v382_v63, 4  ;;  %v699_v47 = vunpack.c.l.b16 %v378_v31  ;;  %v411_v63 = vrot.slane %v409_v52, 5 }
  0x3c   : > { %1091 = vmatmul.bf16.gmra.mxu3 %v10637_v18  ;;  %v579_v18 = vrot.slane %v577_v5, 5  ;;  %v591_v28 = vshll.u32 %v251_v14, 16  ;;  %v595_v29 = vshrl.u32 %v251_v14, 16  ;;  %1422 = vmatpush.bf16.msrb.mxu2 %v10663_v23  ;;  %v407_v0 = vrot.slane %v406_v53, 4  ;;  %v236_v5 = vld [vmem:[%s11089_s8 + $0x3c] sm:$0xf] }
  0x3d   : > { %1051 = vmatmul.bf16.gmra.mxu1 %v10629_v19  ;;  %v390_v19 = vshrl.u32 %v234_v8, 16  ;;  %1736 = vmatpush.bf16.msrb.mxu3 %v10687_v24  ;;  %v388_v32 = vsel %vm11113_vm2, %v383_v15, %v387_v12  ;;  %v253_v8 = vld [vmem:[%s11089_s8 + $0xa0] sm:$0xf]  ;;  %v10632_v52 = vld [vmem:[%s11089_s8 + $0x30] sm:$0xff]  ;;  %v238_v53 = vld [vmem:[%s11089_s8 + $0x48] sm:$0xf] }
  0x3e   : > { %v580_v35 = vsel %vm11113_vm2, %v575_v17, %v579_v18  ;;  %2417 = vmatpush.bf16.msrb.mxu0 %v10695_v30  ;;  %v593_v44 = vrot.slane %v591_v28, 5  ;;  %v597_v45 = vrot.slane %v595_v29, 4  ;;  %v700_v48 = vunpack.c.l.b16 %v388_v32 }
  0x3f   : > { %v392_v36 = vrot.slane %v390_v19, 4  ;;  %v716_v50 = vunpack.c.l.b16 %v580_v35  ;;  %v412_v13 = vsel %vm11113_vm2, %v407_v0, %v411_v63  ;;  %v414_v17 = vshrl.u32 %v236_v5, 16  ;;  %v11298_v35 = vld [vmem:[%s11089_s8 + $0x44] sm:$0x1] }
  0x40   : > { %v598_v56 = vor.u32 %v597_v45, %v593_v44  ;;  %v728_v58 = vpack.c.b16 %v700_v48, %v699_v47  ;;  %v417_v18 = vshll.u32 %v236_v5, 16  ;;  %1423 = vmatpush.bf16.msrb.mxu2 %v10662_v9  ;;  %v615_v23 = vshll.u32 %v253_v8, 16  ;;  %v10661_v5 = vld [vmem:[%s14695_s1 + $0x88] sm:$0xff] }
  0x41   : > { %v396_v51 = vor.u32 %v395_v37, %v392_v36  ;;  %v736_v59 = vpack.c.b16 %v716_v50, %v715_v49  ;;  %1737 = vmatpush.bf16.msrb.mxu3 %v10686_v11  ;;  %v619_v24 = vshrl.u32 %v253_v8, 16  ;;  %v702_v26 = vunpack.c.l.b16 %v412_v13  ;;  %v10693_v13 = vld [vmem:[%s14695_s1 + $0x108] sm:$0xff] }
  0x42   : > { %v599_v3 = vrot.slane %v598_v56, 4  ;;  %2418 = vmatpush.bf16.msrb.mxu0 %v10694_v16  ;;  %v416_v30 = vrot.slane %v414_v17, 4  ;;  %v419_v31 = vrot.slane %v417_v18, 5  ;;  %v433_v46 = vshll.u32 %v11298_v35, 16 }
  0x43   : > { %v397_v62 = vrot.slane %v396_v51, 4  ;;  %v621_v39 = vrot.slane %v619_v24, 4  ;;  %v625_v50 = vshll.u32 %v287_v42, 16  ;;  %v10640_v51 = vld [vmem:[%s11089_s8 + $0x90] sm:$0xff]  ;;  %v438_v0 = vshrl.u32 %v238_v53, 16 }
  0x44   : > { %v604_v15 = vsel %vm11113_vm2, %v599_v3, %v603_v4  ;;  %v420_v45 = vor.u32 %v419_v31, %v416_v30  ;;  %v435_v57 = vrot.slane %v433_v46, 5  ;;  %1424 = vmatpush.bf16.msrb.mxu2 %v10661_v5  ;;  %v10641_v46 = vld [vmem:[%s11089_s8 + $0x9c] sm:$0xff] }
  0x45   : > { %v402_v12 = vsel %vm11113_vm2, %v397_v62, %v401_v38  ;;  %v718_v29 = vunpack.c.l.b16 %v604_v15  ;;  %v617_v38 = vrot.slane %v615_v23, 5  ;;  %v627_v63 = vrot.slane %v625_v50, 5  ;;  %v11329_v23 = vld [vmem:[%s11089_s8 + $0x50] sm:$0x1] }
  0x46   : > { %v701_v25 = vunpack.c.l.b16 %v402_v12  ;;  %v421_v56 = vrot.slane %v420_v45, 4  ;;  %2419 = vmatpush.bf16.msrb.mxu0 %v10693_v13 }
  0x47   : > { %v622_v49 = vor.u32 %v621_v39, %v617_v38 }
  0x48   : > { %v729_v43 = vpack.c.b16 %v702_v26, %v701_v25 }
  0x49   : > { %v623_v62 = vrot.slane %v622_v49, 4 }
  0x4b   : > { %823 = vmatmul.bf16.gmra.mxu0 %v727_v61  ;;  %863 = vmatmul.bf16.gmra.mxu2 %v735_v2  ;;  %v10631_v61 = vld [vmem:[%s11089_s8 + $0x24] sm:$0xff]  ;;  %v589_v2 = vrot.slane %v588_v54, 4  ;;  %v239_v54 = vld [vmem:[%s11089_s8 + $0x4c] sm:$0xf]  ;;  %v628_v18 = vsel %vm11113_vm2, %v623_v62, %v627_v63 }
  0x4c   : > { %1096 = vmatmul.bf16.gmra.mxu3 %v10638_v6  ;;  %v11274_v6 = vld [vmem:[%s11089_s8 + $0x40] sm:$0xf]  ;;  %v447_v3 = vshll.u32 %v239_v54, 16  ;;  %v451_v4 = vshrl.u32 %v239_v54, 16  ;;  %v240_v54 = vld [vmem:[%s11089_s8 + $0x54] sm:$0xf] }
  0x4d   : > { %1056 = vmatmul.bf16.gmra.mxu1 %v10630_v7  ;;  %v252_v7 = vld [vmem:[%s11089_s8 + $0x9c] sm:$0xf]  ;;  %v594_v14 = vsel %vm11113_vm2, %v589_v2, %v593_v44  ;;  %v423_v19 = vshll.u32 %v11274_v6, 16  ;;  %v427_v20 = vshrl.u32 %v11274_v6, 16  ;;  %v441_v2 = vshll.u32 %v238_v53, 16 }
  0x4e   : > { %v606_v21 = vshrl.u32 %v252_v7, 16  ;;  %v609_v22 = vshll.u32 %v252_v7, 16  ;;  %v717_v28 = vunpack.c.l.b16 %v594_v14  ;;  %v10685_v7 = vld [vmem:[%s14695_s1 + $0xc8] sm:$0xff]  ;;  %v10707_v14 = vld [vmem:[%s14695_s1 + $0x178] sm:$0xff]  ;;  %v462_v5 = vshrl.u32 %v240_v54, 16 }
  0x4f   : > { %v425_v32 = vrot.slane %v423_v19, 5  ;;  %v429_v34 = vrot.slane %v427_v20, 4  ;;  %1738 = vmatpush.bf16.msrb.mxu3 %v10685_v7  ;;  %2838 = vmatpush.bf16.msrb.mxu1 %v10707_v14  ;;  %v440_v19 = vrot.slane %v438_v0, 4  ;;  %v443_v20 = vrot.slane %v441_v2, 5 }
  0x50   : > { %v608_v36 = vrot.slane %v606_v21, 4  ;;  %v611_v37 = vrot.slane %v609_v22, 5  ;;  %v737_v44 = vpack.c.b16 %v718_v29, %v717_v28  ;;  %v449_v21 = vrot.slane %v447_v3, 5  ;;  %v288_v29 = vld [vmem:[%s11089_s8 + $0xb0] sm:$0x1]  ;;  %v10705_v3 = vld [vmem:[%s14695_s1 + $0x168] sm:$0xff] }
  0x51   : > { %v430_v47 = vor.u32 %v429_v34, %v425_v32  ;;  %v426_v15 = vsel %vm11113_vm2, %v421_v56, %v425_v32  ;;  %v453_v22 = vrot.slane %v451_v4, 4  ;;  %v720_v34 = vunpack.c.l.b16 %v628_v18  ;;  %v241_v56 = vld [vmem:[%s11089_s8 + $0x58] sm:$0xf]  ;;  %v10692_v4 = vld [vmem:[%s14695_s1 + $0x100] sm:$0xff] }
  0x52   : > { %v612_v48 = vor.u32 %v611_v37, %v608_v36  ;;  %v703_v30 = vunpack.c.l.b16 %v426_v15  ;;  %v444_v36 = vor.u32 %v443_v20, %v440_v19  ;;  %v457_v37 = vshll.u32 %v11329_v23, 16  ;;  %2420 = vmatpush.bf16.msrb.mxu0 %v10692_v4  ;;  %v10704_v19 = vld [vmem:[%s14695_s1 + $0x160] sm:$0xff] }
  0x53   : > { %v465_v7 = vshll.u32 %v240_v54, 16  ;;  %v464_v20 = vrot.slane %v462_v5, 4  ;;  %v10731_v54 = vld [vmem:[%s14695_s1 + $0x1b8] sm:$0xff]  ;;  %v10700_v5 = vld [vmem:[%s14695_s1 + $0x140] sm:$0xff] }
  0x54   : > { %v459_v49 = vrot.slane %v457_v37, 5 }
  0x5b   : > { %828 = vmatmul.bf16.gmra.mxu0 %v728_v58  ;;  %868 = vmatmul.bf16.gmra.mxu2 %v736_v59  ;;  %v254_v58 = vld [vmem:[%s11089_s8 + $0xa8] sm:$0xf]  ;;  %v255_v59 = vld [vmem:[%s11089_s8 + $0xac] sm:$0xf] }
  0x5c   : > { %1101 = vmatmul.bf16.gmra.mxu3 %v10639_v60  ;;  %v431_v60 = vrot.slane %v430_v47, 4  ;;  %v630_v8 = vshrl.u32 %v254_v58, 16  ;;  %v633_v9 = vshll.u32 %v254_v58, 16  ;;  %v639_v11 = vshll.u32 %v255_v59, 16  ;;  %v10633_v47 = vld [vmem:[%s11089_s8 + $0x3c] sm:$0xff]  ;;  %v10706_v58 = vld [vmem:[%s14695_s1 + $0x170] sm:$0xff] }
  0x5d   : > { %1061 = vmatmul.bf16.gmra.mxu1 %v10631_v61  ;;  %v613_v61 = vrot.slane %v612_v48, 4  ;;  %v643_v12 = vshrl.u32 %v255_v59, 16  ;;  %v445_v48 = vrot.slane %v444_v36, 4  ;;  %v257_v59 = vld [vmem:[%s11089_s8 + $0xb8] sm:$0xf] }
  0x5e   : > { %v436_v16 = vsel %vm11113_vm2, %v431_v60, %v435_v57  ;;  %v632_v24 = vrot.slane %v630_v8, 4  ;;  %v635_v25 = vrot.slane %v633_v9, 5  ;;  %v641_v26 = vrot.slane %v639_v11, 5  ;;  %v256_v57 = vld [vmem:[%s11089_s8 + $0xb4] sm:$0xf]  ;;  %v10660_v60 = vld [vmem:[%s14695_s1 + $0x80] sm:$0xff]  ;;  %2839 = vmatpush.bf16.msrb.mxu1 %v10706_v58 }
  0x5f   : > { %v618_v17 = vsel %vm11113_vm2, %v613_v61, %v617_v38  ;;  %v645_v28 = vrot.slane %v643_v12, 4  ;;  %v704_v31 = vunpack.c.l.b16 %v436_v16  ;;  %v454_v38 = vor.u32 %v453_v22, %v449_v21  ;;  %v10684_v61 = vld [vmem:[%s14695_s1 + $0xc0] sm:$0xff]  ;;  %1425 = vmatpush.bf16.msrb.mxu2 %v10660_v60  ;;  %v11386_v58 = vld [vmem:[%s11089_s8 + $0x10] sm:$0xf] }
  0x60   : > { %v719_v32 = vunpack.c.l.b16 %v618_v17  ;;  %v636_v39 = vor.u32 %v635_v25, %v632_v24  ;;  %v450_v62 = vsel %vm11113_vm2, %v445_v48, %v449_v21  ;;  %v471_v8 = vshll.u32 %v241_v56, 16  ;;  %1739 = vmatpush.bf16.msrb.mxu3 %v10684_v61  ;;  %v11366_v25 = vld [vmem:[%s11089_s8 + $0x5c] sm:$0x1] }
  0x61   : > { %v646_v42 = vor.u32 %v645_v28, %v641_v26  ;;  %v455_v50 = vrot.slane %v454_v38, 4  ;;  %v475_v9 = vshrl.u32 %v241_v56, 16  ;;  %v654_v11 = vshrl.u32 %v256_v57, 16  ;;  %v10739_v56 = vld [vmem:[%s14695_s1 + $0x1f8] sm:$0xff] }
  0x62   : > { %v738_v45 = vpack.c.b16 %v720_v34, %v719_v32  ;;  %v657_v12 = vshll.u32 %v256_v57, 16  ;;  %v663_v13 = vshll.u32 %v257_v59, 16  ;;  %v667_v14 = vshrl.u32 %v257_v59, 16  ;;  %2840 = vmatpush.bf16.msrb.mxu1 %v10705_v3  ;;  %v9681_v57 = vld [vmem:[%s11089_s8 + $0xc] sm:$0xf] }
  0x63   : > { %v460_v63 = vsel %vm11113_vm2, %v455_v50, %v459_v49  ;;  %v705_v15 = vunpack.c.l.b16 %v450_v62  ;;  %v467_v21 = vrot.slane %v465_v7, 5  ;;  %v473_v22 = vrot.slane %v471_v8, 5  ;;  %3152 = vmatpush.bf16.msra.mxu2 %v10731_v54  ;;  %v10747_v7 = vld [vmem:[%s14695_s1 + $0x238] sm:$0xff] }
  0x64   : > { %v706_v16 = vunpack.c.l.b16 %v460_v63  ;;  %v477_v24 = vrot.slane %v475_v9, 4  ;;  %v659_v28 = vrot.slane %v657_v12, 5  ;;  %v481_v37 = vshll.u32 %v11366_v25, 16  ;;  %3833 = vmatpush.bf16.msra.mxu3 %v10739_v56  ;;  %v10701_v63 = vld [vmem:[%s14695_s1 + $0x148] sm:$0xff]  ;;  %4258 = vmatpush.bf16.msra.mxu0 %v10747_v7 }
  0x65   : > { %v468_v36 = vor.u32 %v467_v21, %v464_v20  ;;  %v1911_v3 = vshll.u32 %v11386_v58, 16  ;;  %v1915_v4 = vshrl.u32 %v11386_v58, 16  ;;  %v10991_v20 = vld [vmem:[%s11089_s8 + $0x4] sm:$0xf] }
  0x66   : > { %2841 = vmatpush.bf16.msrb.mxu1 %v10704_v19  ;;  %v731_v32 = vpack.c.b16 %v706_v16, %v705_v15  ;;  %v478_v38 = vor.u32 %v477_v24, %v473_v22  ;;  %v483_v48 = vrot.slane %v481_v37, 5  ;;  %v1180_v21 = vrot.slane %v10991_v20, 5  ;;  %v10635_v24 = vld [vmem:[%s11089_s8 + $0x54] sm:$0xff]  ;;  %v10992_v37 = vld [vmem:[%s11089_s8 + $0x8] sm:$0x1] }
  0x67   : > { %v1913_v15 = vrot.slane %v1911_v3, 5  ;;  %v1917_v16 = vrot.slane %v1915_v4, 4 }
  0x68   : > { %v479_v49 = vrot.slane %v478_v38, 4  ;;  %v1183_v38 = vrot.slane %v10992_v37, 5  ;;  %v9687_v37 = vld [vmem:[%s11089_s8 + $0x24] sm:$0xf] }
  0x6a   : > { %v484_v60 = vsel %vm11113_vm2, %v479_v49, %v483_v48  ;;  %v11421_v49 = vld [vmem:[%s11089_s8 + $0x1c] sm:$0xf] }
  0x6b   : > { %833 = vmatmul.bf16.gmra.mxu0 %v729_v43  ;;  %873 = vmatmul.bf16.gmra.mxu2 %v737_v44  ;;  %v649_v43 = vshll.u32 %v288_v29, 16  ;;  %v730_v44 = vpack.c.b16 %v704_v31, %v703_v30  ;;  %v665_v29 = vrot.slane %v663_v13, 5  ;;  %v669_v30 = vrot.slane %v667_v14, 4  ;;  %v289_v31 = vld [vmem:[%s11089_s8 + $0xbc] sm:$0x1] }
  0x6c   : > { %1106 = vmatmul.bf16.gmra.mxu3 %v10640_v51  ;;  %v637_v51 = vrot.slane %v636_v39, 4  ;;  %v708_v9 = vunpack.c.l.b16 %v484_v60 }
  0x6d   : > { %1066 = vmatmul.bf16.gmra.mxu1 %v10632_v52  ;;  %v647_v52 = vrot.slane %v646_v42, 4  ;;  %v651_v53 = vrot.slane %v649_v43, 5  ;;  %v670_v42 = vor.u32 %v669_v30, %v665_v29  ;;  %v673_v43 = vshll.u32 %v289_v31, 16 }
  0x6e   : > { %v642_v0 = vsel %vm11113_vm2, %v637_v51, %v641_v26  ;;  %v656_v26 = vrot.slane %v654_v11, 4  ;;  %v2600_v31 = vrot.slane %v11386_v58, 5  ;;  %v1939_v58 = vshrl.u32 %v11421_v49, 16 }
  0x6f   : > { %v652_v2 = vsel %vm11113_vm2, %v647_v52, %v651_v53  ;;  %v721_v17 = vunpack.c.l.b16 %v642_v0  ;;  %v671_v51 = vrot.slane %v670_v42, 4  ;;  %v675_v52 = vrot.slane %v673_v43, 5  ;;  %v10702_v53 = vld [vmem:[%s14695_s1 + $0x150] sm:$0xff] }
  0x70   : > { %v722_v18 = vunpack.c.l.b16 %v652_v2  ;;  %v660_v39 = vor.u32 %v659_v28, %v656_v26  ;;  %v1902_v0 = vshrl.u32 %v9681_v57, 16  ;;  %v1905_v2 = vshll.u32 %v9681_v57, 16  ;;  %v1127_v26 = vld [vmem:[%s11089_s8] sm:$0xe] }
  0x71   : > { %v676_v62 = vsel %vm11113_vm2, %v671_v51, %v675_v52  ;;  %v1935_v57 = vshll.u32 %v11421_v49, 16 }
  0x72   : > { %v739_v34 = vpack.c.b16 %v722_v18, %v721_v17  ;;  %v661_v50 = vrot.slane %v660_v39, 4  ;;  %v724_v12 = vunpack.c.l.b16 %v676_v62  ;;  %v1904_v13 = vrot.slane %v1902_v0, 4  ;;  %v9683_v17 = vld [vmem:[%s11089_s8 + $0x14] sm:$0x1] }
  0x73   : > { %v1907_v14 = vrot.slane %v1905_v2, 5  ;;  %v1921_v30 = vshll.u32 %v9683_v17, 16  ;;  %v2603_v48 = vrot.slane %v9683_v17, 5  ;;  %v1937_v7 = vrot.slane %v1935_v57, 5 }
  0x74   : > { %v666_v61 = vsel %vm11113_vm2, %v661_v50, %v665_v29  ;;  %v1918_v29 = vor.u32 %v1917_v16, %v1913_v15 }
  0x75   : > { %v723_v11 = vunpack.c.l.b16 %v666_v61  ;;  %v1908_v28 = vor.u32 %v1907_v14, %v1904_v13  ;;  %v1128_v13 = vld [vmem:[%s11089_s8 + $0xc] sm:$0xe]  ;;  %v10993_v14 = vld [vmem:[%s11089_s8 + $0x10] sm:$0xf] }
  0x76   : > { %v1919_v43 = vrot.slane %v1918_v29, 4  ;;  %v9762_v29 = vld [vmem:[%s11089_s8 + $0x18] sm:$0xe] }
  0x77   : > { %v740_v19 = vpack.c.b16 %v724_v12, %v723_v11  ;;  %v1909_v42 = vrot.slane %v1908_v28, 4  ;;  %v9506_v28 = vrot.slane %v1128_v13, 9  ;;  %v9689_v13 = vld [vmem:[%s11089_s8 + $0x2c] sm:$0x1] }
  0x79   : > { %v1914_v54 = vsel %vm11113_vm2, %v1909_v42, %v1913_v15  ;;  %v1187_v15 = vrot.slane %v10993_v14, 5  ;;  %v10738_v42 = vld [vmem:[%s14695_s1 + $0x1f0] sm:$0xff] }
  0x7a   : > { %3834 = vmatpush.bf16.msra.mxu3 %v10738_v42 }
  0x7b   : > { %838 = vmatmul.bf16.gmra.mxu0 %v730_v44  ;;  %878 = vmatmul.bf16.gmra.mxu2 %v738_v45  ;;  %v10703_v44 = vld [vmem:[%s14695_s1 + $0x158] sm:$0xff]  ;;  %v10642_v45 = vld [vmem:[%s11089_s8 + $0xa8] sm:$0xff] }
  0x7c   : > { %1111 = vmatmul.bf16.gmra.mxu3 %v10641_v46  ;;  %v10634_v46 = vld [vmem:[%s11089_s8 + $0x48] sm:$0xff]  ;;  %2842 = vmatpush.bf16.msrb.mxu1 %v10703_v44  ;;  %v1923_v44 = vrot.slane %v1921_v30, 5  ;;  %v1189_v30 = vrot.slane %v1187_v15, 4 }
  0x7d   : > { %1071 = vmatmul.bf16.gmra.mxu1 %v10633_v47  ;;  %v469_v47 = vrot.slane %v468_v36, 4  ;;  %v1182_v36 = vrot.slane %v1180_v21, 4 }
  0x7e   : > { %v1924_v56 = vsel %vm11113_vm2, %v1919_v43, %v1923_v44  ;;  %v9778_v43 = vrot.slane %v9762_v29, 9 }
  0x7f   : > { %v474_v59 = vsel %vm11113_vm2, %v469_v47, %v473_v22  ;;  %v10643_v22 = vld [vmem:[%s11089_s8 + $0xb4] sm:$0xff]  ;;  %v2602_v47 = vrot.slane %v2600_v31, 4  ;;  %v1184_v51 = vsel %vm11415_vm5, %v1182_v36, %v1183_v38  ;;  %v2302_v0 = vunpack.c.l.b16 %v1924_v56 }
  0x80   : > { %2843 = vmatpush.bf16.msrb.mxu1 %v10702_v53  ;;  %v707_v8 = vunpack.c.l.b16 %v474_v59  ;;  %v1307_v62 = vunpack.c.l.b16 %v1184_v51  ;;  %v10730_v38 = vld [vmem:[%s14695_s1 + $0x1b0] sm:$0xff]  ;;  %v1950_v51 = vshrl.u32 %v9687_v37, 16 }
  0x81   : > { %v2604_v60 = vsel %vm11415_vm5, %v2602_v47, %v2603_v48  ;;  %v1188_v47 = vsel %vm11415_vm5, %v9506_v28, %v1187_v15  ;;  %3153 = vmatpush.bf16.msra.mxu2 %v10730_v38  ;;  %v1197_v38 = vrot.slane %v11206_v1, 5 }
  0x82   : > { %v732_v18 = vpack.c.b16 %v708_v9, %v707_v8  ;;  %v1941_v8 = vrot.slane %v1939_v58, 4  ;;  %v9686_v9 = vld [vmem:[%s11089_s8 + $0x20] sm:$0x1] }
  0x84   : > { %2844 = vmatpush.bf16.msrb.mxu1 %v10701_v63  ;;  %v2301_v63 = vunpack.c.l.b16 %v1914_v54  ;;  %v1942_v20 = vor.u32 %v1941_v8, %v1937_v7 }
  0x86   : > { %v2333_v12 = vpack.c.b16 %v2302_v0, %v2301_v63  ;;  %v1308_v63 = vunpack.c.l.b16 %v1188_v47 }
  0x88   : > { %2845 = vmatpush.bf16.msrb.mxu1 %v10700_v5  ;;  %v2727_v5 = vunpack.c.l.b16 %v2604_v60 }
  0x8b   : > { %843 = vmatmul.bf16.gmra.mxu0 %v731_v32  ;;  %883 = vmatmul.bf16.gmra.mxu2 %v739_v34  ;;  %v9761_v32 = vld [vmem:[%s11089_s8 + $0xc] sm:$0xe]  ;;  %v9505_v34 = vrot.slane %v1127_v26, 9 }
  0x8c   : > { %1116 = vmatmul.bf16.gmra.mxu3 %v10642_v45  ;;  %v9684_v45 = vld [vmem:[%s11089_s8 + $0x18] sm:$0xf] }
  0x8d   : > { %1076 = vmatmul.bf16.gmra.mxu1 %v10634_v46  ;;  %v9777_v46 = vrot.slane %v9761_v32, 9  ;;  %v1181_v50 = vsel %vm11415_vm5, %v9505_v34, %v1180_v21  ;;  %v1926_v52 = vshrl.u32 %v9684_v45, 16  ;;  %v1929_v53 = vshll.u32 %v9684_v45, 16 }
  0x8e   : > { %v1306_v61 = vunpack.c.l.b16 %v1181_v50  ;;  %v1945_v21 = vshll.u32 %v9686_v9, 16  ;;  %v1943_v34 = vrot.slane %v1942_v20, 4  ;;  %v2610_v45 = vrot.slane %v9686_v9, 5 }
  0x8f   : > { %v2601_v59 = vsel %vm11415_vm5, %v9777_v46, %v2600_v31  ;;  %v1928_v2 = vrot.slane %v1926_v52, 4  ;;  %v1931_v3 = vrot.slane %v1929_v53, 5  ;;  %v1190_v31 = vrot.slane %v11147_v10, 5  ;;  %v11454_v46 = vld [vmem:[%s11089_s8 + $0x28] sm:$0xf] }
  0x90   : > { %v2726_v4 = vunpack.c.l.b16 %v2601_v59  ;;  %v1338_v11 = vpack.c.b16 %v1307_v62, %v1306_v61  ;;  %v1947_v36 = vrot.slane %v1945_v21, 5  ;;  %v1953_v52 = vshll.u32 %v9687_v37, 16  ;;  %v9763_v37 = vld [vmem:[%s11089_s8 + $0x24] sm:$0xe] }
  0x91   : > { %v1932_v16 = vor.u32 %v1931_v3, %v1928_v2  ;;  %v1959_v57 = vshll.u32 %v11454_v46, 16  ;;  %v1963_v58 = vshrl.u32 %v11454_v46, 16  ;;  %v10746_v2 = vld [vmem:[%s14695_s1 + $0x230] sm:$0xff] }
  0x92   : > { %v1948_v56 = vsel %vm11113_vm2, %v1943_v34, %v1947_v36  ;;  %4259 = vmatpush.bf16.msra.mxu0 %v10746_v2 }
  0x93   : > { %v1933_v32 = vrot.slane %v1932_v16, 4 }
  0x95   : > { %v1938_v50 = vsel %vm11113_vm2, %v1933_v32, %v1937_v7  ;;  %v1955_v7 = vrot.slane %v1953_v52, 5  ;;  %v2614_v32 = vrot.slane %v11454_v46, 5  ;;  %v11490_v46 = vld [vmem:[%s11089_s8 + $0x34] sm:$0xf] }
  0x96   : > { %v2303_v3 = vunpack.c.l.b16 %v1938_v50 }
  0x97   : > { %v2616_v47 = vrot.slane %v2614_v32, 4 }
  0x9b   : > { %848 = vmatmul.bf16.gmra.mxu0 %v732_v18  ;;  %888 = vmatmul.bf16.gmra.mxu2 %v740_v19  ;;  %v10668_v18 = vld [vmem:[%s11089_s8 + $0xc] sm:$0xff]  ;;  %v2758_v19 = vpack.c.b16 %v2727_v5, %v2726_v4  ;;  %v2304_v4 = vunpack.c.l.b16 %v1948_v56  ;;  %v1952_v5 = vrot.slane %v1950_v51, 4 }
  0x9c   : > { %1121 = vmatmul.bf16.gmra.mxu3 %v10643_v22 }
  0x9d   : > { %1081 = vmatmul.bf16.gmra.mxu1 %v10635_v24  ;;  %v2607_v24 = vrot.slane %v11421_v49, 5  ;;  %v1191_v49 = vsel %vm11415_vm5, %v1189_v30, %v1190_v31  ;;  %v1956_v20 = vor.u32 %v1955_v7, %v1952_v5  ;;  %v1969_v30 = vshll.u32 %v9689_v13, 16 }
  0x9e   : > { %v1309_v0 = vunpack.c.l.b16 %v1191_v49 }
  0x9f   : > { %v2609_v44 = vrot.slane %v2607_v24, 4  ;;  %v2608_v60 = vsel %vm11415_vm5, %v9778_v43, %v2607_v24  ;;  %v10669_v24 = vld [vmem:[%s11089_s8 + $0x18] sm:$0xff]  ;;  %v1957_v42 = vrot.slane %v1956_v20, 4 }
  0xa0   : > { %v2728_v8 = vunpack.c.l.b16 %v2608_v60  ;;  %v1339_v16 = vpack.c.b16 %v1309_v0, %v1308_v63  ;;  %v1983_v60 = vshll.u32 %v11490_v46, 16 }
  0xa1   : > { %v2611_v61 = vsel %vm11415_vm5, %v2609_v44, %v2610_v45  ;;  %v1971_v44 = vrot.slane %v1969_v30, 5  ;;  %v9690_v45 = vld [vmem:[%s11089_s8 + $0x30] sm:$0xf] }
  0xa2   : > { %v2729_v9 = vunpack.c.l.b16 %v2611_v61  ;;  %v1977_v56 = vshll.u32 %v9690_v45, 16  ;;  %v1987_v61 = vshrl.u32 %v11490_v46, 16 }
  0xa4   : > { %v2759_v28 = vpack.c.b16 %v2729_v9, %v2728_v8 }
  0xa8   : > { %v814_v17 = vpop.f32.mrf.mxu0 }
  0xaa   : > { %v1047_v22 = vpop.f32.mrf.mxu1 }
  0xab   : > { %v11442_v26 = vadd.f32 %v1047_v22, %v814_v17  ;;  %1426 = vmatmul.bf16.vlgmr.msrb.gmra.mxu2 %v1338_v11  ;;  %2421 = vmatmul.bf16.vlgmr.msrb.gmra.mxu0 %v2333_v12  ;;  %v1961_v11 = vrot.slane %v1959_v57, 5  ;;  %v1965_v12 = vrot.slane %v1963_v58, 4  ;;  %v2334_v17 = vpack.c.b16 %v2304_v4, %v2303_v3 }
  0xac   : > { %1740 = vmatmul.bf16.vlgmr.msrb.gmra.mxu3 %v10668_v18  ;;  %v1129_v18 = vld [vmem:[%s11089_s8 + $0x18] sm:$0xe] }
  0xad   : > { %2846 = vmatmul.bf16.vlgmr.msrb.gmra.mxu1 %v2758_v19  ;;  %v1194_v19 = vrot.slane %v11177_v33, 5  ;;  %v1966_v29 = vor.u32 %v1965_v12, %v1961_v11  ;;  %v9507_v36 = vrot.slane %v1129_v18, 9  ;;  %v1962_v1 = vsel %vm11113_vm2, %v1957_v42, %v1961_v11 }
  0xae   : > { %v854_v10 = vpop.f32.mrf.mxu2  ;;  %v2305_v7 = vunpack.c.l.b16 %v1962_v1  ;;  %v1979_v11 = vrot.slane %v1977_v56, 5 }
  0xaf   : > { %v1087_v48 = vpop.f32.mrf.mxu3  ;;  %v1196_v33 = vrot.slane %v1194_v19, 4  ;;  %v1967_v43 = vrot.slane %v1966_v29, 4  ;;  %v1195_v50 = vsel %vm11415_vm5, %v9507_v36, %v1194_v19 }
  0xb0   : > { %v11462_v53 = vadd.f32 %v1087_v48, %v854_v10  ;;  %v816_v54 = vpop.f32.mrf.mxu0  ;;  %v9779_v10 = vrot.slane %v9763_v37, 9  ;;  %v2617_v48 = vrot.slane %v9689_v13, 5  ;;  %v1310_v4 = vunpack.c.l.b16 %v1195_v50  ;;  %v10737_v50 = vld [vmem:[%s14695_s1 + $0x1e8] sm:$0xff] }
  0xb1   : > { %v1198_v52 = vsel %vm11415_vm5, %v1196_v33, %v1197_v38  ;;  %v2621_v38 = vrot.slane %v11490_v46, 5  ;;  %v10729_v46 = vld [vmem:[%s14695_s1 + $0x1a8] sm:$0xff]  ;;  %3835 = vmatpush.bf16.msra.mxu3 %v10737_v50 }
  0xb2   : > { %v1049_v59 = vpop.f32.mrf.mxu1  ;;  %v2615_v0 = vsel %vm11415_vm5, %v9779_v10, %v2614_v32  ;;  %v2618_v2 = vsel %vm11415_vm5, %v2616_v47, %v2617_v48  ;;  %v1311_v5 = vunpack.c.l.b16 %v1198_v52  ;;  %3154 = vmatpush.bf16.msra.mxu2 %v10729_v46 }
  0xb3   : > { %v11472_v62 = vadd.f32 %v1049_v59, %v816_v54  ;;  %v1974_v54 = vshrl.u32 %v9690_v45, 16  ;;  %v1972_v59 = vsel %vm11113_vm2, %v1967_v43, %v1971_v44  ;;  %v2730_v12 = vunpack.c.l.b16 %v2615_v0  ;;  %v9764_v44 = vld [vmem:[%s11089_s8 + $0x30] sm:$0xe] }
  0xb4   : > { %v2306_v8 = vunpack.c.l.b16 %v1972_v59  ;;  %v2731_v13 = vunpack.c.l.b16 %v2618_v2  ;;  %v1340_v19 = vpack.c.b16 %v1311_v5, %v1310_v4  ;;  %v1204_v45 = vrot.slane %v11238_v55, 5 }
  0xb5   : > { %v1976_v9 = vrot.slane %v1974_v54, 4  ;;  %v2623_v52 = vrot.slane %v2621_v38, 4  ;;  %v11529_v54 = vld [vmem:[%s11089_s8 + $0x40] sm:$0xf] }
  0xb6   : > { %v856_v14 = vpop.f32.mrf.mxu2  ;;  %v2335_v20 = vpack.c.b16 %v2306_v8, %v2305_v7  ;;  %v2760_v32 = vpack.c.b16 %v2731_v13, %v2730_v12  ;;  %v2007_v5 = vshll.u32 %v11529_v54, 16  ;;  %v2011_v7 = vshrl.u32 %v11529_v54, 16 }
  0xb7   : > { %v1089_v15 = vpop.f32.mrf.mxu3  ;;  %v2628_v50 = vrot.slane %v11529_v54, 5  ;;  %v11565_v54 = vld [vmem:[%s11089_s8 + $0x4c] sm:$0xf] }
  0xb8   : > { %v11480_v21 = vadd.f32 %v1089_v15, %v856_v14  ;;  %v819_v22 = vpop.f32.mrf.mxu0  ;;  %v1985_v14 = vrot.slane %v1983_v60, 5  ;;  %v1989_v15 = vrot.slane %v1987_v61, 4 }
  0xba   : > { %v1052_v31 = vpop.f32.mrf.mxu1  ;;  %v1990_v36 = vor.u32 %v1989_v15, %v1985_v14  ;;  %v10745_v15 = vld [vmem:[%s14695_s1 + $0x228] sm:$0xff] }
  0xbb   : > { %v11484_v34 = vadd.f32 %v1052_v31, %v819_v22  ;;  %1431 = vmatmul.bf16.gmra.mxu2 %v1339_v16  ;;  %2426 = vmatmul.bf16.gmra.mxu0 %v2334_v17  ;;  %v9692_v16 = vld [vmem:[%s11089_s8 + $0x38] sm:$0x1]  ;;  %v1130_v22 = vld [vmem:[%s11089_s8 + $0x24] sm:$0xe] }
  0xbc   : > { %1745 = vmatmul.bf16.gmra.mxu3 %v10669_v24  ;;  %v1201_v24 = vrot.slane %v11214_v27, 5  ;;  %v10670_v31 = vld [vmem:[%s11089_s8 + $0x24] sm:$0xff]  ;;  %v1993_v37 = vshll.u32 %v9692_v16, 16  ;;  %v9508_v43 = vrot.slane %v1130_v22, 9  ;;  %v1991_v47 = vrot.slane %v1990_v36, 4  ;;  %4260 = vmatpush.bf16.msra.mxu0 %v10745_v15 }
  0xbd   : > { %2851 = vmatmul.bf16.gmra.mxu1 %v2759_v28  ;;  %v1980_v28 = vor.u32 %v1979_v11, %v1976_v9  ;;  %v2624_v1 = vrot.slane %v9692_v16, 5 }
  0xbe   : > { %v859_v49 = vpop.f32.mrf.mxu2  ;;  %v1203_v27 = vrot.slane %v1201_v24, 4  ;;  %v1995_v48 = vrot.slane %v1993_v37, 5  ;;  %v1202_v56 = vsel %vm11415_vm5, %v9508_v43, %v1201_v24  ;;  %v2009_v24 = vrot.slane %v2007_v5, 5 }
  0xbf   : > { %v1092_v51 = vpop.f32.mrf.mxu3  ;;  %v1981_v10 = vrot.slane %v1980_v28, 4  ;;  %v2625_v11 = vsel %vm11415_vm5, %v2623_v52, %v2624_v1  ;;  %v1312_v13 = vunpack.c.l.b16 %v1202_v56  ;;  %v2013_v28 = vrot.slane %v2011_v7, 4  ;;  %v9765_v1 = vld [vmem:[%s11089_s8 + $0x3c] sm:$0xe] }
  0xc0   : > { %v11498_v57 = vadd.f32 %v1092_v51, %v859_v49  ;;  %v821_v58 = vpop.f32.mrf.mxu0  ;;  %v9693_v49 = vld [vmem:[%s11089_s8 + $0x3c] sm:$0xf]  ;;  %v9780_v51 = vrot.slane %v9764_v44, 9  ;;  %v1205_v59 = vsel %vm11415_vm5, %v1203_v27, %v1204_v45  ;;  %v1996_v4 = vsel %vm11113_vm2, %v1991_v47, %v1995_v48 }
  0xc1   : > { %v1986_v60 = vsel %vm11113_vm2, %v1981_v10, %v1985_v14  ;;  %v1998_v61 = vshrl.u32 %v9693_v49, 16  ;;  %v1313_v14 = vunpack.c.l.b16 %v1205_v59  ;;  %v2733_v22 = vunpack.c.l.b16 %v2625_v11  ;;  %v10671_v10 = vld [vmem:[%s11089_s8 + $0x30] sm:$0xff] }
  0xc2   : > { %v1054_v63 = vpop.f32.mrf.mxu1  ;;  %v2622_v9 = vsel %vm11415_vm5, %v9780_v51, %v2621_v38  ;;  %v2307_v16 = vunpack.c.l.b16 %v1986_v60  ;;  %v10994_v38 = vld [vmem:[%s11089_s8 + $0x34] sm:$0xf]  ;;  %v2014_v48 = vor.u32 %v2013_v28, %v2009_v24  ;;  %v1211_v56 = vrot.slane %v11266_v41, 5 }
  0xc3   : > { %v11508_v3 = vadd.f32 %v1054_v63, %v821_v58  ;;  %v2001_v63 = vshll.u32 %v9693_v49, 16  ;;  %v1341_v36 = vpack.c.b16 %v1313_v14, %v1312_v13  ;;  %v1208_v43 = vrot.slane %v10994_v38, 5 }
  0xc4   : > { %v2015_v59 = vrot.slane %v2014_v48, 4 }
  0xc6   : > { %v861_v17 = vpop.f32.mrf.mxu2 }
  0xc7   : > { %v1094_v18 = vpop.f32.mrf.mxu3 }
  0xc8   : > { %v11513_v29 = vadd.f32 %v1094_v18, %v861_v17  ;;  %v824_v30 = vpop.f32.mrf.mxu0  ;;  %v2308_v17 = vunpack.c.l.b16 %v1996_v4  ;;  %v2000_v18 = vrot.slane %v1998_v61, 4  ;;  %v9696_v61 = vld [vmem:[%s11089_s8 + $0x48] sm:$0xf] }
  0xc9   : > { %v2022_v11 = vshrl.u32 %v9696_v61, 16  ;;  %v2025_v13 = vshll.u32 %v9696_v61, 16 }
  0xca   : > { %v1057_v33 = vpop.f32.mrf.mxu1  ;;  %v2336_v37 = vpack.c.b16 %v2308_v17, %v2307_v16  ;;  %v2031_v17 = vshll.u32 %v11565_v54, 16 }
  0xcb   : > { %v11517_v42 = vadd.f32 %v1057_v33, %v824_v30  ;;  %1436 = vmatmul.bf16.gmra.mxu2 %v1340_v19  ;;  %2431 = vmatmul.bf16.gmra.mxu0 %v2335_v20  ;;  %v2003_v19 = vrot.slane %v2001_v63, 5  ;;  %v2732_v20 = vunpack.c.l.b16 %v2622_v9  ;;  %v9695_v30 = vld [vmem:[%s11089_s8 + $0x44] sm:$0x1]  ;;  %v1131_v33 = vld [vmem:[%s11089_s8 + $0x30] sm:$0xe]  ;;  %v9781_v63 = vrot.slane %v9765_v1, 9 }
  0xcc   : > { %1750 = vmatmul.bf16.gmra.mxu3 %v10670_v31  ;;  %v2017_v49 = vshll.u32 %v9695_v30, 16  ;;  %v9509_v52 = vrot.slane %v1131_v33, 9  ;;  %v2631_v4 = vrot.slane %v9695_v30, 5 }
  0xcd   : > { %2856 = vmatmul.bf16.gmra.mxu1 %v2760_v32  ;;  %v2004_v44 = vor.u32 %v2003_v19, %v2000_v18  ;;  %v2761_v47 = vpack.c.b16 %v2733_v22, %v2732_v20  ;;  %v2035_v18 = vshrl.u32 %v11565_v54, 16  ;;  %v2629_v20 = vsel %vm11415_vm5, %v9781_v63, %v2628_v50 }
  0xce   : > { %v864_v55 = vpop.f32.mrf.mxu2  ;;  %v2019_v60 = vrot.slane %v2017_v49, 5  ;;  %v1209_v7 = vsel %vm11415_vm5, %v9509_v52, %v1208_v43  ;;  %v2734_v33 = vunpack.c.l.b16 %v2629_v20  ;;  %v2635_v63 = vrot.slane %v11565_v54, 5  ;;  %v10728_v54 = vld [vmem:[%s14695_s1 + $0x1a0] sm:$0xff] }
  0xcf   : > { %v1097_v58 = vpop.f32.mrf.mxu3  ;;  %v1314_v28 = vunpack.c.l.b16 %v1209_v7  ;;  %v1218_v7 = vrot.slane %v11298_v35, 5  ;;  %3155 = vmatpush.bf16.msra.mxu2 %v10728_v54 }
  0xd0   : > { %v11537_v0 = vadd.f32 %v1097_v58, %v864_v55  ;;  %v826_v2 = vpop.f32.mrf.mxu0  ;;  %v1210_v55 = vrot.slane %v1208_v43, 4  ;;  %v2005_v58 = vrot.slane %v2004_v44, 4  ;;  %v2020_v16 = vsel %vm11113_vm2, %v2015_v59, %v2019_v60 }
  0xd1   : > { %v2033_v43 = vrot.slane %v2031_v17, 5  ;;  %v2037_v44 = vrot.slane %v2035_v18, 4  ;;  %v11604_v18 = vld [vmem:[%s11089_s8 + $0x58] sm:$0xf] }
  0xd2   : > { %v1059_v8 = vpop.f32.mrf.mxu1  ;;  %v1212_v9 = vsel %vm11415_vm5, %v1210_v55, %v1211_v56  ;;  %v2010_v41 = vsel %vm11113_vm2, %v2005_v58, %v2009_v24  ;;  %v10672_v56 = vld [vmem:[%s11089_s8 + $0x3c] sm:$0xff] }
  0xd3   : > { %v11547_v12 = vadd.f32 %v1059_v8, %v826_v2  ;;  %v2630_v2 = vrot.slane %v2628_v50, 4  ;;  %v1315_v30 = vunpack.c.l.b16 %v1212_v9  ;;  %v1215_v50 = vrot.slane %v11274_v6, 5 }
  0xd4   : > { %v2038_v59 = vor.u32 %v2037_v44, %v2033_v43 }
  0xd5   : > { %v2632_v22 = vsel %vm11415_vm5, %v2630_v2, %v2631_v4  ;;  %v1342_v48 = vpack.c.b16 %v1315_v30, %v1314_v28  ;;  %v1217_v6 = vrot.slane %v1215_v50, 4 }
  0xd6   : > { %v866_v31 = vpop.f32.mrf.mxu2  ;;  %v2735_v38 = vunpack.c.l.b16 %v2632_v22  ;;  %v2039_v9 = vrot.slane %v2038_v59, 4 }
  0xd7   : > { %v1099_v32 = vpop.f32.mrf.mxu3  ;;  %v1219_v22 = vsel %vm11415_vm5, %v1217_v6, %v1218_v7  ;;  %v1133_v7 = vld [vmem:[%s11089_s8 + $0x48] sm:$0xe] }
  0xd8   : > { %v11555_v27 = vadd.f32 %v1099_v32, %v866_v31  ;;  %v829_v45 = vpop.f32.mrf.mxu0  ;;  %v2309_v31 = vunpack.c.l.b16 %v2010_v41  ;;  %v2310_v32 = vunpack.c.l.b16 %v2020_v16  ;;  %v2762_v58 = vpack.c.b16 %v2735_v38, %v2734_v33 }
  0xd9   : > { %v2637_v16 = vrot.slane %v2635_v63, 4  ;;  %v2055_v33 = vshll.u32 %v11604_v18, 16  ;;  %v2059_v38 = vshrl.u32 %v11604_v18, 16 }
  0xda   : > { %v1062_v46 = vpop.f32.mrf.mxu1  ;;  %v2337_v49 = vpack.c.b16 %v2310_v32, %v2309_v31 }
  0xdb   : > { %v11559_v51 = vadd.f32 %v1062_v46, %v829_v45  ;;  %1441 = vmatmul.bf16.gmra.mxu2 %v1341_v36  ;;  %2436 = vmatmul.bf16.gmra.mxu0 %v2336_v37  ;;  %v2024_v36 = vrot.slane %v2022_v11, 4  ;;  %v2027_v37 = vrot.slane %v2025_v13, 5  ;;  %v9698_v45 = vld [vmem:[%s11089_s8 + $0x50] sm:$0x1]  ;;  %v1132_v46 = vld [vmem:[%s11089_s8 + $0x3c] sm:$0xe] }
  0xdc   : > { %1755 = vmatmul.bf16.gmra.mxu3 %v10671_v10  ;;  %v2041_v60 = vshll.u32 %v9698_v45, 16  ;;  %v9510_v4 = vrot.slane %v1132_v46, 9  ;;  %v9699_v11 = vld [vmem:[%s11089_s8 + $0x54] sm:$0xf]  ;;  %v10736_v13 = vld [vmem:[%s14695_s1 + $0x1e0] sm:$0xff]  ;;  %v2638_v17 = vrot.slane %v9698_v45, 5 }
  0xdd   : > { %2861 = vmatmul.bf16.gmra.mxu1 %v2761_v47  ;;  %v2028_v52 = vor.u32 %v2027_v37, %v2024_v36  ;;  %3836 = vmatpush.bf16.msra.mxu3 %v10736_v13  ;;  %v2046_v30 = vshrl.u32 %v9699_v11, 16  ;;  %v2049_v31 = vshll.u32 %v9699_v11, 16  ;;  %v2057_v59 = vrot.slane %v2055_v33, 5  ;;  %v10673_v13 = vld [vmem:[%s11089_s8 + $0x48] sm:$0xff] }
  0xde   : > { %v869_v5 = vpop.f32.mrf.mxu2  ;;  %v2043_v41 = vrot.slane %v2041_v60, 5  ;;  %v2061_v60 = vrot.slane %v2059_v38, 4  ;;  %v9702_v38 = vld [vmem:[%s11089_s8 + $0x60] sm:$0xf] }
  0xdf   : > { %v1102_v8 = vpop.f32.mrf.mxu3 }
  0xe0   : > { %v11573_v14 = vadd.f32 %v1102_v8, %v869_v5  ;;  %v831_v15 = vpop.f32.mrf.mxu0  ;;  %v9766_v5 = vld [vmem:[%s11089_s8 + $0x48] sm:$0xe]  ;;  %v2029_v8 = vrot.slane %v2028_v52, 4  ;;  %v2044_v37 = vsel %vm11113_vm2, %v2039_v9, %v2043_v41  ;;  %v2048_v52 = vrot.slane %v2046_v30, 4 }
  0xe2   : > { %v1064_v19 = vpop.f32.mrf.mxu1  ;;  %v2034_v28 = vsel %vm11113_vm2, %v2029_v8, %v2033_v43  ;;  %v2639_v43 = vsel %vm11415_vm5, %v2637_v16, %v2638_v17  ;;  %v10995_v8 = vld [vmem:[%s11089_s8 + $0x4c] sm:$0xf]  ;;  %v2062_v16 = vor.u32 %v2061_v60, %v2057_v59 }
  0xe3   : > { %v11583_v24 = vadd.f32 %v1064_v19, %v831_v15  ;;  %v9782_v15 = vrot.slane %v9766_v5, 9  ;;  %v1216_v19 = vsel %vm11415_vm5, %v9510_v4, %v1215_v50  ;;  %v2311_v46 = vunpack.c.l.b16 %v2034_v28  ;;  %v9767_v28 = vld [vmem:[%s11089_s8 + $0x54] sm:$0xe] }
  0xe4   : > { %v2312_v50 = vunpack.c.l.b16 %v2044_v37  ;;  %v1222_v9 = vrot.slane %v10995_v8, 5  ;;  %v2063_v37 = vrot.slane %v2062_v16, 4 }
  0xe5   : > { %v2636_v45 = vsel %vm11415_vm5, %v9782_v15, %v2635_v63 }
  0xe6   : > { %v871_v10 = vpop.f32.mrf.mxu2  ;;  %v2338_v6 = vpack.c.b16 %v2312_v50, %v2311_v46  ;;  %v1224_v30 = vrot.slane %v1222_v9, 4  ;;  %v2070_v50 = vshrl.u32 %v9702_v38, 16 }
  0xe7   : > { %v1104_v47 = vpop.f32.mrf.mxu3 }
  0xe8   : > { %v11588_v1 = vadd.f32 %v1104_v47, %v871_v10  ;;  %v834_v55 = vpop.f32.mrf.mxu0  ;;  %v1316_v47 = vunpack.c.l.b16 %v1216_v19  ;;  %v2642_v19 = vrot.slane %v11604_v18, 5  ;;  %v11640_v18 = vld [vmem:[%s11089_s8 + $0x64] sm:$0xf] }
  0xe9   : > { %v2079_v60 = vshll.u32 %v11640_v18, 16 }
  0xea   : > { %v1067_v61 = vpop.f32.mrf.mxu1 }
  0xeb   : > { %v11592_v2 = vadd.f32 %v1067_v61, %v834_v55  ;;  %1446 = vmatmul.bf16.gmra.mxu2 %v1342_v48  ;;  %2441 = vmatmul.bf16.gmra.mxu0 %v2337_v49  ;;  %v1317_v48 = vunpack.c.l.b16 %v1219_v22  ;;  %v10744_v49 = vld [vmem:[%s14695_s1 + $0x220] sm:$0xff]  ;;  %v2051_v55 = vrot.slane %v2049_v31, 5  ;;  %v9701_v61 = vld [vmem:[%s11089_s8 + $0x5c] sm:$0x1]  ;;  %v9511_v22 = vrot.slane %v1133_v7, 9 }
  0xec   : > { %1760 = vmatmul.bf16.gmra.mxu3 %v10672_v56  ;;  %v2736_v56 = vunpack.c.l.b16 %v2636_v45  ;;  %4261 = vmatpush.bf16.msra.mxu0 %v10744_v49  ;;  %v2065_v17 = vshll.u32 %v9701_v61, 16  ;;  %v1225_v31 = vrot.slane %v11329_v23, 5  ;;  %v2644_v45 = vrot.slane %v2642_v19, 4 }
  0xed   : > { %2866 = vmatmul.bf16.gmra.mxu1 %v2762_v58  ;;  %v2737_v58 = vunpack.c.l.b16 %v2639_v43  ;;  %v1343_v5 = vpack.c.b16 %v1317_v48, %v1316_v47  ;;  %v2052_v41 = vor.u32 %v2051_v55, %v2048_v52  ;;  %v2645_v43 = vrot.slane %v9701_v61, 5 }
  0xee   : > { %v874_v35 = vpop.f32.mrf.mxu2  ;;  %v2067_v33 = vrot.slane %v2065_v17, 5  ;;  %v1223_v48 = vsel %vm11415_vm5, %v9511_v22, %v1222_v9  ;;  %v1226_v46 = vsel %vm11415_vm5, %v1224_v30, %v1225_v31  ;;  %v2073_v52 = vshll.u32 %v9702_v38, 16  ;;  %v1134_v31 = vld [vmem:[%s11089_s8 + $0x54] sm:$0xe] }
  0xef   : > { %v1107_v20 = vpop.f32.mrf.mxu3  ;;  %v2763_v15 = vpack.c.b16 %v2737_v58, %v2736_v56  ;;  %v2083_v61 = vshrl.u32 %v11640_v18, 16  ;;  %v1319_v7 = vunpack.c.l.b16 %v1226_v46  ;;  %v2081_v16 = vrot.slane %v2079_v60, 5 }
  0xf0   : > { %v11612_v32 = vadd.f32 %v1107_v20, %v874_v35  ;;  %v836_v36 = vpop.f32.mrf.mxu0  ;;  %v2068_v58 = vsel %vm11113_vm2, %v2063_v37, %v2067_v33  ;;  %v2649_v46 = vrot.slane %v11640_v18, 5  ;;  %v10727_v18 = vld [vmem:[%s14695_s1 + $0x198] sm:$0xff] }
  0xf1   : > { %v2314_v9 = vunpack.c.l.b16 %v2068_v58  ;;  %v2085_v17 = vrot.slane %v2083_v61, 4  ;;  %v1232_v58 = vrot.slane %v11366_v25, 5  ;;  %3156 = vmatpush.bf16.msra.mxu2 %v10727_v18 }
  0xf2   : > { %v1069_v44 = vpop.f32.mrf.mxu1 }
  0xf3   : > { %v11622_v10 = vadd.f32 %v1069_v44, %v836_v36  ;;  %v2053_v36 = vrot.slane %v2052_v41, 4  ;;  %v9783_v44 = vrot.slane %v9767_v28, 9  ;;  %v2072_v41 = vrot.slane %v2070_v50, 4 }
  0xf4   : > { %v9512_v50 = vrot.slane %v1134_v31, 9 }
  0xf5   : > { %v2058_v23 = vsel %vm11113_vm2, %v2053_v36, %v2057_v59  ;;  %v2646_v59 = vsel %vm11415_vm5, %v2644_v45, %v2645_v43  ;;  %v10996_v36 = vld [vmem:[%s11089_s8 + $0x58] sm:$0xf] }
  0xf6   : > { %v876_v63 = vpop.f32.mrf.mxu2  ;;  %v2313_v8 = vunpack.c.l.b16 %v2058_v23  ;;  %v1229_v37 = vrot.slane %v10996_v36, 5  ;;  %v10674_v45 = vld [vmem:[%s11089_s8 + $0x54] sm:$0xff] }
  0xf7   : > { %v1109_v4 = vpop.f32.mrf.mxu3 }
  0xf8   : > { %v11630_v11 = vadd.f32 %v1109_v4, %v876_v63  ;;  %v839_v54 = vpop.f32.mrf.mxu0  ;;  %v2643_v4 = vsel %vm11415_vm5, %v9783_v44, %v2642_v19  ;;  %v2339_v30 = vpack.c.b16 %v2314_v9, %v2313_v8  ;;  %v11679_v9 = vld [vmem:[%s11089_s8 + $0x70] sm:$0xf] }
  0xf9   : > { %v2107_v31 = vshrl.u32 %v11679_v9, 16 }
  0xfa   : > { %v1072_v35 = vpop.f32.mrf.mxu1 }
  0xfb   : > { %v11634_v20 = vadd.f32 %v1072_v35, %v839_v54  ;;  %1451 = vmatmul.bf16.gmra.mxu2 %v1343_v5  ;;  %2446 = vmatmul.bf16.gmra.mxu0 %v2338_v6  ;;  %v1318_v6 = vunpack.c.l.b16 %v1223_v48  ;;  %v2075_v54 = vrot.slane %v2073_v52, 5  ;;  %v9704_v35 = vld [vmem:[%s11089_s8 + $0x68] sm:$0x1]  ;;  %v9768_v52 = vld [vmem:[%s11089_s8 + $0x60] sm:$0xe] }
  0xfc   : > { %1765 = vmatmul.bf16.gmra.mxu3 %v10673_v13  ;;  %v2738_v13 = vunpack.c.l.b16 %v2643_v4  ;;  %v2089_v48 = vshll.u32 %v9704_v35, 16  ;;  %v9705_v4 = vld [vmem:[%s11089_s8 + $0x6c] sm:$0xf]  ;;  %v2652_v8 = vrot.slane %v9704_v35, 5 }
  0xfd   : > { %2871 = vmatmul.bf16.gmra.mxu1 %v2763_v15  ;;  %v2739_v15 = vunpack.c.l.b16 %v2646_v59  ;;  %v1344_v28 = vpack.c.b16 %v1319_v7, %v1318_v6  ;;  %v2076_v33 = vor.u32 %v2075_v54, %v2072_v41  ;;  %v10735_v59 = vld [vmem:[%s14695_s1 + $0x1d8] sm:$0xff]  ;;  %v9784_v6 = vrot.slane %v9768_v52, 9 }
  0xfe   : > { %v879_v47 = vpop.f32.mrf.mxu2  ;;  %v2651_v7 = vrot.slane %v2649_v46, 4  ;;  %v1230_v41 = vsel %vm11415_vm5, %v9512_v50, %v1229_v37  ;;  %3837 = vmatpush.bf16.msra.mxu3 %v10735_v59  ;;  %v1135_v59 = vld [vmem:[%s11089_s8 + $0x60] sm:$0xe] }
  0xff   : > { %v1112_v49 = vpop.f32.mrf.mxu3  ;;  %v2764_v43 = vpack.c.b16 %v2739_v15, %v2738_v13  ;;  %v2077_v60 = vrot.slane %v2076_v33, 4 }
 0x100   : > { %v11648_v55 = vadd.f32 %v1112_v49, %v879_v47  ;;  %v841_v56 = vpop.f32.mrf.mxu0  ;;  %v2086_v47 = vor.u32 %v2085_v17, %v2081_v16  ;;  %v2094_v17 = vshrl.u32 %v9705_v4, 16 }
 0x101   : > { %v2082_v15 = vsel %vm11113_vm2, %v2077_v60, %v2081_v16  ;;  %v2653_v16 = vsel %vm11415_vm5, %v2651_v7, %v2652_v8  ;;  %v9707_v60 = vld [vmem:[%s11089_s8 + $0x74] sm:$0x1] }
 0x102   : > { %v1074_v63 = vpop.f32.mrf.mxu1  ;;  %v2087_v61 = vrot.slane %v2086_v47, 4  ;;  %v2741_v52 = vunpack.c.l.b16 %v2653_v16 }
 0x103   : > { %v11658_v5 = vadd.f32 %v1074_v63, %v841_v56  ;;  %v1231_v56 = vrot.slane %v1229_v37, 4  ;;  %v2091_v63 = vrot.slane %v2089_v48, 5  ;;  %v2650_v37 = vsel %vm11415_vm5, %v9784_v6, %v2649_v46  ;;  %v10743_v46 = vld [vmem:[%s14695_s1 + $0x218] sm:$0xff]  ;;  %v10997_v6 = vld [vmem:[%s11089_s8 + $0x64] sm:$0xf] }
 0x104   : > { %v2096_v48 = vrot.slane %v2094_v17, 4  ;;  %v2740_v50 = vunpack.c.l.b16 %v2650_v37  ;;  %v1236_v7 = vrot.slane %v10997_v6, 5  ;;  %4262 = vmatpush.bf16.msra.mxu0 %v10743_v46  ;;  %v2113_v17 = vshll.u32 %v9707_v60, 16  ;;  %v10998_v37 = vld [vmem:[%s11089_s8 + $0x68] sm:$0x1] }
 0x105   : > { %v1233_v13 = vsel %vm11415_vm5, %v1231_v56, %v1232_v58  ;;  %v2109_v58 = vrot.slane %v2107_v31, 4  ;;  %v9769_v31 = vld [vmem:[%s11089_s8 + $0x6c] sm:$0xe]  ;;  %v1239_v16 = vrot.slane %v10998_v37, 5 }
 0x106   : > { %v881_v19 = vpop.f32.mrf.mxu2 }
 0x107   : > { %v1114_v22 = vpop.f32.mrf.mxu3 }
 0x108   : > { %v11663_v38 = vadd.f32 %v1114_v22, %v881_v19  ;;  %v844_v44 = vpop.f32.mrf.mxu0  ;;  %v2097_v19 = vshll.u32 %v9705_v4, 16 }
 0x10a   : > { %v1077_v49 = vpop.f32.mrf.mxu1 }
 0x10b   : > { %v11667_v23 = vadd.f32 %v1077_v49, %v844_v44  ;;  %1456 = vmatmul.bf16.gmra.mxu2 %v1344_v28  ;;  %2451 = vmatmul.bf16.gmra.mxu0 %v2339_v30  ;;  %v2092_v28 = vsel %vm11113_vm2, %v2087_v61, %v2091_v63  ;;  %v2103_v30 = vshll.u32 %v11679_v9, 16  ;;  %v1320_v44 = vunpack.c.l.b16 %v1230_v41 }
 0x10c   : > { %1770 = vmatmul.bf16.gmra.mxu3 %v10674_v45  ;;  %v1321_v45 = vunpack.c.l.b16 %v1233_v13  ;;  %v2316_v47 = vunpack.c.l.b16 %v2092_v28  ;;  %v2099_v49 = vrot.slane %v2097_v19, 5  ;;  %v2765_v13 = vpack.c.b16 %v2741_v52, %v2740_v50 }
 0x10d   : > { %2876 = vmatmul.bf16.gmra.mxu1 %v2764_v43  ;;  %v2315_v43 = vunpack.c.l.b16 %v2082_v15  ;;  %v2105_v56 = vrot.slane %v2103_v30, 5  ;;  %v9513_v30 = vrot.slane %v1135_v59, 9  ;;  %v2659_v50 = vrot.slane %v9707_v60, 5 }
 0x10e   : > { %v884_v25 = vpop.f32.mrf.mxu2  ;;  %v1345_v4 = vpack.c.b16 %v1321_v45, %v1320_v44  ;;  %v2100_v8 = vor.u32 %v2099_v49, %v2096_v48  ;;  %v9785_v48 = vrot.slane %v9769_v31, 9 }
 0x10f   : > { %v1117_v54 = vpop.f32.mrf.mxu3  ;;  %v2340_v18 = vpack.c.b16 %v2316_v47, %v2315_v43  ;;  %v2110_v15 = vor.u32 %v2109_v58, %v2105_v56  ;;  %v2115_v43 = vrot.slane %v2113_v17, 5  ;;  %v9708_v47 = vld [vmem:[%s11089_s8 + $0x78] sm:$0xf]  ;;  %v1237_v58 = vsel %vm11415_vm5, %v9513_v30, %v1236_v7 }
 0x110   : > { %v11687_v22 = vadd.f32 %v1117_v54, %v884_v25  ;;  %v846_v35 = vpop.f32.mrf.mxu0  ;;  %v10675_v54 = vld [vmem:[%s11089_s8 + $0x60] sm:$0xff]  ;;  %v2101_v44 = vrot.slane %v2100_v8, 4 }
 0x111   : > { %v2111_v45 = vrot.slane %v2110_v15, 4  ;;  %v1322_v15 = vunpack.c.l.b16 %v1237_v58  ;;  %v1136_v58 = vld [vmem:[%s11089_s8 + $0x6c] sm:$0xe] }
 0x112   : > { %v1079_v36 = vpop.f32.mrf.mxu1 }
 0x113   : > { %v11697_v33 = vadd.f32 %v1079_v36, %v846_v35  ;;  %v2656_v35 = vrot.slane %v11679_v9, 5  ;;  %v1238_v36 = vrot.slane %v1236_v7, 4  ;;  %v11715_v9 = vld [vmem:[%s11089_s8 + $0x7c] sm:$0xf]  ;;  %v2116_v60 = vsel %vm11113_vm2, %v2111_v45, %v2115_v43  ;;  %v9710_v43 = vld [vmem:[%s11089_s8 + $0x80] sm:$0x1] }
 0x114   : > { %v2127_v8 = vshll.u32 %v11715_v9, 16  ;;  %v2131_v7 = vshrl.u32 %v11715_v9, 16  ;;  %v2318_v30 = vunpack.c.l.b16 %v2116_v60  ;;  %v2137_v60 = vshll.u32 %v9710_v43, 16 }
 0x115   : > { %v2658_v49 = vrot.slane %v2656_v35, 4 }
 0x116   : > { %v886_v61 = vpop.f32.mrf.mxu2  ;;  %v2133_v45 = vrot.slane %v2131_v7, 4  ;;  %v2663_v7 = vrot.slane %v11715_v9, 5 }
 0x117   : > { %v1119_v63 = vpop.f32.mrf.mxu3 }
 0x118   : > { %v11705_v25 = vadd.f32 %v1119_v63, %v886_v61  ;;  %v849_v41 = vpop.f32.mrf.mxu0  ;;  %v1240_v61 = vsel %vm11415_vm5, %v1238_v36, %v1239_v16  ;;  %v2106_v63 = vsel %vm11113_vm2, %v2101_v44, %v2105_v56  ;;  %v2660_v56 = vsel %vm11415_vm5, %v2658_v49, %v2659_v50 }
 0x119   : > { %v1323_v17 = vunpack.c.l.b16 %v1240_v61  ;;  %v2743_v16 = vunpack.c.l.b16 %v2660_v56  ;;  %v2129_v44 = vrot.slane %v2127_v8, 5  ;;  %v11000_v56 = vld [vmem:[%s11089_s8 + $0x74] sm:$0x1]  ;;  %v2665_v9 = vrot.slane %v2663_v7, 4 }
 0x11a   : > { %v1082_v19 = vpop.f32.mrf.mxu1 }
 0x11b   : > { %v11709_v28 = vadd.f32 %v1082_v19, %v849_v41  ;;  %1461 = vmatmul.bf16.gmra.mxu2 %v1345_v4  ;;  %2456 = vmatmul.bf16.gmra.mxu0 %v2340_v18  ;;  %v2118_v4 = vshrl.u32 %v9708_v47, 16  ;;  %v2121_v18 = vshll.u32 %v9708_v47, 16  ;;  %v2317_v19 = vunpack.c.l.b16 %v2106_v63 }
 0x11c   : > { %1775 = vmatmul.bf16.gmra.mxu3 %v10675_v54  ;;  %v2657_v54 = vsel %vm11415_vm5, %v9785_v48, %v2656_v35  ;;  %v10999_v35 = vld [vmem:[%s11089_s8 + $0x70] sm:$0xf]  ;;  %v1346_v50 = vpack.c.b16 %v1323_v17, %v1322_v15  ;;  %v1246_v15 = vrot.slane %v11000_v56, 5  ;;  %v9770_v17 = vld [vmem:[%s11089_s8 + $0x78] sm:$0xe] }
 0x11d   : > { %2881 = vmatmul.bf16.gmra.mxu1 %v2765_v13  ;;  %v2120_v31 = vrot.slane %v2118_v4, 4  ;;  %v2123_v36 = vrot.slane %v2121_v18, 5  ;;  %v2742_v37 = vunpack.c.l.b16 %v2657_v54  ;;  %v1243_v48 = vrot.slane %v10999_v35, 5  ;;  %v10676_v4 = vld [vmem:[%s11089_s8 + $0x6c] sm:$0xff] }
 0x11e   : > { %v889_v52 = vpop.f32.mrf.mxu2  ;;  %v10734_v35 = vld [vmem:[%s14695_s1 + $0x1d0] sm:$0xff] }
 0x11f   : > { %v1122_v46 = vpop.f32.mrf.mxu3  ;;  %v2766_v18 = vpack.c.b16 %v2743_v16, %v2742_v37  ;;  %v1245_v54 = vrot.slane %v1243_v48, 4  ;;  %v10726_v37 = vld [vmem:[%s14695_s1 + $0x190] sm:$0xff]  ;;  %v9786_v16 = vrot.slane %v9770_v17, 9  ;;  %3838 = vmatpush.bf16.msra.mxu3 %v10734_v35 }
 0x120   : > { %v11723_v59 = vadd.f32 %v1122_v46, %v889_v52  ;;  %v851_v6 = vpop.f32.mrf.mxu0  ;;  %v2341_v52 = vpack.c.b16 %v2318_v30, %v2317_v19  ;;  %v2124_v46 = vor.u32 %v2123_v36, %v2120_v31  ;;  %v2139_v31 = vrot.slane %v2137_v60, 5  ;;  %v9711_v36 = vld [vmem:[%s11089_s8 + $0x84] sm:$0xf]  ;;  %3157 = vmatpush.bf16.msra.mxu2 %v10726_v37 }
 0x122   : > { %v1084_v41 = vpop.f32.mrf.mxu1  ;;  %v2125_v19 = vrot.slane %v2124_v46, 4 }
 0x123   : > { %v11733_v13 = vadd.f32 %v1084_v41, %v851_v6  ;;  %v2134_v6 = vor.u32 %v2133_v45, %v2129_v44  ;;  %v9514_v41 = vrot.slane %v1136_v58, 9  ;;  %v2666_v45 = vrot.slane %v9710_v43, 5 }
 0x124   : > { %v2130_v43 = vsel %vm11113_vm2, %v2125_v19, %v2129_v44 }
 0x125   : > { %v2135_v30 = vrot.slane %v2134_v6, 4  ;;  %v2667_v44 = vsel %vm11415_vm5, %v2665_v9, %v2666_v45  ;;  %v9713_v45 = vld [vmem:[%s11089_s8 + $0x8c] sm:$0x1] }
 0x126   : > { %v891_v47 = vpop.f32.mrf.mxu2 }
 0x127   : > { %v1124_v49 = vpop.f32.mrf.mxu3  ;;  %v2140_v60 = vsel %vm11113_vm2, %v2135_v30, %v2139_v31  ;;  %v2319_v30 = vunpack.c.l.b16 %v2130_v43 }
 0x128   : > { %v11738_v61 = vadd.f32 %v1124_v49, %v891_v47  ;;  %v2422_v63 = vpop.f32.mrf.mxu0  ;;  %v11749_v47 = vld [vmem:[%s11089_s8 + $0x88] sm:$0xf] }
 0x129   : > { %v2151_v56 = vshll.u32 %v11749_v47, 16 }
 0x12a   : > { %14708 = vst [vmem:[#allocation3_spill] sm:$0xff] %v11738_v61  ;;  %v2847_v8 = vpop.f32.mrf.mxu1 }
 0x12b   : > { %1466 = vmatmul.bf16.gmra.mxu2 %v1346_v50  ;;  %2461 = vmatmul.bf16.gmra.mxu0 %v2341_v52  ;;  %v1244_v50 = vsel %vm11415_vm5, %v9514_v41, %v1243_v48  ;;  %v1247_v52 = vsel %vm11415_vm5, %v1245_v54, %v1246_v15  ;;  %v2155_v48 = vshrl.u32 %v11749_v47, 16  ;;  %v10779_v15 = vld [vmem:[%s14697_s3 + $0x78] sm:$0xff] }
 0x12c   : > { %1780 = vmatmul.bf16.gmra.mxu3 %v10676_v4  ;;  %v2142_v4 = vshrl.u32 %v9711_v36, 16  ;;  %v1324_v17 = vunpack.c.l.b16 %v1244_v50  ;;  %v1325_v19 = vunpack.c.l.b16 %v1247_v52  ;;  %5612 = vmatpush.bf16.msra.mxu1 %v10779_v15  ;;  %v10742_v50 = vld [vmem:[%s14695_s1 + $0x210] sm:$0xff]  ;;  %v2161_v15 = vshll.u32 %v9713_v45, 16 }
 0x12d   : > { %2886 = vmatmul.bf16.gmra.mxu1 %v2766_v18  ;;  %v2145_v18 = vshll.u32 %v9711_v36, 16  ;;  %v2320_v36 = vunpack.c.l.b16 %v2140_v60  ;;  %4263 = vmatpush.bf16.msra.mxu0 %v10742_v50 }
 0x12e   : > { %v1427_v49 = vpop.f32.mrf.mxu2  ;;  %v2144_v37 = vrot.slane %v2142_v4, 4 }
 0x12f   : > { %v1507_v58 = vadd.f32 %v1427_v49, %v11442_v26  ;;  %v1741_v46 = vpop.f32.mrf.mxu3  ;;  %v2664_v26 = vsel %vm11415_vm5, %v9786_v16, %v2663_v7  ;;  %v2147_v35 = vrot.slane %v2145_v18, 5  ;;  %v2745_v7 = vunpack.c.l.b16 %v2667_v44 }
 0x130   : > { %v2424_v6 = vpop.f32.mrf.mxu0  ;;  %v2744_v49 = vunpack.c.l.b16 %v2664_v26  ;;  %v2153_v16 = vrot.slane %v2151_v56, 5  ;;  %v1347_v18 = vpack.c.b16 %v1325_v19, %v1324_v17  ;;  %v2342_v60 = vpack.c.b16 %v2320_v36, %v2319_v30  ;;  %v1137_v56 = vld [vmem:[%s11089_s8 + $0x78] sm:$0xe]  ;;  %v9771_v19 = vld [vmem:[%s11089_s8 + $0x84] sm:$0xe] }
 0x131   : > { %v1821_v41 = vadd.f32 %v1741_v46, %v1507_v58  ;;  %v2157_v58 = vrot.slane %v2155_v48, 4  ;;  %v11001_v46 = vld [vmem:[%s11089_s8 + $0x7c] sm:$0xf]  ;;  %v9515_v61 = vrot.slane %v1137_v56, 9 }
 0x132   : > { %v2849_v54 = vpop.f32.mrf.mxu1  ;;  %v10677_v48 = vld [vmem:[%s11089_s8 + $0x78] sm:$0xff]  ;;  %v2767_v26 = vpack.c.b16 %v2745_v7, %v2744_v49  ;;  %v9714_v49 = vld [vmem:[%s11089_s8 + $0x90] sm:$0xf] }
 0x133   : > { %v2502_v31 = vadd.f32 %v2422_v63, %v1821_v41  ;;  %v1250_v63 = vrot.slane %v11001_v46, 5  ;;  %v2148_v41 = vor.u32 %v2147_v35, %v2144_v37  ;;  %v2158_v44 = vor.u32 %v2157_v58, %v2153_v16 }
 0x134   : > { %v2670_v46 = vrot.slane %v11749_v47, 5  ;;  %v2163_v35 = vrot.slane %v2161_v15, 5  ;;  %v9787_v58 = vrot.slane %v9771_v19, 9  ;;  %v2673_v47 = vrot.slane %v9713_v45, 5 }
 0x135   : > { %v11772_v9 = vadd.f32 %v2847_v8, %v2502_v31  ;;  %v2149_v36 = vrot.slane %v2148_v41, 4  ;;  %v2159_v37 = vrot.slane %v2158_v44, 4  ;;  %v1251_v56 = vsel %vm11415_vm5, %v9515_v61, %v1250_v63 }
 0x136   : > { %v1429_v52 = vpop.f32.mrf.mxu2  ;;  %v2672_v50 = vrot.slane %v2670_v46, 4 }
 0x137   : > { %14709 = vst [vmem:[#allocation4_spill] sm:$0xff] %v11772_v9  ;;  %v1508_v43 = vadd.f32 %v1429_v52, %v11472_v62  ;;  %v1743_v4 = vpop.f32.mrf.mxu3  ;;  %v1252_v62 = vrot.slane %v1250_v63, 4  ;;  %v11002_v52 = vld [vmem:[%s11089_s8 + $0x80] sm:$0x1]  ;;  %v2154_v41 = vsel %vm11113_vm2, %v2149_v36, %v2153_v16  ;;  %v2164_v45 = vsel %vm11113_vm2, %v2159_v37, %v2163_v35 }
 0x138   : > { %v2427_v8 = vpop.f32.mrf.mxu0  ;;  %v1253_v17 = vrot.slane %v11002_v52, 5  ;;  %v2674_v16 = vsel %vm11415_vm5, %v2672_v50, %v2673_v47  ;;  %v2321_v52 = vunpack.c.l.b16 %v2154_v41  ;;  %v2322_v19 = vunpack.c.l.b16 %v2164_v45  ;;  %v1138_v41 = vld [vmem:[%s11089_s8 + $0x84] sm:$0xe] }
 0x139   : > { %v1822_v31 = vadd.f32 %v1743_v4, %v1508_v43  ;;  %v11789_v43 = vld [vmem:[%s11089_s8 + $0x94] sm:$0xf]  ;;  %v2747_v35 = vunpack.c.l.b16 %v2674_v16  ;;  %v10678_v45 = vld [vmem:[%s11089_s8 + $0x84] sm:$0xff] }
 0x13a   : > { %v2852_v9 = vpop.f32.mrf.mxu1  ;;  %v2175_v44 = vshll.u32 %v11789_v43, 16  ;;  %v2179_v15 = vshrl.u32 %v11789_v43, 16  ;;  %v2677_v16 = vrot.slane %v11789_v43, 5 }
 0x13b   : > { %1471 = vmatmul.bf16.gmra.mxu2 %v1347_v18  ;;  %2466 = vmatmul.bf16.gmra.mxu0 %v2342_v60  ;;  %v2503_v30 = vadd.f32 %v2424_v6, %v1822_v31  ;;  %v1254_v6 = vsel %vm11415_vm5, %v1252_v62, %v1253_v17  ;;  %v1326_v31 = vunpack.c.l.b16 %v1251_v56 }
 0x13c   : > { %1785 = vmatmul.bf16.gmra.mxu3 %v10677_v48  ;;  %v2169_v48 = vshll.u32 %v9714_v49, 16  ;;  %v1327_v62 = vunpack.c.l.b16 %v1254_v6  ;;  %v2343_v6 = vpack.c.b16 %v2322_v19, %v2321_v52 }
 0x13d   : > { %2891 = vmatmul.bf16.gmra.mxu1 %v2767_v26  ;;  %v11786_v7 = vadd.f32 %v2849_v54, %v2503_v30  ;;  %v2166_v54 = vshrl.u32 %v9714_v49, 16  ;;  %v11806_v49 = vrot.slane %v2175_v44, 5 }
 0x13e   : > { %v1432_v4 = vpop.f32.mrf.mxu2  ;;  %v2171_v36 = vrot.slane %v2169_v48, 5  ;;  %v1348_v56 = vpack.c.b16 %v1327_v62, %v1326_v31  ;;  %v9772_v31 = vld [vmem:[%s11089_s8 + $0x90] sm:$0xe] }
 0x13f   : > { %v1509_v18 = vadd.f32 %v1432_v4, %v11484_v34  ;;  %v1746_v60 = vpop.f32.mrf.mxu3  ;;  %v2671_v34 = vsel %vm11415_vm5, %v9787_v58, %v2670_v46  ;;  %v2168_v30 = vrot.slane %v2166_v54, 4  ;;  %v2181_v4 = vrot.slane %v2179_v15, 4  ;;  %v9716_v46 = vld [vmem:[%s11089_s8 + $0x98] sm:$0x1] }
 0x140   : > { %v2429_v26 = vpop.f32.mrf.mxu0  ;;  %v2746_v37 = vunpack.c.l.b16 %v2671_v34 }
 0x141   : > { %v1823_v61 = vadd.f32 %v1746_v60, %v1509_v18  ;;  %v11003_v60 = vld [vmem:[%s11089_s8 + $0x88] sm:$0xf]  ;;  %v2172_v54 = vor.u32 %v2171_v36, %v2168_v30  ;;  %v2182_v15 = vor.u32 %v2181_v4, %v11806_v49  ;;  %v9717_v36 = vld [vmem:[%s11089_s8 + $0x9c] sm:$0xf]  ;;  %v2679_v4 = vrot.slane %v2677_v16, 4 }
 0x142   : > { %v2854_v63 = vpop.f32.mrf.mxu1  ;;  %v1257_v50 = vrot.slane %v11003_v60, 5  ;;  %v2768_v44 = vpack.c.b16 %v2747_v35, %v2746_v37  ;;  %v10725_v37 = vld [vmem:[%s14695_s1 + $0x188] sm:$0xff]  ;;  %v9788_v35 = vrot.slane %v9772_v31, 9 }
 0x143   : > { %v2504_v17 = vadd.f32 %v2427_v8, %v1823_v61  ;;  %v2173_v52 = vrot.slane %v2172_v54, 4  ;;  %v2183_v19 = vrot.slane %v2182_v15, 4  ;;  %3158 = vmatpush.bf16.msra.mxu2 %v10725_v37 }
 0x145   : > { %v11808_v18 = vadd.f32 %v2852_v9, %v2504_v17  ;;  %v2185_v9 = vshll.u32 %v9716_v46, 16  ;;  %v9516_v17 = vrot.slane %v1138_v41, 9 }
 0x146   : > { %v1434_v58 = vpop.f32.mrf.mxu2 }
 0x147   : > { %v1510_v47 = vadd.f32 %v1434_v58, %v11508_v3  ;;  %v1748_v8 = vpop.f32.mrf.mxu3  ;;  %v1259_v3 = vrot.slane %v1257_v50, 4  ;;  %v11004_v58 = vld [vmem:[%s11089_s8 + $0x8c] sm:$0x1]  ;;  %v2187_v30 = vrot.slane %v2185_v9, 5 }
 0x148   : > { %v2432_v48 = vpop.f32.mrf.mxu0  ;;  %v1260_v60 = vrot.slane %v11004_v58, 5  ;;  %v10778_v58 = vld [vmem:[%s14697_s3 + $0x70] sm:$0xff] }
 0x149   : > { %v1824_v61 = vadd.f32 %v1748_v8, %v1510_v47  ;;  %v2680_v47 = vrot.slane %v9716_v46, 5  ;;  %v11826_v8 = vld [vmem:[%s11089_s8 + $0xa0] sm:$0xf]  ;;  %v2178_v46 = vsel %vm11113_vm2, %v2173_v52, %v11806_v49  ;;  %v2188_v9 = vsel %vm11113_vm2, %v2183_v19, %v2187_v30  ;;  %5613 = vmatpush.bf16.msra.mxu1 %v10778_v58 }
 0x14a   : > { %v2857_v34 = vpop.f32.mrf.mxu1  ;;  %v1261_v41 = vsel %vm11415_vm5, %v1259_v3, %v1260_v60  ;;  %v2324_v19 = vunpack.c.l.b16 %v2188_v9 }
 0x14b   : > { %1476 = vmatmul.bf16.gmra.mxu2 %v1348_v56  ;;  %2471 = vmatmul.bf16.gmra.mxu0 %v2343_v6  ;;  %v2505_v62 = vadd.f32 %v2429_v26, %v1824_v61  ;;  %v10733_v26 = vld [vmem:[%s14695_s1 + $0x1c8] sm:$0xff]  ;;  %v1258_v6 = vsel %vm11415_vm5, %v9516_v17, %v1257_v50  ;;  %v2199_v50 = vshll.u32 %v11826_v8, 16  ;;  %v2203_v61 = vshrl.u32 %v11826_v8, 16 }
 0x14c   : > { %1790 = vmatmul.bf16.gmra.mxu3 %v10678_v45  ;;  %v2190_v45 = vshrl.u32 %v9717_v36, 16  ;;  %v2681_v49 = vsel %vm11415_vm5, %v2679_v4, %v2680_v47  ;;  %v1328_v60 = vunpack.c.l.b16 %v1258_v6  ;;  %v1329_v31 = vunpack.c.l.b16 %v1261_v41  ;;  %v9719_v47 = vld [vmem:[%s11089_s8 + $0xa4] sm:$0x1]  ;;  %v11005_v41 = vld [vmem:[%s11089_s8 + $0x94] sm:$0xf] }
 0x14d   : > { %2896 = vmatmul.bf16.gmra.mxu1 %v2768_v44  ;;  %v11823_v43 = vadd.f32 %v2854_v63, %v2505_v62  ;;  %v2193_v44 = vshll.u32 %v9717_v36, 16  ;;  %3839 = vmatpush.bf16.msra.mxu3 %v10733_v26  ;;  %v2323_v62 = vunpack.c.l.b16 %v2178_v46  ;;  %v2205_v26 = vrot.slane %v2203_v61, 4 }
 0x14e   : > { %v1437_v56 = vpop.f32.mrf.mxu2  ;;  %v2192_v30 = vrot.slane %v2190_v45, 4  ;;  %v1349_v46 = vpack.c.b16 %v1329_v31, %v1328_v60  ;;  %v9773_v31 = vld [vmem:[%s11089_s8 + $0x9c] sm:$0xe] }
 0x14f   : > { %v1511_v63 = vadd.f32 %v1437_v56, %v11517_v42  ;;  %v1751_v54 = vpop.f32.mrf.mxu3  ;;  %v2678_v42 = vsel %vm11415_vm5, %v9788_v35, %v2677_v16  ;;  %v2195_v36 = vrot.slane %v2193_v44, 5  ;;  %v2749_v16 = vunpack.c.l.b16 %v2681_v49  ;;  %v10741_v56 = vld [vmem:[%s14695_s1 + $0x208] sm:$0xff]  ;;  %v1139_v44 = vld [vmem:[%s11089_s8 + $0x90] sm:$0xe] }
 0x150   : > { %v2434_v15 = vpop.f32.mrf.mxu0  ;;  %v2748_v37 = vunpack.c.l.b16 %v2678_v42  ;;  %v2201_v35 = vrot.slane %v2199_v50, 5  ;;  %v2344_v45 = vpack.c.b16 %v2324_v19, %v2323_v62  ;;  %4264 = vmatpush.bf16.msra.mxu0 %v10741_v56  ;;  %v10679_v50 = vld [vmem:[%s11089_s8 + $0x90] sm:$0xff]  ;;  %v2209_v42 = vshll.u32 %v9719_v47, 16 }
 0x151   : > { %v1825_v17 = vadd.f32 %v1751_v54, %v1511_v63  ;;  %v2196_v9 = vor.u32 %v2195_v36, %v2192_v30 }
 0x152   : > { %v2859_v3 = vpop.f32.mrf.mxu1  ;;  %v2769_v61 = vpack.c.b16 %v2749_v16, %v2748_v37  ;;  %v2211_v36 = vrot.slane %v2209_v42, 5  ;;  %v9720_v37 = vld [vmem:[%s11089_s8 + $0xa8] sm:$0xf] }
 0x153   : > { %v2506_v52 = vadd.f32 %v2432_v48, %v1825_v17  ;;  %v1264_v48 = vrot.slane %v11005_v41, 5  ;;  %v2206_v17 = vor.u32 %v2205_v26, %v2201_v35  ;;  %v9517_v41 = vrot.slane %v1139_v44, 9 }
 0x154   : > { %v2197_v19 = vrot.slane %v2196_v9, 4  ;;  %v9789_v26 = vrot.slane %v9773_v31, 9 }
 0x155   : > { %v11850_v4 = vadd.f32 %v2857_v34, %v2506_v52  ;;  %v2684_v52 = vrot.slane %v11826_v8, 5  ;;  %v2207_v30 = vrot.slane %v2206_v17, 4  ;;  %v2687_v8 = vrot.slane %v9719_v47, 5 }
 0x156   : > { %v1439_v6 = vpop.f32.mrf.mxu2  ;;  %v1265_v44 = vsel %vm11415_vm5, %v9517_v41, %v1264_v48  ;;  %v2202_v9 = vsel %vm11113_vm2, %v2197_v19, %v2201_v35 }
 0x157   : > { %v1512_v63 = vadd.f32 %v1439_v6, %v11547_v12  ;;  %v1753_v54 = vpop.f32.mrf.mxu3  ;;  %v1266_v12 = vrot.slane %v1264_v48, 4  ;;  %v11006_v6 = vld [vmem:[%s11089_s8 + $0x98] sm:$0x1]  ;;  %v2686_v56 = vrot.slane %v2684_v52, 4  ;;  %v2212_v47 = vsel %vm11113_vm2, %v2207_v30, %v2211_v36 }
 0x158   : > { %v2437_v34 = vpop.f32.mrf.mxu0  ;;  %v1267_v60 = vrot.slane %v11006_v6, 5  ;;  %v1330_v41 = vunpack.c.l.b16 %v1265_v44  ;;  %v2325_v6 = vunpack.c.l.b16 %v2202_v9  ;;  %v2326_v31 = vunpack.c.l.b16 %v2212_v47  ;;  %v1140_v9 = vld [vmem:[%s11089_s8 + $0x9c] sm:$0xe] }
 0x159   : > { %v1826_v49 = vadd.f32 %v1753_v54, %v1512_v63  ;;  %v11867_v63 = vld [vmem:[%s11089_s8 + $0xac] sm:$0xf]  ;;  %v2688_v35 = vsel %vm11415_vm5, %v2686_v56, %v2687_v8  ;;  %v10680_v47 = vld [vmem:[%s11089_s8 + $0x9c] sm:$0xff] }
 0x15a   : > { %v2862_v58 = vpop.f32.mrf.mxu1  ;;  %v2223_v17 = vshll.u32 %v11867_v63, 16  ;;  %v2227_v42 = vshrl.u32 %v11867_v63, 16  ;;  %v2751_v36 = vunpack.c.l.b16 %v2688_v35  ;;  %v2691_v35 = vrot.slane %v11867_v63, 5 }
 0x15b   : > { %1481 = vmatmul.bf16.gmra.mxu2 %v1349_v46  ;;  %2476 = vmatmul.bf16.gmra.mxu0 %v2344_v45  ;;  %v2507_v62 = vadd.f32 %v2434_v15, %v1826_v49  ;;  %v1268_v15 = vsel %vm11415_vm5, %v1266_v12, %v1267_v60 }
 0x15c   : > { %1795 = vmatmul.bf16.gmra.mxu3 %v10679_v50  ;;  %v2217_v50 = vshll.u32 %v9720_v37, 16  ;;  %v1331_v12 = vunpack.c.l.b16 %v1268_v15  ;;  %v2345_v15 = vpack.c.b16 %v2326_v31, %v2325_v6 }
 0x15d   : > { %2901 = vmatmul.bf16.gmra.mxu1 %v2769_v61  ;;  %v11864_v16 = vadd.f32 %v2859_v3, %v2507_v62  ;;  %v2214_v3 = vshrl.u32 %v9720_v37, 16  ;;  %v11884_v37 = vrot.slane %v2223_v17, 5 }
 0x15e   : > { %v1442_v54 = vpop.f32.mrf.mxu2  ;;  %v2219_v19 = vrot.slane %v2217_v50, 5  ;;  %v1350_v44 = vpack.c.b16 %v1331_v12, %v1330_v41  ;;  %v9774_v41 = vld [vmem:[%s11089_s8 + $0xa8] sm:$0xe] }
 0x15f   : > { %v1513_v46 = vadd.f32 %v1442_v54, %v11559_v51  ;;  %v1756_v45 = vpop.f32.mrf.mxu3  ;;  %v2685_v51 = vsel %vm11415_vm5, %v9789_v26, %v2684_v52  ;;  %v2216_v62 = vrot.slane %v2214_v3, 4  ;;  %v2229_v54 = vrot.slane %v2227_v42, 4  ;;  %v9722_v52 = vld [vmem:[%s11089_s8 + $0xb0] sm:$0x1] }
 0x160   : > { %v2439_v61 = vpop.f32.mrf.mxu0  ;;  %v2750_v30 = vunpack.c.l.b16 %v2685_v51 }
 0x161   : > { %v1827_v48 = vadd.f32 %v1756_v45, %v1513_v46  ;;  %v11007_v45 = vld [vmem:[%s11089_s8 + $0xa0] sm:$0xf]  ;;  %v2220_v3 = vor.u32 %v2219_v19, %v2216_v62  ;;  %v2230_v42 = vor.u32 %v2229_v54, %v11884_v37  ;;  %v9723_v19 = vld [vmem:[%s11089_s8 + $0xb4] sm:$0xf]  ;;  %v2693_v54 = vrot.slane %v2691_v35, 4 }
 0x162   : > { %v2864_v49 = vpop.f32.mrf.mxu1  ;;  %v1271_v56 = vrot.slane %v11007_v45, 5  ;;  %v2770_v17 = vpack.c.b16 %v2751_v36, %v2750_v30  ;;  %v10724_v30 = vld [vmem:[%s14695_s1 + $0x180] sm:$0xff]  ;;  %v9790_v36 = vrot.slane %v9774_v41, 9 }
 0x163   : > { %v2508_v60 = vadd.f32 %v2437_v34, %v1827_v48  ;;  %v2221_v6 = vrot.slane %v2220_v3, 4  ;;  %v2231_v31 = vrot.slane %v2230_v42, 4  ;;  %3159 = vmatpush.bf16.msra.mxu2 %v10724_v30 }
 0x165   : > { %v11886_v46 = vadd.f32 %v2862_v58, %v2508_v60  ;;  %v2233_v58 = vshll.u32 %v9722_v52, 16  ;;  %v9518_v60 = vrot.slane %v1140_v9, 9 }
 0x166   : > { %v1444_v26 = vpop.f32.mrf.mxu2 }
 0x167   : > { %v1514_v8 = vadd.f32 %v1444_v26, %v11583_v24  ;;  %v1758_v34 = vpop.f32.mrf.mxu3  ;;  %v1273_v24 = vrot.slane %v1271_v56, 4  ;;  %v11008_v26 = vld [vmem:[%s11089_s8 + $0xa4] sm:$0x1]  ;;  %v2235_v62 = vrot.slane %v2233_v58, 5 }
 0x168   : > { %v2442_v50 = vpop.f32.mrf.mxu0  ;;  %v1274_v45 = vrot.slane %v11008_v26, 5  ;;  %v10777_v26 = vld [vmem:[%s14697_s3 + $0x68] sm:$0xff] }
 0x169   : > { %v1828_v48 = vadd.f32 %v1758_v34, %v1514_v8  ;;  %v2694_v8 = vrot.slane %v9722_v52, 5  ;;  %v11904_v34 = vld [vmem:[%s11089_s8 + $0xb8] sm:$0xf]  ;;  %v2226_v52 = vsel %vm11113_vm2, %v2221_v6, %v11884_v37  ;;  %v2236_v58 = vsel %vm11113_vm2, %v2231_v31, %v2235_v62  ;;  %5614 = vmatpush.bf16.msra.mxu1 %v10777_v26 }
 0x16a   : > { %v2867_v51 = vpop.f32.mrf.mxu1  ;;  %v1275_v9 = vsel %vm11415_vm5, %v1273_v24, %v1274_v45  ;;  %v2328_v31 = vunpack.c.l.b16 %v2236_v58 }
 0x16b   : > { %1486 = vmatmul.bf16.gmra.mxu2 %v1350_v44  ;;  %2481 = vmatmul.bf16.gmra.mxu0 %v2345_v15  ;;  %v2509_v12 = vadd.f32 %v2439_v61, %v1828_v48  ;;  %v10732_v61 = vld [vmem:[%s14695_s1 + $0x1c0] sm:$0xff]  ;;  %v1272_v15 = vsel %vm11415_vm5, %v9518_v60, %v1271_v56  ;;  %v2247_v56 = vshll.u32 %v11904_v34, 16  ;;  %v2251_v48 = vshrl.u32 %v11904_v34, 16 }
 0x16c   : > { %1800 = vmatmul.bf16.gmra.mxu3 %v10680_v47  ;;  %v2238_v47 = vshrl.u32 %v9723_v19, 16  ;;  %v2695_v37 = vsel %vm11415_vm5, %v2693_v54, %v2694_v8  ;;  %v1332_v45 = vunpack.c.l.b16 %v1272_v15  ;;  %v1333_v41 = vunpack.c.l.b16 %v1275_v9  ;;  %v9725_v8 = vld [vmem:[%s11089_s8 + $0xbc] sm:$0x1]  ;;  %v11009_v9 = vld [vmem:[%s11089_s8 + $0xac] sm:$0xf] }
 0x16d   : > { %2906 = vmatmul.bf16.gmra.mxu1 %v2770_v17  ;;  %v11901_v63 = vadd.f32 %v2864_v49, %v2509_v12  ;;  %v2241_v17 = vshll.u32 %v9723_v19, 16  ;;  %3840 = vmatpush.bf16.msra.mxu3 %v10732_v61  ;;  %v2327_v12 = vunpack.c.l.b16 %v2226_v52  ;;  %v2253_v61 = vrot.slane %v2251_v48, 4 }
 0x16e   : > { %v1447_v44 = vpop.f32.mrf.mxu2  ;;  %v2240_v62 = vrot.slane %v2238_v47, 4  ;;  %v1351_v52 = vpack.c.b16 %v1333_v41, %v1332_v45  ;;  %v9775_v41 = vld [vmem:[%s11089_s8 + $0xb4] sm:$0xe] }
 0x16f   : > { %v1515_v49 = vadd.f32 %v1447_v44, %v11592_v2  ;;  %v1761_v3 = vpop.f32.mrf.mxu3  ;;  %v2692_v2 = vsel %vm11415_vm5, %v9790_v36, %v2691_v35  ;;  %v2243_v19 = vrot.slane %v2241_v17, 5  ;;  %v2753_v35 = vunpack.c.l.b16 %v2695_v37  ;;  %v10740_v44 = vld [vmem:[%s14695_s1 + $0x200] sm:$0xff]  ;;  %v1141_v17 = vld [vmem:[%s11089_s8 + $0xa8] sm:$0xe] }
 0x170   : > { %v2444_v42 = vpop.f32.mrf.mxu0  ;;  %v2752_v30 = vunpack.c.l.b16 %v2692_v2  ;;  %v2249_v36 = vrot.slane %v2247_v56, 5  ;;  %v2346_v47 = vpack.c.b16 %v2328_v31, %v2327_v12  ;;  %4265 = vmatpush.bf16.msra.mxu0 %v10740_v44  ;;  %v10681_v56 = vld [vmem:[%s11089_s8 + $0xa8] sm:$0xff]  ;;  %v2257_v2 = vshll.u32 %v9725_v8, 16 }
 0x171   : > { %v1829_v60 = vadd.f32 %v1761_v3, %v1515_v49  ;;  %v2244_v58 = vor.u32 %v2243_v19, %v2240_v62  ;;  %v2701_v44 = vrot.slane %v9725_v8, 5 }
 0x172   : > { %v11921_v24 = vpop.f32.mrf.mxu1  ;;  %v2771_v48 = vpack.c.b16 %v2753_v35, %v2752_v30  ;;  %v2259_v19 = vrot.slane %v2257_v2, 5  ;;  %v9726_v30 = vld [vmem:[%s11089_s8 + $0xc0] sm:$0xf]  ;;  %v9791_v35 = vrot.slane %v9775_v41, 9 }
 0x173   : > { %v2510_v6 = vadd.f32 %v2442_v50, %v1829_v60  ;;  %v1278_v50 = vrot.slane %v11009_v9, 5  ;;  %v2254_v60 = vor.u32 %v2253_v61, %v2249_v36  ;;  %v9519_v9 = vrot.slane %v1141_v17, 9 }
 0x174   : > { %v2245_v31 = vrot.slane %v2244_v58, 4  ;;  %v2262_v58 = vshrl.u32 %v9726_v30, 16 }
 0x175   : > { %v11930_v54 = vadd.f32 %v2867_v51, %v2510_v6  ;;  %v2698_v6 = vrot.slane %v11904_v34, 5  ;;  %v2255_v62 = vrot.slane %v2254_v60, 4  ;;  %v11947_v34 = vld [vmem:[%s11089_s8 + $0xc4] sm:$0xf] }
 0x176   : > { %v1449_v15 = vpop.f32.mrf.mxu2  ;;  %v2250_v17 = vsel %vm11113_vm2, %v2245_v31, %v2249_v36  ;;  %v2271_v60 = vshll.u32 %v11947_v34, 16  ;;  %v2275_v2 = vshrl.u32 %v11947_v34, 16  ;;  %v2264_v31 = vrot.slane %v2262_v58, 4 }
 0x177   : > { %14710 = vst [vmem:[#allocation5_spill] sm:$0xff] %v11930_v54  ;;  %v1516_v49 = vadd.f32 %v1449_v15, %v11622_v10  ;;  %v1763_v3 = vpop.f32.mrf.mxu3  ;;  %v1280_v10 = vrot.slane %v1278_v50, 4  ;;  %v11010_v15 = vld [vmem:[%s11089_s8 + $0xb0] sm:$0x1]  ;;  %v2700_v61 = vrot.slane %v2698_v6, 4  ;;  %v2260_v8 = vsel %vm11113_vm2, %v2255_v62, %v2259_v19 }
 0x178   : > { %v2447_v51 = vpop.f32.mrf.mxu0  ;;  %v1281_v45 = vrot.slane %v11010_v15, 5  ;;  %v2329_v15 = vunpack.c.l.b16 %v2250_v17  ;;  %v2330_v41 = vunpack.c.l.b16 %v2260_v8  ;;  %v10682_v8 = vld [vmem:[%s11089_s8 + $0xb4] sm:$0xff] }
 0x179   : > { %v1830_v37 = vadd.f32 %v1763_v3, %v1516_v49  ;;  %v1279_v3 = vsel %vm11415_vm5, %v9519_v9, %v1278_v50  ;;  %v2702_v36 = vsel %vm11415_vm5, %v2700_v61, %v2701_v44 }
 0x17a   : > { %v2872_v26 = vpop.f32.mrf.mxu1  ;;  %v1334_v9 = vunpack.c.l.b16 %v1279_v3  ;;  %v2347_v3 = vpack.c.b16 %v2330_v41, %v2329_v15 }
 0x17b   : > { %1491 = vmatmul.bf16.gmra.mxu2 %v1351_v52  ;;  %2486 = vmatmul.bf16.gmra.mxu0 %v2346_v47  ;;  %v11943_v12 = vadd.f32 %v2444_v42, %v1830_v37  ;;  %v1282_v52 = vsel %vm11415_vm5, %v1280_v10, %v1281_v45 }
 0x17c   : > { %1805 = vmatmul.bf16.gmra.mxu3 %v10681_v56  ;;  %v2265_v56 = vshll.u32 %v9726_v30, 16  ;;  %v1335_v10 = vunpack.c.l.b16 %v1282_v52  ;;  %v2755_v30 = vunpack.c.l.b16 %v2702_v36  ;;  %v11011_v52 = vld [vmem:[%s11089_s8 + $0xb8] sm:$0xf]  ;;  %v2705_v36 = vrot.slane %v11947_v34, 5  ;;  %v11980_v34 = vld [vmem:[%s11089_s8 + $0x1c] sm:$0xf] }
 0x17d   : > { %2911 = vmatmul.bf16.gmra.mxu1 %v2771_v48  ;;  %v1285_v17 = vrot.slane %v11011_v52, 5 }
 0x17e   : > { %v1452_v49 = vpop.f32.mrf.mxu2  ;;  %v2267_v62 = vrot.slane %v2265_v56, 5  ;;  %v1352_v54 = vpack.c.b16 %v1335_v10, %v1334_v9 }
 0x17f   : > { %v1517_v42 = vadd.f32 %v1452_v49, %v11634_v20  ;;  %v1766_v47 = vpop.f32.mrf.mxu3  ;;  %v2699_v20 = vsel %vm11415_vm5, %v9791_v35, %v2698_v6  ;;  %v2273_v49 = vrot.slane %v2271_v60, 5  ;;  %v9728_v6 = vld [vmem:[%s11089_s8 + $0xc8] sm:$0x1]  ;;  %v1287_v15 = vrot.slane %v1285_v17, 4 }
 0x180   : > { %v2449_v48 = vpop.f32.mrf.mxu0  ;;  %v2754_v19 = vunpack.c.l.b16 %v2699_v20  ;;  %v2268_v58 = vor.u32 %v2267_v62, %v2264_v31 }
 0x181   : > { %v1831_v50 = vadd.f32 %v1766_v47, %v1517_v42  ;;  %v2277_v42 = vrot.slane %v2275_v2, 4  ;;  %v2281_v2 = vshll.u32 %v9728_v6, 16 }
 0x182   : > { %v11960_v37 = vpop.f32.mrf.mxu1  ;;  %v2269_v31 = vrot.slane %v2268_v58, 4 }
 0x183   : > { %v2512_v45 = vadd.f32 %v2447_v51, %v1831_v50  ;;  %v1142_v51 = vld [vmem:[%s11089_s8 + $0xb4] sm:$0xe]  ;;  %v2772_v50 = vpack.c.b16 %v2755_v30, %v2754_v19  ;;  %v2278_v60 = vor.u32 %v2277_v42, %v2273_v49  ;;  %v2283_v19 = vrot.slane %v2281_v2, 5  ;;  %v9953_v30 = vld [vmem:[%s11089_s8 + $0x18] sm:$0xf] }
 0x184   : > { %v9520_v9 = vrot.slane %v1142_v51, 9  ;;  %v2274_v52 = vsel %vm11113_vm2, %v2269_v31, %v2273_v49  ;;  %v10776_v49 = vld [vmem:[%s14697_s3 + $0x60] sm:$0xff] }
 0x185   : > { %v11966_v47 = vadd.f32 %v2872_v26, %v2512_v45  ;;  %v11012_v45 = vld [vmem:[%s11089_s8 + $0xbc] sm:$0x1]  ;;  %v2279_v62 = vrot.slane %v2278_v60, 4  ;;  %v3331_v60 = vshll.u32 %v11980_v34, 16  ;;  %5615 = vmatpush.bf16.msra.mxu1 %v10776_v49 }
 0x186   : > { %v1454_v35 = vpop.f32.mrf.mxu2  ;;  %v1288_v41 = vrot.slane %v11012_v45, 5 }
 0x187   : > { %v1518_v61 = vadd.f32 %v1454_v35, %v11658_v5  ;;  %v1768_v44 = vpop.f32.mrf.mxu3  ;;  %v9776_v5 = vld [vmem:[%s11089_s8 + $0xc0] sm:$0xe]  ;;  %v2707_v35 = vrot.slane %v2705_v36, 4 }
 0x188   : > { %v2452_v56 = vpop.f32.mrf.mxu0  ;;  %v9792_v42 = vrot.slane %v9776_v5, 9  ;;  %v1289_v51 = vsel %vm11415_vm5, %v1287_v15, %v1288_v41  ;;  %v2331_v41 = vunpack.c.l.b16 %v2274_v52 }
 0x189   : > { %v1832_v26 = vadd.f32 %v1768_v44, %v1518_v61  ;;  %v2708_v61 = vrot.slane %v9728_v6, 5  ;;  %v3322_v6 = vshrl.u32 %v9953_v30, 16  ;;  %v1337_v45 = vunpack.c.l.b16 %v1289_v51 }
 0x18a   : > { %v2877_v20 = vpop.f32.mrf.mxu1 }
 0x18b   : > { %1496 = vmatmul.bf16.gmra.mxu2 %v1352_v54  ;;  %2491 = vmatmul.bf16.gmra.mxu0 %v2347_v3  ;;  %v11975_v10 = vadd.f32 %v2449_v48, %v1832_v26  ;;  %v1286_v48 = vsel %vm11415_vm5, %v9520_v9, %v1285_v17  ;;  %v2706_v17 = vsel %vm11415_vm5, %v9792_v42, %v2705_v36  ;;  %v3335_v9 = vshrl.u32 %v11980_v34, 16 }
 0x18c   : > { %1810 = vmatmul.bf16.gmra.mxu3 %v10682_v8  ;;  %v2284_v8 = vsel %vm11113_vm2, %v2279_v62, %v2283_v19  ;;  %v2709_v26 = vsel %vm11415_vm5, %v2707_v35, %v2708_v61  ;;  %v1336_v5 = vunpack.c.l.b16 %v1286_v48  ;;  %v2756_v62 = vunpack.c.l.b16 %v2706_v17  ;;  %v10033_v17 = vld [vmem:[%s11089_s8 + $0x18] sm:$0xe] }
 0x18d   : > { %2916 = vmatmul.bf16.gmra.mxu1 %v2772_v50  ;;  %v3325_v50 = vshll.u32 %v9953_v30, 16  ;;  %v2332_v31 = vunpack.c.l.b16 %v2284_v8  ;;  %v2757_v19 = vunpack.c.l.b16 %v2709_v26  ;;  %v3324_v36 = vrot.slane %v3322_v6, 4  ;;  %v10683_v8 = vld [vmem:[%s11089_s8 + $0xc0] sm:$0xff] }
 0x18e   : > { %v1457_v44 = vpop.f32.mrf.mxu2  ;;  %v3333_v35 = vrot.slane %v3331_v60, 5  ;;  %v3337_v61 = vrot.slane %v3335_v9, 4  ;;  %v4020_v6 = vrot.slane %v11980_v34, 5  ;;  %v9957_v34 = vld [vmem:[%s11089_s8 + $0x28] sm:$0xf] }
 0x18f   : > { %v1519_v54 = vadd.f32 %v1457_v44, %v11667_v23  ;;  %v1771_v3 = vpop.f32.mrf.mxu3  ;;  %v3327_v30 = vrot.slane %v3325_v50, 5  ;;  %v2348_v51 = vpack.c.b16 %v2332_v31, %v2331_v41  ;;  %v9956_v41 = vld [vmem:[%s11089_s8 + $0x24] sm:$0xf] }
 0x190   : > { %v2454_v58 = vpop.f32.mrf.mxu0  ;;  %v3338_v60 = vor.u32 %v3337_v61, %v3333_v35 }
 0x191   : > { %v1833_v2 = vadd.f32 %v1771_v3, %v1519_v54  ;;  %v9955_v54 = vld [vmem:[%s11089_s8 + $0x20] sm:$0x1]  ;;  %v3328_v49 = vor.u32 %v3327_v30, %v3324_v36 }
 0x192   : > { %v11992_v23 = vpop.f32.mrf.mxu1  ;;  %v3341_v26 = vshll.u32 %v9955_v54, 16  ;;  %v3339_v31 = vrot.slane %v3338_v60, 4 }
 0x193   : > { %v2514_v15 = vadd.f32 %v2452_v56, %v1833_v2  ;;  %v1353_v56 = vpack.c.b16 %v1337_v45, %v1336_v5  ;;  %v2773_v2 = vpack.c.b16 %v2757_v19, %v2756_v62  ;;  %v3329_v5 = vrot.slane %v3328_v49, 4 }
 0x194   : > { %v4023_v45 = vrot.slane %v9955_v54, 5  ;;  %v3343_v62 = vrot.slane %v3341_v26, 5 }
 0x195   : > { %v12002_v42 = vadd.f32 %v2877_v20, %v2514_v15  ;;  %v4022_v15 = vrot.slane %v4020_v6, 4 }
 0x196   : > { %v1459_v44 = vpop.f32.mrf.mxu2 }
 0x197   : > { %v1520_v3 = vadd.f32 %v1459_v44, %v11697_v33  ;;  %v1773_v48 = vpop.f32.mrf.mxu3  ;;  %v10049_v33 = vrot.slane %v10033_v17, 9  ;;  %v3346_v44 = vshrl.u32 %v9956_v41, 16  ;;  %v4024_v54 = vsel %vm11415_vm5, %v4022_v15, %v4023_v45 }
 0x198   : > { %v2457_v52 = vpop.f32.mrf.mxu0 }
 0x199   : > { %v1834_v50 = vadd.f32 %v1773_v48, %v1520_v3  ;;  %v4021_v61 = vsel %vm11415_vm5, %v10049_v33, %v4020_v6  ;;  %v3334_v48 = vsel %vm11113_vm2, %v3329_v5, %v3333_v35  ;;  %v4147_v6 = vunpack.c.l.b16 %v4024_v54 }
 0x19a   : > { %v2882_v20 = vpop.f32.mrf.mxu1  ;;  %v4146_v49 = vunpack.c.l.b16 %v4021_v61  ;;  %v3721_v26 = vunpack.c.l.b16 %v3334_v48  ;;  %v4027_v54 = vrot.slane %v9957_v34, 5 }
 0x19b   : > { %1501 = vmatmul.bf16.gmra.mxu2 %v1353_v56  ;;  %2496 = vmatmul.bf16.gmra.mxu0 %v2348_v51  ;;  %v12009_v9 = vadd.f32 %v2454_v58, %v1834_v50  ;;  %v3349_v58 = vshll.u32 %v9956_v41, 16  ;;  %v3344_v51 = vsel %vm11113_vm2, %v3339_v31, %v3343_v62  ;;  %v3348_v50 = vrot.slane %v3346_v44, 4  ;;  %v9958_v41 = vld [vmem:[%s11089_s8 + $0x2c] sm:$0x1] }
 0x19c   : > { %1815 = vmatmul.bf16.gmra.mxu3 %v10683_v8  ;;  %v3722_v35 = vunpack.c.l.b16 %v3344_v51  ;;  %v3365_v48 = vshll.u32 %v9958_v41, 16 }
 0x19d   : > { %2921 = vmatmul.bf16.gmra.mxu1 %v2773_v2  ;;  %v3359_v2 = vshrl.u32 %v9957_v34, 16  ;;  %v3351_v60 = vrot.slane %v3349_v58, 5 }
 0x19e   : > { %v1462_v19 = vpop.f32.mrf.mxu2 }
 0x19f   : > { %v1521_v36 = vadd.f32 %v1462_v19, %v11709_v28  ;;  %v1776_v30 = vpop.f32.mrf.mxu3  ;;  %v3355_v28 = vshll.u32 %v9957_v34, 16  ;;  %v3361_v15 = vrot.slane %v3359_v2, 4  ;;  %v10708_v19 = vld [vmem:[%s11089_s8 + $0x18] sm:$0xff]  ;;  %v4029_v2 = vrot.slane %v4027_v54, 4 }
 0x1a0   : > { %v2459_v3 = vpop.f32.mrf.mxu0 }
 0x1a1   : > { %v1835_v56 = vadd.f32 %v1776_v30, %v1521_v36  ;;  %v3357_v5 = vrot.slane %v3355_v28, 5  ;;  %v4178_v36 = vpack.c.b16 %v4147_v6, %v4146_v49  ;;  %v3352_v30 = vor.u32 %v3351_v60, %v3348_v50  ;;  %v9959_v50 = vld [vmem:[%s11089_s8 + $0x30] sm:$0xf]  ;;  %v9960_v60 = vld [vmem:[%s11089_s8 + $0x34] sm:$0xf] }
 0x1a2   : > { %v12022_v8 = vpop.f32.mrf.mxu1  ;;  %v4030_v49 = vrot.slane %v9958_v41, 5  ;;  %v3367_v6 = vrot.slane %v3365_v48, 5  ;;  %v3373_v41 = vshll.u32 %v9959_v50, 16 }
 0x1a3   : > { %v2516_v17 = vadd.f32 %v2457_v52, %v1835_v56  ;;  %v3753_v52 = vpack.c.b16 %v3722_v35, %v3721_v26  ;;  %v10034_v56 = vld [vmem:[%s11089_s8 + $0x24] sm:$0xe]  ;;  %v3353_v28 = vrot.slane %v3352_v30, 4 }
 0x1a5   : > { %v12024_v33 = vadd.f32 %v2882_v20, %v2516_v17  ;;  %v3362_v20 = vor.u32 %v3361_v15, %v3357_v5  ;;  %v3358_v15 = vsel %vm11113_vm2, %v3353_v28, %v3357_v5  ;;  %v10775_v5 = vld [vmem:[%s14697_s3 + $0x58] sm:$0xff] }
 0x1a6   : > { %v1464_v45 = vpop.f32.mrf.mxu2  ;;  %5616 = vmatpush.bf16.msra.mxu1 %v10775_v5  ;;  %v3723_v48 = vunpack.c.l.b16 %v3358_v15  ;;  %v10035_v15 = vld [vmem:[%s11089_s8 + $0x30] sm:$0xe] }
 0x1a7   : > { %v1522_v31 = vadd.f32 %v1464_v45, %v11733_v13  ;;  %v1778_v62 = vpop.f32.mrf.mxu3  ;;  %v10050_v13 = vrot.slane %v10034_v56, 9  ;;  %v3363_v17 = vrot.slane %v3362_v20, 4 }
 0x1a8   : > { %v2462_v61 = vpop.f32.mrf.mxu0 }
 0x1a9   : > { %v1836_v44 = vadd.f32 %v1778_v62, %v1522_v31  ;;  %v4031_v31 = vsel %vm11415_vm5, %v4029_v2, %v4030_v49  ;;  %v3370_v62 = vshrl.u32 %v9959_v50, 16  ;;  %v9961_v50 = vld [vmem:[%s11089_s8 + $0x38] sm:$0x1] }
 0x1aa   : > { %v2887_v58 = vpop.f32.mrf.mxu1  ;;  %v4149_v20 = vunpack.c.l.b16 %v4031_v31 }
 0x1ab   : > { %3160 = vmatmul.bf16.vlgmr.msra.gmra.mxu2 %v10708_v19  ;;  %4266 = vmatmul.bf16.vlgmr.msra.gmra.mxu0 %v4178_v36  ;;  %v12030_v51 = vadd.f32 %v2459_v3, %v1836_v44  ;;  %v4028_v3 = vsel %vm11415_vm5, %v10050_v13, %v4027_v54  ;;  %v3368_v36 = vsel %vm11113_vm2, %v3363_v17, %v3367_v6  ;;  %v3372_v28 = vrot.slane %v3370_v62, 4 }
 0x1ac   : > { %3841 = vmatmul.bf16.vlgmr.msra.gmra.mxu3 %v3753_v52  ;;  %v3383_v52 = vshrl.u32 %v9960_v60, 16  ;;  %v4148_v44 = vunpack.c.l.b16 %v4028_v3  ;;  %v3724_v56 = vunpack.c.l.b16 %v3368_v36  ;;  %v3375_v13 = vrot.slane %v3373_v41, 5 }
 0x1ad   : > { %v3389_v41 = vshll.u32 %v9961_v50, 16 }
 0x1ae   : > { %v1467_v34 = vpop.f32.mrf.mxu2  ;;  %v3385_v17 = vrot.slane %v3383_v52, 4  ;;  %v3754_v3 = vpack.c.b16 %v3724_v56, %v3723_v48  ;;  %v3376_v31 = vor.u32 %v3375_v13, %v3372_v28  ;;  %v10051_v52 = vrot.slane %v10035_v15, 9  ;;  %v9963_v28 = vld [vmem:[%s11089_s8 + $0x40] sm:$0xf] }
 0x1af   : > { %v1523_v26 = vadd.f32 %v1467_v34, %v11462_v53  ;;  %v1781_v35 = vpop.f32.mrf.mxu3  ;;  %v3379_v53 = vshll.u32 %v9960_v60, 16  ;;  %v3391_v48 = vrot.slane %v3389_v41, 5 }
 0x1b0   : > { %v2464_v45 = vpop.f32.mrf.mxu0 }
 0x1b1   : > { %v1837_v19 = vadd.f32 %v1781_v35, %v1523_v26  ;;  %v3381_v49 = vrot.slane %v3379_v53, 5  ;;  %v10709_v35 = vld [vmem:[%s11089_s8 + $0x24] sm:$0xff] }
 0x1b2   : > { %v12043_v30 = vpop.f32.mrf.mxu1 }
 0x1b3   : > { %14711 = vst [vmem:[#allocation6_spill] sm:$0xff] %v12043_v30  ;;  %v2518_v54 = vadd.f32 %v2462_v61, %v1837_v19  ;;  %v4179_v30 = vpack.c.b16 %v4149_v20, %v4148_v44  ;;  %v4034_v19 = vrot.slane %v9960_v60, 5  ;;  %v9962_v44 = vld [vmem:[%s11089_s8 + $0x3c] sm:$0xf] }
 0x1b5   : > { %v12048_v2 = vadd.f32 %v2887_v58, %v2518_v54  ;;  %v3386_v58 = vor.u32 %v3385_v17, %v3381_v49  ;;  %v4036_v5 = vrot.slane %v4034_v19, 4  ;;  %v4037_v54 = vrot.slane %v9961_v50, 5 }
 0x1b6   : > { %v1469_v6 = vpop.f32.mrf.mxu2  ;;  %v4035_v17 = vsel %vm11415_vm5, %v10051_v52, %v4034_v19 }
 0x1b7   : > { %v1524_v34 = vadd.f32 %v1469_v6, %v11480_v21  ;;  %v1783_v26 = vpop.f32.mrf.mxu3  ;;  %v3377_v21 = vrot.slane %v3376_v31, 4  ;;  %v3387_v20 = vrot.slane %v3386_v58, 4  ;;  %v3394_v6 = vshrl.u32 %v9962_v44, 16 }
 0x1b8   : > { %v2467_v61 = vpop.f32.mrf.mxu0  ;;  %v4038_v50 = vsel %vm11415_vm5, %v4036_v5, %v4037_v54  ;;  %v3407_v31 = vshrl.u32 %v9963_v28, 16  ;;  %v4150_v15 = vunpack.c.l.b16 %v4035_v17 }
 0x1b9   : > { %v1838_v36 = vadd.f32 %v1783_v26, %v1524_v34  ;;  %v3382_v34 = vsel %vm11113_vm2, %v3377_v21, %v3381_v49  ;;  %v3396_v58 = vrot.slane %v3394_v6, 4 }
 0x1ba   : > { %v2892_v62 = vpop.f32.mrf.mxu1  ;;  %v3725_v52 = vunpack.c.l.b16 %v3382_v34  ;;  %v3409_v54 = vrot.slane %v3407_v31, 4 }
 0x1bb   : > { %3165 = vmatmul.bf16.gmra.mxu2 %v10709_v35  ;;  %4271 = vmatmul.bf16.gmra.mxu0 %v4179_v30  ;;  %v12054_v53 = vadd.f32 %v2464_v45, %v1838_v36  ;;  %v3397_v30 = vshll.u32 %v9962_v44, 16  ;;  %v3392_v35 = vsel %vm11113_vm2, %v3387_v20, %v3391_v48  ;;  %v4151_v36 = vunpack.c.l.b16 %v4038_v50 }
 0x1bc   : > { %3846 = vmatmul.bf16.gmra.mxu3 %v3754_v3  ;;  %v3726_v49 = vunpack.c.l.b16 %v3392_v35  ;;  %v4041_v50 = vrot.slane %v9963_v28, 5 }
 0x1bd   : > { %v3399_v41 = vrot.slane %v3397_v30, 5 }
 0x1be   : > { %v1472_v56 = vpop.f32.mrf.mxu2  ;;  %v4043_v31 = vrot.slane %v4041_v50, 4 }
 0x1bf   : > { %v1525_v60 = vadd.f32 %v1472_v56, %v11498_v57  ;;  %v1786_v13 = vpop.f32.mrf.mxu3  ;;  %v3403_v57 = vshll.u32 %v9963_v28, 16  ;;  %v9964_v56 = vld [vmem:[%s11089_s8 + $0x44] sm:$0x1] }
 0x1c0   : > { %v2469_v45 = vpop.f32.mrf.mxu0  ;;  %v3413_v34 = vshll.u32 %v9964_v56, 16 }
 0x1c1   : > { %v1839_v26 = vadd.f32 %v1786_v13, %v1525_v60  ;;  %v3405_v5 = vrot.slane %v3403_v57, 5  ;;  %v10710_v60 = vld [vmem:[%s11089_s8 + $0x30] sm:$0xff]  ;;  %v4180_v13 = vpack.c.b16 %v4151_v36, %v4150_v15  ;;  %v4044_v15 = vrot.slane %v9964_v56, 5 }
 0x1c2   : > { %v12067_v3 = vpop.f32.mrf.mxu1  ;;  %v3415_v36 = vrot.slane %v3413_v34, 5 }
 0x1c3   : > { %14712 = vst [vmem:[#allocation7_spill] sm:$0xff] %v12067_v3  ;;  %v2520_v19 = vadd.f32 %v2467_v61, %v1839_v26  ;;  %v3400_v3 = vor.u32 %v3399_v41, %v3396_v58  ;;  %v3755_v61 = vpack.c.b16 %v3726_v49, %v3725_v52  ;;  %v10036_v26 = vld [vmem:[%s11089_s8 + $0x3c] sm:$0xe]  ;;  %v9965_v58 = vld [vmem:[%s11089_s8 + $0x48] sm:$0xf] }
 0x1c4   : > { %v9966_v41 = vld [vmem:[%s11089_s8 + $0x4c] sm:$0xf]  ;;  %v3421_v56 = vshll.u32 %v9965_v58, 16 }
 0x1c5   : > { %v12069_v21 = vadd.f32 %v2892_v62, %v2520_v19  ;;  %v3410_v62 = vor.u32 %v3409_v54, %v3405_v5  ;;  %v3401_v57 = vrot.slane %v3400_v3, 4  ;;  %v4045_v3 = vsel %vm11415_vm5, %v4043_v31, %v4044_v15 }
 0x1c6   : > { %v1474_v44 = vpop.f32.mrf.mxu2 }
 0x1c7   : > { %v1526_v20 = vadd.f32 %v1474_v44, %v11513_v29  ;;  %v1788_v48 = vpop.f32.mrf.mxu3  ;;  %v10052_v29 = vrot.slane %v10036_v26, 9  ;;  %v3411_v19 = vrot.slane %v3410_v62, 4  ;;  %v3406_v54 = vsel %vm11113_vm2, %v3401_v57, %v3405_v5  ;;  %v10774_v5 = vld [vmem:[%s14697_s3 + $0x50] sm:$0xff] }
 0x1c8   : > { %v2472_v17 = vpop.f32.mrf.mxu0  ;;  %v4153_v62 = vunpack.c.l.b16 %v4045_v3  ;;  %5617 = vmatpush.bf16.msra.mxu1 %v10774_v5  ;;  %v3727_v34 = vunpack.c.l.b16 %v3406_v54  ;;  %v10037_v54 = vld [vmem:[%s11089_s8 + $0x48] sm:$0xe] }
 0x1c9   : > { %v1840_v6 = vadd.f32 %v1788_v48, %v1526_v20  ;;  %v3418_v20 = vshrl.u32 %v9965_v58, 16  ;;  %v9967_v58 = vld [vmem:[%s11089_s8 + $0x50] sm:$0x1] }
 0x1ca   : > { %v2897_v30 = vpop.f32.mrf.mxu1 }
 0x1cb   : > { %3170 = vmatmul.bf16.gmra.mxu2 %v10710_v60  ;;  %4276 = vmatmul.bf16.gmra.mxu0 %v4180_v13  ;;  %v12075_v35 = vadd.f32 %v2469_v45, %v1840_v6  ;;  %v4042_v45 = vsel %vm11415_vm5, %v10052_v29, %v4041_v50  ;;  %v3416_v60 = vsel %vm11113_vm2, %v3411_v19, %v3415_v36  ;;  %v3420_v57 = vrot.slane %v3418_v20, 4 }
 0x1cc   : > { %3851 = vmatmul.bf16.gmra.mxu3 %v3755_v61  ;;  %v3431_v61 = vshrl.u32 %v9966_v41, 16  ;;  %v4152_v6 = vunpack.c.l.b16 %v4042_v45  ;;  %v3728_v26 = vunpack.c.l.b16 %v3416_v60  ;;  %v3423_v29 = vrot.slane %v3421_v56, 5 }
 0x1cd   : > { %v3437_v56 = vshll.u32 %v9967_v58, 16 }
 0x1ce   : > { %v1477_v28 = vpop.f32.mrf.mxu2  ;;  %v3433_v19 = vrot.slane %v3431_v61, 4  ;;  %v3756_v45 = vpack.c.b16 %v3728_v26, %v3727_v34  ;;  %v3424_v3 = vor.u32 %v3423_v29, %v3420_v57  ;;  %v10053_v61 = vrot.slane %v10037_v54, 9  ;;  %v9969_v57 = vld [vmem:[%s11089_s8 + $0x58] sm:$0xf] }
 0x1cf   : > { %v1527_v52 = vadd.f32 %v1477_v28, %v11537_v0  ;;  %v1791_v49 = vpop.f32.mrf.mxu3  ;;  %v3427_v0 = vshll.u32 %v9966_v41, 16  ;;  %v3439_v34 = vrot.slane %v3437_v56, 5 }
 0x1d0   : > { %v2474_v44 = vpop.f32.mrf.mxu0 }
 0x1d1   : > { %v1841_v48 = vadd.f32 %v1791_v49, %v1527_v52  ;;  %v3429_v15 = vrot.slane %v3427_v0, 5  ;;  %v10711_v49 = vld [vmem:[%s11089_s8 + $0x3c] sm:$0xff] }
 0x1d2   : > { %v12088_v13 = vpop.f32.mrf.mxu1 }
 0x1d3   : > { %14713 = vst [vmem:[#allocation8_spill] sm:$0xff] %v12088_v13  ;;  %v2522_v50 = vadd.f32 %v2472_v17, %v1841_v48  ;;  %v4181_v13 = vpack.c.b16 %v4153_v62, %v4152_v6  ;;  %v4048_v48 = vrot.slane %v9966_v41, 5  ;;  %v9968_v6 = vld [vmem:[%s11089_s8 + $0x54] sm:$0xf] }
 0x1d5   : > { %v12093_v31 = vadd.f32 %v2897_v30, %v2522_v50  ;;  %v3434_v30 = vor.u32 %v3433_v19, %v3429_v15  ;;  %v4050_v5 = vrot.slane %v4048_v48, 4  ;;  %v4051_v50 = vrot.slane %v9967_v58, 5 }
 0x1d6   : > { %v1479_v36 = vpop.f32.mrf.mxu2  ;;  %v4049_v19 = vsel %vm11415_vm5, %v10053_v61, %v4048_v48 }
 0x1d7   : > { %v1528_v28 = vadd.f32 %v1479_v36, %v11555_v27  ;;  %v1793_v52 = vpop.f32.mrf.mxu3  ;;  %v3425_v27 = vrot.slane %v3424_v3, 4  ;;  %v3435_v62 = vrot.slane %v3434_v30, 4  ;;  %v3442_v36 = vshrl.u32 %v9968_v6, 16 }
 0x1d8   : > { %v2477_v17 = vpop.f32.mrf.mxu0  ;;  %v4052_v58 = vsel %vm11415_vm5, %v4050_v5, %v4051_v50  ;;  %v3455_v3 = vshrl.u32 %v9969_v57, 16  ;;  %v4154_v54 = vunpack.c.l.b16 %v4049_v19 }
 0x1d9   : > { %v1842_v60 = vadd.f32 %v1793_v52, %v1528_v28  ;;  %v3430_v28 = vsel %vm11113_vm2, %v3425_v27, %v3429_v15  ;;  %v3444_v30 = vrot.slane %v3442_v36, 4 }
 0x1da   : > { %v2902_v20 = vpop.f32.mrf.mxu1  ;;  %v3729_v61 = vunpack.c.l.b16 %v3430_v28  ;;  %v3457_v50 = vrot.slane %v3455_v3, 4 }
 0x1db   : > { %3175 = vmatmul.bf16.gmra.mxu2 %v10711_v49  ;;  %4281 = vmatmul.bf16.gmra.mxu0 %v4181_v13  ;;  %v12099_v0 = vadd.f32 %v2474_v44, %v1842_v60  ;;  %v3445_v13 = vshll.u32 %v9968_v6, 16  ;;  %v3440_v49 = vsel %vm11113_vm2, %v3435_v62, %v3439_v34  ;;  %v4155_v60 = vunpack.c.l.b16 %v4052_v58 }
 0x1dc   : > { %3856 = vmatmul.bf16.gmra.mxu3 %v3756_v45  ;;  %v3730_v15 = vunpack.c.l.b16 %v3440_v49  ;;  %v4055_v58 = vrot.slane %v9969_v57, 5 }
 0x1dd   : > { %v3447_v56 = vrot.slane %v3445_v13, 5 }
 0x1de   : > { %v1482_v26 = vpop.f32.mrf.mxu2  ;;  %v4057_v3 = vrot.slane %v4055_v58, 4 }
 0x1df   : > { %v1529_v41 = vadd.f32 %v1482_v26, %v11573_v14  ;;  %v1796_v29 = vpop.f32.mrf.mxu3  ;;  %v3451_v14 = vshll.u32 %v9969_v57, 16  ;;  %v9970_v26 = vld [vmem:[%s11089_s8 + $0x5c] sm:$0x1] }
 0x1e0   : > { %v2479_v44 = vpop.f32.mrf.mxu0  ;;  %v3461_v28 = vshll.u32 %v9970_v26, 16 }
 0x1e1   : > { %v1843_v52 = vadd.f32 %v1796_v29, %v1529_v41  ;;  %v3453_v5 = vrot.slane %v3451_v14, 5  ;;  %v10712_v41 = vld [vmem:[%s11089_s8 + $0x48] sm:$0xff]  ;;  %v4182_v29 = vpack.c.b16 %v4155_v60, %v4154_v54  ;;  %v4058_v54 = vrot.slane %v9970_v26, 5 }
 0x1e2   : > { %v12112_v45 = vpop.f32.mrf.mxu1  ;;  %v3463_v60 = vrot.slane %v3461_v28, 5 }
 0x1e3   : > { %14714 = vst [vmem:[#allocation9_spill] sm:$0xff] %v12112_v45  ;;  %v2524_v48 = vadd.f32 %v2477_v17, %v1843_v52  ;;  %v3448_v45 = vor.u32 %v3447_v56, %v3444_v30  ;;  %v3757_v17 = vpack.c.b16 %v3730_v15, %v3729_v61  ;;  %v10038_v52 = vld [vmem:[%s11089_s8 + $0x54] sm:$0xe]  ;;  %v9971_v30 = vld [vmem:[%s11089_s8 + $0x60] sm:$0xf] }
 0x1e4   : > { %v9972_v56 = vld [vmem:[%s11089_s8 + $0x64] sm:$0xf]  ;;  %v3469_v26 = vshll.u32 %v9971_v30, 16 }
 0x1e5   : > { %v12114_v27 = vadd.f32 %v2902_v20, %v2524_v48  ;;  %v3458_v20 = vor.u32 %v3457_v50, %v3453_v5  ;;  %v3449_v14 = vrot.slane %v3448_v45, 4  ;;  %v4059_v45 = vsel %vm11415_vm5, %v4057_v3, %v4058_v54 }
 0x1e6   : > { %v1484_v6 = vpop.f32.mrf.mxu2 }
 0x1e7   : > { %14715 = vst [vmem:[#allocation10_spill] sm:$0xff] %v12114_v27  ;;  %v1530_v62 = vadd.f32 %v1484_v6, %v11588_v1  ;;  %v1798_v34 = vpop.f32.mrf.mxu3  ;;  %v10054_v1 = vrot.slane %v10038_v52, 9  ;;  %v3459_v48 = vrot.slane %v3458_v20, 4  ;;  %v3454_v50 = vsel %vm11113_vm2, %v3449_v14, %v3453_v5  ;;  %v10773_v5 = vld [vmem:[%s14697_s3 + $0x48] sm:$0xff] }
 0x1e8   : > { %v2482_v19 = vpop.f32.mrf.mxu0  ;;  %v4157_v20 = vunpack.c.l.b16 %v4059_v45  ;;  %5618 = vmatpush.bf16.msra.mxu1 %v10773_v5  ;;  %v3731_v28 = vunpack.c.l.b16 %v3454_v50  ;;  %v4062_v50 = vrot.slane %v9972_v56, 5 }
 0x1e9   : > { %v1844_v36 = vadd.f32 %v1798_v34, %v1530_v62  ;;  %v3466_v62 = vshrl.u32 %v9971_v30, 16  ;;  %v9973_v30 = vld [vmem:[%s11089_s8 + $0x68] sm:$0x1] }
 0x1ea   : > { %v2907_v13 = vpop.f32.mrf.mxu1 }
 0x1eb   : > { %3180 = vmatmul.bf16.gmra.mxu2 %v10712_v41  ;;  %4286 = vmatmul.bf16.gmra.mxu0 %v4182_v29  ;;  %v12120_v49 = vadd.f32 %v2479_v44, %v1844_v36  ;;  %v4056_v44 = vsel %vm11415_vm5, %v10054_v1, %v4055_v58  ;;  %v3464_v41 = vsel %vm11113_vm2, %v3459_v48, %v3463_v60  ;;  %v3468_v14 = vrot.slane %v3466_v62, 4 }
 0x1ec   : > { %3861 = vmatmul.bf16.gmra.mxu3 %v3757_v17  ;;  %v3479_v17 = vshrl.u32 %v9972_v56, 16  ;;  %v4156_v36 = vunpack.c.l.b16 %v4056_v44  ;;  %v3732_v52 = vunpack.c.l.b16 %v3464_v41  ;;  %v3471_v1 = vrot.slane %v3469_v26, 5  ;;  %v10039_v26 = vld [vmem:[%s11089_s8 + $0x60] sm:$0xe] }
 0x1ed   : > { %14716 = vst [vmem:[#allocation11_spill] sm:$0xff] %v12120_v49 }
 0x1ee   : > { %v1487_v57 = vpop.f32.mrf.mxu2  ;;  %v3481_v48 = vrot.slane %v3479_v17, 4  ;;  %v3758_v45 = vpack.c.b16 %v3732_v52, %v3731_v28  ;;  %v9974_v17 = vld [vmem:[%s11089_s8 + $0x6c] sm:$0xf] }
 0x1ef   : > { %v1531_v61 = vadd.f32 %v1487_v57, %v11612_v32  ;;  %v1801_v15 = vpop.f32.mrf.mxu3  ;;  %v3475_v32 = vshll.u32 %v9972_v56, 16  ;;  %v12148_v56 = vld [vmem:[%s11089_s8 + $0x70] sm:$0xf] }
 0x1f0   : > { %v2484_v6 = vpop.f32.mrf.mxu0 }
 0x1f1   : > { %v1845_v34 = vadd.f32 %v1801_v15, %v1531_v61  ;;  %v3477_v54 = vrot.slane %v3475_v32, 5  ;;  %v10713_v15 = vld [vmem:[%s11089_s8 + $0x54] sm:$0xff] }
 0x1f2   : > { %v12133_v29 = vpop.f32.mrf.mxu1 }
 0x1f3   : > { %14717 = vst [vmem:[#allocation12_spill] sm:$0xff] %v12133_v29  ;;  %v2526_v58 = vadd.f32 %v2482_v19, %v1845_v34  ;;  %v4183_v19 = vpack.c.b16 %v4157_v20, %v4156_v36  ;;  %v3472_v34 = vor.u32 %v3471_v1, %v3468_v14  ;;  %v3482_v62 = vor.u32 %v3481_v48, %v3477_v54 }
 0x1f4   : > { %v4065_v36 = vrot.slane %v9973_v30, 5  ;;  %v3490_v14 = vshrl.u32 %v9974_v17, 16  ;;  %v3493_v1 = vshll.u32 %v9974_v17, 16 }
 0x1f5   : > { %v12138_v3 = vadd.f32 %v2907_v13, %v2526_v58  ;;  %v3485_v13 = vshll.u32 %v9973_v30, 16  ;;  %v10055_v58 = vrot.slane %v10039_v26, 9  ;;  %v3483_v20 = vrot.slane %v3482_v62, 4 }
 0x1f6   : > { %v1489_v60 = vpop.f32.mrf.mxu2  ;;  %v3495_v62 = vrot.slane %v3493_v1, 5 }
 0x1f7   : > { %14718 = vst [vmem:[#allocation13_spill] sm:$0xff] %v12138_v3  ;;  %v1532_v57 = vadd.f32 %v1489_v60, %v11630_v11  ;;  %v1803_v61 = vpop.f32.mrf.mxu3  ;;  %v3473_v11 = vrot.slane %v3472_v34, 4  ;;  %v4064_v60 = vrot.slane %v4062_v50, 4  ;;  %v3487_v28 = vrot.slane %v3485_v13, 5 }
 0x1f8   : > { %v2487_v44 = vpop.f32.mrf.mxu0  ;;  %v3499_v34 = vshll.u32 %v12148_v56, 16 }
 0x1f9   : > { %v1846_v41 = vadd.f32 %v1803_v61, %v1532_v57  ;;  %v4066_v30 = vsel %vm11415_vm5, %v4064_v60, %v4065_v36 }
 0x1fa   : > { %v2912_v5 = vpop.f32.mrf.mxu1  ;;  %v4159_v26 = vunpack.c.l.b16 %v4066_v30  ;;  %v3501_v60 = vrot.slane %v3499_v34, 5  ;;  %v10040_v30 = vld [vmem:[%s11089_s8 + $0x6c] sm:$0xe]  ;;  %v9977_v34 = vld [vmem:[%s11089_s8 + $0x78] sm:$0xf] }
 0x1fb   : > { %3185 = vmatmul.bf16.gmra.mxu2 %v10713_v15  ;;  %4291 = vmatmul.bf16.gmra.mxu0 %v4183_v19  ;;  %v12144_v32 = vadd.f32 %v2484_v6, %v1846_v41  ;;  %v3478_v6 = vsel %vm11113_vm2, %v3473_v11, %v3477_v54  ;;  %v4063_v15 = vsel %vm11415_vm5, %v10055_v58, %v4062_v50  ;;  %v3492_v41 = vrot.slane %v3490_v14, 4 }
 0x1fc   : > { %3866 = vmatmul.bf16.gmra.mxu3 %v3758_v45  ;;  %v3488_v45 = vsel %vm11113_vm2, %v3483_v20, %v3487_v28  ;;  %v4158_v54 = vunpack.c.l.b16 %v4063_v15  ;;  %v3733_v17 = vunpack.c.l.b16 %v3478_v6  ;;  %v9976_v28 = vld [vmem:[%s11089_s8 + $0x74] sm:$0x1] }
 0x1fd   : > { %14719 = vst [vmem:[#allocation14_spill] sm:$0xff] %v12144_v32  ;;  %v3734_v50 = vunpack.c.l.b16 %v3488_v45  ;;  %v3509_v45 = vshll.u32 %v9976_v28, 16 }
 0x1fe   : > { %v1492_v52 = vpop.f32.mrf.mxu2 }
 0x1ff   : > { %v1533_v48 = vadd.f32 %v1492_v52, %v11648_v55  ;;  %v1806_v57 = vpop.f32.mrf.mxu3  ;;  %v3503_v55 = vshrl.u32 %v12148_v56, 16  ;;  %v3496_v52 = vor.u32 %v3495_v62, %v3492_v41  ;;  %v3759_v15 = vpack.c.b16 %v3734_v50, %v3733_v17 }
 0x200   : > { %v2489_v61 = vpop.f32.mrf.mxu0  ;;  %v10056_v41 = vrot.slane %v10040_v30, 9  ;;  %v3511_v50 = vrot.slane %v3509_v45, 5  ;;  %v12188_v45 = vld [vmem:[%s11089_s8 + $0x80] sm:$0x1] }
 0x201   : > { %v1847_v19 = vadd.f32 %v1806_v57, %v1533_v48  ;;  %v3505_v36 = vrot.slane %v3503_v55, 4  ;;  %v4184_v48 = vpack.c.b16 %v4159_v26, %v4158_v54  ;;  %v4069_v57 = vrot.slane %v12148_v56, 5  ;;  %v12172_v55 = vld [vmem:[%s11089_s8 + $0x7c] sm:$0xf] }
 0x202   : > { %v12161_v11 = vpop.f32.mrf.mxu1  ;;  %v4072_v54 = vrot.slane %v9976_v28, 5  ;;  %v3514_v56 = vshrl.u32 %v9977_v34, 16  ;;  %v3517_v26 = vshll.u32 %v9977_v34, 16 }
 0x203   : > { %v2528_v13 = vadd.f32 %v2487_v44, %v1847_v19  ;;  %14720 = vst [vmem:[#allocation15_spill] sm:$0xff] %v12161_v11  ;;  %v10714_v44 = vld [vmem:[%s11089_s8 + $0x60] sm:$0xff]  ;;  %v11029_v11 = vmov 0   ;;  %v4071_v62 = vrot.slane %v4069_v57, 4 }
 0x204   : > { %4447 = vst [vmem:[#allocation2] sm:$0xf] %v11029_v11  ;;  %v3516_v30 = vrot.slane %v3514_v56, 4 }
 0x205   : > { %v12163_v58 = vadd.f32 %v2912_v5, %v2528_v13  ;;  %v3506_v5 = vor.u32 %v3505_v36, %v3501_v60  ;;  %v3497_v13 = vrot.slane %v3496_v52, 4  ;;  %4448 = vst [vmem:[#allocation2 + $0x4] sm:$0xf] %v11029_v11  ;;  %v3523_v36 = vshll.u32 %v12172_v55, 16 }
 0x206   : > { %v1494_v20 = vpop.f32.mrf.mxu2  ;;  %4449 = vst [vmem:[#allocation2 + $0x8] sm:$0x1] %v11029_v11 }
 0x207   : > { %14721 = vst [vmem:[#allocation16_spill] sm:$0xff] %v12163_v58  ;;  %v1534_v14 = vadd.f32 %v1494_v20, %v11663_v38  ;;  %v1808_v1 = vpop.f32.mrf.mxu3  ;;  %v3507_v17 = vrot.slane %v3506_v5, 4  ;;  %v3527_v20 = vshrl.u32 %v12172_v55, 16  ;;  %v3502_v28 = vsel %vm11113_vm2, %v3497_v13, %v3501_v60 }
 0x208   : > { %v2492_v6 = vpop.f32.mrf.mxu0  ;;  %4451 = vst [vmem:[#allocation2 + $0xcc] sm:$0xf] %v11029_v11  ;;  %v12190_v34 = vrot.slane %v3523_v36, 5 }
 0x209   : > { %v1848_v19 = vadd.f32 %v1808_v1, %v1534_v14  ;;  %4452 = vst [vmem:[#allocation2 + $0xd0] sm:$0xf] %v11029_v11  ;;  %v3529_v60 = vrot.slane %v3527_v20, 4 }
 0x20a   : > { %v2917_v14 = vpop.f32.mrf.mxu1  ;;  %4453 = vst [vmem:[#allocation2 + $0xd4] sm:$0x1] %v11029_v11 }
 0x20b   : > { %3190 = vmatmul.bf16.gmra.mxu2 %v10714_v44  ;;  %4296 = vmatmul.bf16.gmra.mxu0 %v4184_v48  ;;  %v12174_v38 = vadd.f32 %v2489_v61, %v1848_v19  ;;  %v4070_v44 = vsel %vm11415_vm5, %v10056_v41, %v4069_v57  ;;  %v4073_v48 = vsel %vm11415_vm5, %v4071_v62, %v4072_v54  ;;  %v3519_v19 = vrot.slane %v3517_v26, 5  ;;  %v4457_v11 = vld [vmem:[#allocation2] sm:$0x1] }
 0x20c   : > { %3871 = vmatmul.bf16.gmra.mxu3 %v3759_v15  ;;  %v14723_v57 = vmov 0  ;;  %v4458_v13 = vsel %vm12194_vm8, 0, %v4457_v11  ;;  %v3735_v62 = vunpack.c.l.b16 %v3502_v28  ;;  %v4160_v54 = vunpack.c.l.b16 %v4070_v44  ;;  %v10041_v28 = vld [vmem:[%s11089_s8 + $0x78] sm:$0xe] }
 0x20d   : > { %14722 = vst [vmem:[#allocation17_spill] sm:$0xff] %v12174_v38  ;;  %v14724_v57 = vsel %vm12194_vm8, 4294967295, %v14723_v57  ;;  %v4161_v56 = vunpack.c.l.b16 %v4073_v48  ;;  %v3530_v20 = vor.u32 %v3529_v60, %v12190_v34  ;;  %v10057_v58 = vrot.slane %v10041_v28, 9 }
 0x20e   : > { %v1497_v52 = vpop.f32.mrf.mxu2  ;;  %14725 = vst [vmem:[#allocation18_spill] sm:$0xff] %v14724_v57 }
 0x20f   : > { %v1535_v61 = vadd.f32 %v1497_v52, %v11687_v22  ;;  %v1811_v1 = vpop.f32.mrf.mxu3  ;;  %v3512_v22 = vsel %vm11113_vm2, %v3507_v17, %v3511_v50  ;;  %4459 = vst [vmem:[#allocation2] sm:$0x1] %v4458_v13  ;;  %v3520_v17 = vor.u32 %v3519_v19, %v3516_v30  ;;  %v3533_v50 = vshll.u32 %v12188_v45, 16  ;;  %v10715_v30 = vld [vmem:[%s11089_s8 + $0x6c] sm:$0xff] }
 0x210   : > { %v2494_v15 = vpop.f32.mrf.mxu0  ;;  %v3736_v26 = vunpack.c.l.b16 %v3512_v22  ;;  %v4076_v52 = vrot.slane %v12172_v55, 5  ;;  %v4185_v19 = vpack.c.b16 %v4161_v56, %v4160_v54  ;;  %v4460_v55 = vld [vmem:[#allocation2 + $0xc] sm:$0x1]  ;;  %v5037_v56 = vld [vmem:[#allocation2 + $0x4] sm:$0xf] }
 0x211   : > { %v1849_v5 = vadd.f32 %v1811_v1, %v1535_v61  ;;  %v4513_v61 = vld [vmem:[#allocation2 + $0x8] sm:$0x1]  ;;  %v3521_v11 = vrot.slane %v3520_v17, 4  ;;  %v3535_v13 = vrot.slane %v3533_v50, 5 }
 0x212   : > { %v4514_v44 = vsel %vm12207_vm10, 0, %v4513_v61  ;;  %v3760_v22 = vpack.c.b16 %v3736_v26, %v3735_v62  ;;  %v12216_v60 = vpop.f32.mrf.mxu1  ;;  %v3531_v61 = vrot.slane %v3530_v20, 4  ;;  %v4079_v26 = vrot.slane %v12188_v45, 5 }
 0x213   : > { %v2530_v41 = vadd.f32 %v2492_v6, %v1849_v5  ;;  %v14727_v6 = vmov 0  ;;  %4515 = vst [vmem:[#allocation2 + $0x8] sm:$0x1] %v4514_v44  ;;  %v5114_v20 = vshrl.u32 %v5037_v56, 16  ;;  %v3526_v28 = vsel %vm11113_vm2, %v3521_v11, %v12190_v34 }
 0x214   : > { %v14728_v6 = vsel %vm12207_vm10, 4294967295, %v14727_v6  ;;  %14730 = vst [vmem:[#allocation21_spill] sm:$0xff] %v12216_v60  ;;  %v3536_v34 = vsel %vm11113_vm2, %v3531_v61, %v3535_v13 }
 0x215   : > { %v12201_v36 = vadd.f32 %v2917_v14, %v2530_v41  ;;  %14729 = vst [vmem:[#allocation20_spill] sm:$0xff] %v14728_v6  ;;  %v4461_v41 = vsel %vm12194_vm8, 0, %v4460_v55  ;;  %v3738_v61 = vunpack.c.l.b16 %v3536_v34 }
 0x216   : > { %v1499_v1 = vpop.f32.mrf.mxu2  ;;  %4462 = vst [vmem:[#allocation2 + $0xc] sm:$0x1] %v4461_v41  ;;  %v5036_v54 = vld [vmem:[#allocation2] sm:$0xf] }
 0x217   : > { %14726 = vst [vmem:[#allocation19_spill] sm:$0xff] %v12201_v36  ;;  %v1536_v14 = vadd.f32 %v1499_v1, %v11705_v25  ;;  %v1813_v48 = vpop.f32.mrf.mxu3  ;;  %v9980_v36 = vld [vmem:[%s11089_s8 + $0x84] sm:$0xf]  ;;  %v4078_v25 = vrot.slane %v4076_v52, 4  ;;  %v12222_v1 = vld [vmem:[%s11089_s8 + $0x88] sm:$0xf] }
 0x218   : > { %v2497_v5 = vpop.f32.mrf.mxu0  ;;  %v3538_v17 = vshrl.u32 %v9980_v36, 16  ;;  %v5101_v50 = vshrl.u32 %v5036_v54, 16  ;;  %v3541_v44 = vshll.u32 %v9980_v36, 16  ;;  %v5104_v55 = vshll.u32 %v5036_v54, 16 }
 0x219   : > { %v1850_v38 = vadd.f32 %v1813_v48, %v1536_v14  ;;  %v5110_v14 = vshll.u32 %v5037_v56, 16  ;;  %v4077_v48 = vsel %vm11415_vm5, %v10057_v58, %v4076_v52  ;;  %v3551_v45 = vshrl.u32 %v12222_v1, 16 }
 0x21a   : > { %v5106_v41 = vrot.slane %v5104_v55, 5  ;;  %v5116_v36 = vrot.slane %v5114_v20, 4  ;;  %v4080_v58 = vsel %vm11415_vm5, %v4078_v25, %v4079_v26  ;;  %v3540_v60 = vrot.slane %v3538_v17, 4  ;;  %v2922_v13 = vpop.f32.mrf.mxu1  ;;  %v10772_v25 = vld [vmem:[%s14697_s3 + $0x40] sm:$0xff] }
 0x21b   : > { %3195 = vmatmul.bf16.gmra.mxu2 %v10715_v30  ;;  %4301 = vmatmul.bf16.gmra.mxu0 %v4185_v19  ;;  %v12224_v62 = vadd.f32 %v2494_v15, %v1850_v38  ;;  %v3547_v30 = vshll.u32 %v12222_v1, 16  ;;  %v5103_v38 = vrot.slane %v5101_v50, 4  ;;  %v5084_v19 = vld [vmem:[#allocation2 + $0x8] sm:$0x1]  ;;  %v4516_v50 = vld [vmem:[#allocation2 + $0x14] sm:$0x1] }
 0x21c   : > { %3876 = vmatmul.bf16.gmra.mxu3 %v3760_v22  ;;  %v5112_v22 = vrot.slane %v5110_v14, 5  ;;  %v5120_v52 = vshll.u32 %v5084_v19, 16  ;;  %v3737_v14 = vunpack.c.l.b16 %v3526_v28  ;;  %v4517_v20 = vsel %vm12207_vm10, 0, %v4516_v50  ;;  %5619 = vmatpush.bf16.msra.mxu1 %v10772_v25  ;;  %v14733_v50 = vld [vmem:[#allocation3_spill] sm:$0xff] }
 0x21d   : > { %14731 = vst [vmem:[#allocation22_spill] sm:$0xff] %v12224_v62  ;;  %v3543_v62 = vrot.slane %v3541_v44, 5  ;;  %v5107_v29 = vor.u32 %v5106_v41, %v5103_v38  ;;  %v3549_v26 = vrot.slane %v3547_v30, 5  ;;  %v3553_v17 = vrot.slane %v3551_v45, 4 }
 0x21e   : > { %v1502_v15 = vpop.f32.mrf.mxu2  ;;  %v5117_v32 = vor.u32 %v5116_v36, %v5112_v22  ;;  %4518 = vst [vmem:[#allocation2 + $0x14] sm:$0x1] %v4517_v20  ;;  %v4162_v28 = vunpack.c.l.b16 %v4077_v48  ;;  %v4163_v19 = vunpack.c.l.b16 %v4080_v58  ;;  %v3761_v45 = vpack.c.b16 %v3738_v61, %v3737_v14  ;;  %v10042_v58 = vld [vmem:[%s11089_s8 + $0x84] sm:$0xe]  ;;  %v10716_v20 = vld [vmem:[%s11089_s8 + $0x78] sm:$0xff] }
 0x21f   : > { %v1537_v54 = vadd.f32 %v1502_v15, %v11723_v59  ;;  %v1816_v56 = vpop.f32.mrf.mxu3  ;;  %v12242_v59 = vld [vmem:[%s11089_s8 + $0x8c] sm:$0x1]  ;;  %v5122_v15 = vrot.slane %v5120_v52, 5  ;;  %v5108_v44 = vrot.slane %v5107_v29, 4  ;;  %v3544_v36 = vor.u32 %v3543_v62, %v3540_v60 }
 0x220   : > { %v2499_v11 = vpop.f32.mrf.mxu0  ;;  %v5118_v41 = vrot.slane %v5117_v32, 4  ;;  %v3557_v52 = vshll.u32 %v12242_v59, 16  ;;  %v3554_v32 = vor.u32 %v3553_v17, %v3549_v26  ;;  %v4083_v60 = vrot.slane %v12222_v1, 5 }
 0x221   : > { %v1851_v55 = vadd.f32 %v1816_v56, %v1537_v54  ;;  %v5113_v54 = vsel %vm11113_vm2, %v5108_v44, %v5112_v22  ;;  %v9983_v56 = vld [vmem:[%s11089_s8 + $0x90] sm:$0xf]  ;;  %v10058_v1 = vrot.slane %v10042_v58, 9 }
 0x222   : > { %v5123_v30 = vsel %vm11113_vm2, %v5118_v41, %v5122_v15  ;;  %v5500_v29 = vunpack.c.l.b16 %v5113_v54  ;;  %v3562_v25 = vshrl.u32 %v9983_v56, 16  ;;  %v3565_v44 = vshll.u32 %v9983_v56, 16  ;;  %v4463_v41 = vld [vmem:[#allocation2 + $0x18] sm:$0x1] }
 0x223   : > { %v2532_v38 = vadd.f32 %v2497_v5, %v1851_v55  ;;  %v12256_v5 = vld [vmem:[%s11089_s8 + $0x94] sm:$0xf]  ;;  %v5501_v62 = vunpack.c.l.b16 %v5123_v30  ;;  %v3545_v15 = vrot.slane %v3544_v36, 4  ;;  %v3559_v17 = vrot.slane %v3557_v52, 5 }
 0x224   : > { %v3575_v14 = vshrl.u32 %v12256_v5, 16  ;;  %v4464_v30 = vsel %vm12194_vm8, 0, %v4463_v41  ;;  %v4086_v36 = vrot.slane %v12242_v59, 5  ;;  %v3564_v56 = vrot.slane %v3562_v25, 4 }
 0x225   : > { %v12250_v34 = vadd.f32 %v2922_v13, %v2532_v38  ;;  %v4186_v13 = vpack.c.b16 %v4163_v19, %v4162_v28  ;;  %v5532_v54 = vpack.c.b16 %v5501_v62, %v5500_v29  ;;  %4465 = vst [vmem:[#allocation2 + $0x18] sm:$0x1] %v4464_v30  ;;  %v12267_v28 = vld [vmem:[%s11089_s8 + $0x98] sm:$0x1]  ;;  %v3567_v52 = vrot.slane %v3565_v44, 5 }
 0x226   : > { %v1504_v48 = vpop.f32.mrf.mxu2  ;;  %v3550_v29 = vsel %vm11113_vm2, %v3545_v15, %v3549_v26  ;;  %v3577_v58 = vrot.slane %v3575_v14, 4  ;;  %v3581_v62 = vshll.u32 %v12267_v28, 16  ;;  %v4084_v59 = vsel %vm11415_vm5, %v10058_v1, %v4083_v60  ;;  %v10043_v44 = vld [vmem:[%s11089_s8 + $0x90] sm:$0xe]  ;;  %v12289_v15 = vld [vmem:[%s11089_s8 + $0xa0] sm:$0xf] }
 0x227   : > { %14732 = vst [vmem:[#allocation23_spill] sm:$0xff] %v12250_v34  ;;  %v1538_v22 = vadd.f32 %v1504_v48, %v14733_v50  ;;  %v1818_v55 = vpop.f32.mrf.mxu3  ;;  %v3571_v34 = vshll.u32 %v12256_v5, 16  ;;  %v3555_v48 = vrot.slane %v3554_v32, 4  ;;  %v4085_v50 = vrot.slane %v4083_v60, 4  ;;  %5620 = vmatmul.bf16.vlgmr.msra.gmra.mxu1 %v5532_v54  ;;  %v4519_v54 = vld [vmem:[#allocation2 + $0x20] sm:$0x1] }
 0x228   : > { %v4267_v38 = vpop.f32.mrf.mxu0  ;;  %v12296_v30 = vld [vmem:[%s14696_s2] ss:$0 sm:$0xff] }
 0x229   : > { %v1852_v61 = vadd.f32 %v1818_v55, %v1538_v22  ;;  %v12274_v32 = vrot.slane %v3571_v34, 5  ;;  %v9986_v55 = vld [vmem:[%s11089_s8 + $0x9c] sm:$0xf]  ;;  %v4087_v26 = vsel %vm11415_vm5, %v4085_v50, %v4086_v36  ;;  %v3568_v34 = vor.u32 %v3567_v52, %v3564_v56 }
 0x22a   : > { %v3586_v60 = vshrl.u32 %v9986_v55, 16  ;;  %v4520_v50 = vsel %vm12207_vm10, 0, %v4519_v54  ;;  %v3583_v36 = vrot.slane %v3581_v62, 5  ;;  %v4164_v56 = vunpack.c.l.b16 %v4084_v59 }
 0x22b   : > { %3200 = vmatmul.bf16.gmra.mxu2 %v10716_v20  ;;  %4306 = vmatmul.bf16.gmra.mxu0 %v4186_v13  ;;  %v12269_v19 = vadd.f32 %v2499_v11, %v1852_v61  ;;  %v3560_v11 = vsel %vm11113_vm2, %v3555_v48, %v3559_v17  ;;  %v14735_v20 = vld [vmem:[#allocation4_spill] sm:$0xff]  ;;  %v3578_v14 = vor.u32 %v3577_v58, %v12274_v32  ;;  %v4090_v61 = vrot.slane %v12256_v5, 5  ;;  %v10787_v5 = vld [vmem:[%s14697_s3 + $0xb8] sm:$0xff] }
 0x22c   : > { %3881 = vmatmul.bf16.gmra.mxu3 %v3761_v45  ;;  %v12283_v45 = vunpack.c.l.b16 %v3550_v29  ;;  %v3589_v17 = vshll.u32 %v9986_v55, 16  ;;  %v3740_v48 = vunpack.c.l.b16 %v3560_v11  ;;  %v4165_v52 = vunpack.c.l.b16 %v4087_v26  ;;  %v10771_v29 = vld [vmem:[%s14697_s3 + $0x38] sm:$0xff]  ;;  %4521 = vst [vmem:[#allocation2 + $0x20] sm:$0x1] %v4520_v50 }
 0x22d   : > { %14734 = vst [vmem:[#allocation3_spill] sm:$0xff] %v12269_v19  ;;  %v3595_v58 = vshll.u32 %v12289_v15, 16  ;;  %v3569_v55 = vrot.slane %v3568_v34, 4  ;;  %v4093_v62 = vrot.slane %v12267_v28, 5  ;;  %5845 = vmatpush.bf16.msrb.mxu2 %v10771_v29  ;;  %6222 = vmatpush.bf16.msrb.mxu3 %v10787_v5  ;;  %v3579_v59 = vrot.slane %v3578_v14, 4 }
 0x22e   : > { %v3161_v22 = vpop.f32.mrf.mxu2  ;;  %v3591_v26 = vrot.slane %v3589_v17, 5  ;;  %v3762_v19 = vpack.c.b16 %v3740_v48, %v12283_v45  ;;  %v4187_v3 = vpack.c.b16 %v4165_v52, %v4164_v56  ;;  %v9988_v17 = vld [vmem:[%s11089_s8 + $0xa4] sm:$0x1]  ;;  %v4097_v52 = vrot.slane %v12289_v15, 5 }
 0x22f   : > { %v3241_v13 = vadd.f32 %v3161_v22, %v14735_v20  ;;  %v3842_v25 = vpop.f32.mrf.mxu3  ;;  %v3599_v22 = vshrl.u32 %v12289_v15, 16  ;;  %v10059_v20 = vrot.slane %v10043_v44, 9  ;;  %v12311_v49 = vrot.slane %v3595_v58, 5  ;;  %v4466_v56 = vld [vmem:[#allocation2 + $0x24] sm:$0x1] }
 0x230   : > { %v4269_v41 = vpop.f32.mrf.mxu0  ;;  %v3574_v14 = vsel %vm11113_vm2, %v3569_v55, %v12274_v32  ;;  %v3584_v45 = vsel %vm11113_vm2, %v3579_v59, %v3583_v36  ;;  %v4467_v32 = vsel %vm12194_vm8, 0, %v4466_v56  ;;  %v3605_v55 = vshll.u32 %v9988_v17, 16 }
 0x231   : > { %v3922_v1 = vadd.f32 %v3842_v25, %v3241_v13  ;;  %v4092_v13 = vrot.slane %v4090_v61, 4  ;;  %v3588_v25 = vrot.slane %v3586_v60, 4  ;;  %v4091_v60 = vsel %vm11415_vm5, %v10059_v20, %v4090_v61  ;;  %4468 = vst [vmem:[#allocation2 + $0x24] sm:$0x1] %v4467_v32 }
 0x232   : > { %v12329_v61 = vunpack.c.l.b16 %v3574_v14  ;;  %v12332_v59 = vunpack.c.l.b16 %v3584_v45 }
 0x233   : > { %v4347_v11 = vadd.f32 %v4267_v38, %v3922_v1  ;;  %v3601_v38 = vrot.slane %v3599_v22, 4  ;;  %v10717_v1 = vld [vmem:[%s11089_s8 + $0x84] sm:$0xff]  ;;  %v4094_v48 = vsel %vm11415_vm5, %v4092_v13, %v4093_v62  ;;  %v10044_v22 = vld [vmem:[%s11089_s8 + $0x9c] sm:$0xe] }
 0x234   : > { %v4167_v15 = vunpack.c.l.b16 %v4094_v48  ;;  %v10811_v13 = vld [vmem:[%s14697_s3 + $0xf8] sm:$0xff] }
 0x235   : > { %v4383_v54 = vadd.f32 %v12296_v30, %v4347_v11  ;;  %v4166_v11 = vunpack.c.l.b16 %v4091_v60  ;;  %v3602_v36 = vor.u32 %v3601_v38, %v12311_v49  ;;  %6535 = vmatpush.bf16.msrb.mxu0 %v10811_v13 }
 0x236   : > { %v3163_v50 = vpop.f32.mrf.mxu2 }
 0x237   : > { %v4415_v34 = vmax.f32 %v4383_v54, 0.0  ;;  %v3242_v28 = vadd.f32 %v3163_v50, %v11786_v7  ;;  %v3844_v44 = vpop.f32.mrf.mxu3  ;;  %v3592_v7 = vor.u32 %v3591_v26, %v3588_v25  ;;  %v10060_v26 = vrot.slane %v10044_v22, 9  ;;  %v9989_v22 = vld [vmem:[%s11089_s8 + $0xa8] sm:$0xf] }
 0x238   : > { %v4272_v29 = vpop.f32.mrf.mxu0  ;;  %v4099_v54 = vrot.slane %v4097_v52, 4  ;;  %v4100_v50 = vrot.slane %v9988_v17, 5  ;;  %v3613_v13 = vshll.u32 %v9989_v22, 16 }
 0x239   : > { %v4567_v5 = vpack.c.bf16 %v4415_v34, %v4415_v34  ;;  %v3923_v58 = vadd.f32 %v3844_v44, %v3242_v28  ;;  %v3593_v25 = vrot.slane %v3592_v7, 4  ;;  %v3603_v44 = vrot.slane %v3602_v36, 4  ;;  %v12367_v36 = vld [vmem:[%s11089_s8 + $0xac] sm:$0xf] }
 0x23a   : > { %v12352_v7 = vpack.c.b16 %v4167_v15, %v4166_v11  ;;  %v12359_v32 = vsel %vm11415_vm5, %v10060_v26, %v4097_v52  ;;  %v10819_v52 = vld [vmem:[%s14697_s3 + $0x138] sm:$0xff]  ;;  %v3610_v15 = vshrl.u32 %v9989_v22, 16 }
 0x23b   : > { %v4602_v20 = vshrl.u32 %v4567_v5, 16  ;;  %v4348_v62 = vadd.f32 %v4269_v41, %v3923_v58  ;;  %3205 = vmatmul.bf16.gmra.mxu2 %v10717_v1  ;;  %4311 = vmatmul.bf16.gmra.mxu0 %v4187_v3  ;;  %v4605_v38 = vshll.u32 %v4567_v5, 16  ;;  %v4924_v41 = vld [vmem:[#allocation2 + $0xc] sm:$0xf]  ;;  %v3607_v1 = vrot.slane %v3605_v55, 5  ;;  %v10859_v3 = vld [vmem:[%s14697_s3 + $0x1f8] sm:$0xff] }
 0x23c   : > { %3886 = vmatmul.bf16.gmra.mxu3 %v3762_v19  ;;  %v4522_v5 = vld [vmem:[#allocation2 + $0x2c] sm:$0x1]  ;;  %v3598_v58 = vsel %vm11113_vm2, %v3593_v25, %v12311_v49  ;;  %v3619_v25 = vshll.u32 %v12367_v36, 16  ;;  %7216 = vmatpush.bf16.msrb.mxu1 %v10819_v52 }
 0x23d   : > { %v12337_v34 = vrot.slane %v4602_v20, 7  ;;  %v4384_v28 = vadd.f32 %v12296_v30, %v4348_v62  ;;  %v4523_v49 = vsel %vm12207_vm10, 0, %v4522_v5  ;;  %v3608_v62 = vsel %vm11113_vm2, %v3603_v44, %v3607_v1 }
 0x23e   : > { %v3166_v19 = vpop.f32.mrf.mxu2  ;;  %4524 = vst [vmem:[#allocation2 + $0x2c] sm:$0x1] %v4523_v49 }
 0x23f   : > { %v4607_v14 = vor.u32 %v4605_v38, %v12337_v34  ;;  %v4416_v60 = vmax.f32 %v4384_v28, 0.0  ;;  %v3243_v17 = vadd.f32 %v3166_v19, %v11808_v18  ;;  %v3847_v45 = vpop.f32.mrf.mxu3  ;;  %v12363_v18 = vsel %vm11415_vm5, %v4099_v54, %v4100_v50 }
 0x240   : > { %v12350_v56 = vpop.f32.mrf.mxu0  ;;  %v12379_v50 = vunpack.c.l.b16 %v3598_v58  ;;  %v3623_v38 = vshrl.u32 %v12367_v36, 16  ;;  %v4168_v28 = vunpack.c.l.b16 %v12359_v32  ;;  %v3612_v19 = vrot.slane %v3610_v15, 4  ;;  %v4928_v58 = vld [vmem:[#allocation2 + $0x14] sm:$0x1] }
 0x241   : > { %v4925_v11 = vsel %vm12342_vm12, %v4607_v14, %v4924_v41  ;;  %v4568_v55 = vpack.c.bf16 %v4416_v60, %v4416_v60  ;;  %v3924_v20 = vadd.f32 %v3847_v45, %v3243_v17  ;;  %v12384_v41 = vld [vmem:[%s11089_s8 + $0xb0] sm:$0x1]  ;;  %v3615_v14 = vrot.slane %v3613_v13, 5 }
 0x242   : > { %4926 = vst [vmem:[#allocation2 + $0xc] sm:$0xf] %v4925_v11  ;;  %v12386_v60 = vrot.slane %v3619_v25, 5  ;;  %v3625_v17 = vrot.slane %v3623_v38, 4  ;;  %v4608_v45 = vrot.slane %v12337_v34, 4  ;;  %v4169_v22 = vunpack.c.l.b16 %v12363_v18  ;;  %v10718_v34 = vld [vmem:[%s11089_s8 + $0x90] sm:$0xff] }
 0x243   : > { %v4610_v26 = vshrl.u32 %v4568_v55, 16  ;;  %v4349_v54 = vadd.f32 %v4272_v29, %v3924_v20  ;;  %v4613_v1 = vshll.u32 %v4568_v55, 16  ;;  %v3616_v11 = vor.u32 %v3615_v14, %v3612_v19  ;;  %v10045_v25 = vld [vmem:[%s11089_s8 + $0xa8] sm:$0xe]  ;;  %v4469_v38 = vld [vmem:[#allocation2 + $0x30] sm:$0x1] }
 0x244   : > { %v3629_v20 = vshll.u32 %v12384_v41, 16  ;;  %v3626_v27 = vor.u32 %v3625_v17, %v12386_v60  ;;  %v4104_v18 = vrot.slane %v12367_v36, 5 }
 0x245   : > { %v4612_v44 = vrot.slane %v4610_v26, 7  ;;  %v4385_v29 = vadd.f32 %v12296_v30, %v4349_v54  ;;  %v12401_v54 = vunpack.c.l.b16 %v3608_v62  ;;  %v3617_v48 = vrot.slane %v3616_v11, 4 }
 0x246   : > { %v3168_v32 = vpop.f32.mrf.mxu2  ;;  %v4470_v62 = vsel %vm12194_vm8, 0, %v4469_v38  ;;  %v10061_v11 = vrot.slane %v10045_v25, 9  ;;  %v12425_v25 = vadd.f32 %v11921_v24, %v11943_v12  ;;  %v12427_v38 = vpack.c.b16 %v4169_v22, %v4168_v28 }
 0x247   : > { %v4615_v55 = vor.u32 %v4613_v1, %v4612_v44  ;;  %v4617_v49 = vrot.slane %v4612_v44, 4  ;;  %v4417_v52 = vmax.f32 %v4385_v29, 0.0  ;;  %v3244_v15 = vadd.f32 %v3168_v32, %v11823_v43  ;;  %v3849_v13 = vpop.f32.mrf.mxu3  ;;  %4471 = vst [vmem:[#allocation2 + $0x30] sm:$0x1] %v4470_v62 }
 0x248   : > { %v4277_v26 = vpop.f32.mrf.mxu0  ;;  %v3631_v32 = vrot.slane %v3629_v20, 5  ;;  %v3764_v28 = vpack.c.b16 %v12401_v54, %v12379_v50 }
 0x249   : > { %v4616_v19 = vsel %vm12392_vm14, %v4608_v45, %v4615_v55  ;;  %v4929_v14 = vsel %vm12194_vm8, %v4617_v49, %v4928_v58  ;;  %v4569_v44 = vpack.c.bf16 %v4417_v52, %v4417_v52  ;;  %v3925_v43 = vadd.f32 %v3849_v13, %v3244_v15  ;;  %v5038_v1 = vld [vmem:[#allocation2 + $0xc] sm:$0xf] }
 0x24a   : > { %4927 = vst [vmem:[#allocation2 + $0x10] sm:$0xf] %v4616_v19  ;;  %v5125_v29 = vshrl.u32 %v5038_v1, 16  ;;  %v5128_v45 = vshll.u32 %v5038_v1, 16  ;;  %v3622_v58 = vsel %vm11113_vm2, %v3617_v48, %v12386_v60  ;;  %v14740_v49 = vpack.c.b16 %v12332_v59, %v12329_v61  ;;  %v4931_v48 = vld [vmem:[#allocation2 + $0x18] sm:$0xf] }
 0x24b   : > { %4930 = vst [vmem:[#allocation2 + $0x14] sm:$0x1] %v4929_v14  ;;  %v4619_v17 = vshrl.u32 %v4569_v44, 16  ;;  %v4350_v36 = vadd.f32 %v12350_v56, %v3925_v43  ;;  %3210 = vmatmul.bf16.gmra.mxu2 %v10718_v34  ;;  %4316 = vmatmul.bf16.gmra.mxu0 %v12352_v7  ;;  %v4622_v55 = vshll.u32 %v4569_v44, 16  ;;  %v3627_v52 = vrot.slane %v3626_v27, 4 }
 0x24c   : > { %3891 = vmatmul.bf16.gmra.mxu3 %v14740_v49  ;;  %v5127_v20 = vrot.slane %v5125_v29, 4  ;;  %v4106_v15 = vrot.slane %v4104_v18, 4  ;;  %v5130_v34 = vrot.slane %v5128_v45, 5  ;;  %v4107_v7 = vrot.slane %v12384_v41, 5  ;;  %v9992_v29 = vld [vmem:[%s11089_s8 + $0xb4] sm:$0xf] }
 0x24d   : > { %v12419_v13 = vrot.slane %v4619_v17, 7  ;;  %v4386_v56 = vadd.f32 %v12296_v30, %v4350_v36  ;;  %v12431_v61 = vsel %vm11415_vm5, %v10061_v11, %v4104_v18  ;;  %v3632_v41 = vsel %vm11113_vm2, %v3627_v52, %v3631_v32  ;;  %v10770_v52 = vld [vmem:[%s14697_s3 + $0x30] sm:$0xff]  ;;  %v6656_v5 = vld [vmem:[#allocation2 + $0xc] sm:$0xf] }
 0x24e   : > { %v3171_v60 = vpop.f32.mrf.mxu2  ;;  %v5131_v22 = vor.u32 %v5130_v34, %v5127_v20  ;;  %v12442_v18 = vunpack.c.l.b16 %v3622_v58  ;;  %v4108_v62 = vsel %vm11415_vm5, %v4106_v15, %v4107_v7  ;;  %v12449_v36 = vunpack.c.l.b16 %v3632_v41  ;;  %v4525_v34 = vld [vmem:[#allocation2 + $0x38] sm:$0x1]  ;;  %5846 = vmatpush.bf16.msrb.mxu2 %v10770_v52 }
 0x24f   : > { %v4624_v27 = vor.u32 %v4622_v55, %v12419_v13  ;;  %v4418_v59 = vmax.f32 %v4386_v56, 0.0  ;;  %v3245_v19 = vadd.f32 %v3171_v60, %v11850_v4  ;;  %v3852_v14 = vpop.f32.mrf.mxu3  ;;  %v4625_v24 = vrot.slane %v12419_v13, 4  ;;  %v10786_v56 = vld [vmem:[%s14697_s3 + $0xb0] sm:$0xff] }
 0x250   : > { %v12438_v12 = vpop.f32.mrf.mxu0  ;;  %v5132_v11 = vrot.slane %v5131_v22, 4  ;;  %v4170_v45 = vunpack.c.l.b16 %v12431_v61  ;;  %v4171_v7 = vunpack.c.l.b16 %v4108_v62  ;;  %6223 = vmatpush.bf16.msrb.mxu3 %v10786_v56  ;;  %v3765_v22 = vpack.c.b16 %v12449_v36, %v12442_v18 }
 0x251   : > { %v4932_v44 = vsel %vm12342_vm12, %v4624_v27, %v4931_v48  ;;  %v4570_v43 = vpack.c.bf16 %v4418_v59, %v4418_v59  ;;  %v3926_v1 = vadd.f32 %v3852_v14, %v3245_v19  ;;  %v5039_v4 = vld [vmem:[#allocation2 + $0x10] sm:$0xf]  ;;  %v3634_v48 = vshrl.u32 %v9992_v29, 16  ;;  %v12462_v59 = vld [vmem:[%s11089_s8 + $0xb8] sm:$0xf] }
 0x252   : > { %4933 = vst [vmem:[#allocation2 + $0x18] sm:$0xf] %v4932_v44  ;;  %v5085_v32 = vld [vmem:[#allocation2 + $0x14] sm:$0x1]  ;;  %v5134_v17 = vshll.u32 %v5039_v4, 16  ;;  %v5138_v20 = vshrl.u32 %v5039_v4, 16 }
 0x253   : > { %v4627_v58 = vshrl.u32 %v4570_v43, 16  ;;  %v4630_v55 = vshll.u32 %v4570_v43, 16  ;;  %v4351_v49 = vadd.f32 %v4277_v26, %v3926_v1  ;;  %v5144_v15 = vshll.u32 %v5085_v32, 16  ;;  %v4935_v19 = vld [vmem:[#allocation2 + $0x20] sm:$0x1] }
 0x254   : > { %v5136_v13 = vrot.slane %v5134_v17, 5  ;;  %v5140_v27 = vrot.slane %v5138_v20, 4  ;;  %v4526_v26 = vsel %vm12207_vm10, 0, %v4525_v34  ;;  %v3636_v44 = vrot.slane %v3634_v48, 4 }
 0x255   : > { %v4629_v60 = vrot.slane %v4627_v58, 7  ;;  %v4387_v61 = vadd.f32 %v12296_v30, %v4351_v49  ;;  %4527 = vst [vmem:[#allocation2 + $0x38] sm:$0x1] %v4526_v26  ;;  %v3637_v43 = vshll.u32 %v9992_v29, 16  ;;  %v10719_v58 = vld [vmem:[%s11089_s8 + $0x9c] sm:$0xff]  ;;  %v3643_v56 = vshll.u32 %v12462_v59, 16 }
 0x256   : > { %v3173_v14 = vpop.f32.mrf.mxu2  ;;  %v5137_v41 = vsel %vm11113_vm2, %v5132_v11, %v5136_v13  ;;  %v5141_v20 = vor.u32 %v5140_v27, %v5136_v13  ;;  %v5146_v11 = vrot.slane %v5144_v15, 5  ;;  %v12480_v26 = vpack.c.b16 %v4171_v7, %v4170_v45  ;;  %v4472_v13 = vld [vmem:[#allocation2 + $0x3c] sm:$0x1] }
 0x257   : > { %v4632_v1 = vor.u32 %v4630_v55, %v4629_v60  ;;  %v4634_v4 = vrot.slane %v4629_v60, 4  ;;  %v4419_v62 = vmax.f32 %v4387_v61, 0.0  ;;  %v3246_v32 = vadd.f32 %v3173_v14, %v11864_v16  ;;  %v3854_v17 = vpop.f32.mrf.mxu3  ;;  %v12478_v16 = vld [vmem:[%s11089_s8 + $0xbc] sm:$0x1]  ;;  %v12483_v14 = vld [vmem:[%s11089_s8 + $0xb4] sm:$0xe] }
 0x258   : > { %v12470_v49 = vpop.f32.mrf.mxu0  ;;  %v3639_v52 = vrot.slane %v3637_v43, 5  ;;  %v5142_v61 = vrot.slane %v5141_v20, 4  ;;  %v4473_v45 = vsel %vm12194_vm8, 0, %v4472_v13  ;;  %v3647_v50 = vshrl.u32 %v12462_v59, 16 }
 0x259   : > { %v4633_v34 = vsel %vm12392_vm14, %v4625_v24, %v4632_v1  ;;  %v4936_v29 = vsel %vm12194_vm8, %v4634_v4, %v4935_v19  ;;  %v4571_v55 = vpack.c.bf16 %v4419_v62, %v4419_v62  ;;  %v3927_v48 = vadd.f32 %v3854_v17, %v3246_v32  ;;  %v5040_v60 = vld [vmem:[#allocation2 + $0x18] sm:$0xf]  ;;  %v10810_v1 = vld [vmem:[%s14697_s3 + $0xf0] sm:$0xff]  ;;  %4474 = vst [vmem:[#allocation2 + $0x3c] sm:$0x1] %v4473_v45 }
 0x25a   : > { %4934 = vst [vmem:[#allocation2 + $0x1c] sm:$0xf] %v4633_v34  ;;  %v5149_v15 = vshrl.u32 %v5040_v60, 16  ;;  %v3640_v27 = vor.u32 %v3639_v52, %v3636_v44  ;;  %v5502_v19 = vunpack.c.l.b16 %v5137_v41  ;;  %v5147_v44 = vsel %vm11113_vm2, %v5142_v61, %v5146_v11  ;;  %6536 = vmatpush.bf16.msrb.mxu0 %v10810_v1  ;;  %v4938_v17 = vld [vmem:[#allocation2 + $0x24] sm:$0xf] }
 0x25b   : > { %4937 = vst [vmem:[#allocation2 + $0x20] sm:$0x1] %v4936_v29  ;;  %v4636_v43 = vshrl.u32 %v4571_v55, 16  ;;  %v4352_v24 = vadd.f32 %v12438_v12, %v3927_v48  ;;  %3215 = vmatmul.bf16.gmra.mxu2 %v10719_v58  ;;  %4321 = vmatmul.bf16.gmra.mxu0 %v12427_v38  ;;  %v4639_v7 = vshll.u32 %v4571_v55, 16  ;;  %v5152_v4 = vshll.u32 %v5040_v60, 16 }
 0x25c   : > { %3896 = vmatmul.bf16.gmra.mxu3 %v3764_v28  ;;  %v5151_v12 = vrot.slane %v5149_v15, 4  ;;  %v5503_v62 = vunpack.c.l.b16 %v5147_v44  ;;  %v3641_v32 = vrot.slane %v3640_v27, 4  ;;  %v3645_v52 = vrot.slane %v3643_v56, 5 }
 0x25d   : > { %v12497_v38 = vrot.slane %v4636_v43, 7  ;;  %v4388_v41 = vadd.f32 %v12296_v30, %v4352_v24  ;;  %v5154_v20 = vrot.slane %v5152_v4, 5  ;;  %v3653_v54 = vshll.u32 %v12478_v16, 16 }
 0x25e   : > { %v3176_v58 = vpop.f32.mrf.mxu2  ;;  %v10062_v55 = vrot.slane %v12483_v14, 9  ;;  %v5533_v60 = vpack.c.b16 %v5503_v62, %v5502_v19  ;;  %v3649_v15 = vrot.slane %v3647_v50, 4  ;;  %v3646_v19 = vsel %vm11113_vm2, %v3641_v32, %v3645_v52 }
 0x25f   : > { %v4641_v28 = vor.u32 %v4639_v7, %v12497_v38  ;;  %v4420_v11 = vmax.f32 %v4388_v41, 0.0  ;;  %v3247_v34 = vadd.f32 %v3176_v58, %v11886_v46  ;;  %v3857_v29 = vpop.f32.mrf.mxu3  ;;  %v4642_v48 = vrot.slane %v12497_v38, 4  ;;  %v10818_v41 = vld [vmem:[%s14697_s3 + $0x130] sm:$0xff]  ;;  %v4528_v58 = vld [vmem:[#allocation2 + $0x44] sm:$0x1] }
 0x260   : > { %v12506_v61 = vpop.f32.mrf.mxu0  ;;  %v5155_v13 = vor.u32 %v5154_v20, %v5151_v12  ;;  %v3655_v1 = vrot.slane %v3653_v54, 5  ;;  %5625 = vmatmul.bf16.gmra.mxu1 %v5533_v60  ;;  %v3650_v7 = vor.u32 %v3649_v15, %v3645_v52  ;;  %v4111_v50 = vrot.slane %v12462_v59, 5 }
 0x261   : > { %v4939_v56 = vsel %vm12342_vm12, %v4641_v28, %v4938_v17  ;;  %v4572_v27 = vpack.c.bf16 %v4420_v11, %v4420_v11  ;;  %v3928_v43 = vadd.f32 %v3857_v29, %v3247_v34  ;;  %v12510_v24 = vld [vmem:[#allocation2 + $0x1c] sm:$0xf]  ;;  %7217 = vmatpush.bf16.msrb.mxu1 %v10818_v41  ;;  %v4942_v28 = vld [vmem:[#allocation2 + $0x2c] sm:$0x1]  ;;  %v12528_v60 = vunpack.c.l.b16 %v3646_v19  ;;  %v9995_v41 = vld [vmem:[%s11089_s8 + $0xc0] sm:$0xf] }
 0x262   : > { %4940 = vst [vmem:[#allocation2 + $0x24] sm:$0xf] %v4939_v56  ;;  %v5086_v46 = vld [vmem:[#allocation2 + $0x20] sm:$0x1]  ;;  %v5156_v45 = vrot.slane %v5155_v13, 4  ;;  %v5158_v14 = vshll.u32 %v12510_v24, 16  ;;  %v12532_v59 = vsel %vm11415_vm5, %v10062_v55, %v4111_v50 }
 0x263   : > { %v4644_v44 = vshrl.u32 %v4572_v27, 16  ;;  %v4647_v12 = vshll.u32 %v4572_v27, 16  ;;  %v4353_v4 = vadd.f32 %v12470_v49, %v3928_v43  ;;  %v5162_v38 = vshrl.u32 %v12510_v24, 16 }
 0x264   : > { %v5160_v62 = vrot.slane %v5158_v14, 5  ;;  %v5168_v17 = vshll.u32 %v5086_v46, 16  ;;  %v3651_v20 = vrot.slane %v3650_v7, 4  ;;  %v4529_v49 = vsel %vm12207_vm10, 0, %v4528_v58  ;;  %v10720_v46 = vld [vmem:[%s11089_s8 + $0xa8] sm:$0xff] }
 0x265   : > { %v4646_v54 = vrot.slane %v4644_v44, 7  ;;  %v4389_v32 = vadd.f32 %v12296_v30, %v4353_v4  ;;  %v5164_v52 = vrot.slane %v5162_v38, 4  ;;  %4530 = vst [vmem:[#allocation2 + $0x44] sm:$0x1] %v4529_v49  ;;  %v3658_v36 = vshrl.u32 %v9995_v41, 16 }
 0x266   : > { %v3178_v11 = vpop.f32.mrf.mxu2  ;;  %v5161_v34 = vsel %vm11113_vm2, %v5156_v45, %v5160_v62  ;;  %v3656_v29 = vsel %vm11113_vm2, %v3651_v20, %v3655_v1  ;;  %v5170_v7 = vrot.slane %v5168_v17, 5  ;;  %v4113_v1 = vrot.slane %v4111_v50, 4  ;;  %v4475_v17 = vld [vmem:[#allocation2 + $0x48] sm:$0x1] }
 0x267   : > { %v4649_v13 = vor.u32 %v4647_v12, %v4646_v54  ;;  %v4651_v15 = vrot.slane %v4646_v54, 4  ;;  %v4421_v56 = vmax.f32 %v4389_v32, 0.0  ;;  %v3248_v27 = vadd.f32 %v3178_v11, %v11901_v63  ;;  %v3859_v43 = vpop.f32.mrf.mxu3 }
 0x268   : > { %v12536_v14 = vpop.f32.mrf.mxu0  ;;  %v5165_v45 = vor.u32 %v5164_v52, %v5160_v62  ;;  %v5504_v44 = vunpack.c.l.b16 %v5161_v34  ;;  %v12543_v58 = vunpack.c.l.b16 %v3656_v29  ;;  %v4114_v20 = vrot.slane %v12478_v16, 5  ;;  %v4945_v29 = vld [vmem:[#allocation2 + $0x30] sm:$0xf] }
 0x269   : > { %v4650_v19 = vsel %vm12392_vm14, %v4642_v48, %v4649_v13  ;;  %v4943_v55 = vsel %vm12194_vm8, %v4651_v15, %v4942_v28  ;;  %v4573_v12 = vpack.c.bf16 %v4421_v56, %v4421_v56  ;;  %v3929_v4 = vadd.f32 %v3859_v43, %v3248_v27  ;;  %v5042_v38 = vld [vmem:[#allocation2 + $0x24] sm:$0xf]  ;;  %v14741_v43 = vld [vmem:[#allocation5_spill] sm:$0xff] }
 0x26a   : > { %4941 = vst [vmem:[#allocation2 + $0x28] sm:$0xf] %v4650_v19  ;;  %v5166_v63 = vrot.slane %v5165_v45, 4  ;;  %v4172_v62 = vunpack.c.l.b16 %v12532_v59  ;;  %v4476_v32 = vsel %vm12194_vm8, 0, %v4475_v17  ;;  %v4115_v52 = vsel %vm11415_vm5, %v4113_v1, %v4114_v20  ;;  %v7339_v6 = vld [vmem:[#allocation2 + $0x24] sm:$0xe] }
 0x26b   : > { %4944 = vst [vmem:[#allocation2 + $0x2c] sm:$0x1] %v4943_v55  ;;  %v4653_v50 = vshrl.u32 %v4573_v12, 16  ;;  %v4656_v54 = vshll.u32 %v4573_v12, 16  ;;  %v4354_v48 = vadd.f32 %v12506_v61, %v3929_v4  ;;  %3220 = vmatmul.bf16.gmra.mxu2 %v10720_v46  ;;  %4326 = vmatmul.bf16.gmra.mxu0 %v12480_v26  ;;  %v5173_v49 = vshrl.u32 %v5042_v38, 16 }
 0x26c   : > { %3901 = vmatmul.bf16.gmra.mxu3 %v3765_v22  ;;  %v5171_v16 = vsel %vm11113_vm2, %v5166_v63, %v5170_v7  ;;  %4477 = vst [vmem:[#allocation2 + $0x48] sm:$0x1] %v4476_v32  ;;  %v5176_v28 = vshll.u32 %v5042_v38, 16  ;;  %v4173_v34 = vunpack.c.l.b16 %v4115_v52  ;;  %v3661_v22 = vshll.u32 %v9995_v41, 16 }
 0x26d   : > { %v12558_v61 = vrot.slane %v4653_v50, 7  ;;  %v4390_v26 = vadd.f32 %v12296_v30, %v4354_v48  ;;  %v5505_v11 = vunpack.c.l.b16 %v5171_v16  ;;  %v5175_v13 = vrot.slane %v5173_v49, 4  ;;  %v10769_v49 = vld [vmem:[%s14697_s3 + $0x28] sm:$0xff] }
 0x26e   : > { %v3181_v59 = vpop.f32.mrf.mxu2  ;;  %v5178_v18 = vrot.slane %v5176_v28, 5  ;;  %v12563_v15 = vadd.f32 %v11960_v37, %v11975_v10  ;;  %v3660_v12 = vrot.slane %v3658_v36, 4  ;;  %v12575_v10 = vld [vmem:[%s11089_s8 + $0xc4] sm:$0xf]  ;;  %v3663_v63 = vrot.slane %v3661_v22, 5  ;;  %5847 = vmatpush.bf16.msrb.mxu2 %v10769_v49 }
 0x26f   : > { %v4658_v56 = vor.u32 %v4656_v54, %v12558_v61  ;;  %v4422_v27 = vmax.f32 %v4390_v26, 0.0  ;;  %v3249_v46 = vadd.f32 %v3181_v59, %v14741_v43  ;;  %v3862_v45 = vpop.f32.mrf.mxu3  ;;  %v4659_v7 = vrot.slane %v12558_v61, 4 }
 0x270   : > { %v5534_v1 = vpack.c.b16 %v5505_v11, %v5504_v44  ;;  %v12568_v19 = vpop.f32.mrf.mxu0  ;;  %v5179_v55 = vor.u32 %v5178_v18, %v5175_v13  ;;  %v3766_v20 = vpack.c.b16 %v12543_v58, %v12528_v60  ;;  %v4191_v44 = vpack.c.b16 %v4173_v34, %v4172_v62  ;;  %v10785_v60 = vld [vmem:[%s14697_s3 + $0xa8] sm:$0xff]  ;;  %v4531_v58 = vld [vmem:[#allocation2 + $0x50] sm:$0x1]  ;;  %v4949_v34 = vld [vmem:[#allocation2 + $0x38] sm:$0x1] }
 0x271   : > { %v4946_v4 = vsel %vm12342_vm12, %v4658_v56, %v4945_v29  ;;  %v4574_v38 = vpack.c.bf16 %v4422_v27, %v4422_v27  ;;  %v3930_v41 = vadd.f32 %v3862_v45, %v3249_v46  ;;  %v12572_v37 = vld [vmem:[#allocation2 + $0x28] sm:$0xf]  ;;  %v3664_v62 = vor.u32 %v3663_v63, %v3660_v12  ;;  %6224 = vmatpush.bf16.msrb.mxu3 %v10785_v60  ;;  %v10721_v12 = vld [vmem:[%s11089_s8 + $0xb4] sm:$0xff] }
 0x272   : > { %4947 = vst [vmem:[#allocation2 + $0x30] sm:$0xf] %v4946_v4  ;;  %5630 = vmatmul.bf16.gmra.mxu1 %v5534_v1  ;;  %v12579_v17 = vld [vmem:[#allocation2 + $0x2c] sm:$0x1]  ;;  %v5180_v50 = vrot.slane %v5179_v55, 4  ;;  %v5182_v54 = vshll.u32 %v12572_v37, 16 }
 0x273   : > { %v4661_v48 = vshrl.u32 %v4574_v38, 16  ;;  %v4664_v32 = vshll.u32 %v4574_v38, 16  ;;  %v4355_v16 = vadd.f32 %v12536_v14, %v3930_v41  ;;  %v5186_v52 = vshrl.u32 %v12572_v37, 16  ;;  %v10809_v13 = vld [vmem:[%s14697_s3 + $0xe8] sm:$0xff] }
 0x274   : > { %v5184_v28 = vrot.slane %v5182_v54, 5  ;;  %v5192_v61 = vshll.u32 %v12579_v17, 16  ;;  %v3667_v26 = vshll.u32 %v12575_v10, 16  ;;  %v4532_v59 = vsel %vm12207_vm10, 0, %v4531_v58  ;;  %v9997_v4 = vld [vmem:[%s11089_s8 + $0xc8] sm:$0x1]  ;;  %6537 = vmatpush.bf16.msrb.mxu0 %v10809_v13 }
 0x275   : > { %v4663_v11 = vrot.slane %v4661_v48, 7  ;;  %v4391_v14 = vadd.f32 %v12296_v30, %v4355_v16  ;;  %v5188_v29 = vrot.slane %v5186_v52, 4  ;;  %4533 = vst [vmem:[#allocation2 + $0x50] sm:$0x1] %v4532_v59  ;;  %v3665_v56 = vrot.slane %v3664_v62, 4 }
 0x276   : > { %v3183_v18 = vpop.f32.mrf.mxu2  ;;  %v5185_v36 = vsel %vm11113_vm2, %v5180_v50, %v5184_v28  ;;  %v5194_v22 = vrot.slane %v5192_v61, 5  ;;  %v3669_v27 = vrot.slane %v3667_v26, 5  ;;  %v3671_v54 = vshrl.u32 %v12575_v10, 16  ;;  %v10047_v48 = vld [vmem:[%s11089_s8 + $0xc0] sm:$0xe] }
 0x277   : > { %v4666_v43 = vor.u32 %v4664_v32, %v4663_v11  ;;  %v4668_v46 = vrot.slane %v4663_v11, 4  ;;  %v4423_v45 = vmax.f32 %v4391_v14, 0.0  ;;  %v3250_v1 = vadd.f32 %v3183_v18, %v12425_v25  ;;  %v3864_v55 = vpop.f32.mrf.mxu3  ;;  %v4478_v59 = vld [vmem:[#allocation2 + $0x54] sm:$0x1]  ;;  %v4952_v18 = vld [vmem:[#allocation2 + $0x3c] sm:$0xf] }
 0x278   : > { %v12603_v38 = vpop.f32.mrf.mxu0  ;;  %v5189_v41 = vor.u32 %v5188_v29, %v5184_v28  ;;  %v5506_v63 = vunpack.c.l.b16 %v5185_v36  ;;  %v3670_v50 = vsel %vm11113_vm2, %v3665_v56, %v3669_v27  ;;  %v3673_v61 = vrot.slane %v3671_v54, 4 }
 0x279   : > { %v4667_v32 = vsel %vm12392_vm14, %v4659_v7, %v4666_v43  ;;  %v4950_v25 = vsel %vm12194_vm8, %v4668_v46, %v4949_v34  ;;  %v4575_v16 = vpack.c.bf16 %v4423_v45, %v4423_v45  ;;  %v3931_v52 = vadd.f32 %v3864_v55, %v3250_v1  ;;  %v10808_v45 = vld [vmem:[%s14697_s3 + $0xe0] sm:$0xff] }
 0x27a   : > { %4948 = vst [vmem:[#allocation2 + $0x34] sm:$0xf] %v4667_v32  ;;  %v5190_v49 = vrot.slane %v5189_v41, 4  ;;  %v3677_v60 = vshll.u32 %v9997_v4, 16  ;;  %v12613_v28 = vunpack.c.l.b16 %v3670_v50  ;;  %v10063_v11 = vrot.slane %v10047_v48, 9  ;;  %6538 = vmatpush.bf16.msrb.mxu0 %v10808_v45  ;;  %v10722_v45 = vld [vmem:[%s11089_s8 + $0xc0] sm:$0xff] }
 0x27b   : > { %4951 = vst [vmem:[#allocation2 + $0x38] sm:$0x1] %v4950_v25  ;;  %v4670_v58 = vshrl.u32 %v4575_v16, 16  ;;  %v4673_v62 = vshll.u32 %v4575_v16, 16  ;;  %v4356_v26 = vadd.f32 %v12568_v19, %v3931_v52  ;;  %3225 = vmatmul.bf16.gmra.mxu2 %v10721_v12  ;;  %4331 = vmatmul.bf16.gmra.mxu0 %v4191_v44  ;;  %v3674_v34 = vor.u32 %v3673_v61, %v3669_v27  ;;  %v10784_v27 = vld [vmem:[%s14697_s3 + $0xa0] sm:$0xff] }
 0x27c   : > { %3906 = vmatmul.bf16.gmra.mxu3 %v3766_v20  ;;  %v5195_v7 = vsel %vm11113_vm2, %v5190_v49, %v5194_v22  ;;  %v3679_v14 = vrot.slane %v3677_v60, 5  ;;  %v4118_v29 = vrot.slane %v12575_v10, 5  ;;  %v4121_v43 = vrot.slane %v9997_v4, 5  ;;  %v10768_v10 = vld [vmem:[%s14697_s3 + $0x20] sm:$0xff]  ;;  %v5044_v50 = vld [vmem:[#allocation2 + $0x30] sm:$0xf] }
 0x27d   : > { %v12619_v13 = vrot.slane %v4670_v58, 7  ;;  %v4392_v36 = vadd.f32 %v12296_v30, %v4356_v26  ;;  %v5507_v56 = vunpack.c.l.b16 %v5195_v7  ;;  %v3675_v46 = vrot.slane %v3674_v34, 4  ;;  %5848 = vmatpush.bf16.msrb.mxu2 %v10768_v10  ;;  %6225 = vmatpush.bf16.msrb.mxu3 %v10784_v27  ;;  %v4956_v10 = vld [vmem:[#allocation2 + $0x44] sm:$0x1] }
 0x27e   : > { %v3186_v19 = vpop.f32.mrf.mxu2  ;;  %v4119_v20 = vsel %vm11415_vm5, %v10063_v11, %v4118_v29  ;;  %v4120_v44 = vrot.slane %v4118_v29, 4  ;;  %v4479_v22 = vsel %vm12194_vm8, 0, %v4478_v59  ;;  %v12655_v58 = vadd.f32 %v11992_v23, %v12009_v9  ;;  %v10767_v23 = vld [vmem:[%s14697_s3 + $0x18] sm:$0xff] }
 0x27f   : > { %v4675_v1 = vor.u32 %v4673_v62, %v12619_v13  ;;  %v4676_v55 = vrot.slane %v12619_v13, 4  ;;  %v4424_v12 = vmax.f32 %v4392_v36, 0.0  ;;  %v3251_v4 = vadd.f32 %v3186_v19, %v11966_v47  ;;  %v3867_v41 = vpop.f32.mrf.mxu3  ;;  %4480 = vst [vmem:[#allocation2 + $0x54] sm:$0x1] %v4479_v22  ;;  %v4534_v36 = vld [vmem:[#allocation2 + $0x5c] sm:$0x1] }
 0x280   : > { %v5535_v54 = vpack.c.b16 %v5507_v56, %v5506_v63  ;;  %v12638_v48 = vpop.f32.mrf.mxu0  ;;  %v3680_v32 = vsel %vm11113_vm2, %v3675_v46, %v3679_v14  ;;  %v4122_v25 = vsel %vm11415_vm5, %v4120_v44, %v4121_v43  ;;  %v4174_v16 = vunpack.c.l.b16 %v4119_v20  ;;  %v12651_v63 = vld [vmem:[%s11089_s8 + $0xcc] sm:$0xf] }
 0x281   : > { %v4953_v52 = vsel %vm12342_vm12, %v4675_v1, %v4952_v18  ;;  %v4576_v47 = vpack.c.bf16 %v4424_v12, %v4424_v12  ;;  %v3932_v49 = vadd.f32 %v3867_v41, %v3251_v4  ;;  %v12646_v61 = vunpack.c.l.b16 %v3680_v32  ;;  %v12648_v60 = vld [vmem:[#allocation2 + $0x34] sm:$0xf]  ;;  %v10817_v18 = vld [vmem:[%s14697_s3 + $0x128] sm:$0xff]  ;;  %5849 = vmatpush.bf16.msrb.mxu2 %v10767_v23 }
 0x282   : > { %4954 = vst [vmem:[#allocation2 + $0x3c] sm:$0xf] %v4953_v52  ;;  %5635 = vmatmul.bf16.gmra.mxu1 %v5535_v54  ;;  %v4175_v62 = vunpack.c.l.b16 %v4122_v25  ;;  %v5088_v26 = vld [vmem:[#allocation2 + $0x38] sm:$0x1]  ;;  %v5197_v11 = vshrl.u32 %v5044_v50, 16  ;;  %v5200_v7 = vshll.u32 %v5044_v50, 16 }
 0x283   : > { %v4678_v34 = vshrl.u32 %v4576_v47, 16  ;;  %v4681_v14 = vshll.u32 %v4576_v47, 16  ;;  %v4357_v29 = vadd.f32 %v12603_v38, %v3932_v49  ;;  %v3767_v59 = vpack.c.b16 %v12646_v61, %v12613_v28  ;;  %v10783_v38 = vld [vmem:[%s14697_s3 + $0x98] sm:$0xff]  ;;  %7218 = vmatpush.bf16.msrb.mxu1 %v10817_v18  ;;  %v10782_v23 = vld [vmem:[%s14697_s3 + $0x90] sm:$0xff] }
 0x284   : > { %v4192_v9 = vpack.c.b16 %v4175_v62, %v4174_v16  ;;  %v5199_v56 = vrot.slane %v5197_v11, 4  ;;  %v5202_v43 = vrot.slane %v5200_v7, 5  ;;  %v5206_v19 = vshll.u32 %v12648_v60, 16  ;;  %v10807_v28 = vld [vmem:[%s14697_s3 + $0xd8] sm:$0xff]  ;;  %6226 = vmatpush.bf16.msrb.mxu3 %v10783_v38  ;;  %v12681_v16 = vld [vmem:[%s11089_s8 + $0xd0] sm:$0xf] }
 0x285   : > { %v4680_v46 = vrot.slane %v4678_v34, 7  ;;  %v4393_v20 = vadd.f32 %v12296_v30, %v4357_v29  ;;  %v5210_v44 = vshrl.u32 %v12648_v60, 16  ;;  %v5216_v22 = vshll.u32 %v5088_v26, 16  ;;  %6539 = vmatpush.bf16.msrb.mxu0 %v10807_v28  ;;  %v12692_v34 = vld [vmem:[%s11089_s8 + $0xd4] sm:$0x1] }
 0x286   : > { %v3188_v27 = vpop.f32.mrf.mxu2  ;;  %v5203_v1 = vor.u32 %v5202_v43, %v5199_v56  ;;  %v5208_v12 = vrot.slane %v5206_v19, 5  ;;  %v4535_v4 = vsel %vm12207_vm10, 0, %v4534_v36  ;;  %v3682_v41 = vshrl.u32 %v12651_v63, 16 }
 0x287   : > { %v4683_v50 = vor.u32 %v4681_v14, %v4680_v46  ;;  %v4685_v30 = vrot.slane %v4680_v46, 4  ;;  %v4425_v54 = vmax.f32 %v4393_v20, 0.0  ;;  %v3252_v32 = vadd.f32 %v3188_v27, %v12563_v15  ;;  %v3869_v25 = vpop.f32.mrf.mxu3  ;;  %4536 = vst [vmem:[#allocation2 + $0x5c] sm:$0x1] %v4535_v4  ;;  %v10048_v14 = vld [vmem:[%s11089_s8 + $0xcc] sm:$0xe] }
 0x288   : > { %v12683_v52 = vpop.f32.mrf.mxu0  ;;  %v5204_v47 = vrot.slane %v5203_v1, 4  ;;  %v5212_v49 = vrot.slane %v5210_v44, 4  ;;  %v5218_v61 = vrot.slane %v5216_v22, 5  ;;  %v3684_v62 = vrot.slane %v3682_v41, 4  ;;  %v10806_v44 = vld [vmem:[%s14697_s3 + $0xd0] sm:$0xff]  ;;  %6227 = vmatpush.bf16.msrb.mxu3 %v10782_v23 }
 0x289   : > { %v4684_v26 = vsel %vm12392_vm14, %v4676_v55, %v4683_v50  ;;  %v4957_v11 = vsel %vm12194_vm8, %v4685_v30, %v4956_v10  ;;  %v4577_v7 = vpack.c.bf16 %v4425_v54, %v4425_v54  ;;  %v3933_v15 = vadd.f32 %v3869_v25, %v3252_v32  ;;  %v10766_v55 = vld [vmem:[%s14697_s3 + $0x10] sm:$0xff]  ;;  %v4959_v27 = vld [vmem:[#allocation2 + $0x48] sm:$0xf]  ;;  %6540 = vmatpush.bf16.msrb.mxu0 %v10806_v44  ;;  %v10764_v44 = vld [vmem:[%s14697_s3] sm:$0xff] }
 0x28a   : > { %4955 = vst [vmem:[#allocation2 + $0x40] sm:$0xf] %v4684_v26  ;;  %v5209_v29 = vsel %vm11113_vm2, %v5204_v47, %v5208_v12  ;;  %v5213_v18 = vor.u32 %v5212_v49, %v5208_v12  ;;  %v3685_v36 = vshll.u32 %v12651_v63, 16  ;;  %v3691_v13 = vshll.u32 %v12681_v16, 16  ;;  %5850 = vmatpush.bf16.msrb.mxu2 %v10766_v55  ;;  %v10765_v50 = vld [vmem:[%s14697_s3 + $0x8] sm:$0xff] }
 0x28b   : > { %4958 = vst [vmem:[#allocation2 + $0x44] sm:$0x1] %v4957_v11  ;;  %v4687_v56 = vshrl.u32 %v4577_v7, 16  ;;  %v4690_v43 = vshll.u32 %v4577_v7, 16  ;;  %v4358_v19 = vadd.f32 %v12638_v48, %v3933_v15  ;;  %3230 = vmatmul.bf16.gmra.mxu2 %v10722_v45  ;;  %4336 = vmatmul.bf16.gmra.mxu0 %v4192_v9  ;;  %v5508_v38 = vunpack.c.l.b16 %v5209_v29  ;;  %v12715_v48 = vld [vmem:[%s14696_s2] ss:$0 sm:$0xff] }
 0x28c   : > { %3911 = vmatmul.bf16.gmra.mxu3 %v3767_v59  ;;  %v5214_v63 = vrot.slane %v5213_v18, 4  ;;  %v3687_v28 = vrot.slane %v3685_v36, 5  ;;  %v3693_v46 = vrot.slane %v3691_v13, 5  ;;  %v3695_v20 = vshrl.u32 %v12681_v16, 16  ;;  %v10781_v30 = vld [vmem:[%s14697_s3 + $0x88] sm:$0xff] }
 0x28d   : > { %v12710_v22 = vrot.slane %v4687_v56, 7  ;;  %v4394_v9 = vadd.f32 %v12715_v48, %v4358_v19  ;;  %v3701_v59 = vshll.u32 %v12692_v34, 16  ;;  %v10064_v10 = vrot.slane %v10048_v14, 9  ;;  %v4481_v18 = vld [vmem:[#allocation2 + $0x60] sm:$0x1]  ;;  %6228 = vmatpush.bf16.msrb.mxu3 %v10781_v30 }
 0x28e   : > { %v3191_v45 = vpop.f32.mrf.mxu2  ;;  %v5219_v1 = vsel %vm11113_vm2, %v5214_v63, %v5218_v61  ;;  %v3688_v12 = vor.u32 %v3687_v28, %v3684_v62  ;;  %v3697_v4 = vrot.slane %v3695_v20, 4  ;;  %v4125_v41 = vrot.slane %v12681_v16, 5  ;;  %v10805_v16 = vld [vmem:[%s14697_s3 + $0xc8] sm:$0xff]  ;;  %5851 = vmatpush.bf16.msrb.mxu2 %v10765_v50  ;;  %v5046_v56 = vld [vmem:[#allocation2 + $0x3c] sm:$0xf] }
 0x28f   : > { %v4692_v54 = vor.u32 %v4690_v43, %v12710_v22  ;;  %v4693_v32 = vrot.slane %v12710_v22, 4  ;;  %v4426_v25 = vmax.f32 %v4394_v9, 0.0  ;;  %v3253_v47 = vadd.f32 %v3191_v45, %v12002_v42  ;;  %v3872_v49 = vpop.f32.mrf.mxu3  ;;  %6541 = vmatpush.bf16.msrb.mxu0 %v10805_v16 }
 0x290   : > { %v5509_v61 = vunpack.c.l.b16 %v5219_v1  ;;  %v12734_v62 = vpop.f32.mrf.mxu0  ;;  %v3689_v26 = vrot.slane %v3688_v12, 4  ;;  %v3698_v11 = vor.u32 %v3697_v4, %v3693_v46  ;;  %v3703_v7 = vrot.slane %v3701_v59, 5  ;;  %v4963_v4 = vld [vmem:[#allocation2 + $0x50] sm:$0x1] }
 0x291   : > { %v4960_v15 = vsel %vm12342_vm12, %v4692_v54, %v4959_v27  ;;  %v4578_v14 = vpack.c.bf16 %v4426_v25, %v4426_v25  ;;  %v3934_v29 = vadd.f32 %v3872_v49, %v3253_v47  ;;  %v4126_v42 = vsel %vm11415_vm5, %v10064_v10, %v4125_v41  ;;  %v12743_v20 = vld [vmem:[#allocation2 + $0x40] sm:$0xf] }
 0x292   : > { %4961 = vst [vmem:[#allocation2 + $0x48] sm:$0xf] %v4960_v15  ;;  %v5536_v36 = vpack.c.b16 %v5509_v61, %v5508_v38  ;;  %v3694_v13 = vsel %vm11113_vm2, %v3689_v26, %v3693_v46  ;;  %v3699_v55 = vrot.slane %v3698_v11, 4  ;;  %v4127_v23 = vrot.slane %v4125_v41, 4  ;;  %v10780_v38 = vld [vmem:[%s14697_s3 + $0x80] sm:$0xff]  ;;  %5852 = vmatpush.bf16.msrb.mxu2 %v10764_v44  ;;  %v10723_v26 = vld [vmem:[%s11089_s8 + $0xcc] sm:$0xff] }
 0x293   : > { %v4695_v43 = vshrl.u32 %v4578_v14, 16  ;;  %v4698_v19 = vshll.u32 %v4578_v14, 16  ;;  %v4359_v63 = vadd.f32 %v12683_v52, %v3934_v29  ;;  %v3751_v28 = vunpack.c.l.b16 %v3694_v13  ;;  %v10804_v10 = vld [vmem:[%s14697_s3 + $0xc0] sm:$0xff]  ;;  %6229 = vmatpush.bf16.msrb.mxu3 %v10780_v38 }
 0x294   : > { %5640 = vmatmul.bf16.gmra.mxu1 %v5536_v36  ;;  %v3704_v46 = vsel %vm11113_vm2, %v3699_v55, %v3703_v7  ;;  %v4128_v9 = vrot.slane %v12692_v34, 5  ;;  %v4176_v59 = vunpack.c.l.b16 %v4126_v42  ;;  %v4482_v52 = vsel %vm12194_vm8, 0, %v4481_v18  ;;  %6542 = vmatpush.bf16.msrb.mxu0 %v10804_v10  ;;  %v12768_v14 = vld [vmem:[#allocation2 + $0x44] sm:$0x1]  ;;  %v4537_v55 = vld [vmem:[#allocation2 + $0x68] sm:$0x1] }
 0x295   : > { %v4697_v27 = vrot.slane %v4695_v43, 7  ;;  %v4395_v45 = vadd.f32 %v12715_v48, %v4359_v63  ;;  %v3752_v1 = vunpack.c.l.b16 %v3704_v46  ;;  %4483 = vst [vmem:[#allocation2 + $0x60] sm:$0x1] %v4482_v52  ;;  %v5221_v12 = vshrl.u32 %v5046_v56, 16 }
 0x296   : > { %v3193_v41 = vpop.f32.mrf.mxu2  ;;  %v4129_v34 = vsel %vm11415_vm5, %v4127_v23, %v4128_v9  ;;  %v5224_v50 = vshll.u32 %v5046_v56, 16  ;;  %v5230_v30 = vshll.u32 %v12743_v20, 16  ;;  %v5234_v54 = vshrl.u32 %v12743_v20, 16  ;;  %v5934_v23 = vld [vmem:[#allocation2] sm:$0xe] }
 0x297   : > { %v4700_v25 = vor.u32 %v4698_v19, %v4697_v27  ;;  %v4702_v47 = vrot.slane %v4697_v27, 4  ;;  %v4427_v49 = vmax.f32 %v4395_v45, 0.0  ;;  %v3254_v16 = vadd.f32 %v3193_v41, %v12655_v58  ;;  %v3874_v61 = vpop.f32.mrf.mxu3  ;;  %v11014_v27 = vld [vmem:[#allocation2 + $0x4] sm:$0xf]  ;;  %v4966_v45 = vld [vmem:[#allocation2 + $0x54] sm:$0xf] }
 0x298   : > { %v12766_v11 = vpop.f32.mrf.mxu0  ;;  %v3768_v7 = vpack.c.b16 %v3752_v1, %v3751_v28  ;;  %v4177_v15 = vunpack.c.l.b16 %v4129_v34  ;;  %v5223_v29 = vrot.slane %v5221_v12, 4  ;;  %v5226_v42 = vrot.slane %v5224_v50, 5  ;;  %v11015_v34 = vld [vmem:[#allocation2 + $0x8] sm:$0x1]  ;;  %8636 = vmatpush.bf16.msra.mxu0 %v10859_v3 }
 0x299   : > { %v4701_v18 = vsel %vm12392_vm14, %v4693_v32, %v4700_v25  ;;  %v4964_v36 = vsel %vm12194_vm8, %v4702_v47, %v4963_v4  ;;  %v4579_v13 = vpack.c.bf16 %v4427_v49, %v4427_v49  ;;  %v3935_v58 = vadd.f32 %v3874_v61, %v3254_v16  ;;  %v5048_v52 = vld [vmem:[#allocation2 + $0x48] sm:$0xf]  ;;  %v4484_v49 = vld [vmem:[#allocation2 + $0x6c] sm:$0x1] }
 0x29a   : > { %4962 = vst [vmem:[#allocation2 + $0x4c] sm:$0xf] %v4701_v18  ;;  %v4193_v56 = vpack.c.b16 %v4177_v15, %v4176_v59  ;;  %v5227_v43 = vor.u32 %v5226_v42, %v5223_v29  ;;  %v5232_v19 = vrot.slane %v5230_v30, 5  ;;  %v5236_v63 = vrot.slane %v5234_v54, 4 }
 0x29b   : > { %v12778_v28 = vadd.f32 %v12022_v8, %v12030_v51  ;;  %4965 = vst [vmem:[#allocation2 + $0x50] sm:$0x1] %v4964_v36  ;;  %v4704_v22 = vshrl.u32 %v4579_v13, 16  ;;  %v4360_v32 = vadd.f32 %v12734_v62, %v3935_v58  ;;  %3235 = vmatmul.bf16.gmra.mxu2 %v10723_v26  ;;  %v5240_v44 = vshll.u32 %v12768_v14, 16 }
 0x29c   : > { %3916 = vmatmul.bf16.gmra.mxu3 %v3768_v7  ;;  %4341 = vmatmul.bf16.gmra.mxu0 %v4193_v56  ;;  %v5228_v38 = vrot.slane %v5227_v43, 4  ;;  %v5237_v46 = vor.u32 %v5236_v63, %v5232_v19  ;;  %v4538_v9 = vsel %vm12207_vm10, 0, %v4537_v55  ;;  %v10225_v59 = vrot.slane %v5934_v23, 9 }
 0x29d   : > { %v12784_v10 = vrot.slane %v4704_v22, 7  ;;  %v4707_v8 = vshll.u32 %v4579_v13, 16  ;;  %v4396_v51 = vadd.f32 %v12715_v48, %v4360_v32  ;;  %4539 = vst [vmem:[#allocation2 + $0x68] sm:$0x1] %v4538_v9  ;;  %v5984_v62 = vrot.slane %v11014_v27, 5 }
 0x29e   : > { %v3196_v1 = vpop.f32.mrf.mxu2  ;;  %v5233_v12 = vsel %vm11113_vm2, %v5228_v38, %v5232_v19  ;;  %v5238_v4 = vrot.slane %v5237_v46, 4  ;;  %v5242_v41 = vrot.slane %v5240_v44, 5  ;;  %v5987_v50 = vrot.slane %v11015_v34, 5  ;;  %v10816_v44 = vld [vmem:[%s14697_s3 + $0x120] sm:$0xff]  ;;  %v4540_v27 = vld [vmem:[#allocation2 + $0x74] sm:$0x1] }
 0x29f   : > { %v4709_v30 = vor.u32 %v4707_v8, %v12784_v10  ;;  %v4428_v54 = vmax.f32 %v4396_v51, 0.0  ;;  %v3255_v25 = vadd.f32 %v3196_v1, %v12024_v33  ;;  %v3877_v47 = vpop.f32.mrf.mxu3  ;;  %v5245_v16 = vshrl.u32 %v5048_v52, 16  ;;  %7219 = vmatpush.bf16.msrb.mxu1 %v10816_v44 }
 0x2a0   : > { %v5243_v61 = vsel %vm11113_vm2, %v5238_v4, %v5242_v41  ;;  %v5510_v26 = vunpack.c.l.b16 %v5233_v12  ;;  %v4304_v7 = vpop.f32.mrf.mxu0  ;;  %v5985_v15 = vsel %vm11415_vm5, %v10225_v59, %v5984_v62  ;;  %v5986_v29 = vrot.slane %v5984_v62, 4  ;;  %v4970_v62 = vld [vmem:[#allocation2 + $0x5c] sm:$0x1]  ;;  %v11016_v41 = vld [vmem:[#allocation2 + $0x10] sm:$0xf] }
 0x2a1   : > { %v4967_v42 = vsel %vm12342_vm12, %v4709_v30, %v4966_v45  ;;  %v4580_v18 = vpack.c.bf16 %v4428_v54, %v4428_v54  ;;  %v3936_v36 = vadd.f32 %v3877_v47, %v3255_v25  ;;  %v5511_v13 = vunpack.c.l.b16 %v5243_v61  ;;  %v12797_v58 = vld [vmem:[#allocation2 + $0x4c] sm:$0xf]  ;;  %v10748_v47 = vld [vmem:[#allocation2] sm:$0xff] }
 0x2a2   : > { %v4710_v33 = vrot.slane %v12784_v10, 4  ;;  %4968 = vst [vmem:[#allocation2 + $0x54] sm:$0xf] %v4967_v42  ;;  %v5988_v55 = vsel %vm11415_vm5, %v5986_v29, %v5987_v50  ;;  %v6110_v23 = vunpack.c.l.b16 %v5985_v15  ;;  %v4485_v56 = vsel %vm12194_vm8, 0, %v4484_v49  ;;  %v12804_v43 = vld [vmem:[#allocation2 + $0x50] sm:$0x1] }
 0x2a3   : > { %v4712_v19 = vshrl.u32 %v4580_v18, 16  ;;  %v4361_v63 = vadd.f32 %v12766_v11, %v3936_v36  ;;  %v5537_v22 = vpack.c.b16 %v5511_v13, %v5510_v26  ;;  %4486 = vst [vmem:[#allocation2 + $0x6c] sm:$0x1] %v4485_v56  ;;  %v5247_v32 = vrot.slane %v5245_v16, 4 }
 0x2a4   : > { %v6111_v38 = vunpack.c.l.b16 %v5988_v55  ;;  %v5248_v46 = vshll.u32 %v5048_v52, 16  ;;  %v5254_v9 = vshll.u32 %v12797_v58, 16  ;;  %v5258_v59 = vshrl.u32 %v12797_v58, 16 }
 0x2a5   : > { %v4714_v10 = vrot.slane %v4712_v19, 7  ;;  %v4715_v8 = vshll.u32 %v4580_v18, 16  ;;  %v4397_v51 = vadd.f32 %v12715_v48, %v4361_v63  ;;  %5645 = vmatmul.bf16.gmra.mxu1 %v5537_v22  ;;  %v5264_v11 = vshll.u32 %v12804_v43, 16 }
 0x2a6   : > { %v3198_v45 = vpop.f32.mrf.mxu2  ;;  %v5250_v1 = vrot.slane %v5248_v46, 5  ;;  %v5256_v12 = vrot.slane %v5254_v9, 5  ;;  %v5260_v4 = vrot.slane %v5258_v59, 4  ;;  %v5991_v52 = vrot.slane %v11016_v41, 5  ;;  %v5935_v59 = vld [vmem:[#allocation2 + $0xc] sm:$0xe] }
 0x2a7   : > { %v4717_v34 = vor.u32 %v4715_v8, %v4714_v10  ;;  %v4719_v50 = vrot.slane %v4714_v10, 4  ;;  %v4429_v30 = vmax.f32 %v4397_v51, 0.0  ;;  %v3256_v54 = vadd.f32 %v3198_v45, %v12778_v28  ;;  %v3879_v25 = vpop.f32.mrf.mxu3  ;;  %v10788_v28 = vld [vmem:[#allocation2 + $0xc] sm:$0xff]  ;;  %v4973_v10 = vld [vmem:[#allocation2 + $0x60] sm:$0xf] }
 0x2a8   : > { %v4307_v49 = vpop.f32.mrf.mxu0  ;;  %v6142_v16 = vpack.c.b16 %v6111_v38, %v6110_v23  ;;  %v5251_v61 = vor.u32 %v5250_v1, %v5247_v32  ;;  %v5261_v26 = vor.u32 %v5260_v4, %v5256_v12  ;;  %v4541_v15 = vsel %vm12207_vm10, 0, %v4540_v27  ;;  %v4487_v32 = vld [vmem:[#allocation2 + $0x78] sm:$0x1]  ;;  %v11017_v8 = vld [vmem:[#allocation2 + $0x14] sm:$0x1] }
 0x2a9   : > { %v4718_v29 = vsel %vm12392_vm14, %v4710_v33, %v4717_v34  ;;  %v4971_v42 = vsel %vm12194_vm8, %v4719_v50, %v4970_v62  ;;  %v4581_v18 = vpack.c.bf16 %v4429_v30, %v4429_v30  ;;  %v3937_v36 = vadd.f32 %v3879_v25, %v3256_v54  ;;  %4542 = vst [vmem:[#allocation2 + $0x74] sm:$0x1] %v4541_v15  ;;  %v5050_v15 = vld [vmem:[#allocation2 + $0x54] sm:$0xf] }
 0x2aa   : > { %4969 = vst [vmem:[#allocation2 + $0x58] sm:$0xf] %v4718_v29  ;;  %v5252_v13 = vrot.slane %v5251_v61, 4  ;;  %v5262_v55 = vrot.slane %v5261_v26, 4  ;;  %v5266_v56 = vrot.slane %v5264_v11, 5  ;;  %v5993_v22 = vrot.slane %v5991_v52, 4 }
 0x2ab   : > { %4972 = vst [vmem:[#allocation2 + $0x5c] sm:$0x1] %v4971_v42  ;;  %v4721_v23 = vshrl.u32 %v4581_v18, 16  ;;  %v4362_v19 = vadd.f32 %v4304_v7, %v3937_v36  ;;  %5853 = vmatmul.bf16.vlgmr.msrb.gmra.mxu2 %v10748_v47  ;;  %v4724_v38 = vshll.u32 %v4581_v18, 16  ;;  %v5994_v51 = vrot.slane %v11017_v8, 5 }
 0x2ac   : > { %6230 = vmatmul.bf16.vlgmr.msrb.gmra.mxu3 %v6142_v16  ;;  %6543 = vmatmul.bf16.vlgmr.msrb.gmra.mxu0 %v10788_v28  ;;  %v5257_v33 = vsel %vm11113_vm2, %v5252_v13, %v5256_v12  ;;  %v5267_v63 = vsel %vm11113_vm2, %v5262_v55, %v5266_v56  ;;  %v4488_v11 = vsel %vm12194_vm8, 0, %v4487_v32  ;;  %v10226_v34 = vrot.slane %v5935_v59, 9 }
 0x2ad   : > { %v12825_v44 = vrot.slane %v4721_v23, 7  ;;  %v4398_v46 = vadd.f32 %v12715_v48, %v4362_v19  ;;  %v5513_v9 = vunpack.c.l.b16 %v5267_v63  ;;  %v5512_v12 = vunpack.c.l.b16 %v5257_v33  ;;  %4489 = vst [vmem:[#allocation2 + $0x78] sm:$0x1] %v4488_v11 }
 0x2ae   : > { %v3201_v7 = vpop.f32.mrf.mxu2  ;;  %v5995_v50 = vsel %vm11415_vm5, %v5993_v22, %v5994_v51  ;;  %v5998_v30 = vrot.slane %v12510_v24, 5  ;;  %v5992_v26 = vsel %vm11415_vm5, %v10226_v34, %v5991_v52  ;;  %v5269_v13 = vshrl.u32 %v5050_v15, 16 }
 0x2af   : > { %v4726_v27 = vor.u32 %v4724_v38, %v12825_v44  ;;  %v4430_v62 = vmax.f32 %v4398_v46, 0.0  ;;  %v3257_v45 = vadd.f32 %v3201_v7, %v12048_v2  ;;  %v3882_v1 = vpop.f32.mrf.mxu3  ;;  %v4727_v4 = vrot.slane %v12825_v44, 4  ;;  %v14742_v2 = vld [vmem:[#allocation6_spill] sm:$0xff] }
 0x2b0   : > { %v4309_v41 = vpop.f32.mrf.mxu0  ;;  %v5538_v16 = vpack.c.b16 %v5513_v9, %v5512_v12  ;;  %v2944_v61 = vadd.f32 %v14742_v2, %v12054_v53  ;;  %v6113_v36 = vunpack.c.l.b16 %v5995_v50  ;;  %v5272_v56 = vshll.u32 %v5050_v15, 16  ;;  %v4543_v53 = vld [vmem:[#allocation2 + $0x80] sm:$0x1]  ;;  %v10789_v2 = vld [vmem:[#allocation2 + $0x18] sm:$0xff] }
 0x2b1   : > { %v4974_v54 = vsel %vm12342_vm12, %v4726_v27, %v4973_v10  ;;  %v4582_v25 = vpack.c.bf16 %v4430_v62, %v4430_v62  ;;  %v3938_v47 = vadd.f32 %v3882_v1, %v3257_v45  ;;  %v12842_v29 = vld [vmem:[#allocation2 + $0x58] sm:$0xf]  ;;  %v5271_v52 = vrot.slane %v5269_v13, 4 }
 0x2b2   : > { %4975 = vst [vmem:[#allocation2 + $0x60] sm:$0xf] %v4974_v54  ;;  %v12844_v28 = vld [vmem:[#allocation2 + $0x5c] sm:$0x1]  ;;  %v5278_v23 = vshll.u32 %v12842_v29, 16  ;;  %v5282_v19 = vshrl.u32 %v12842_v29, 16  ;;  %v6112_v27 = vunpack.c.l.b16 %v5992_v26 }
 0x2b3   : > { %v4729_v42 = vshrl.u32 %v4582_v25, 16  ;;  %v4363_v18 = vadd.f32 %v4307_v49, %v3938_v47  ;;  %v4732_v55 = vshll.u32 %v4582_v25, 16  ;;  %v4544_v22 = vsel %vm12207_vm10, 0, %v4543_v53  ;;  %v4977_v49 = vld [vmem:[#allocation2 + $0x68] sm:$0x1]  ;;  %v10749_v47 = vld [vmem:[#allocation2 + $0xc] sm:$0xff] }
 0x2b4   : > { %v5274_v44 = vrot.slane %v5272_v56, 5  ;;  %v5280_v38 = vrot.slane %v5278_v23, 5  ;;  %v5284_v46 = vrot.slane %v5282_v19, 4  ;;  %v5288_v9 = vshll.u32 %v12844_v28, 16  ;;  %4545 = vst [vmem:[#allocation2 + $0x80] sm:$0x1] %v4544_v22 }
 0x2b5   : > { %v4731_v33 = vrot.slane %v4729_v42, 7  ;;  %v4399_v63 = vadd.f32 %v12715_v48, %v4363_v18  ;;  %5650 = vmatmul.bf16.gmra.mxu1 %v5538_v16  ;;  %v5936_v1 = vld [vmem:[#allocation2 + $0x18] sm:$0xe]  ;;  %v6000_v12 = vrot.slane %v5998_v30, 4  ;;  %v6143_v16 = vpack.c.b16 %v6113_v36, %v6112_v27  ;;  %v11018_v23 = vld [vmem:[#allocation2 + $0x20] sm:$0x1] }
 0x2b6   : > { %v3203_v32 = vpop.f32.mrf.mxu2  ;;  %v5275_v62 = vor.u32 %v5274_v44, %v5271_v52  ;;  %v5285_v45 = vor.u32 %v5284_v46, %v5280_v38  ;;  %v5290_v15 = vrot.slane %v5288_v9, 5  ;;  %v10227_v13 = vrot.slane %v5936_v1, 9  ;;  %v5937_v52 = vld [vmem:[#allocation2 + $0x24] sm:$0xe]  ;;  %v4980_v22 = vld [vmem:[#allocation2 + $0x6c] sm:$0xf] }
 0x2b7   : > { %v4734_v59 = vor.u32 %v4732_v55, %v4731_v33  ;;  %v4736_v10 = vrot.slane %v4731_v33, 4  ;;  %v4431_v7 = vmax.f32 %v4399_v63, 0.0  ;;  %v3258_v8 = vadd.f32 %v3203_v32, %v2944_v61  ;;  %v3884_v51 = vpop.f32.mrf.mxu3  ;;  %v4490_v55 = vld [vmem:[#allocation2 + $0x84] sm:$0x1] }
 0x2b8   : > { %v4312_v11 = vpop.f32.mrf.mxu0  ;;  %v5276_v61 = vrot.slane %v5275_v62, 4  ;;  %v5286_v26 = vrot.slane %v5285_v45, 4  ;;  %v6001_v36 = vrot.slane %v11018_v23, 5  ;;  %v4491_v19 = vsel %vm12194_vm8, 0, %v4490_v55  ;;  %v14743_v45 = vld [vmem:[#allocation7_spill] sm:$0xff] }
 0x2b9   : > { %v4735_v34 = vsel %vm12392_vm14, %v4727_v4, %v4734_v59  ;;  %v4978_v50 = vsel %vm12194_vm8, %v4736_v10, %v4977_v49  ;;  %v4583_v54 = vpack.c.bf16 %v4431_v7, %v4431_v7  ;;  %v3939_v25 = vadd.f32 %v3884_v51, %v3258_v8  ;;  %4492 = vst [vmem:[#allocation2 + $0x84] sm:$0x1] %v4491_v19  ;;  %v4984_v23 = vld [vmem:[#allocation2 + $0x74] sm:$0x1] }
 0x2ba   : > { %4976 = vst [vmem:[#allocation2 + $0x64] sm:$0xf] %v4735_v34  ;;  %v5281_v4 = vsel %vm11113_vm2, %v5276_v61, %v5280_v38  ;;  %v5291_v56 = vsel %vm11113_vm2, %v5286_v26, %v5290_v15  ;;  %v12871_v32 = vsel %vm11415_vm5, %v10227_v13, %v5998_v30  ;;  %v12875_v44 = vsel %vm11415_vm5, %v6000_v12, %v6001_v36 }
 0x2bb   : > { %4979 = vst [vmem:[#allocation2 + $0x68] sm:$0x1] %v4978_v50  ;;  %v4738_v42 = vshrl.u32 %v4583_v54, 16  ;;  %v4364_v18 = vadd.f32 %v4309_v41, %v3939_v25  ;;  %5858 = vmatmul.bf16.gmra.mxu2 %v10749_v47  ;;  %v4741_v33 = vshll.u32 %v4583_v54, 16  ;;  %v5515_v63 = vunpack.c.l.b16 %v5291_v56  ;;  %v4546_v56 = vld [vmem:[#allocation2 + $0x8c] sm:$0x1] }
 0x2bc   : > { %6235 = vmatmul.bf16.gmra.mxu3 %v6143_v16  ;;  %6548 = vmatmul.bf16.gmra.mxu0 %v10789_v2  ;;  %v6005_v38 = vrot.slane %v12572_v37, 5  ;;  %v5514_v7 = vunpack.c.l.b16 %v5281_v4  ;;  %v10228_v24 = vrot.slane %v5937_v52, 9  ;;  %v2946_v1 = vadd.f32 %v14743_v45, %v12075_v35  ;;  %v10815_v35 = vld [vmem:[%s14697_s3 + $0x118] sm:$0xff] }
 0x2bd   : > { %v12864_v53 = vrot.slane %v4738_v42, 7  ;;  %v4400_v41 = vadd.f32 %v12715_v48, %v4364_v18  ;;  %v6114_v37 = vunpack.c.l.b16 %v12871_v32  ;;  %v6115_v12 = vunpack.c.l.b16 %v12875_v44  ;;  %v12902_v18 = vpop.f32.mrf.mxu1  ;;  %7220 = vmatpush.bf16.msrb.mxu1 %v10815_v35 }
 0x2be   : > { %v3206_v49 = vpop.f32.mrf.mxu2  ;;  %v5539_v62 = vpack.c.b16 %v5515_v63, %v5514_v7  ;;  %v12892_v50 = vsel %vm11415_vm5, %v10228_v24, %v6005_v38  ;;  %v6007_v2 = vrot.slane %v6005_v38, 4  ;;  %v6705_v3 = vshrl.u32 %v6656_v5, 16 }
 0x2bf   : > { %v4743_v46 = vor.u32 %v4741_v33, %v12864_v53  ;;  %v4432_v9 = vmax.f32 %v4400_v41, 0.0  ;;  %v3259_v59 = vadd.f32 %v3206_v49, %v12069_v21  ;;  %v3887_v10 = vpop.f32.mrf.mxu3  ;;  %v5052_v21 = vld [vmem:[#allocation2 + $0x60] sm:$0xf]  ;;  %v4744_v61 = vrot.slane %v12864_v53, 4 }
 0x2c0   : > { %v12880_v8 = vpop.f32.mrf.mxu0  ;;  %v5293_v16 = vshrl.u32 %v5052_v21, 16  ;;  %v5296_v26 = vshll.u32 %v5052_v21, 16  ;;  %v6144_v45 = vpack.c.b16 %v6115_v12, %v6114_v37 }
 0x2c1   : > { %v4981_v30 = vsel %vm12342_vm12, %v4743_v46, %v4980_v22  ;;  %v4584_v51 = vpack.c.bf16 %v4432_v9, %v4432_v9  ;;  %v3940_v27 = vadd.f32 %v3887_v10, %v3259_v59  ;;  %v12888_v34 = vld [vmem:[#allocation2 + $0x64] sm:$0xf]  ;;  %v4547_v9 = vsel %vm12207_vm10, 0, %v4546_v56  ;;  %v12911_v10 = vld [vmem:[#allocation2 + $0x30] sm:$0xe] }
 0x2c2   : > { %4982 = vst [vmem:[#allocation2 + $0x6c] sm:$0xf] %v4981_v30  ;;  %v12894_v47 = vld [vmem:[#allocation2 + $0x68] sm:$0x1]  ;;  %v5302_v15 = vshll.u32 %v12888_v34, 16  ;;  %v5306_v42 = vshrl.u32 %v12888_v34, 16 }
 0x2c3   : > { %v4746_v54 = vshrl.u32 %v4584_v51, 16  ;;  %v4365_v25 = vadd.f32 %v4312_v11, %v3940_v27  ;;  %v4749_v55 = vshll.u32 %v4584_v51, 16  ;;  %v5295_v4 = vrot.slane %v5293_v16, 4  ;;  %v10750_v27 = vld [vmem:[#allocation2 + $0x18] sm:$0xff]  ;;  %4548 = vst [vmem:[#allocation2 + $0x8c] sm:$0x1] %v4547_v9 }
 0x2c4   : > { %v5298_v19 = vrot.slane %v5296_v26, 5  ;;  %v5304_v33 = vrot.slane %v5302_v15, 5  ;;  %v5308_v41 = vrot.slane %v5306_v42, 4  ;;  %v5312_v53 = vshll.u32 %v12894_v47, 16 }
 0x2c5   : > { %v4748_v13 = vrot.slane %v4746_v54, 7  ;;  %v4401_v11 = vadd.f32 %v12715_v48, %v4365_v25  ;;  %5655 = vmatmul.bf16.gmra.mxu1 %v5539_v62  ;;  %v6008_v59 = vrot.slane %v12579_v17, 5  ;;  %v5939_v62 = vld [vmem:[#allocation2 + $0x3c] sm:$0xe]  ;;  %v10229_v26 = vrot.slane %v12911_v10, 9 }
 0x2c6   : > { %v3208_v36 = vpop.f32.mrf.mxu2  ;;  %v5299_v38 = vor.u32 %v5298_v19, %v5295_v4  ;;  %v5309_v46 = vor.u32 %v5308_v41, %v5304_v33  ;;  %v5314_v25 = vrot.slane %v5312_v53, 5  ;;  %v6116_v15 = vunpack.c.l.b16 %v12892_v50  ;;  %v4987_v4 = vld [vmem:[#allocation2 + $0x78] sm:$0xf] }
 0x2c7   : > { %v4751_v63 = vor.u32 %v4749_v55, %v4748_v13  ;;  %v4753_v52 = vrot.slane %v4748_v13, 4  ;;  %v4433_v22 = vmax.f32 %v4401_v11, 0.0  ;;  %v3260_v49 = vadd.f32 %v3208_v36, %v2946_v1  ;;  %v3889_v32 = vpop.f32.mrf.mxu3  ;;  %v10790_v1 = vld [vmem:[#allocation2 + $0x24] sm:$0xff] }
 0x2c8   : > { %v12906_v44 = vpop.f32.mrf.mxu0  ;;  %v5300_v21 = vrot.slane %v5299_v38, 4  ;;  %v5310_v54 = vrot.slane %v5309_v46, 4  ;;  %v6009_v35 = vsel %vm11415_vm5, %v6007_v2, %v6008_v59  ;;  %v12930_v2 = vpop.f32.mrf.mxu1  ;;  %v6012_v36 = vrot.slane %v12648_v60, 5 }
 0x2c9   : > { %v4752_v7 = vsel %vm12392_vm14, %v4744_v61, %v4751_v63  ;;  %v4985_v24 = vsel %vm12194_vm8, %v4753_v52, %v4984_v23  ;;  %v4585_v30 = vpack.c.bf16 %v4433_v22, %v4433_v22  ;;  %v3941_v51 = vadd.f32 %v3889_v32, %v3260_v49  ;;  %v4493_v61 = vld [vmem:[#allocation2 + $0x90] sm:$0x1] }
 0x2ca   : > { %4983 = vst [vmem:[#allocation2 + $0x70] sm:$0xf] %v4752_v7  ;;  %v5305_v37 = vsel %vm11113_vm2, %v5300_v21, %v5304_v33  ;;  %v5315_v12 = vsel %vm11113_vm2, %v5310_v54, %v5314_v25  ;;  %v6117_v23 = vunpack.c.l.b16 %v6009_v35  ;;  %v10230_v19 = vrot.slane %v5939_v62, 9 }
 0x2cb   : > { %4986 = vst [vmem:[#allocation2 + $0x74] sm:$0x1] %v4985_v24  ;;  %v4755_v17 = vshrl.u32 %v4585_v30, 16  ;;  %v4366_v16 = vadd.f32 %v12880_v8, %v3941_v51  ;;  %5863 = vmatmul.bf16.gmra.mxu2 %v10750_v27  ;;  %v4494_v8 = vsel %vm12194_vm8, 0, %v4493_v61  ;;  %v4758_v13 = vshll.u32 %v4585_v30, 16  ;;  %v14744_v24 = vld [vmem:[#allocation8_spill] sm:$0xff] }
 0x2cc   : > { %6240 = vmatmul.bf16.gmra.mxu3 %v6144_v45  ;;  %6553 = vmatmul.bf16.gmra.mxu0 %v10790_v1  ;;  %v5517_v11 = vunpack.c.l.b16 %v5315_v12  ;;  %4495 = vst [vmem:[#allocation2 + $0x90] sm:$0x1] %v4494_v8  ;;  %v6019_v50 = vrot.slane %v12743_v20, 5  ;;  %v5516_v52 = vunpack.c.l.b16 %v5305_v37  ;;  %v6022_v46 = vrot.slane %v12768_v14, 5  ;;  %v5054_v51 = vld [vmem:[#allocation2 + $0x6c] sm:$0xf] }
 0x2cd   : > { %v12928_v42 = vrot.slane %v4755_v17, 7  ;;  %v4402_v55 = vadd.f32 %v12715_v48, %v4366_v16  ;;  %v6145_v30 = vpack.c.b16 %v6117_v23, %v6116_v15  ;;  %v5317_v21 = vshrl.u32 %v5054_v51, 16  ;;  %v4549_v12 = vld [vmem:[#allocation2 + $0x98] sm:$0x1]  ;;  %v4991_v8 = vld [vmem:[#allocation2 + $0x80] sm:$0x1] }
 0x2ce   : > { %v3211_v56 = vpop.f32.mrf.mxu2  ;;  %v6020_v32 = vsel %vm11415_vm5, %v10230_v19, %v6019_v50  ;;  %v6021_v38 = vrot.slane %v6019_v50, 4  ;;  %v5540_v7 = vpack.c.b16 %v5517_v11, %v5516_v52  ;;  %v5320_v17 = vshll.u32 %v5054_v51, 16 }
 0x2cf   : > { %v4760_v33 = vor.u32 %v4758_v13, %v12928_v42  ;;  %v4434_v41 = vmax.f32 %v4402_v55, 0.0  ;;  %v3261_v53 = vadd.f32 %v3211_v56, %v12093_v31  ;;  %v3892_v63 = vpop.f32.mrf.mxu3  ;;  %v4761_v22 = vrot.slane %v12928_v42, 4 }
 0x2d0   : > { %v4319_v49 = vpop.f32.mrf.mxu0  ;;  %v2948_v31 = vadd.f32 %v14744_v24, %v12099_v0  ;;  %v6023_v62 = vsel %vm11415_vm5, %v6021_v38, %v6022_v46  ;;  %v6120_v54 = vunpack.c.l.b16 %v6020_v32  ;;  %v5319_v37 = vrot.slane %v5317_v21, 4  ;;  %v12956_v23 = vpop.f32.mrf.mxu1  ;;  %v5940_v24 = vld [vmem:[#allocation2 + $0x48] sm:$0xe] }
 0x2d1   : > { %v4988_v9 = vsel %vm12342_vm12, %v4760_v33, %v4987_v4  ;;  %v4586_v20 = vpack.c.bf16 %v4434_v41, %v4434_v41  ;;  %v3942_v59 = vadd.f32 %v3892_v63, %v3261_v53  ;;  %v12945_v27 = vld [vmem:[#allocation2 + $0x70] sm:$0xf]  ;;  %v6121_v15 = vunpack.c.l.b16 %v6023_v62 }
 0x2d2   : > { %4989 = vst [vmem:[#allocation2 + $0x78] sm:$0xf] %v4988_v9  ;;  %v12950_v1 = vld [vmem:[#allocation2 + $0x74] sm:$0x1]  ;;  %v5326_v16 = vshll.u32 %v12945_v27, 16  ;;  %v5330_v0 = vshrl.u32 %v12945_v27, 16 }
 0x2d3   : > { %v4763_v45 = vshrl.u32 %v4586_v20, 16  ;;  %v4367_v14 = vadd.f32 %v12906_v44, %v3942_v59  ;;  %v4766_v25 = vshll.u32 %v4586_v20, 16  ;;  %v5322_v44 = vrot.slane %v5320_v17, 5  ;;  %v10751_v59 = vld [vmem:[#allocation2 + $0x24] sm:$0xff] }
 0x2d4   : > { %v5328_v13 = vrot.slane %v5326_v16, 5  ;;  %v5332_v55 = vrot.slane %v5330_v0, 4  ;;  %v5336_v11 = vshll.u32 %v12950_v1, 16  ;;  %v4550_v52 = vsel %vm12207_vm10, 0, %v4549_v12 }
 0x2d5   : > { %v4765_v35 = vrot.slane %v4763_v45, 7  ;;  %v4403_v61 = vadd.f32 %v12715_v48, %v4367_v14  ;;  %5660 = vmatmul.bf16.gmra.mxu1 %v5540_v7  ;;  %v5323_v53 = vor.u32 %v5322_v44, %v5319_v37  ;;  %v12962_v32 = vpack.c.b16 %v6121_v15, %v6120_v54  ;;  %v10791_v7 = vld [vmem:[#allocation2 + $0x30] sm:$0xff]  ;;  %4551 = vst [vmem:[#allocation2 + $0x98] sm:$0x1] %v4550_v52 }
 0x2d6   : > { %v3213_v42 = vpop.f32.mrf.mxu2  ;;  %v5333_v63 = vor.u32 %v5332_v55, %v5328_v13  ;;  %v5338_v62 = vrot.slane %v5336_v11, 5  ;;  %v6014_v45 = vrot.slane %v6012_v36, 4 }
 0x2d7   : > { %v4768_v4 = vor.u32 %v4766_v25, %v4765_v35  ;;  %v4770_v56 = vrot.slane %v4765_v35, 4  ;;  %v4435_v19 = vmax.f32 %v4403_v61, 0.0  ;;  %v3262_v50 = vadd.f32 %v3213_v42, %v2948_v31  ;;  %v3894_v33 = vpop.f32.mrf.mxu3  ;;  %v4496_v25 = vld [vmem:[#allocation2 + $0x9c] sm:$0x1] }
 0x2d8   : > { %v12958_v41 = vpop.f32.mrf.mxu0  ;;  %v5324_v31 = vrot.slane %v5323_v53, 4  ;;  %v5334_v51 = vrot.slane %v5333_v63, 4  ;;  %v4497_v0 = vsel %vm12194_vm8, 0, %v4496_v25  ;;  %v6026_v35 = vrot.slane %v12797_v58, 5  ;;  %v14745_v58 = vld [vmem:[#allocation10_spill] sm:$0xff] }
 0x2d9   : > { %v4769_v38 = vsel %vm12392_vm14, %v4761_v22, %v4768_v4  ;;  %v4992_v46 = vsel %vm12194_vm8, %v4770_v56, %v4991_v8  ;;  %v4587_v9 = vpack.c.bf16 %v4435_v19, %v4435_v19  ;;  %v3943_v20 = vadd.f32 %v3894_v33, %v3262_v50  ;;  %v11019_v22 = vld [vmem:[#allocation2 + $0x38] sm:$0x1]  ;;  %4498 = vst [vmem:[#allocation2 + $0x9c] sm:$0x1] %v4497_v0  ;;  %v10814_v25 = vld [vmem:[%s14697_s3 + $0x110] sm:$0xff] }
 0x2da   : > { %4990 = vst [vmem:[#allocation2 + $0x7c] sm:$0xf] %v4769_v38  ;;  %v6015_v54 = vrot.slane %v11019_v22, 5  ;;  %v5329_v17 = vsel %vm11113_vm2, %v5324_v31, %v5328_v13  ;;  %v5339_v16 = vsel %vm11113_vm2, %v5334_v51, %v5338_v62  ;;  %v10231_v42 = vrot.slane %v5940_v24, 9  ;;  %v5056_v62 = vld [vmem:[#allocation2 + $0x78] sm:$0xf]  ;;  %7221 = vmatpush.bf16.msrb.mxu1 %v10814_v25 }
 0x2db   : > { %4993 = vst [vmem:[#allocation2 + $0x80] sm:$0x1] %v4992_v46  ;;  %v4772_v14 = vshrl.u32 %v4587_v9, 16  ;;  %v4368_v21 = vadd.f32 %v4319_v49, %v3943_v20  ;;  %5868 = vmatmul.bf16.gmra.mxu2 %v10751_v59  ;;  %v4775_v49 = vshll.u32 %v4587_v9, 16  ;;  %v5519_v12 = vunpack.c.l.b16 %v5339_v16  ;;  %v14746_v59 = vld [vmem:[#allocation11_spill] sm:$0xff] }
 0x2dc   : > { %6245 = vmatmul.bf16.gmra.mxu3 %v6145_v30  ;;  %6558 = vmatmul.bf16.gmra.mxu0 %v10791_v7  ;;  %v4994_v30 = vld [vmem:[#allocation2 + $0x84] sm:$0xf]  ;;  %v5518_v8 = vunpack.c.l.b16 %v5329_v17  ;;  %v6028_v44 = vrot.slane %v6026_v35, 4  ;;  %v6029_v13 = vrot.slane %v12804_v43, 5  ;;  %v6016_v50 = vsel %vm11415_vm5, %v6014_v45, %v6015_v54  ;;  %v14747_v7 = vld [vmem:[#allocation9_spill] sm:$0xff] }
 0x2dd   : > { %v12977_v61 = vrot.slane %v4772_v14, 7  ;;  %v4404_v37 = vadd.f32 %v12715_v48, %v4368_v21  ;;  %v12982_v4 = vpop.f32.mrf.mxu1  ;;  %v6027_v52 = vsel %vm11415_vm5, %v10231_v42, %v6026_v35  ;;  %v2950_v24 = vadd.f32 %v14747_v7, %v14746_v59  ;;  %v10792_v7 = vld [vmem:[#allocation2 + $0x3c] sm:$0xff] }
 0x2de   : > { %v3216_v15 = vpop.f32.mrf.mxu2  ;;  %v5541_v53 = vpack.c.b16 %v5519_v12, %v5518_v8  ;;  %v6030_v43 = vsel %vm11415_vm5, %v6028_v44, %v6029_v13  ;;  %v6013_v31 = vsel %vm11415_vm5, %v10229_v26, %v6012_v36  ;;  %v6119_v51 = vunpack.c.l.b16 %v6016_v50 }
 0x2df   : > { %v4777_v55 = vor.u32 %v4775_v49, %v12977_v61  ;;  %v4436_v11 = vmax.f32 %v4404_v37, 0.0  ;;  %v3263_v56 = vadd.f32 %v3216_v15, %v14745_v58  ;;  %v3897_v19 = vpop.f32.mrf.mxu3  ;;  %v4778_v33 = vrot.slane %v12977_v61, 4  ;;  %v4998_v49 = vld [vmem:[#allocation2 + $0x8c] sm:$0x1] }
 0x2e0   : > { %v4324_v63 = vpop.f32.mrf.mxu0  ;;  %v6123_v20 = vunpack.c.l.b16 %v6030_v43  ;;  %v5341_v54 = vshrl.u32 %v5056_v62, 16  ;;  %v6122_v60 = vunpack.c.l.b16 %v6027_v52  ;;  %v5344_v10 = vshll.u32 %v5056_v62, 16 }
 0x2e1   : > { %v4995_v38 = vsel %vm12342_vm12, %v4777_v55, %v4994_v30  ;;  %v4588_v46 = vpack.c.bf16 %v4436_v11, %v4436_v11  ;;  %v3944_v9 = vadd.f32 %v3897_v19, %v3263_v56  ;;  %v13002_v45 = vld [vmem:[#allocation2 + $0x7c] sm:$0xf]  ;;  %v6118_v56 = vunpack.c.l.b16 %v6013_v31 }
 0x2e2   : > { %4996 = vst [vmem:[#allocation2 + $0x84] sm:$0xf] %v4995_v38  ;;  %v13005_v22 = vld [vmem:[#allocation2 + $0x80] sm:$0x1]  ;;  %v5350_v16 = vshll.u32 %v13002_v45, 16  ;;  %v5354_v26 = vshrl.u32 %v13002_v45, 16  ;;  %v13013_v61 = vpack.c.b16 %v6123_v20, %v6122_v60 }
 0x2e3   : > { %v4780_v14 = vshrl.u32 %v4588_v46, 16  ;;  %v4369_v21 = vadd.f32 %v12958_v41, %v3944_v9  ;;  %v4783_v17 = vshll.u32 %v4588_v46, 16  ;;  %v5343_v35 = vrot.slane %v5341_v54, 4  ;;  %v4552_v41 = vld [vmem:[#allocation2 + $0xa4] sm:$0x1]  ;;  %v10752_v9 = vld [vmem:[#allocation2 + $0x30] sm:$0xff] }
 0x2e4   : > { %v5346_v12 = vrot.slane %v5344_v10, 5  ;;  %v5352_v30 = vrot.slane %v5350_v16, 5  ;;  %v5356_v15 = vrot.slane %v5354_v26, 4  ;;  %v5360_v8 = vshll.u32 %v13005_v22, 16  ;;  %v5941_v20 = vld [vmem:[#allocation2 + $0x54] sm:$0xe] }
 0x2e5   : > { %v4782_v36 = vrot.slane %v4780_v14, 7  ;;  %v4405_v0 = vadd.f32 %v12715_v48, %v4369_v21  ;;  %5665 = vmatmul.bf16.gmra.mxu1 %v5541_v53  ;;  %v13016_v55 = vpop.f32.mrf.mxu1  ;;  %v4553_v53 = vsel %vm12207_vm10, 0, %v4552_v41  ;;  %v6146_v59 = vpack.c.b16 %v6119_v51, %v6118_v56  ;;  %v4499_v54 = vld [vmem:[#allocation2 + $0xa8] sm:$0x1] }
 0x2e6   : > { %v3218_v37 = vpop.f32.mrf.mxu2  ;;  %v5347_v19 = vor.u32 %v5346_v12, %v5343_v35  ;;  %v5357_v50 = vor.u32 %v5356_v15, %v5352_v30  ;;  %4554 = vst [vmem:[#allocation2 + $0xa4] sm:$0x1] %v4553_v53  ;;  %v5362_v62 = vrot.slane %v5360_v8, 5  ;;  %v4500_v51 = vsel %vm12194_vm8, 0, %v4499_v54  ;;  %v14748_v15 = vld [vmem:[#allocation13_spill] sm:$0xff] }
 0x2e7   : > { %v4785_v42 = vor.u32 %v4783_v17, %v4782_v36  ;;  %v4787_v44 = vrot.slane %v4782_v36, 4  ;;  %v4437_v13 = vmax.f32 %v4405_v0, 0.0  ;;  %v3264_v11 = vadd.f32 %v3218_v37, %v2950_v24  ;;  %v3899_v48 = vpop.f32.mrf.mxu3  ;;  %4501 = vst [vmem:[#allocation2 + $0xa8] sm:$0x1] %v4500_v51  ;;  %v5001_v36 = vld [vmem:[#allocation2 + $0x90] sm:$0xf] }
 0x2e8   : > { %v4327_v58 = vpop.f32.mrf.mxu0  ;;  %v5348_v24 = vrot.slane %v5347_v19, 4  ;;  %v5358_v31 = vrot.slane %v5357_v50, 4  ;;  %v6033_v60 = vrot.slane %v12842_v29, 5  ;;  %v10232_v41 = vrot.slane %v5941_v20, 9 }
 0x2e9   : > { %v4786_v52 = vsel %vm12392_vm14, %v4778_v33, %v4785_v42  ;;  %v4999_v43 = vsel %vm12194_vm8, %v4787_v44, %v4998_v49  ;;  %v4589_v38 = vpack.c.bf16 %v4437_v13, %v4437_v13  ;;  %v3945_v46 = vadd.f32 %v3899_v48, %v3264_v11 }
 0x2ea   : > { %4997 = vst [vmem:[#allocation2 + $0x88] sm:$0xf] %v4786_v52  ;;  %v5353_v33 = vsel %vm11113_vm2, %v5348_v24, %v5352_v30  ;;  %v5363_v25 = vsel %vm11113_vm2, %v5358_v31, %v5362_v62  ;;  %v6035_v49 = vrot.slane %v6033_v60, 4  ;;  %v6036_v37 = vrot.slane %v12844_v28, 5  ;;  %v14749_v52 = vld [vmem:[#allocation14_spill] sm:$0xff] }
 0x2eb   : > { %5000 = vst [vmem:[#allocation2 + $0x8c] sm:$0x1] %v4999_v43  ;;  %v4789_v14 = vshrl.u32 %v4589_v38, 16  ;;  %v4370_v21 = vadd.f32 %v4324_v63, %v3945_v46  ;;  %5873 = vmatmul.bf16.gmra.mxu2 %v10752_v9  ;;  %v4792_v10 = vshll.u32 %v4589_v38, 16  ;;  %v13036_v63 = vld [vmem:[%s14696_s2] ss:$0 sm:$0xff]  ;;  %v5521_v26 = vunpack.c.l.b16 %v5363_v25 }
 0x2ec   : > { %6250 = vmatmul.bf16.gmra.mxu3 %v6146_v59  ;;  %6563 = vmatmul.bf16.gmra.mxu0 %v10792_v7  ;;  %v5520_v35 = vunpack.c.l.b16 %v5353_v33  ;;  %v6034_v48 = vsel %vm11415_vm5, %v10232_v41, %v6033_v60  ;;  %v6037_v56 = vsel %vm11415_vm5, %v6035_v49, %v6036_v37  ;;  %v14750_v43 = vld [vmem:[#allocation12_spill] sm:$0xff]  ;;  %v4555_v60 = vld [vmem:[#allocation2 + $0xb0] sm:$0x1] }
 0x2ed   : > { %v13031_v17 = vrot.slane %v4789_v14, 7  ;;  %v4406_v16 = vadd.f32 %v13036_v63, %v4370_v21  ;;  %v6125_v53 = vunpack.c.l.b16 %v6037_v56  ;;  %v2952_v38 = vadd.f32 %v14750_v43, %v14749_v52  ;;  %v5058_v46 = vld [vmem:[#allocation2 + $0x84] sm:$0xf]  ;;  %v10793_v52 = vld [vmem:[#allocation2 + $0x48] sm:$0xff] }
 0x2ee   : > { %v3221_v0 = vpop.f32.mrf.mxu2  ;;  %v5542_v13 = vpack.c.b16 %v5521_v26, %v5520_v35  ;;  %v5365_v24 = vshrl.u32 %v5058_v46, 16  ;;  %v6124_v31 = vunpack.c.l.b16 %v6034_v48  ;;  %v5368_v14 = vshll.u32 %v5058_v46, 16 }
 0x2ef   : > { %v4794_v29 = vor.u32 %v4792_v10, %v13031_v17  ;;  %v4438_v12 = vmax.f32 %v4406_v16, 0.0  ;;  %v13041_v30 = vpop.f32.mrf.mxu1  ;;  %v3265_v8 = vadd.f32 %v3221_v0, %v14748_v15  ;;  %v3902_v42 = vpop.f32.mrf.mxu3  ;;  %v4795_v44 = vrot.slane %v13031_v17, 4  ;;  %v5005_v10 = vld [vmem:[#allocation2 + $0x98] sm:$0x1] }
 0x2f0   : > { %v4329_v11 = vpop.f32.mrf.mxu0  ;;  %v5367_v51 = vrot.slane %v5365_v24, 4  ;;  %v13060_v17 = vpack.c.b16 %v6125_v53, %v6124_v31  ;;  %v5370_v16 = vrot.slane %v5368_v14, 5  ;;  %v5942_v53 = vld [vmem:[#allocation2 + $0x60] sm:$0xe]  ;;  %v4502_v24 = vld [vmem:[#allocation2 + $0xb4] sm:$0x1] }
 0x2f1   : > { %v5002_v28 = vsel %vm12342_vm12, %v4794_v29, %v5001_v36  ;;  %v4590_v19 = vpack.c.bf16 %v4438_v12, %v4438_v12  ;;  %v3946_v50 = vadd.f32 %v3902_v42, %v3265_v8  ;;  %v13053_v9 = vld [vmem:[#allocation2 + $0x88] sm:$0xf]  ;;  %v6040_v14 = vrot.slane %v12888_v34, 5  ;;  %v14751_v34 = vld [vmem:[#allocation16_spill] sm:$0xff] }
 0x2f2   : > { %5003 = vst [vmem:[#allocation2 + $0x90] sm:$0xf] %v5002_v28  ;;  %v13055_v7 = vld [vmem:[#allocation2 + $0x8c] sm:$0x1]  ;;  %v5374_v21 = vshll.u32 %v13053_v9, 16  ;;  %v5378_v54 = vshrl.u32 %v13053_v9, 16  ;;  %v5371_v8 = vor.u32 %v5370_v16, %v5367_v51 }
 0x2f3   : > { %v4797_v20 = vshrl.u32 %v4590_v19, 16  ;;  %v4371_v59 = vadd.f32 %v4327_v58, %v3946_v50  ;;  %v4800_v62 = vshll.u32 %v4590_v19, 16  ;;  %v5384_v0 = vshll.u32 %v13055_v7, 16  ;;  %v10753_v50 = vld [vmem:[#allocation2 + $0x3c] sm:$0xff] }
 0x2f4   : > { %v5376_v26 = vrot.slane %v5374_v21, 5  ;;  %v5380_v36 = vrot.slane %v5378_v54, 4  ;;  %v5372_v43 = vrot.slane %v5371_v8, 4 }
 0x2f5   : > { %v4799_v33 = vrot.slane %v4797_v20, 7  ;;  %v4407_v25 = vadd.f32 %v13036_v63, %v4371_v59  ;;  %5670 = vmatmul.bf16.gmra.mxu1 %v5542_v13  ;;  %v4556_v13 = vsel %vm12207_vm10, 0, %v4555_v60  ;;  %v5386_v46 = vrot.slane %v5384_v0, 5 }
 0x2f6   : > { %v3223_v58 = vpop.f32.mrf.mxu2  ;;  %v5381_v42 = vor.u32 %v5380_v36, %v5376_v26  ;;  %4557 = vst [vmem:[#allocation2 + $0xb0] sm:$0x1] %v4556_v13  ;;  %v10233_v60 = vrot.slane %v5942_v53, 9 }
 0x2f7   : > { %v4802_v35 = vor.u32 %v4800_v62, %v4799_v33  ;;  %v4804_v41 = vrot.slane %v4799_v33, 4  ;;  %v4439_v49 = vmax.f32 %v4407_v25, 0.0  ;;  %v13063_v37 = vpop.f32.mrf.mxu1  ;;  %v3266_v29 = vadd.f32 %v3223_v58, %v2952_v38  ;;  %v3904_v12 = vpop.f32.mrf.mxu3 }
 0x2f8   : > { %v4332_v15 = vpop.f32.mrf.mxu0  ;;  %v5382_v38 = vrot.slane %v5381_v42, 4  ;;  %v4503_v62 = vsel %vm12194_vm8, 0, %v4502_v24  ;;  %v6043_v58 = vrot.slane %v12894_v47, 5 }
 0x2f9   : > { %v4803_v48 = vsel %vm12392_vm14, %v4795_v44, %v4802_v35  ;;  %v5006_v56 = vsel %vm12194_vm8, %v4804_v41, %v5005_v10  ;;  %v4591_v28 = vpack.c.bf16 %v4439_v49, %v4439_v49  ;;  %v3947_v19 = vadd.f32 %v3904_v12, %v3266_v29  ;;  %4504 = vst [vmem:[#allocation2 + $0xb4] sm:$0x1] %v4503_v62 }
 0x2fa   : > { %5004 = vst [vmem:[#allocation2 + $0x94] sm:$0xf] %v4803_v48  ;;  %v5377_v44 = vsel %vm11113_vm2, %v5372_v43, %v5376_v26  ;;  %v5387_v31 = vsel %vm11113_vm2, %v5382_v38, %v5386_v46  ;;  %v6042_v10 = vrot.slane %v6040_v14, 4  ;;  %v6041_v12 = vsel %vm11415_vm5, %v10233_v60, %v6040_v14 }
 0x2fb   : > { %5007 = vst [vmem:[#allocation2 + $0x98] sm:$0x1] %v5006_v56  ;;  %v4806_v20 = vshrl.u32 %v4591_v28, 16  ;;  %v4372_v59 = vadd.f32 %v4329_v11, %v3947_v19  ;;  %5878 = vmatmul.bf16.gmra.mxu2 %v10753_v50  ;;  %v4809_v54 = vshll.u32 %v4591_v28, 16  ;;  %v5523_v33 = vunpack.c.l.b16 %v5387_v31  ;;  %v14752_v56 = vld [vmem:[#allocation17_spill] sm:$0xff]  ;;  %v14753_v28 = vld [vmem:[#allocation15_spill] sm:$0xff] }
 0x2fc   : > { %6255 = vmatmul.bf16.gmra.mxu3 %v12962_v32  ;;  %6568 = vmatmul.bf16.gmra.mxu0 %v10793_v52  ;;  %v5008_v32 = vld [vmem:[#allocation2 + $0x9c] sm:$0xf]  ;;  %v5522_v51 = vunpack.c.l.b16 %v5377_v44  ;;  %v6044_v8 = vsel %vm11415_vm5, %v6042_v10, %v6043_v58  ;;  %v2954_v19 = vadd.f32 %v14753_v28, %v14752_v56  ;;  %v5060_v50 = vld [vmem:[#allocation2 + $0x90] sm:$0xf]  ;;  %v10754_v28 = vld [vmem:[#allocation2 + $0x48] sm:$0xff] }
 0x2fd   : > { %v13079_v21 = vrot.slane %v4806_v20, 7  ;;  %v4408_v11 = vadd.f32 %v13036_v63, %v4372_v59  ;;  %v6127_v48 = vunpack.c.l.b16 %v6044_v8  ;;  %v5389_v46 = vshrl.u32 %v5060_v50, 16  ;;  %v10813_v20 = vld [vmem:[%s14697_s3 + $0x108] sm:$0xff] }
 0x2fe   : > { %v3226_v25 = vpop.f32.mrf.mxu2  ;;  %v5543_v49 = vpack.c.b16 %v5523_v33, %v5522_v51  ;;  %v6126_v59 = vunpack.c.l.b16 %v6041_v12  ;;  %v5392_v44 = vshll.u32 %v5060_v50, 16  ;;  %v5012_v33 = vld [vmem:[#allocation2 + $0xa4] sm:$0x1]  ;;  %7222 = vmatpush.bf16.msrb.mxu1 %v10813_v20  ;;  %v5943_v50 = vld [vmem:[#allocation2 + $0x6c] sm:$0xe] }
 0x2ff   : > { %v4811_v16 = vor.u32 %v4809_v54, %v13079_v21  ;;  %v4440_v26 = vmax.f32 %v4408_v11, 0.0  ;;  %v13084_v36 = vpop.f32.mrf.mxu1  ;;  %v3267_v0 = vadd.f32 %v3226_v25, %v14751_v34  ;;  %v3907_v35 = vpop.f32.mrf.mxu3  ;;  %v4812_v41 = vrot.slane %v13079_v21, 4 }
 0x300   : > { %v4334_v29 = vpop.f32.mrf.mxu0  ;;  %v5391_v54 = vrot.slane %v5389_v46, 4  ;;  %v13106_v11 = vpack.c.b16 %v6127_v48, %v6126_v59  ;;  %v5394_v25 = vrot.slane %v5392_v44, 5 }
 0x301   : > { %v5009_v47 = vsel %vm12342_vm12, %v4811_v16, %v5008_v32  ;;  %v4592_v42 = vpack.c.bf16 %v4440_v26, %v4440_v26  ;;  %v3948_v13 = vadd.f32 %v3907_v35, %v3267_v0  ;;  %v13096_v53 = vld [vmem:[#allocation2 + $0x94] sm:$0xf] }
 0x302   : > { %5010 = vst [vmem:[#allocation2 + $0x9c] sm:$0xf] %v5009_v47  ;;  %v13098_v38 = vld [vmem:[#allocation2 + $0x98] sm:$0x1]  ;;  %v5398_v31 = vshll.u32 %v13096_v53, 16  ;;  %v5402_v62 = vshrl.u32 %v13096_v53, 16  ;;  %v5395_v12 = vor.u32 %v5394_v25, %v5391_v54 }
 0x303   : > { %v4814_v52 = vshrl.u32 %v4592_v42, 16  ;;  %v4373_v43 = vadd.f32 %v4332_v15, %v3948_v13  ;;  %v4817_v24 = vshll.u32 %v4592_v42, 16  ;;  %v4558_v15 = vld [vmem:[#allocation2 + $0xbc] sm:$0x1]  ;;  %v5408_v10 = vshll.u32 %v13098_v38, 16 }
 0x304   : > { %v5400_v51 = vrot.slane %v5398_v31, 5  ;;  %v5404_v60 = vrot.slane %v5402_v62, 4  ;;  %v4559_v47 = vsel %vm12207_vm10, 0, %v4558_v15  ;;  %v6047_v62 = vrot.slane %v12945_v27, 5  ;;  %v5015_v15 = vld [vmem:[#allocation2 + $0xa8] sm:$0xf] }
 0x305   : > { %v4816_v14 = vrot.slane %v4814_v52, 7  ;;  %v4409_v21 = vadd.f32 %v13036_v63, %v4373_v43  ;;  %5675 = vmatmul.bf16.gmra.mxu1 %v5543_v49  ;;  %4560 = vst [vmem:[#allocation2 + $0xbc] sm:$0x1] %v4559_v47  ;;  %v5396_v52 = vrot.slane %v5395_v12, 4  ;;  %v5410_v46 = vrot.slane %v5408_v10, 5 }
 0x306   : > { %v3228_v32 = vpop.f32.mrf.mxu2  ;;  %v5405_v8 = vor.u32 %v5404_v60, %v5400_v51  ;;  %v6049_v25 = vrot.slane %v6047_v62, 4 }
 0x307   : > { %v4819_v58 = vor.u32 %v4817_v24, %v4816_v14  ;;  %v4821_v16 = vrot.slane %v4816_v14, 4  ;;  %v4441_v26 = vmax.f32 %v4409_v21, 0.0  ;;  %v13109_v34 = vpop.f32.mrf.mxu1  ;;  %v3268_v0 = vadd.f32 %v3228_v32, %v2954_v19  ;;  %v3909_v35 = vpop.f32.mrf.mxu3  ;;  %v10794_v19 = vld [vmem:[#allocation2 + $0x54] sm:$0xff]  ;;  %v4505_v24 = vld [vmem:[#allocation2 + $0xc0] sm:$0x1] }
 0x308   : > { %v4337_v49 = vpop.f32.mrf.mxu0  ;;  %v5406_v43 = vrot.slane %v5405_v8, 4  ;;  %v4506_v31 = vsel %vm12194_vm8, 0, %v4505_v24  ;;  %v10234_v32 = vrot.slane %v5943_v50, 9 }
 0x309   : > { %v4820_v42 = vsel %vm12392_vm14, %v4812_v41, %v4819_v58  ;;  %v5013_v13 = vsel %vm12194_vm8, %v4821_v16, %v5012_v33  ;;  %v4593_v48 = vpack.c.bf16 %v4441_v26, %v4441_v26  ;;  %v3949_v56 = vadd.f32 %v3909_v35, %v3268_v0  ;;  %4507 = vst [vmem:[#allocation2 + $0xc0] sm:$0x1] %v4506_v31  ;;  %v14754_v58 = vld [vmem:[#allocation19_spill] sm:$0xff] }
 0x30a   : > { %5011 = vst [vmem:[#allocation2 + $0xa0] sm:$0xf] %v4820_v42  ;;  %v5401_v41 = vsel %vm11113_vm2, %v5396_v52, %v5400_v51  ;;  %v5411_v44 = vsel %vm11113_vm2, %v5406_v43, %v5410_v46  ;;  %v6050_v51 = vrot.slane %v12950_v1, 5  ;;  %v6048_v12 = vsel %vm11415_vm5, %v10234_v32, %v6047_v62 }
 0x30b   : > { %5014 = vst [vmem:[#allocation2 + $0xa4] sm:$0x1] %v5013_v13  ;;  %v4823_v20 = vshrl.u32 %v4593_v48, 16  ;;  %v4374_v59 = vadd.f32 %v4334_v29, %v3949_v56  ;;  %5883 = vmatmul.bf16.gmra.mxu2 %v10754_v28  ;;  %v4826_v21 = vshll.u32 %v4593_v48, 16  ;;  %v5525_v54 = vunpack.c.l.b16 %v5411_v44  ;;  %v14755_v56 = vld [vmem:[#allocation22_spill] sm:$0xff]  ;;  %v14756_v28 = vld [vmem:[#allocation21_spill] sm:$0xff] }
 0x30c   : > { %6260 = vmatmul.bf16.gmra.mxu3 %v13013_v61  ;;  %6573 = vmatmul.bf16.gmra.mxu0 %v10794_v19  ;;  %v5524_v33 = vunpack.c.l.b16 %v5401_v41  ;;  %v6051_v8 = vsel %vm11415_vm5, %v6049_v25, %v6050_v51  ;;  %v2956_v50 = vadd.f32 %v14756_v28, %v14755_v56  ;;  %v5062_v19 = vld [vmem:[#allocation2 + $0x9c] sm:$0xf]  ;;  %v6128_v24 = vunpack.c.l.b16 %v6048_v12 }
 0x30d   : > { %v4825_v14 = vrot.slane %v4823_v20, 7  ;;  %v4410_v29 = vadd.f32 %v13036_v63, %v4374_v59  ;;  %v6129_v48 = vunpack.c.l.b16 %v6051_v8  ;;  %v5413_v59 = vshrl.u32 %v5062_v19, 16 }
 0x30e   : > { %v3231_v61 = vpop.f32.mrf.mxu2  ;;  %v5544_v27 = vpack.c.b16 %v5525_v54, %v5524_v33  ;;  %v5416_v44 = vshll.u32 %v5062_v19, 16  ;;  %v4561_v54 = vld [vmem:[#allocation2 + $0xc8] sm:$0x1]  ;;  %v10755_v19 = vld [vmem:[#allocation2 + $0x54] sm:$0xff] }
 0x30f   : > { %v4828_v60 = vor.u32 %v4826_v21, %v4825_v14  ;;  %v4442_v10 = vmax.f32 %v4410_v29, 0.0  ;;  %v3269_v16 = vadd.f32 %v3231_v61, %v14754_v58  ;;  %v3912_v26 = vpop.f32.mrf.mxu3  ;;  %v4829_v0 = vrot.slane %v4825_v14, 4  ;;  %v5019_v61 = vld [vmem:[#allocation2 + $0xb0] sm:$0x1] }
 0x310   : > { %v4339_v35 = vpop.f32.mrf.mxu0  ;;  %v5415_v29 = vrot.slane %v5413_v59, 4  ;;  %v5418_v33 = vrot.slane %v5416_v44, 5 }
 0x311   : > { %v5016_v47 = vsel %vm12342_vm12, %v4828_v60, %v5015_v15  ;;  %v4594_v42 = vpack.c.bf16 %v4442_v10, %v4442_v10  ;;  %v13134_v13 = vpop.f32.mrf.mxu1  ;;  %v3950_v1 = vadd.f32 %v3912_v26, %v3269_v16  ;;  %v13138_v52 = vld [vmem:[#allocation2 + $0xa0] sm:$0xf]  ;;  %v13145_v15 = vpack.c.b16 %v6129_v48, %v6128_v24 }
 0x312   : > { %5017 = vst [vmem:[#allocation2 + $0xa8] sm:$0xf] %v5016_v47  ;;  %v13140_v20 = vld [vmem:[#allocation2 + $0xa4] sm:$0x1]  ;;  %v5422_v31 = vshll.u32 %v13138_v52, 16  ;;  %v5426_v62 = vshrl.u32 %v13138_v52, 16  ;;  %v5419_v12 = vor.u32 %v5418_v33, %v5415_v29 }
 0x313   : > { %v4831_v43 = vshrl.u32 %v4594_v42, 16  ;;  %v4375_v46 = vadd.f32 %v4337_v49, %v3950_v1  ;;  %v4834_v41 = vshll.u32 %v4594_v42, 16  ;;  %v5432_v51 = vshll.u32 %v13140_v20, 16 }
 0x314   : > { %v5424_v32 = vrot.slane %v5422_v31, 5  ;;  %v5428_v25 = vrot.slane %v5426_v62, 4  ;;  %v10812_v62 = vld [vmem:[%s14697_s3 + $0x100] sm:$0xff] }
 0x315   : > { %v4833_v14 = vrot.slane %v4831_v43, 7  ;;  %v4411_v21 = vadd.f32 %v13036_v63, %v4375_v46  ;;  %5680 = vmatmul.bf16.gmra.mxu1 %v5544_v27  ;;  %v4562_v27 = vsel %vm12207_vm10, 0, %v4561_v54  ;;  %v5420_v43 = vrot.slane %v5419_v12, 4 }
 0x316   : > { %v3233_v49 = vpop.f32.mrf.mxu2  ;;  %v5429_v8 = vor.u32 %v5428_v25, %v5424_v32  ;;  %4563 = vst [vmem:[#allocation2 + $0xc8] sm:$0x1] %v4562_v27  ;;  %v5434_v59 = vrot.slane %v5432_v51, 5  ;;  %7223 = vmatpush.bf16.msrb.mxu1 %v10812_v62  ;;  %v6057_v27 = vrot.slane %v13005_v22, 5 }
 0x317   : > { %v4836_v60 = vor.u32 %v4834_v41, %v4833_v14  ;;  %v4838_v10 = vrot.slane %v4833_v14, 4  ;;  %v4443_v58 = vmax.f32 %v4411_v21, 0.0  ;;  %v3270_v16 = vadd.f32 %v3233_v49, %v2956_v50  ;;  %v3914_v26 = vpop.f32.mrf.mxu3  ;;  %v10795_v50 = vld [vmem:[#allocation2 + $0x60] sm:$0xff]  ;;  %v5944_v14 = vld [vmem:[#allocation2 + $0x78] sm:$0xe] }
 0x318   : > { %v5430_v46 = vrot.slane %v5429_v8, 4  ;;  %v5425_v44 = vsel %vm11113_vm2, %v5420_v43, %v5424_v32  ;;  %v6054_v32 = vrot.slane %v13002_v45, 5 }
 0x319   : > { %v4837_v47 = vsel %vm12392_vm14, %v4829_v0, %v4836_v60  ;;  %v5020_v42 = vsel %vm12194_vm8, %v4838_v10, %v5019_v61  ;;  %v4595_v1 = vpack.c.bf16 %v4443_v58, %v4443_v58  ;;  %v13154_v48 = vpop.f32.mrf.mxu1  ;;  %v3951_v56 = vadd.f32 %v3914_v26, %v3270_v16  ;;  %v4342_v28 = vpop.f32.mrf.mxu0  ;;  %v5064_v0 = vld [vmem:[#allocation2 + $0xa8] sm:$0xf]  ;;  %v5022_v61 = vld [vmem:[#allocation2 + $0xb4] sm:$0xf]  ;;  %v14757_v10 = vld [vmem:[#allocation23_spill] sm:$0xff] }
 0x31a   : > { %5018 = vst [vmem:[#allocation2 + $0xac] sm:$0xf] %v4837_v47  ;;  %v5435_v31 = vsel %vm11113_vm2, %v5430_v46, %v5434_v59  ;;  %v5437_v33 = vshrl.u32 %v5064_v0, 16  ;;  %v5440_v25 = vshll.u32 %v5064_v0, 16  ;;  %v10235_v26 = vrot.slane %v5944_v14, 9 }
 0x31b   : > { %5021 = vst [vmem:[#allocation2 + $0xb0] sm:$0x1] %v5020_v42  ;;  %v4840_v24 = vshrl.u32 %v4595_v1, 16  ;;  %v4376_v41 = vadd.f32 %v4339_v35, %v3951_v56  ;;  %5888 = vmatmul.bf16.gmra.mxu2 %v10755_v19  ;;  %v4843_v29 = vshll.u32 %v4595_v1, 16  ;;  %v5527_v54 = vunpack.c.l.b16 %v5435_v31  ;;  %v14758_v31 = vld [vmem:[#allocation3_spill] sm:$0xff] }
 0x31c   : > { %6265 = vmatmul.bf16.gmra.mxu3 %v13060_v17  ;;  %6578 = vmatmul.bf16.gmra.mxu0 %v10795_v50  ;;  %v5526_v17 = vunpack.c.l.b16 %v5425_v44  ;;  %v6056_v8 = vrot.slane %v6054_v32, 4  ;;  %v6055_v45 = vsel %vm11415_vm5, %v10235_v26, %v6054_v32  ;;  %v5439_v43 = vrot.slane %v5437_v33, 4 }
 0x31d   : > { %v4842_v21 = vrot.slane %v4840_v24, 7  ;;  %v4412_v35 = vadd.f32 %v13036_v63, %v4376_v41  ;;  %v5442_v46 = vrot.slane %v5440_v25, 5  ;;  %v2958_v62 = vadd.f32 %v12902_v18, %v14758_v31  ;;  %v5026_v25 = vld [vmem:[#allocation2 + $0xbc] sm:$0x1] }
 0x31e   : > { %v3236_v49 = vpop.f32.mrf.mxu2  ;;  %v5545_v12 = vpack.c.b16 %v5527_v54, %v5526_v17  ;;  %v6058_v22 = vsel %vm11415_vm5, %v6056_v8, %v6057_v27 }
 0x31f   : > { %v4845_v51 = vor.u32 %v4843_v29, %v4842_v21  ;;  %v4444_v60 = vmax.f32 %v4412_v35, 0.0  ;;  %v3271_v58 = vadd.f32 %v3236_v49, %v14757_v10  ;;  %v3917_v16 = vpop.f32.mrf.mxu3  ;;  %v6130_v29 = vunpack.c.l.b16 %v6055_v45  ;;  %v10756_v45 = vld [vmem:[#allocation2 + $0x60] sm:$0xff] }
 0x320   : > { %v6131_v35 = vunpack.c.l.b16 %v6058_v22  ;;  %v4846_v33 = vrot.slane %v4842_v21, 4 }
 0x321   : > { %v5023_v47 = vsel %vm12342_vm12, %v4845_v51, %v5022_v61  ;;  %v4596_v42 = vpack.c.bf16 %v4444_v60, %v4444_v60  ;;  %v3952_v1 = vadd.f32 %v3917_v16, %v3271_v58  ;;  %v4344_v56 = vpop.f32.mrf.mxu0  ;;  %v13170_v19 = vld [vmem:[#allocation2 + $0xac] sm:$0xf]  ;;  %v5443_v51 = vor.u32 %v5442_v46, %v5439_v43 }
 0x322   : > { %5024 = vst [vmem:[#allocation2 + $0xb4] sm:$0xf] %v5023_v47  ;;  %v13174_v50 = vpop.f32.mrf.mxu1  ;;  %v5446_v59 = vshll.u32 %v13170_v19, 16  ;;  %v13179_v0 = vld [vmem:[#allocation2 + $0xb0] sm:$0x1]  ;;  %v5450_v44 = vshrl.u32 %v13170_v19, 16  ;;  %v13189_v18 = vpack.c.b16 %v6131_v35, %v6130_v29 }
 0x323   : > { %v4848_v24 = vshrl.u32 %v4596_v42, 16  ;;  %v4377_v41 = vadd.f32 %v4342_v28, %v3952_v1  ;;  %v4851_v61 = vshll.u32 %v4596_v42, 16  ;;  %v10827_v28 = vld [vmem:[%s14697_s3 + $0x178] sm:$0xff]  ;;  %v5456_v60 = vshll.u32 %v13179_v0, 16  ;;  %v10796_v43 = vld [vmem:[#allocation2 + $0x6c] sm:$0xff] }
 0x324   : > { %v5448_v14 = vrot.slane %v5446_v59, 5  ;;  %v5452_v17 = vrot.slane %v5450_v44, 4  ;;  %7641 = vmatpush.bf16.msra.mxu2 %v10827_v28  ;;  %v5444_v22 = vrot.slane %v5443_v51, 4  ;;  %v10851_v44 = vld [vmem:[%s14697_s3 + $0x1b8] sm:$0xff] }
 0x325   : > { %v4850_v54 = vrot.slane %v4848_v24, 7  ;;  %v4413_v49 = vadd.f32 %v13036_v63, %v4377_v41  ;;  %5685 = vmatmul.bf16.gmra.mxu1 %v5545_v12  ;;  %v5458_v41 = vrot.slane %v5456_v60, 5  ;;  %7955 = vmatpush.bf16.msra.mxu3 %v10851_v44  ;;  %v10867_v44 = vld [vmem:[%s14697_s3 + $0x238] sm:$0xff] }
 0x326   : > { %v3238_v32 = vpop.f32.mrf.mxu2  ;;  %v5453_v12 = vor.u32 %v5452_v17, %v5448_v14  ;;  %v5449_v29 = vsel %vm11113_vm2, %v5444_v22, %v5448_v14  ;;  %9061 = vmatpush.bf16.msra.mxu1 %v10867_v44 }
 0x327   : > { %v4853_v10 = vor.u32 %v4851_v61, %v4850_v54  ;;  %v4855_v58 = vrot.slane %v4850_v54, 4  ;;  %v4445_v16 = vmax.f32 %v4413_v49, 0.0  ;;  %v3272_v26 = vadd.f32 %v3238_v32, %v2958_v62  ;;  %v3919_v8 = vpop.f32.mrf.mxu3 }
 0x328   : > { %v5454_v24 = vrot.slane %v5453_v12, 4 }
 0x329   : > { %v4854_v27 = vsel %vm12392_vm14, %v4846_v33, %v4853_v10  ;;  %v5027_v21 = vsel %vm12194_vm8, %v4855_v58, %v5026_v25  ;;  %v4597_v47 = vpack.c.bf16 %v4445_v16, %v4445_v16  ;;  %v3953_v42 = vadd.f32 %v3919_v8, %v3272_v26  ;;  %v13195_v1 = vpop.f32.mrf.mxu0  ;;  %v5066_v46 = vld [vmem:[#allocation2 + $0xb4] sm:$0xf]  ;;  %v5029_v25 = vld [vmem:[#allocation2 + $0xc0] sm:$0xf] }
 0x32a   : > { %5025 = vst [vmem:[#allocation2 + $0xb8] sm:$0xf] %v4854_v27  ;;  %v13197_v59 = vpop.f32.mrf.mxu1  ;;  %v5459_v35 = vsel %vm11113_vm2, %v5454_v24, %v5458_v41  ;;  %v5461_v54 = vshrl.u32 %v5066_v46, 16  ;;  %v5464_v61 = vshll.u32 %v5066_v46, 16  ;;  %v5528_v10 = vunpack.c.l.b16 %v5449_v29 }
 0x32b   : > { %5028 = vst [vmem:[#allocation2 + $0xbc] sm:$0x1] %v5027_v21  ;;  %v4857_v31 = vshrl.u32 %v4597_v47, 16  ;;  %v4378_v62 = vadd.f32 %v4344_v56, %v3953_v42  ;;  %5893 = vmatmul.bf16.gmra.mxu2 %v10756_v45  ;;  %v4860_v17 = vshll.u32 %v4597_v47, 16  ;;  %v5529_v33 = vunpack.c.l.b16 %v5459_v35 }
 0x32c   : > { %6270 = vmatmul.bf16.gmra.mxu3 %v13106_v11  ;;  %6583 = vmatmul.bf16.gmra.mxu0 %v10796_v43  ;;  %v5463_v14 = vrot.slane %v5461_v54, 4  ;;  %v5466_v58 = vrot.slane %v5464_v61, 5 }
 0x32d   : > { %v4859_v49 = vrot.slane %v4857_v31, 7  ;;  %v4414_v28 = vadd.f32 %v13036_v63, %v4378_v62  ;;  %v5546_v12 = vpack.c.b16 %v5529_v33, %v5528_v10  ;;  %v5033_v31 = vld [vmem:[#allocation2 + $0xc8] sm:$0x1]  ;;  %v10757_v10 = vld [vmem:[#allocation2 + $0x6c] sm:$0xff] }
 0x32e   : > { %v5854_v56 = vpop.f32.mrf.mxu2  ;;  %v5467_v29 = vor.u32 %v5466_v58, %v5463_v14 }
 0x32f   : > { %v4862_v32 = vor.u32 %v4860_v17, %v4859_v49  ;;  %v4446_v51 = vmax.f32 %v4414_v28, 0.0  ;;  %v5855_v11 = vadd.f32 %v5854_v56, %v12930_v2  ;;  %v6231_v60 = vpop.f32.mrf.mxu3  ;;  %v4863_v54 = vrot.slane %v4859_v49, 4  ;;  %v13239_v49 = vld [vmem:[#allocation2 + $0x10] sm:$0xf] }
 0x330   : > { %v5468_v58 = vrot.slane %v5467_v29, 4 }
 0x331   : > { %v5030_v16 = vsel %vm12342_vm12, %v4862_v32, %v5029_v25  ;;  %v4598_v26 = vpack.c.bf16 %v4446_v51, %v4446_v51  ;;  %v13211_v8 = vadd.f32 %v6231_v60, %v5855_v11  ;;  %v13213_v63 = vpop.f32.mrf.mxu0  ;;  %v13215_v27 = vld [vmem:[#allocation2 + $0xb8] sm:$0xf] }
 0x332   : > { %5031 = vst [vmem:[#allocation2 + $0xc0] sm:$0xf] %v5030_v16  ;;  %v13217_v21 = vpop.f32.mrf.mxu1  ;;  %v13219_v47 = vld [vmem:[#allocation2 + $0xbc] sm:$0x1]  ;;  %v5470_v2 = vshll.u32 %v13215_v27, 16  ;;  %v5474_v42 = vshrl.u32 %v13215_v27, 16 }
 0x333   : > { %v4865_v45 = vshrl.u32 %v4598_v26, 16  ;;  %v5480_v22 = vshll.u32 %v13219_v47, 16  ;;  %v4868_v41 = vshll.u32 %v4598_v26, 16 }
 0x334   : > { %v5472_v43 = vrot.slane %v5470_v2, 5  ;;  %v5476_v46 = vrot.slane %v5474_v42, 4  ;;  %v6718_v2 = vshrl.u32 %v13239_v49, 16 }
 0x335   : > { %v4867_v24 = vrot.slane %v4865_v45, 7  ;;  %5690 = vmatmul.bf16.gmra.mxu1 %v5546_v12  ;;  %v5482_v56 = vrot.slane %v5480_v22, 5  ;;  %v6714_v12 = vshll.u32 %v13239_v49, 16 }
 0x336   : > { %v5856_v62 = vpop.f32.mrf.mxu2  ;;  %v5477_v35 = vor.u32 %v5476_v46, %v5472_v43  ;;  %v5473_v26 = vsel %vm11113_vm2, %v5468_v58, %v5472_v43  ;;  %v6708_v46 = vshll.u32 %v6656_v5, 16 }
 0x337   : > { %v4870_v61 = vor.u32 %v4868_v41, %v4867_v24  ;;  %v4872_v17 = vrot.slane %v4867_v24, 4  ;;  %v5857_v28 = vadd.f32 %v5856_v62, %v12956_v23  ;;  %v6233_v33 = vpop.f32.mrf.mxu3  ;;  %v10797_v23 = vld [vmem:[#allocation2 + $0x78] sm:$0xff]  ;;  %v5530_v41 = vunpack.c.l.b16 %v5473_v26 }
 0x338   : > { %v5478_v25 = vrot.slane %v5477_v35, 4  ;;  %v6716_v44 = vrot.slane %v6714_v12, 5  ;;  %v6707_v35 = vrot.slane %v6705_v3, 4  ;;  %v10758_v26 = vld [vmem:[#allocation2 + $0x78] sm:$0xff]  ;;  %v10798_v3 = vld [vmem:[#allocation2 + $0x84] sm:$0xff] }
 0x339   : > { %v4871_v32 = vsel %vm12392_vm14, %v4863_v54, %v4870_v61  ;;  %v5034_v51 = vsel %vm12194_vm8, %v4872_v17, %v5033_v31  ;;  %v13235_v11 = vadd.f32 %v6233_v33, %v5857_v28  ;;  %v13237_v60 = vpop.f32.mrf.mxu0  ;;  %v6720_v31 = vrot.slane %v6718_v2, 4  ;;  %v13257_v61 = vld [vmem:[#allocation2 + $0x14] sm:$0x1]  ;;  %v6659_v28 = vld [vmem:[#allocation2 + $0x18] sm:$0xf] }
 0x33a   : > { %14759 = vst [vmem:[#allocation4_spill] sm:$0xff] %v13237_v60  ;;  %v13241_v14 = vpop.f32.mrf.mxu1  ;;  %v5483_v16 = vsel %vm11113_vm2, %v5478_v25, %v5482_v56  ;;  %v6710_v54 = vrot.slane %v6708_v46, 5  ;;  %v6724_v56 = vshll.u32 %v13257_v61, 16  ;;  %v6729_v58 = vshrl.u32 %v6659_v28, 16  ;;  %v8759_v60 = vld [vmem:[#allocation2 + $0x30] sm:$0xe] }
 0x33b   : > { %5032 = vst [vmem:[#allocation2 + $0xc4] sm:$0xf] %v4871_v32  ;;  %5898 = vmatmul.bf16.gmra.mxu2 %v10757_v10  ;;  %v5531_v42 = vunpack.c.l.b16 %v5483_v16  ;;  %v6721_v17 = vor.u32 %v6720_v31, %v6716_v44  ;;  %v13263_v32 = vld [vmem:[#allocation2 + $0x1c] sm:$0xf]  ;;  %v6732_v12 = vshll.u32 %v6659_v28, 16 }
 0x33c   : > { %5035 = vst [vmem:[#allocation2 + $0xc8] sm:$0x1] %v5034_v51  ;;  %6275 = vmatmul.bf16.gmra.mxu3 %v13145_v15  ;;  %6588 = vmatmul.bf16.gmra.mxu0 %v10797_v23  ;;  %v6711_v25 = vor.u32 %v6710_v54, %v6707_v35  ;;  %v6738_v2 = vshll.u32 %v13263_v32, 16 }
 0x33d   : > { %v5547_v15 = vpack.c.b16 %v5531_v42, %v5530_v41  ;;  %v6722_v23 = vrot.slane %v6721_v17, 4  ;;  %v6742_v42 = vshrl.u32 %v13263_v32, 16  ;;  %v6734_v35 = vrot.slane %v6732_v12, 5 }
 0x33e   : > { %v5859_v45 = vpop.f32.mrf.mxu2  ;;  %v6712_v46 = vrot.slane %v6711_v25, 4  ;;  %v13283_v54 = vrot.slane %v6738_v2, 5 }
 0x33f   : > { %v5860_v22 = vadd.f32 %v5859_v45, %v12982_v4  ;;  %v6236_v24 = vpop.f32.mrf.mxu3  ;;  %v10826_v4 = vld [vmem:[%s14697_s3 + $0x170] sm:$0xff]  ;;  %v6744_v17 = vrot.slane %v6742_v42, 4 }
 0x340   : > { %7642 = vmatpush.bf16.msra.mxu2 %v10826_v4  ;;  %v6717_v41 = vsel %vm11113_vm2, %v6712_v46, %v6716_v44 }
 0x341   : > { %v13251_v62 = vadd.f32 %v6236_v24, %v5860_v22  ;;  %v13253_v29 = vpop.f32.mrf.mxu0  ;;  %v6726_v22 = vrot.slane %v6724_v56, 5  ;;  %v6061_v24 = vrot.slane %v13053_v9, 5  ;;  %v5945_v56 = vld [vmem:[#allocation2 + $0x84] sm:$0xe] }
 0x342   : > { %14761 = vst [vmem:[#allocation6_spill] sm:$0xff] %v13253_v29  ;;  %v13255_v43 = vpop.f32.mrf.mxu1  ;;  %v10236_v42 = vrot.slane %v5945_v56, 9  ;;  %v10801_v29 = vld [vmem:[#allocation2 + $0xa8] sm:$0xff] }
 0x343   : > { %14760 = vst [vmem:[#allocation5_spill] sm:$0xff] %v13251_v62  ;;  %v6727_v31 = vsel %vm11113_vm2, %v6722_v23, %v6726_v22  ;;  %v6063_v25 = vrot.slane %v6061_v24, 4  ;;  %v6064_v23 = vrot.slane %v13055_v7, 5  ;;  %v7338_v22 = vld [vmem:[#allocation2 + $0x18] sm:$0xe] }
 0x344   : > { %v7105_v9 = vunpack.c.l.b16 %v6727_v31  ;;  %v6062_v7 = vsel %vm11415_vm5, %v10236_v42, %v6061_v24  ;;  %v10866_v31 = vld [vmem:[%s14697_s3 + $0x230] sm:$0xff] }
 0x345   : > { %5695 = vmatmul.bf16.gmra.mxu1 %v5547_v15  ;;  %v6731_v15 = vrot.slane %v6729_v58, 4  ;;  %v6132_v56 = vunpack.c.l.b16 %v6062_v7 }
 0x346   : > { %v5861_v33 = vpop.f32.mrf.mxu2  ;;  %9062 = vmatpush.bf16.msra.mxu1 %v10866_v31 }
 0x347   : > { %v5862_v51 = vadd.f32 %v5861_v33, %v13016_v55  ;;  %v6238_v10 = vpop.f32.mrf.mxu3  ;;  %v10850_v55 = vld [vmem:[%s14697_s3 + $0x1b0] sm:$0xff]  ;;  %v6735_v58 = vor.u32 %v6734_v35, %v6731_v15  ;;  %v7410_v15 = vrot.slane %v13263_v32, 5 }
 0x348   : > { %7956 = vmatpush.bf16.msra.mxu3 %v10850_v55 }
 0x349   : > { %v13266_v16 = vadd.f32 %v6238_v10, %v5862_v51  ;;  %v13268_v5 = vpop.f32.mrf.mxu0  ;;  %v6661_v51 = vld [vmem:[#allocation2 + $0x20] sm:$0x1]  ;;  %v6736_v55 = vrot.slane %v6735_v58, 4  ;;  %v7412_v58 = vrot.slane %v7410_v15, 4 }
 0x34a   : > { %14763 = vst [vmem:[#allocation8_spill] sm:$0xff] %v13268_v5  ;;  %v13272_v45 = vpop.f32.mrf.mxu1  ;;  %v6748_v46 = vshll.u32 %v6661_v51, 16  ;;  %v7413_v32 = vrot.slane %v6661_v51, 5  ;;  %v6068_v51 = vrot.slane %v13096_v53, 5 }
 0x34b   : > { %14762 = vst [vmem:[#allocation7_spill] sm:$0xff] %v13266_v16  ;;  %5903 = vmatmul.bf16.gmra.mxu2 %v10758_v26  ;;  %v6745_v26 = vor.u32 %v6744_v17, %v13283_v54 }
 0x34c   : > { %6280 = vmatmul.bf16.gmra.mxu3 %v13189_v18  ;;  %6593 = vmatmul.bf16.gmra.mxu0 %v10798_v3  ;;  %v7104_v18 = vunpack.c.l.b16 %v6717_v41  ;;  %v6065_v3 = vsel %vm11415_vm5, %v6063_v25, %v6064_v23  ;;  %v6741_v25 = vsel %vm11113_vm2, %v6736_v55, %v13283_v54  ;;  %v6750_v24 = vrot.slane %v6748_v46, 5 }
 0x34d   : > { %v6746_v41 = vrot.slane %v6745_v26, 4  ;;  %v6133_v17 = vunpack.c.l.b16 %v6065_v3  ;;  %v7414_v31 = vsel %vm11415_vm5, %v7412_v58, %v7413_v32  ;;  %v6070_v53 = vrot.slane %v6068_v51, 4 }
 0x34e   : > { %v5864_v28 = vpop.f32.mrf.mxu2  ;;  %v7136_v2 = vpack.c.b16 %v7105_v9, %v7104_v18  ;;  %v6663_v18 = vld [vmem:[#allocation2 + $0x28] sm:$0xf] }
 0x34f   : > { %v5865_v4 = vadd.f32 %v5864_v28, %v13041_v30  ;;  %v6241_v33 = vpop.f32.mrf.mxu3  ;;  %v10858_v30 = vld [vmem:[%s14697_s3 + $0x1f0] sm:$0xff]  ;;  %v6662_v28 = vld [vmem:[#allocation2 + $0x24] sm:$0xf]  ;;  %v6153_v46 = vpack.c.b16 %v6133_v17, %v6132_v56  ;;  %v6762_v7 = vshll.u32 %v6663_v18, 16  ;;  %v6766_v55 = vshrl.u32 %v6663_v18, 16 }
 0x350   : > { %8637 = vmatpush.bf16.msra.mxu0 %v10858_v30  ;;  %v6753_v42 = vshrl.u32 %v6662_v28, 16  ;;  %v6756_v3 = vshll.u32 %v6662_v28, 16 }
 0x351   : > { %v13286_v10 = vadd.f32 %v6241_v33, %v5865_v4  ;;  %v13288_v44 = vpop.f32.mrf.mxu0  ;;  %v10402_v4 = vrot.slane %v7338_v22, 9  ;;  %v10799_v22 = vld [vmem:[#allocation2 + $0x90] sm:$0xff]  ;;  %v6768_v56 = vrot.slane %v6766_v55, 4 }
 0x352   : > { %14765 = vst [vmem:[#allocation11_spill] sm:$0xff] %v13288_v44  ;;  %v13292_v12 = vpop.f32.mrf.mxu1  ;;  %v6758_v17 = vrot.slane %v6756_v3, 5 }
 0x353   : > { %14764 = vst [vmem:[#allocation10_spill] sm:$0xff] %v13286_v10  ;;  %v7411_v23 = vsel %vm11415_vm5, %v10402_v4, %v7410_v15  ;;  %v10761_v10 = vld [vmem:[#allocation2 + $0x9c] sm:$0xff] }
 0x354   : > { %v7531_v15 = vunpack.c.l.b16 %v7411_v23  ;;  %v6664_v23 = vld [vmem:[#allocation2 + $0x2c] sm:$0x1] }
 0x355   : > { %7224 = vmatmul.bf16.vlgmr.msrb.gmra.mxu1 %v7136_v2  ;;  %v10759_v2 = vld [vmem:[#allocation2 + $0x84] sm:$0xff] }
 0x356   : > { %v5866_v35 = vpop.f32.mrf.mxu2 }
 0x357   : > { %v5867_v33 = vadd.f32 %v5866_v35, %v13063_v37  ;;  %v6243_v9 = vpop.f32.mrf.mxu3  ;;  %v6751_v37 = vsel %vm11113_vm2, %v6746_v41, %v6750_v24  ;;  %v7532_v35 = vunpack.c.l.b16 %v7414_v31  ;;  %v7106_v41 = vunpack.c.l.b16 %v6741_v25 }
 0x358   : > { %v7107_v4 = vunpack.c.l.b16 %v6751_v37  ;;  %v13324_v24 = vrot.slane %v6762_v7, 5  ;;  %v6071_v25 = vrot.slane %v13098_v38, 5  ;;  %v6666_v38 = vld [vmem:[#allocation2 + $0x34] sm:$0xf] }
 0x359   : > { %v13311_v26 = vadd.f32 %v6243_v9, %v5867_v33  ;;  %v13313_v30 = vpop.f32.mrf.mxu0  ;;  %v13322_v33 = vpack.c.b16 %v7532_v35, %v7531_v15  ;;  %v6755_v9 = vrot.slane %v6753_v42, 4  ;;  %v7417_v42 = vrot.slane %v6663_v18, 5  ;;  %v10825_v18 = vld [vmem:[%s14697_s3 + $0x168] sm:$0xff] }
 0x35a   : > { %14767 = vst [vmem:[#allocation13_spill] sm:$0xff] %v13313_v30  ;;  %v13317_v54 = vpop.f32.mrf.mxu1  ;;  %v7137_v31 = vpack.c.b16 %v7107_v4, %v7106_v41  ;;  %v6769_v15 = vor.u32 %v6768_v56, %v13324_v24  ;;  %v6072_v35 = vsel %vm11415_vm5, %v6070_v53, %v6071_v25  ;;  %7643 = vmatpush.bf16.msra.mxu2 %v10825_v18 }
 0x35b   : > { %14766 = vst [vmem:[#allocation9_spill] sm:$0xff] %v13311_v26  ;;  %5908 = vmatmul.bf16.gmra.mxu2 %v10759_v2  ;;  %v5946_v2 = vld [vmem:[#allocation2 + $0x90] sm:$0xe]  ;;  %v6759_v55 = vor.u32 %v6758_v17, %v6755_v9  ;;  %v7419_v41 = vrot.slane %v7417_v42, 4  ;;  %v13417_v26 = vld [vmem:[#allocation2 + $0xc] sm:$0xe] }
 0x35c   : > { %6285 = vmatmul.bf16.gmra.mxu3 %v6153_v46  ;;  %6598 = vmatmul.bf16.gmra.mxu0 %v10799_v22  ;;  %v10403_v22 = vrot.slane %v7339_v6, 9  ;;  %v10237_v7 = vrot.slane %v5946_v2, 9  ;;  %v7340_v17 = vld [vmem:[#allocation2 + $0x30] sm:$0xe] }
 0x35d   : > { %v6760_v2 = vrot.slane %v6759_v55, 4  ;;  %v10404_v30 = vrot.slane %v7340_v17, 9  ;;  %v10760_v55 = vld [vmem:[#allocation2 + $0x90] sm:$0xff] }
 0x35e   : > { %v5869_v28 = vpop.f32.mrf.mxu2  ;;  %v7418_v4 = vsel %vm11415_vm5, %v10403_v22, %v7417_v42  ;;  %v6069_v6 = vsel %vm11415_vm5, %v10237_v7, %v6068_v51  ;;  %v6770_v22 = vrot.slane %v6769_v15, 4  ;;  %v13347_v51 = vld [vmem:[#allocation2 + $0x38] sm:$0x1] }
 0x35f   : > { %v5870_v58 = vadd.f32 %v5869_v28, %v13084_v36  ;;  %v6246_v32 = vpop.f32.mrf.mxu3  ;;  %v6772_v36 = vshll.u32 %v6664_v23, 16  ;;  %v7420_v28 = vrot.slane %v6664_v23, 5  ;;  %v7533_v53 = vunpack.c.l.b16 %v7418_v4 }
 0x360   : > { %v6134_v57 = vunpack.c.l.b16 %v6069_v6  ;;  %v10849_v6 = vld [vmem:[%s14697_s3 + $0x1a8] sm:$0xff] }
 0x361   : > { %v13327_v46 = vadd.f32 %v6246_v32, %v5870_v58  ;;  %v13329_v37 = vpop.f32.mrf.mxu0  ;;  %v6665_v58 = vld [vmem:[#allocation2 + $0x30] sm:$0xf]  ;;  %v7421_v9 = vsel %vm11415_vm5, %v7419_v41, %v7420_v28  ;;  %v6135_v32 = vunpack.c.l.b16 %v6072_v35  ;;  %v6774_v42 = vrot.slane %v6772_v36, 5  ;;  %v10800_v36 = vld [vmem:[#allocation2 + $0x9c] sm:$0xff]  ;;  %7957 = vmatpush.bf16.msra.mxu3 %v10849_v6 }
 0x362   : > { %14769 = vst [vmem:[#allocation12_spill] sm:$0xff] %v13329_v37  ;;  %v13332_v3 = vpop.f32.mrf.mxu1  ;;  %v7534_v25 = vunpack.c.l.b16 %v7421_v9  ;;  %v6777_v7 = vshrl.u32 %v6665_v58, 16  ;;  %v7424_v41 = vrot.slane %v6666_v38, 5  ;;  %v6780_v4 = vshll.u32 %v6665_v58, 16 }
 0x363   : > { %14768 = vst [vmem:[#allocation14_spill] sm:$0xff] %v13327_v46  ;;  %v6786_v9 = vshll.u32 %v6666_v38, 16  ;;  %v6154_v15 = vpack.c.b16 %v6135_v32, %v6134_v57  ;;  %v6765_v57 = vsel %vm11113_vm2, %v6760_v2, %v13324_v24  ;;  %v6775_v58 = vsel %vm11113_vm2, %v6770_v22, %v6774_v42  ;;  %v7341_v42 = vld [vmem:[#allocation2 + $0x3c] sm:$0xe] }
 0x364   : > { %v13349_v37 = vpack.c.b16 %v7534_v25, %v7533_v53  ;;  %v7425_v18 = vsel %vm11415_vm5, %v10404_v30, %v7424_v41  ;;  %v7426_v17 = vrot.slane %v7424_v41, 4  ;;  %v7427_v53 = vrot.slane %v13347_v51, 5 }
 0x365   : > { %7229 = vmatmul.bf16.gmra.mxu1 %v7137_v31  ;;  %v6075_v25 = vrot.slane %v13138_v52, 5  ;;  %v6779_v32 = vrot.slane %v6777_v7, 4  ;;  %v6782_v30 = vrot.slane %v6780_v4, 5  ;;  %v13371_v52 = vrot.slane %v6786_v9, 5  ;;  %v5947_v4 = vld [vmem:[#allocation2 + $0x9c] sm:$0xe] }
 0x366   : > { %v5871_v56 = vpop.f32.mrf.mxu2  ;;  %v7109_v24 = vunpack.c.l.b16 %v6775_v58  ;;  %v7108_v7 = vunpack.c.l.b16 %v6765_v57  ;;  %v10857_v57 = vld [vmem:[%s14697_s3 + $0x1e8] sm:$0xff] }
 0x367   : > { %v5872_v23 = vadd.f32 %v5871_v56, %v13109_v34  ;;  %v6248_v31 = vpop.f32.mrf.mxu3  ;;  %v6790_v34 = vshrl.u32 %v6666_v38, 16  ;;  %v7428_v38 = vsel %vm11415_vm5, %v7426_v17, %v7427_v53  ;;  %v6077_v2 = vrot.slane %v6075_v25, 4  ;;  %v13381_v53 = vld [vmem:[#allocation2 + $0x44] sm:$0x1]  ;;  %8638 = vmatpush.bf16.msra.mxu0 %v10857_v57 }
 0x368   : > { %v7536_v41 = vunpack.c.l.b16 %v7428_v38  ;;  %v6783_v9 = vor.u32 %v6782_v30, %v6779_v32  ;;  %v10238_v32 = vrot.slane %v5947_v4, 9  ;;  %v13410_v4 = vld [vmem:[#allocation2 + $0x20] sm:$0x1] }
 0x369   : > { %v13351_v28 = vadd.f32 %v6248_v31, %v5872_v23  ;;  %v13353_v35 = vpop.f32.mrf.mxu0  ;;  %v6668_v23 = vld [vmem:[#allocation2 + $0x3c] sm:$0xf]  ;;  %v7535_v31 = vunpack.c.l.b16 %v7425_v18  ;;  %v6078_v18 = vrot.slane %v13140_v20, 5  ;;  %v7138_v20 = vpack.c.b16 %v7109_v24, %v7108_v7 }
 0x36a   : > { %14771 = vst [vmem:[#allocation17_spill] sm:$0xff] %v13353_v35  ;;  %v13355_v56 = vpop.f32.mrf.mxu1  ;;  %v6801_v6 = vshrl.u32 %v6668_v23, 16  ;;  %v6076_v24 = vsel %vm11415_vm5, %v10238_v32, %v6075_v25 }
 0x36b   : > { %14770 = vst [vmem:[#allocation16_spill] sm:$0xff] %v13351_v28  ;;  %5913 = vmatmul.bf16.gmra.mxu2 %v10760_v55  ;;  %v13374_v28 = vld [vmem:[#allocation2 + $0x40] sm:$0xf]  ;;  %v13376_v22 = vpack.c.b16 %v7536_v41, %v7535_v31  ;;  %v6079_v30 = vsel %vm11415_vm5, %v6077_v2, %v6078_v18  ;;  %v6136_v46 = vunpack.c.l.b16 %v6076_v24 }
 0x36c   : > { %6290 = vmatmul.bf16.gmra.mxu3 %v6154_v15  ;;  %6603 = vmatmul.bf16.gmra.mxu0 %v10800_v36  ;;  %v6792_v15 = vrot.slane %v6790_v34, 4  ;;  %v6804_v34 = vshll.u32 %v6668_v23, 16  ;;  %v7431_v41 = vrot.slane %v13374_v28, 5  ;;  %v6796_v23 = vshll.u32 %v13347_v51, 16  ;;  %v10865_v51 = vld [vmem:[%s14697_s3 + $0x228] sm:$0xff] }
 0x36d   : > { %v13403_v7 = vrot.slane %v6801_v6, 4  ;;  %v6137_v57 = vunpack.c.l.b16 %v6079_v30  ;;  %9063 = vmatpush.bf16.msra.mxu1 %v10865_v51  ;;  %v6814_v44 = vshrl.u32 %v13374_v28, 16  ;;  %v6820_v51 = vshll.u32 %v13381_v53, 16 }
 0x36e   : > { %v5874_v55 = vpop.f32.mrf.mxu2  ;;  %v6793_v31 = vor.u32 %v6792_v15, %v13371_v52  ;;  %v7434_v15 = vrot.slane %v13381_v53, 5  ;;  %v13405_v2 = vrot.slane %v6804_v34, 5  ;;  %v6082_v53 = vrot.slane %v13170_v19, 5  ;;  %v5948_v19 = vld [vmem:[#allocation2 + $0xa8] sm:$0xe] }
 0x36f   : > { %v5875_v36 = vadd.f32 %v5874_v55, %v13134_v13  ;;  %v6251_v35 = vpop.f32.mrf.mxu3  ;;  %v13383_v13 = vld [vmem:[#allocation2 + $0x1c] sm:$0xf] }
 0x371   : > { %v13378_v17 = vadd.f32 %v6251_v35, %v5875_v36  ;;  %v13387_v38 = vpop.f32.mrf.mxu0  ;;  %v10405_v35 = vrot.slane %v7341_v42, 9  ;;  %v7433_v36 = vrot.slane %v7431_v41, 4  ;;  %v6784_v42 = vrot.slane %v6783_v9, 4 }
 0x372   : > { %v13385_v58 = vpop.f32.mrf.mxu1  ;;  %14773 = vst [vmem:[#allocation19_spill] sm:$0xff] %v13387_v38  ;;  %v8757_v38 = vld [vmem:[#allocation2 + $0x18] sm:$0xe] }
 0x373   : > { %14772 = vst [vmem:[#allocation15_spill] sm:$0xff] %v13378_v17  ;;  %v7432_v55 = vsel %vm11415_vm5, %v10405_v35, %v7431_v41  ;;  %v8823_v17 = vrot.slane %v13383_v13, 5  ;;  %v6794_v35 = vrot.slane %v6793_v31, 4  ;;  %v6810_v41 = vshll.u32 %v13374_v28, 16 }
 0x374   : > { %v7537_v9 = vunpack.c.l.b16 %v7432_v55  ;;  %v10577_v32 = vrot.slane %v8757_v38, 9  ;;  %v8826_v31 = vrot.slane %v13410_v4, 5  ;;  %v6155_v28 = vpack.c.b16 %v6137_v57, %v6136_v46  ;;  %v13450_v57 = vld [vmem:[#allocation2 + $0x28] sm:$0xf] }
 0x375   : > { %7234 = vmatmul.bf16.gmra.mxu1 %v7138_v20  ;;  %v7435_v20 = vsel %vm11415_vm5, %v7433_v36, %v7434_v15  ;;  %v8825_v5 = vrot.slane %v8823_v17, 4  ;;  %v6798_v36 = vrot.slane %v6796_v23, 5  ;;  %v13422_v15 = vld [vmem:[#allocation2 + $0x4c] sm:$0xf]  ;;  %v6789_v24 = vsel %vm11113_vm2, %v6784_v42, %v13371_v52  ;;  %v10824_v23 = vld [vmem:[%s14697_s3 + $0x160] sm:$0xff] }
 0x376   : > { %v5876_v18 = vpop.f32.mrf.mxu2  ;;  %v7538_v34 = vunpack.c.l.b16 %v7435_v20  ;;  %v8824_v38 = vsel %vm11415_vm5, %v10577_v32, %v8823_v17  ;;  %v10856_v17 = vld [vmem:[%s14697_s3 + $0x1e0] sm:$0xff]  ;;  %v6807_v42 = vor.u32 %v13405_v2, %v13403_v7  ;;  %7644 = vmatpush.bf16.msra.mxu2 %v10824_v23  ;;  %v7438_v7 = vrot.slane %v13422_v15, 5 }
 0x377   : > { %v5877_v25 = vadd.f32 %v5876_v18, %v13154_v48  ;;  %v6253_v6 = vpop.f32.mrf.mxu3  ;;  %v10848_v18 = vld [vmem:[%s14697_s3 + $0x1a0] sm:$0xff]  ;;  %v8827_v46 = vsel %vm11415_vm5, %v8825_v5, %v8826_v31  ;;  %v6799_v52 = vsel %vm11113_vm2, %v6794_v35, %v6798_v36  ;;  %v7342_v5 = vld [vmem:[#allocation2 + $0x48] sm:$0xe]  ;;  %v13460_v36 = vrot.slane %v6820_v51, 5  ;;  %8639 = vmatpush.bf16.msra.mxu0 %v10856_v17 }
 0x378   : > { %v13424_v48 = vpack.c.b16 %v7538_v34, %v7537_v9  ;;  %v8950_v20 = vunpack.c.l.b16 %v8827_v46  ;;  %v6816_v9 = vrot.slane %v6814_v44, 4  ;;  %v7110_v34 = vunpack.c.l.b16 %v6789_v24  ;;  %7958 = vmatpush.bf16.msra.mxu3 %v10848_v18  ;;  %v13456_v35 = vld [vmem:[#allocation2 + $0x48] sm:$0xf]  ;;  %v8758_v2 = vld [vmem:[#allocation2 + $0x24] sm:$0xe] }
 0x379   : > { %v13420_v30 = vadd.f32 %v6253_v6, %v5877_v25  ;;  %v13452_v25 = vpop.f32.mrf.mxu0  ;;  %v13454_v6 = vrot.slane %v6810_v41, 5  ;;  %v7111_v31 = vunpack.c.l.b16 %v6799_v52  ;;  %v8830_v41 = vrot.slane %v13450_v57, 5  ;;  %v13470_v18 = vld [vmem:[#allocation2 + $0x2c] sm:$0x1] }
 0x37a   : > { %14775 = vst [vmem:[#allocation21_spill] sm:$0xff] %v13424_v48  ;;  %v13428_v55 = vpop.f32.mrf.mxu1  ;;  %v6084_v24 = vrot.slane %v6082_v53, 4  ;;  %v13468_v23 = vrot.slane %v6807_v42, 4  ;;  %v10406_v46 = vrot.slane %v7342_v5, 9  ;;  %v6085_v51 = vrot.slane %v13179_v0, 5  ;;  %v10823_v0 = vld [vmem:[%s14697_s3 + $0x158] sm:$0xff] }
 0x37b   : > { %14774 = vst [vmem:[#allocation22_spill] sm:$0xff] %v13420_v30  ;;  %5918 = vmatmul.bf16.gmra.mxu2 %v10761_v10  ;;  %v8949_v10 = vunpack.c.l.b16 %v8824_v38  ;;  %v6817_v17 = vor.u32 %v6816_v9, %v13454_v6  ;;  %v6825_v52 = vshrl.u32 %v13456_v35, 16  ;;  %v7440_v42 = vrot.slane %v7438_v7, 4  ;;  %v10847_v9 = vld [vmem:[%s14697_s3 + $0x198] sm:$0xff] }
 0x37c   : > { %14776 = vst [vmem:[#allocation23_spill] sm:$0xff] %v13452_v25  ;;  %6295 = vmatmul.bf16.gmra.mxu3 %v6155_v28  ;;  %6608 = vmatmul.bf16.gmra.mxu0 %v10801_v29  ;;  %v13462_v29 = vld [vmem:[#allocation2 + $0x50] sm:$0x1]  ;;  %v7139_v5 = vpack.c.b16 %v7111_v31, %v7110_v34  ;;  %v6086_v34 = vsel %vm11415_vm5, %v6084_v24, %v6085_v51  ;;  %v6834_v24 = vshll.u32 %v13422_v15, 16 }
 0x37d   : > { %v13464_v44 = vpack.c.b16 %v8950_v20, %v8949_v10  ;;  %v10578_v20 = vrot.slane %v8758_v2, 9  ;;  %v10855_v2 = vld [vmem:[%s14697_s3 + $0x1d8] sm:$0xff]  ;;  %v13501_v30 = vrot.slane %v6817_v17, 4  ;;  %7645 = vmatpush.bf16.msra.mxu2 %v10823_v0  ;;  %7959 = vmatpush.bf16.msra.mxu3 %v10847_v9  ;;  %v10846_v51 = vld [vmem:[%s14697_s3 + $0x190] sm:$0xff] }
 0x37e   : > { %v5879_v32 = vpop.f32.mrf.mxu2  ;;  %8640 = vmatpush.bf16.msra.mxu0 %v10855_v2  ;;  %v10854_v17 = vld [vmem:[%s14697_s3 + $0x1d0] sm:$0xff]  ;;  %v13521_v0 = vld [vmem:[#allocation2 + $0x38] sm:$0x1] }
 0x37f   : > { %14777 = vst [vmem:[#allocation3_spill] sm:$0xff] %v13464_v44  ;;  %v5880_v38 = vadd.f32 %v5879_v32, %v13174_v50  ;;  %v6256_v28 = vpop.f32.mrf.mxu3  ;;  %v13477_v44 = vld [vmem:[#allocation2 + $0x34] sm:$0xf]  ;;  %v7439_v50 = vsel %vm11415_vm5, %v10406_v46, %v7438_v7  ;;  %v7441_v32 = vrot.slane %v13462_v29, 5  ;;  %v8832_v7 = vrot.slane %v8830_v41, 4 }
 0x380   : > { %v10239_v46 = vrot.slane %v5948_v19, 9  ;;  %v7539_v48 = vunpack.c.l.b16 %v7439_v50  ;;  %v8837_v50 = vrot.slane %v13477_v44, 5 }
 0x381   : > { %v13475_v10 = vadd.f32 %v6256_v28, %v5880_v38  ;;  %v6828_v38 = vshll.u32 %v13456_v35, 16  ;;  %v8833_v28 = vrot.slane %v13470_v18, 5  ;;  %v7442_v31 = vsel %vm11415_vm5, %v7440_v42, %v7441_v32  ;;  %v13518_v42 = vpop.f32.mrf.mxu0  ;;  %7960 = vmatpush.bf16.msra.mxu3 %v10846_v51 }
 0x382   : > { %v13482_v25 = vpop.f32.mrf.mxu1  ;;  %v7540_v16 = vunpack.c.l.b16 %v7442_v31  ;;  %v6083_v19 = vsel %vm11415_vm5, %v10239_v46, %v6082_v53  ;;  %14779 = vst [vmem:[#allocation25_spill] sm:$0xff] %v13518_v42  ;;  %v6139_v32 = vunpack.c.l.b16 %v6086_v34  ;;  %v6813_v46 = vsel %vm11113_vm2, %v13468_v23, %v13454_v6  ;;  %8641 = vmatpush.bf16.msra.mxu0 %v10854_v17  ;;  %v10821_v17 = vld [vmem:[%s14697_s3 + $0x148] sm:$0xff] }
 0x383   : > { %14778 = vst [vmem:[#allocation24_spill] sm:$0xff] %v13475_v10  ;;  %v8831_v10 = vsel %vm11415_vm5, %v10578_v20, %v8830_v41  ;;  %v8834_v35 = vsel %vm11415_vm5, %v8832_v7, %v8833_v28  ;;  %v10822_v41 = vld [vmem:[%s14697_s3 + $0x150] sm:$0xff]  ;;  %v14702_v31 = vrot.slane %v13239_v49, 5  ;;  %v6138_v42 = vunpack.c.l.b16 %v6083_v19 }
 0x384   : > { %v8952_v20 = vunpack.c.l.b16 %v8834_v35  ;;  %v13523_v9 = vpack.c.b16 %v7540_v16, %v7539_v48  ;;  %v8951_v2 = vunpack.c.l.b16 %v8831_v10  ;;  %v10579_v35 = vrot.slane %v8759_v60, 9  ;;  %7646 = vmatpush.bf16.msra.mxu2 %v10822_v41  ;;  %v10802_v10 = vld [vmem:[#allocation2 + $0xb4] sm:$0xff] }
 0x385   : > { %7239 = vmatmul.bf16.gmra.mxu1 %v7139_v5  ;;  %v6838_v5 = vshrl.u32 %v13422_v15, 16  ;;  %v13531_v34 = vrot.slane %v6825_v52, 4  ;;  %v13533_v15 = vrot.slane %v6828_v38, 5  ;;  %v8839_v23 = vrot.slane %v8837_v50, 4 }
 0x386   : > { %v5881_v53 = vpop.f32.mrf.mxu2  ;;  %14780 = vst [vmem:[#allocation26_spill] sm:$0xff] %v13523_v9  ;;  %v13535_v16 = vpack.c.b16 %v8952_v20, %v8951_v2  ;;  %v8838_v6 = vsel %vm11415_vm5, %v10579_v35, %v8837_v50  ;;  %v8840_v60 = vrot.slane %v13521_v0, 5  ;;  %v6156_v52 = vpack.c.b16 %v6139_v32, %v6138_v42  ;;  %v10845_v20 = vld [vmem:[%s14697_s3 + $0x188] sm:$0xff]  ;;  %v13569_v2 = vld [vmem:[#allocation2 + $0x58] sm:$0xf] }
 0x387   : > { %v5882_v7 = vadd.f32 %v5881_v53, %v13197_v59  ;;  %v6258_v28 = vpop.f32.mrf.mxu3  ;;  %v10762_v59 = vld [vmem:[#allocation2 + $0xa8] sm:$0xff]  ;;  %v6823_v38 = vsel %vm11113_vm2, %v13501_v30, %v13460_v36  ;;  %v13548_v41 = vrot.slane %v6834_v24, 5  ;;  %v13550_v51 = vrot.slane %v6838_v5, 4  ;;  %v8076_v24 = vld [vmem:[#allocation2 + $0x18] sm:$0xf]  ;;  %7961 = vmatpush.bf16.msra.mxu3 %v10845_v20 }
 0x388   : > { %14781 = vst [vmem:[#allocation27_spill] sm:$0xff] %v13535_v16  ;;  %v10853_v50 = vld [vmem:[%s14697_s3 + $0x1c8] sm:$0xff]  ;;  %v13561_v42 = vunpack.c.l.b16 %v6813_v46  ;;  %v14703_v30 = vrot.slane %v13215_v27, 5  ;;  %v8841_v53 = vsel %vm11415_vm5, %v8839_v23, %v8840_v60  ;;  %v8134_v32 = vshll.u32 %v13383_v13, 16  ;;  %7647 = vmatpush.bf16.msra.mxu2 %v10821_v17  ;;  %v10820_v23 = vld [vmem:[%s14697_s3 + $0x140] sm:$0xff] }
 0x389   : > { %v13537_v48 = vadd.f32 %v6258_v28, %v5882_v7  ;;  %v8138_v5 = vshrl.u32 %v13383_v13, 16  ;;  %v7343_v7 = vld [vmem:[#allocation2 + $0x54] sm:$0xe]  ;;  %v8953_v28 = vunpack.c.l.b16 %v8838_v6  ;;  %v8954_v46 = vunpack.c.l.b16 %v8841_v53  ;;  %v13587_v60 = vld [vmem:[#allocation2 + $0x40] sm:$0xf]  ;;  %8642 = vmatpush.bf16.msra.mxu0 %v10853_v50 }
 0x38a   : > { %v13542_v19 = vpop.f32.mrf.mxu1  ;;  %v7113_v35 = vunpack.c.l.b16 %v6823_v38  ;;  %v14784_v13 = vrot.slane %v13417_v26, 9  ;;  %v6844_v38 = vshll.u32 %v13462_v29, 16  ;;  %v10852_v17 = vld [vmem:[%s14697_s3 + $0x1c0] sm:$0xff]  ;;  %v8125_v26 = vshrl.u32 %v8076_v24, 16  ;;  %v13596_v20 = vld [vmem:[#allocation2 + $0x5c] sm:$0x1] }
 0x38b   : > { %14782 = vst [vmem:[#allocation28_spill] sm:$0xff] %v13537_v48  ;;  %5923 = vmatmul.bf16.gmra.mxu2 %v10762_v59  ;;  %v6831_v59 = vor.u32 %v13533_v15, %v13531_v34  ;;  %v7445_v34 = vrot.slane %v13569_v2, 5  ;;  %v13598_v53 = vpack.c.b16 %v8954_v46, %v8953_v28  ;;  %v8128_v16 = vshll.u32 %v8076_v24, 16  ;;  %v13603_v48 = vpop.f32.mrf.mxu0  ;;  %v5949_v29 = vld [vmem:[#allocation2 + $0xb4] sm:$0xe] }
 0x38c   : > { %14783 = vst [vmem:[#allocation29_spill] sm:$0xff] %v13542_v19  ;;  %6300 = vmatmul.bf16.gmra.mxu3 %v6156_v52  ;;  %6613 = vmatmul.bf16.gmra.mxu0 %v10802_v10  ;;  %v10844_v10 = vld [vmem:[%s14697_s3 + $0x180] sm:$0xff]  ;;  %v13585_v6 = vsel %vm11415_vm5, %v14784_v13, %v14702_v31  ;;  %v6841_v52 = vor.u32 %v13550_v51, %v13548_v41  ;;  %v6091_v31 = vrot.slane %v14703_v30, 4  ;;  %v10407_v51 = vrot.slane %v7343_v7, 9 }
 0x38d   : > { %14785 = vst [vmem:[#allocation30_spill] sm:$0xff] %v13598_v53  ;;  %v6092_v50 = vrot.slane %v13219_v47, 5  ;;  %v13606_v9 = vrot.slane %v8134_v32, 5  ;;  %v8140_v19 = vrot.slane %v8138_v5, 4  ;;  %v8844_v62 = vrot.slane %v13587_v60, 5  ;;  %7648 = vmatpush.bf16.msra.mxu2 %v10820_v23  ;;  %7962 = vmatpush.bf16.msra.mxu3 %v10844_v10 }
 0x38e   : > { %v5884_v15 = vpop.f32.mrf.mxu2  ;;  %14786 = vst [vmem:[#allocation31_spill] sm:$0xff] %v13603_v48  ;;  %v7447_v46 = vrot.slane %v7445_v34, 4  ;;  %v7448_v24 = vrot.slane %v13596_v20, 5  ;;  %v6832_v47 = vrot.slane %v6831_v59, 4  ;;  %8643 = vmatpush.bf16.msra.mxu0 %v10852_v17  ;;  %v14787_v32 = vrot.slane %v13239_v49, 5 }
 0x38f   : > { %v5885_v13 = vadd.f32 %v5884_v15, %v13217_v21  ;;  %v6261_v36 = vpop.f32.mrf.mxu3  ;;  %v7446_v21 = vsel %vm11415_vm5, %v10407_v51, %v7445_v34  ;;  %v7140_v15 = vpack.c.b16 %v7113_v35, %v13561_v42  ;;  %v8127_v30 = vrot.slane %v8125_v26, 4  ;;  %v13623_v48 = vld [vmem:[#allocation2 + $0x44] sm:$0x1] }
 0x390   : > { %v7405_v5 = vrot.slane %v14787_v32, 4  ;;  %v6093_v23 = vsel %vm11415_vm5, %v6091_v31, %v6092_v50  ;;  %v8130_v10 = vrot.slane %v8128_v16, 5  ;;  %v7449_v34 = vsel %vm11415_vm5, %v7447_v46, %v7448_v24  ;;  %v10864_v31 = vld [vmem:[%s14697_s3 + $0x220] sm:$0xff] }
 0x391   : > { %v13609_v28 = vadd.f32 %v6261_v36, %v5885_v13  ;;  %v8760_v36 = vld [vmem:[#allocation2 + $0x3c] sm:$0xe]  ;;  %v10240_v13 = vrot.slane %v5949_v29, 9  ;;  %v6842_v51 = vrot.slane %v6841_v52, 4  ;;  %v6846_v53 = vrot.slane %v6844_v38, 5  ;;  %9064 = vmatpush.bf16.msra.mxu1 %v10864_v31 }
 0x392   : > { %v13614_v7 = vpop.f32.mrf.mxu1  ;;  %v7541_v42 = vunpack.c.l.b16 %v7446_v21  ;;  %v7542_v35 = vunpack.c.l.b16 %v7449_v34  ;;  %v14788_v49 = vrot.slane %v13215_v27, 5  ;;  %v8141_v17 = vor.u32 %v8140_v19, %v13606_v9  ;;  %v8079_v16 = vld [vmem:[#allocation2 + $0x24] sm:$0xf] }
 0x393   : > { %v10580_v26 = vrot.slane %v8760_v36, 9  ;;  %v8846_v52 = vrot.slane %v8844_v62, 4  ;;  %v6141_v29 = vunpack.c.l.b16 %v6093_v23  ;;  %v14789_v50 = vrot.slane %v13257_v61, 5 }
 0x394   : > { %v6090_v59 = vsel %vm11415_vm5, %v10240_v13, %v14788_v49  ;;  %v8144_v27 = vshll.u32 %v13410_v4, 16  ;;  %v13640_v46 = vpack.c.b16 %v7542_v35, %v7541_v42  ;;  %v8847_v36 = vrot.slane %v13623_v48, 5  ;;  %v10803_v49 = vld [vmem:[#allocation2 + $0xc0] sm:$0xff] }
 0x395   : > { %7244 = vmatmul.bf16.gmra.mxu1 %v7140_v15  ;;  %v13637_v21 = vsel %vm11415_vm5, %v7405_v5, %v14789_v50  ;;  %v8131_v15 = vor.u32 %v8130_v10, %v8127_v30  ;;  %v8845_v32 = vsel %vm11415_vm5, %v10580_v26, %v8844_v62  ;;  %v6140_v13 = vunpack.c.l.b16 %v6090_v59  ;;  %v13655_v62 = vpop.f32.mrf.mxu0  ;;  %v7344_v50 = vld [vmem:[#allocation2 + $0x60] sm:$0xe] }
 0x396   : > { %v5886_v38 = vpop.f32.mrf.mxu2  ;;  %v6837_v61 = vsel %vm11113_vm2, %v6832_v47, %v13548_v41  ;;  %v6847_v4 = vsel %vm11113_vm2, %v6842_v51, %v6846_v53  ;;  %v8149_v5 = vshrl.u32 %v8079_v16, 16  ;;  %v8142_v34 = vrot.slane %v8141_v17, 4  ;;  %14791 = vst [vmem:[#allocation33_spill] sm:$0xff] %v13655_v62  ;;  %v6674_v17 = vld [vmem:[#allocation2 + $0x54] sm:$0xf] }
 0x397   : > { %v5887_v19 = vadd.f32 %v5886_v38, %v13241_v14  ;;  %v6263_v24 = vpop.f32.mrf.mxu3  ;;  %v10763_v14 = vld [vmem:[#allocation2 + $0xb4] sm:$0xff]  ;;  %v8152_v30 = vshll.u32 %v8079_v16, 16  ;;  %v8848_v10 = vsel %vm11415_vm5, %v8846_v52, %v8847_v36  ;;  %v6157_v35 = vpack.c.b16 %v6141_v29, %v6140_v13  ;;  %v13665_v29 = vld [vmem:[#allocation2 + $0x64] sm:$0xf] }
 0x398   : > { %v8158_v41 = vshll.u32 %v13450_v57, 16  ;;  %v8955_v47 = vunpack.c.l.b16 %v8845_v32  ;;  %v8956_v59 = vunpack.c.l.b16 %v8848_v10  ;;  %v7529_v53 = vunpack.c.l.b16 %v13585_v6 }
 0x399   : > { %v13651_v23 = vadd.f32 %v6263_v24, %v5887_v19  ;;  %v8132_v51 = vrot.slane %v8131_v15, 4  ;;  %v8146_v31 = vrot.slane %v8144_v27, 5  ;;  %v8162_v16 = vshrl.u32 %v13450_v57, 16  ;;  %v13671_v27 = vld [vmem:[#allocation2 + $0x4c] sm:$0xf] }
 0x39a   : > { %v13657_v42 = vpop.f32.mrf.mxu1  ;;  %v7530_v26 = vunpack.c.l.b16 %v13637_v21  ;;  %v6858_v52 = vshll.u32 %v13569_v2, 16  ;;  %v6862_v38 = vshrl.u32 %v13569_v2, 16  ;;  %v13667_v19 = vpack.c.b16 %v8956_v59, %v8955_v47 }
 0x39b   : > { %14790 = vst [vmem:[#allocation32_spill] sm:$0xff] %v13651_v23  ;;  %5928 = vmatmul.bf16.gmra.mxu2 %v10763_v14  ;;  %v7114_v24 = vunpack.c.l.b16 %v6837_v61  ;;  %v7115_v6 = vunpack.c.l.b16 %v6847_v4  ;;  %v13669_v15 = vrot.slane %v8149_v5, 4  ;;  %v7452_v57 = vrot.slane %v13665_v29, 5  ;;  %v13683_v61 = vld [vmem:[#allocation2 + $0x68] sm:$0x1] }
 0x39c   : > { %6305 = vmatmul.bf16.gmra.mxu3 %v6157_v35  ;;  %6618 = vmatmul.bf16.gmra.mxu0 %v10803_v49  ;;  %14792 = vst [vmem:[#allocation34_spill] sm:$0xff] %v13667_v19  ;;  %v8137_v21 = vsel %vm11113_vm2, %v8132_v51, %v13606_v9  ;;  %v8147_v2 = vsel %vm11113_vm2, %v8142_v34, %v8146_v31  ;;  %v13679_v36 = vrot.slane %v8152_v30, 5  ;;  %v13681_v13 = vrot.slane %v8158_v41, 5 }
 0x39d   : > { %v6849_v14 = vshrl.u32 %v6674_v17, 16  ;;  %v6852_v10 = vshll.u32 %v6674_v17, 16  ;;  %v10408_v35 = vrot.slane %v7344_v50, 9  ;;  %v13686_v49 = vrot.slane %v6858_v52, 5  ;;  %v8761_v50 = vld [vmem:[#allocation2 + $0x48] sm:$0xe] }
 0x39e   : > { %v5889_v32 = vpop.f32.mrf.mxu2  ;;  %v6864_v47 = vrot.slane %v6862_v38, 4  ;;  %v8164_v59 = vrot.slane %v8162_v16, 4  ;;  %v8851_v9 = vrot.slane %v13671_v27, 5  ;;  %v7454_v30 = vrot.slane %v7452_v57, 4 }
 0x39f   : > { %v5890_v4 = vadd.f32 %v5889_v32, %v13255_v43  ;;  %v6266_v5 = vpop.f32.mrf.mxu3  ;;  %v7453_v34 = vsel %vm11415_vm5, %v10408_v35, %v7452_v57  ;;  %v7455_v41 = vrot.slane %v13683_v61, 5  ;;  %v7141_v43 = vpack.c.b16 %v7115_v6, %v7114_v24  ;;  %v13703_v35 = vld [vmem:[#allocation2 + $0x50] sm:$0x1] }
 0x3a0   : > { %v7561_v32 = vpack.c.b16 %v7530_v26, %v7529_v53  ;;  %v8524_v17 = vunpack.c.l.b16 %v8137_v21  ;;  %v8525_v52 = vunpack.c.l.b16 %v8147_v2  ;;  %v6851_v19 = vrot.slane %v6849_v14, 4  ;;  %v8082_v26 = vld [vmem:[#allocation2 + $0x30] sm:$0xf] }
 0x3a1   : > { %v13689_v51 = vadd.f32 %v6266_v5, %v5890_v4  ;;  %v6854_v38 = vrot.slane %v6852_v10, 5  ;;  %v7456_v16 = vsel %vm11415_vm5, %v7454_v30, %v7455_v41  ;;  %v13698_v4 = vpop.f32.mrf.mxu0  ;;  %v6865_v5 = vor.u32 %v6864_v47, %v13686_v49 }
 0x3a2   : > { %v13694_v31 = vpop.f32.mrf.mxu1  ;;  %14794 = vst [vmem:[#allocation36_spill] sm:$0xff] %v13698_v4  ;;  %v8155_v57 = vor.u32 %v13679_v36, %v13669_v15  ;;  %v7544_v24 = vunpack.c.l.b16 %v7456_v16  ;;  %v8165_v53 = vor.u32 %v8164_v59, %v13681_v13  ;;  %v8182_v6 = vshll.u32 %v13477_v44, 16 }
 0x3a3   : > { %14793 = vst [vmem:[#allocation35_spill] sm:$0xff] %v13689_v51  ;;  %v7543_v51 = vunpack.c.l.b16 %v7453_v34  ;;  %v10581_v21 = vrot.slane %v8761_v50, 9  ;;  %v8853_v2 = vrot.slane %v8851_v9, 4  ;;  %v6868_v10 = vshll.u32 %v13596_v20, 16 }
 0x3a4   : > { %v8168_v47 = vshll.u32 %v13470_v18, 16  ;;  %v8186_v30 = vshrl.u32 %v13477_v44, 16  ;;  %v6855_v41 = vor.u32 %v6854_v38, %v6851_v19  ;;  %v8556_v50 = vpack.c.b16 %v8525_v52, %v8524_v17  ;;  %v10828_v19 = vld [vmem:[#allocation2 + $0x18] sm:$0xff] }
 0x3a5   : > { %7249 = vmatmul.bf16.gmra.mxu1 %v7141_v43  ;;  %v13710_v15 = vpack.c.b16 %v7544_v24, %v7543_v51  ;;  %v8852_v59 = vsel %vm11415_vm5, %v10581_v21, %v8851_v9  ;;  %v8854_v43 = vrot.slane %v13703_v35, 5  ;;  %v6866_v16 = vrot.slane %v6865_v5, 4 }
 0x3a6   : > { %v5891_v14 = vpop.f32.mrf.mxu2  ;;  %v8173_v4 = vshrl.u32 %v8082_v26, 16  ;;  %v8176_v62 = vshll.u32 %v8082_v26, 16  ;;  %v8166_v18 = vrot.slane %v8165_v53, 4  ;;  %v13718_v23 = vrot.slane %v8182_v6, 5  ;;  %v6677_v26 = vld [vmem:[#allocation2 + $0x60] sm:$0xf] }
 0x3a7   : > { %v5892_v36 = vadd.f32 %v5891_v14, %v13272_v45  ;;  %v6268_v34 = vpop.f32.mrf.mxu3  ;;  %v8855_v44 = vsel %vm11415_vm5, %v8853_v2, %v8854_v43  ;;  %v6870_v51 = vrot.slane %v6868_v10, 5  ;;  %v8188_v38 = vrot.slane %v8186_v30, 4  ;;  %v13728_v2 = vld [vmem:[#allocation2 + $0x70] sm:$0xf]  ;;  %v7345_v14 = vld [vmem:[#allocation2 + $0x6c] sm:$0xe] }
 0x3a8   : > { %v8957_v9 = vunpack.c.l.b16 %v8852_v59  ;;  %v8958_v24 = vunpack.c.l.b16 %v8855_v44  ;;  %v6856_v17 = vrot.slane %v6855_v41, 4  ;;  %v8156_v52 = vrot.slane %v8155_v57, 4  ;;  %v13738_v30 = vld [vmem:[#allocation2 + $0x58] sm:$0xf] }
 0x3a9   : > { %v13716_v20 = vadd.f32 %v6268_v34, %v5892_v36  ;;  %v8170_v5 = vrot.slane %v8168_v47, 5  ;;  %v6871_v53 = vsel %vm11113_vm2, %v6866_v16, %v6870_v51  ;;  %v6882_v6 = vshll.u32 %v13665_v29, 16  ;;  %v13741_v34 = vpop.f32.mrf.mxu0 }
 0x3aa   : > { %v13722_v45 = vpop.f32.mrf.mxu1  ;;  %v6886_v21 = vshrl.u32 %v13665_v29, 16  ;;  %v13730_v10 = vpack.c.b16 %v8958_v24, %v8957_v9  ;;  %v8161_v57 = vsel %vm11113_vm2, %v8156_v52, %v13681_v13  ;;  %v8175_v47 = vrot.slane %v8173_v4, 4 }
 0x3ab   : > { %7649 = vmatmul.bf16.vlgmr.msra.gmra.mxu2 %v7561_v32  ;;  %v6861_v32 = vsel %vm11113_vm2, %v6856_v17, %v13686_v49  ;;  %v7459_v36 = vrot.slane %v13728_v2, 5  ;;  %v8171_v41 = vsel %vm11113_vm2, %v8166_v18, %v8170_v5  ;;  %v6873_v59 = vshrl.u32 %v6677_v26, 16  ;;  %v13746_v49 = vld [vmem:[#allocation2 + $0x74] sm:$0x1] }
 0x3ac   : > { %7963 = vmatmul.bf16.vlgmr.msra.gmra.mxu3 %v10828_v19  ;;  %8644 = vmatmul.bf16.vlgmr.msra.gmra.mxu0 %v8556_v50  ;;  %14795 = vst [vmem:[#allocation37_spill] sm:$0xff] %v13730_v10  ;;  %v8178_v43 = vrot.slane %v8176_v62, 5  ;;  %v8189_v50 = vor.u32 %v8188_v38, %v13718_v23  ;;  %v7117_v4 = vunpack.c.l.b16 %v6871_v53  ;;  %v6876_v44 = vshll.u32 %v6677_v26, 16 }
 0x3ad   : > { %v10409_v19 = vrot.slane %v7345_v14, 9  ;;  %v7116_v51 = vunpack.c.l.b16 %v6861_v32  ;;  %v13749_v9 = vrot.slane %v6882_v6, 5  ;;  %v6888_v24 = vrot.slane %v6886_v21, 4  ;;  %v8762_v14 = vld [vmem:[#allocation2 + $0x54] sm:$0xe] }
 0x3ae   : > { %v5894_v29 = vpop.f32.mrf.mxu2  ;;  %v8858_v17 = vrot.slane %v13738_v30, 5  ;;  %v7461_v18 = vrot.slane %v7459_v36, 4  ;;  %v7462_v38 = vrot.slane %v13746_v49, 5  ;;  %v8527_v53 = vunpack.c.l.b16 %v8171_v41 }
 0x3af   : > { %v5895_v16 = vadd.f32 %v5894_v29, %v13292_v12  ;;  %v6271_v13 = vpop.f32.mrf.mxu3  ;;  %v7460_v62 = vsel %vm11415_vm5, %v10409_v19, %v7459_v36  ;;  %v8526_v12 = vunpack.c.l.b16 %v8161_v57  ;;  %v8192_v26 = vshll.u32 %v13521_v0, 16  ;;  %v13763_v19 = vld [vmem:[#allocation2 + $0x5c] sm:$0x1] }
 0x3b0   : > { %v7142_v6 = vpack.c.b16 %v7117_v4, %v7116_v51  ;;  %v6875_v32 = vrot.slane %v6873_v59, 4  ;;  %v6878_v21 = vrot.slane %v6876_v44, 5  ;;  %v7463_v29 = vsel %vm11415_vm5, %v7461_v18, %v7462_v38  ;;  %v10863_v0 = vld [vmem:[%s14697_s3 + $0x218] sm:$0xff] }
 0x3b1   : > { %v13752_v52 = vadd.f32 %v6271_v13, %v5895_v16  ;;  %v6889_v16 = vor.u32 %v6888_v24, %v13749_v9  ;;  %v8179_v13 = vor.u32 %v8178_v43, %v8175_v47  ;;  %v7545_v36 = vunpack.c.l.b16 %v7460_v62  ;;  %v8085_v57 = vld [vmem:[#allocation2 + $0x3c] sm:$0xf]  ;;  %9065 = vmatpush.bf16.msra.mxu1 %v10863_v0 }
 0x3b2   : > { %v13757_v5 = vpop.f32.mrf.mxu1  ;;  %v7546_v10 = vunpack.c.l.b16 %v7463_v29  ;;  %v10582_v41 = vrot.slane %v8762_v14, 9  ;;  %v8860_v59 = vrot.slane %v8858_v17, 4  ;;  %v8557_v44 = vpack.c.b16 %v8527_v53, %v8526_v12 }
 0x3b3   : > { %14796 = vst [vmem:[#allocation38_spill] sm:$0xff] %v13752_v52  ;;  %v8190_v52 = vrot.slane %v8189_v50, 4  ;;  %v6892_v51 = vshll.u32 %v13683_v61, 16  ;;  %v8194_v18 = vrot.slane %v8192_v26, 5  ;;  %v6879_v62 = vor.u32 %v6878_v21, %v6875_v32 }
 0x3b4   : > { %v13769_v24 = vpack.c.b16 %v7546_v10, %v7545_v36  ;;  %v8859_v50 = vsel %vm11415_vm5, %v10582_v41, %v8858_v17  ;;  %v8861_v38 = vrot.slane %v13763_v19, 5  ;;  %v6890_v14 = vrot.slane %v6889_v16, 4  ;;  %v10829_v17 = vld [vmem:[#allocation2 + $0x24] sm:$0xff] }
 0x3b5   : > { %7254 = vmatmul.bf16.gmra.mxu1 %v7142_v6  ;;  %v13775_v6 = vpop.f32.mrf.mxu0  ;;  %v8180_v29 = vrot.slane %v8179_v13, 4  ;;  %v8197_v12 = vshrl.u32 %v8085_v57, 16  ;;  %v8200_v53 = vshll.u32 %v8085_v57, 16  ;;  %v8195_v10 = vsel %vm11113_vm2, %v8190_v52, %v8194_v18  ;;  %v6680_v57 = vld [vmem:[#allocation2 + $0x6c] sm:$0xf] }
 0x3b6   : > { %v5896_v4 = vpop.f32.mrf.mxu2  ;;  %14797 = vst [vmem:[#allocation39_spill] sm:$0xff] %v13775_v6  ;;  %v8862_v26 = vsel %vm11415_vm5, %v8860_v59, %v8861_v38  ;;  %v6894_v21 = vrot.slane %v6892_v51, 5  ;;  %v8210_v36 = vshrl.u32 %v13587_v60, 16  ;;  %v8959_v16 = vunpack.c.l.b16 %v8859_v50  ;;  %v7346_v51 = vld [vmem:[#allocation2 + $0x78] sm:$0xe] }
 0x3b7   : > { %v5897_v47 = vadd.f32 %v5896_v4, %v13317_v54  ;;  %v6273_v43 = vpop.f32.mrf.mxu3  ;;  %v8206_v54 = vshll.u32 %v13587_v60, 16  ;;  %v8960_v13 = vunpack.c.l.b16 %v8862_v26  ;;  %v6880_v0 = vrot.slane %v6879_v62, 4  ;;  %v13795_v60 = vld [vmem:[#allocation2 + $0x7c] sm:$0xf] }
 0x3b8   : > { %v8185_v52 = vsel %vm11113_vm2, %v8180_v29, %v13718_v23  ;;  %v6895_v41 = vsel %vm11113_vm2, %v6890_v14, %v6894_v21  ;;  %v6906_v59 = vshll.u32 %v13728_v2, 16  ;;  %v6910_v4 = vshrl.u32 %v13728_v2, 16  ;;  %v13809_v29 = vld [vmem:[#allocation2 + $0x80] sm:$0x1] }
 0x3b9   : > { %v13777_v61 = vadd.f32 %v6273_v43, %v5897_v47  ;;  %v13797_v18 = vpack.c.b16 %v8960_v13, %v8959_v16  ;;  %v13802_v23 = vunpack.c.l.b16 %v8195_v10  ;;  %v8199_v47 = vrot.slane %v8197_v12, 4 }
 0x3ba   : > { %v13784_v32 = vpop.f32.mrf.mxu1  ;;  %v7466_v43 = vrot.slane %v13795_v60, 5  ;;  %v6897_v50 = vshrl.u32 %v6680_v57, 16  ;;  %v8202_v38 = vrot.slane %v8200_v53, 5  ;;  %v13807_v2 = vrot.slane %v8206_v54, 5 }
 0x3bb   : > { %14798 = vst [vmem:[#allocation40_spill] sm:$0xff] %v13777_v61  ;;  %7654 = vmatmul.bf16.gmra.mxu2 %v13322_v33  ;;  %v6885_v33 = vsel %vm11113_vm2, %v6880_v0, %v13749_v9  ;;  %v8212_v14 = vrot.slane %v8210_v36, 4  ;;  %v7119_v21 = vunpack.c.l.b16 %v6895_v41  ;;  %v6900_v9 = vshll.u32 %v6680_v57, 16 }
 0x3bc   : > { %7968 = vmatmul.bf16.gmra.mxu3 %v10829_v17  ;;  %8649 = vmatmul.bf16.gmra.mxu0 %v8557_v44  ;;  %14799 = vst [vmem:[#allocation41_spill] sm:$0xff] %v13797_v18  ;;  %v13804_v44 = vld [vmem:[#allocation2 + $0x64] sm:$0xf]  ;;  %v10410_v10 = vrot.slane %v7346_v51, 9  ;;  %v7118_v16 = vunpack.c.l.b16 %v6885_v33  ;;  %v13812_v12 = vrot.slane %v6906_v59, 5  ;;  %v6912_v13 = vrot.slane %v6910_v4, 4 }
 0x3bd   : > { %v8865_v0 = vrot.slane %v13804_v44, 5  ;;  %v7468_v54 = vrot.slane %v7466_v43, 4  ;;  %v7469_v36 = vrot.slane %v13809_v29, 5  ;;  %v13820_v61 = vpop.f32.mrf.mxu0  ;;  %v8528_v57 = vunpack.c.l.b16 %v8185_v52  ;;  %v8763_v51 = vld [vmem:[#allocation2 + $0x60] sm:$0xe] }
 0x3be   : > { %v5899_v62 = vpop.f32.mrf.mxu2  ;;  %v7467_v53 = vsel %vm11415_vm5, %v10410_v10, %v7466_v43  ;;  %14801 = vst [vmem:[#allocation43_spill] sm:$0xff] %v13820_v61  ;;  %v8203_v41 = vor.u32 %v8202_v38, %v8199_v47  ;;  %v8213_v59 = vor.u32 %v8212_v14, %v13807_v2  ;;  %v7143_v4 = vpack.c.b16 %v7119_v21, %v7118_v16  ;;  %v13829_v10 = vld [vmem:[#allocation2 + $0x68] sm:$0x1] }
 0x3bf   : > { %v5900_v26 = vadd.f32 %v5899_v62, %v13332_v3  ;;  %v6276_v17 = vpop.f32.mrf.mxu3  ;;  %v6899_v33 = vrot.slane %v6897_v50, 4  ;;  %v6902_v62 = vrot.slane %v6900_v9, 5  ;;  %v8216_v43 = vshll.u32 %v13623_v48, 16  ;;  %v8088_v47 = vld [vmem:[#allocation2 + $0x48] sm:$0xf] }
 0x3c0   : > { %v8558_v52 = vpack.c.b16 %v13802_v23, %v8528_v57  ;;  %v10583_v38 = vrot.slane %v8763_v51, 9  ;;  %v8867_v14 = vrot.slane %v8865_v0, 4  ;;  %v6916_v50 = vshll.u32 %v13746_v49, 16 }
 0x3c1   : > { %v13815_v18 = vadd.f32 %v6276_v17, %v5900_v26  ;;  %v7470_v26 = vsel %vm11415_vm5, %v7468_v54, %v7469_v36  ;;  %v6913_v17 = vor.u32 %v6912_v13, %v13812_v12  ;;  %v8204_v9 = vrot.slane %v8203_v41, 4 }
 0x3c2   : > { %v13822_v3 = vpop.f32.mrf.mxu1  ;;  %v7548_v61 = vunpack.c.l.b16 %v7470_v26  ;;  %v8214_v16 = vrot.slane %v8213_v59, 4  ;;  %v6903_v36 = vor.u32 %v6902_v62, %v6899_v33  ;;  %v8218_v51 = vrot.slane %v8216_v43, 5 }
 0x3c3   : > { %14800 = vst [vmem:[#allocation42_spill] sm:$0xff] %v13815_v18  ;;  %v7547_v18 = vunpack.c.l.b16 %v7467_v53  ;;  %v8866_v53 = vsel %vm11415_vm5, %v10583_v38, %v8865_v0  ;;  %v6914_v23 = vrot.slane %v6913_v17, 4  ;;  %v8209_v57 = vsel %vm11113_vm2, %v8204_v9, %v13807_v2  ;;  %v10830_v0 = vld [vmem:[#allocation2 + $0x30] sm:$0xff]  ;;  %v6683_v38 = vld [vmem:[#allocation2 + $0x78] sm:$0xf] }
 0x3c4   : > { %v8221_v49 = vshrl.u32 %v8088_v47, 16  ;;  %v6918_v33 = vrot.slane %v6916_v50, 5  ;;  %v8234_v62 = vshrl.u32 %v13671_v27, 16  ;;  %v8961_v26 = vunpack.c.l.b16 %v8866_v53  ;;  %v13861_v9 = vld [vmem:[#allocation2 + $0x88] sm:$0xf] }
 0x3c5   : > { %7259 = vmatmul.bf16.gmra.mxu1 %v7143_v4  ;;  %v13833_v54 = vpack.c.b16 %v7548_v61, %v7547_v18  ;;  %v8868_v4 = vrot.slane %v13829_v10, 5  ;;  %v8224_v61 = vshll.u32 %v8088_v47, 16  ;;  %v8230_v18 = vshll.u32 %v13671_v27, 16 }
 0x3c6   : > { %v5901_v21 = vpop.f32.mrf.mxu2  ;;  %v6904_v2 = vrot.slane %v6903_v36, 4  ;;  %v8219_v43 = vsel %vm11113_vm2, %v8214_v16, %v8218_v51  ;;  %v13853_v47 = vunpack.c.l.b16 %v8209_v57  ;;  %v6930_v27 = vshll.u32 %v13795_v60, 16  ;;  %v13873_v51 = vld [vmem:[#allocation2 + $0x8c] sm:$0x1] }
 0x3c7   : > { %v5902_v13 = vadd.f32 %v5901_v21, %v13355_v56  ;;  %v6278_v48 = vpop.f32.mrf.mxu3  ;;  %v8869_v56 = vsel %vm11415_vm5, %v8867_v14, %v8868_v4  ;;  %v13855_v21 = vpop.f32.mrf.mxu0  ;;  %v6919_v14 = vsel %vm11113_vm2, %v6914_v23, %v6918_v33  ;;  %v6934_v50 = vshrl.u32 %v13795_v60, 16 }
 0x3c8   : > { %v8962_v17 = vunpack.c.l.b16 %v8869_v56  ;;  %14803 = vst [vmem:[#allocation45_spill] sm:$0xff] %v13855_v21  ;;  %v6909_v16 = vsel %vm11113_vm2, %v6904_v2, %v13812_v12  ;;  %v8226_v36 = vrot.slane %v8224_v61, 5  ;;  %v13869_v4 = vunpack.c.l.b16 %v8219_v43 }
 0x3c9   : > { %v13842_v41 = vadd.f32 %v6278_v48, %v5902_v13  ;;  %v8223_v48 = vrot.slane %v8221_v49, 4  ;;  %v6921_v23 = vshrl.u32 %v6683_v38, 16  ;;  %v13871_v57 = vrot.slane %v8230_v18, 5  ;;  %v13882_v18 = vld [vmem:[#allocation2 + $0x70] sm:$0xf] }
 0x3ca   : > { %v13847_v59 = vpop.f32.mrf.mxu1  ;;  %v13863_v13 = vpack.c.b16 %v8962_v17, %v8961_v26  ;;  %v8236_v60 = vrot.slane %v8234_v62, 4  ;;  %v7121_v33 = vunpack.c.l.b16 %v6919_v14  ;;  %v6924_v26 = vshll.u32 %v6683_v38, 16 }
 0x3cb   : > { %14802 = vst [vmem:[#allocation44_spill] sm:$0xff] %v13842_v41  ;;  %7659 = vmatmul.bf16.gmra.mxu2 %v13349_v37  ;;  %v7347_v37 = vld [vmem:[#allocation2 + $0x84] sm:$0xe]  ;;  %v6624_v12 = vadd.f32 %v13195_v1, %v13211_v8  ;;  %v7120_v49 = vunpack.c.l.b16 %v6909_v16  ;;  %v13878_v61 = vrot.slane %v6930_v27, 5  ;;  %v6936_v2 = vrot.slane %v6934_v50, 4 }
 0x3cc   : > { %7973 = vmatmul.bf16.gmra.mxu3 %v10830_v0  ;;  %8654 = vmatmul.bf16.gmra.mxu0 %v8558_v52  ;;  %14804 = vst [vmem:[#allocation46_spill] sm:$0xff] %v13863_v13  ;;  %v7473_v52 = vrot.slane %v13861_v9, 5  ;;  %v10411_v17 = vrot.slane %v7347_v37, 9  ;;  %v6923_v38 = vrot.slane %v6921_v23, 4  ;;  %v8227_v37 = vor.u32 %v8226_v36, %v8223_v48  ;;  %v13900_v36 = vld [vmem:[#allocation2 + $0x74] sm:$0x1] }
 0x3cd   : > { %v8240_v1 = vshll.u32 %v13703_v35, 16  ;;  %v7144_v27 = vpack.c.b16 %v7121_v33, %v7120_v49  ;;  %v6926_v50 = vrot.slane %v6924_v26, 5  ;;  %v8559_v48 = vpack.c.b16 %v13869_v4, %v13853_v47  ;;  %v10862_v35 = vld [vmem:[%s14697_s3 + $0x210] sm:$0xff] }
 0x3ce   : > { %v5904_v53 = vpop.f32.mrf.mxu2  ;;  %v7474_v62 = vsel %vm11415_vm5, %v10411_v17, %v7473_v52  ;;  %v7475_v13 = vrot.slane %v7473_v52, 4  ;;  %v13905_v33 = vrot.slane %v8227_v37, 4  ;;  %v8091_v26 = vld [vmem:[#allocation2 + $0x54] sm:$0xf]  ;;  %9066 = vmatpush.bf16.msra.mxu1 %v10862_v35  ;;  %v8875_v37 = vrot.slane %v13900_v36, 5 }
 0x3cf   : > { %v5905_v56 = vadd.f32 %v5904_v53, %v13385_v58  ;;  %v6281_v0 = vpop.f32.mrf.mxu3  ;;  %v7476_v58 = vrot.slane %v13873_v51, 5  ;;  %v8237_v53 = vor.u32 %v8236_v60, %v13871_v57  ;;  %v7549_v52 = vunpack.c.l.b16 %v7474_v62  ;;  %v13902_v23 = vpop.f32.mrf.mxu0 }
 0x3d0   : > { %14806 = vst [vmem:[#allocation48_spill] sm:$0xff] %v13902_v23  ;;  %v6940_v60 = vshll.u32 %v13809_v29, 16  ;;  %v6927_v4 = vor.u32 %v6926_v50, %v6923_v38  ;;  %v8254_v38 = vshll.u32 %v13738_v30, 16  ;;  %v10831_v50 = vld [vmem:[#allocation2 + $0x3c] sm:$0xff]  ;;  %v14022_v23 = vld [vmem:[#allocation2 + $0x98] sm:$0x1] }
 0x3d1   : > { %v13880_v43 = vadd.f32 %v6281_v0, %v5905_v56  ;;  %v7477_v16 = vsel %vm11415_vm5, %v7475_v13, %v7476_v58  ;;  %v8764_v56 = vld [vmem:[#allocation2 + $0x6c] sm:$0xe]  ;;  %v6937_v0 = vor.u32 %v6936_v2, %v13878_v61  ;;  %v13910_v62 = vrot.slane %v8237_v53, 4  ;;  %v13922_v53 = vld [vmem:[#allocation2 + $0x7c] sm:$0xf] }
 0x3d2   : > { %v7225_v14 = vpop.f32.mrf.mxu1  ;;  %v7550_v17 = vunpack.c.l.b16 %v7477_v16  ;;  %v10584_v49 = vrot.slane %v8764_v56, 9  ;;  %v13912_v58 = vrot.slane %v8240_v1, 5  ;;  %v6625_v16 = vadd.f32 %v13213_v63, %v13235_v11  ;;  %v6686_v11 = vld [vmem:[#allocation2 + $0x84] sm:$0xf] }
 0x3d3   : > { %14805 = vst [vmem:[#allocation47_spill] sm:$0xff] %v13880_v43  ;;  %v13889_v8 = vadd.f32 %v7225_v14, %v6624_v12  ;;  %v8872_v43 = vrot.slane %v13882_v18, 5  ;;  %v6938_v14 = vrot.slane %v6937_v0, 4  ;;  %v8248_v0 = vshll.u32 %v8091_v26, 16 }
 0x3d4   : > { %v13907_v12 = vpack.c.b16 %v7550_v17, %v7549_v52  ;;  %v6942_v52 = vrot.slane %v6940_v60, 5  ;;  %v8258_v17 = vshrl.u32 %v13738_v30, 16  ;;  %v6928_v63 = vrot.slane %v6927_v4, 4 }
 0x3d5   : > { %7264 = vmatmul.bf16.gmra.mxu1 %v7144_v27  ;;  %v8873_v27 = vsel %vm11415_vm5, %v10584_v49, %v8872_v43  ;;  %v8874_v29 = vrot.slane %v8872_v43, 4  ;;  %v6954_v60 = vshll.u32 %v13861_v9, 16  ;;  %v6958_v30 = vshrl.u32 %v13861_v9, 16 }
 0x3d6   : > { %v5906_v13 = vpop.f32.mrf.mxu2  ;;  %v6945_v9 = vshrl.u32 %v6686_v11, 16 }
 0x3d7   : > { %v5907_v2 = vadd.f32 %v5906_v13, %v13428_v55  ;;  %v6283_v47 = vpop.f32.mrf.mxu3  ;;  %v8245_v55 = vshrl.u32 %v8091_v26, 16  ;;  %v8876_v43 = vsel %vm11415_vm5, %v8874_v29, %v8875_v37  ;;  %v8963_v13 = vunpack.c.l.b16 %v8873_v27  ;;  %v8765_v26 = vld [vmem:[#allocation2 + $0x78] sm:$0xe] }
 0x3d8   : > { %v8964_v49 = vunpack.c.l.b16 %v8876_v43  ;;  %v13941_v27 = vrot.slane %v8254_v38, 5  ;;  %v6948_v37 = vshll.u32 %v6686_v11, 16  ;;  %v13951_v38 = vpop.f32.mrf.mxu0  ;;  %v14810_v43 = vld [vmem:[#allocation5_spill] sm:$0xff] }
 0x3d9   : > { %v13919_v56 = vadd.f32 %v6283_v47, %v5907_v2  ;;  %v6943_v2 = vsel %vm11113_vm2, %v6938_v14, %v6942_v52  ;;  %v8879_v47 = vrot.slane %v13922_v53, 5  ;;  %v13939_v4 = vrot.slane %v8245_v55, 4  ;;  %14809 = vst [vmem:[#allocation51_spill] sm:$0xff] %v13951_v38 }
 0x3da   : > { %v7227_v1 = vpop.f32.mrf.mxu1  ;;  %v6933_v14 = vsel %vm11113_vm2, %v6928_v63, %v13878_v61  ;;  %v10585_v55 = vrot.slane %v8765_v26, 9  ;;  %v6947_v26 = vrot.slane %v6945_v9, 4 }
 0x3db   : > { %14807 = vst [vmem:[#allocation49_spill] sm:$0xff] %v13919_v56  ;;  %v13927_v35 = vadd.f32 %v7227_v1, %v6625_v16  ;;  %7664 = vmatmul.bf16.gmra.mxu2 %v13376_v22  ;;  %v8243_v22 = vsel %vm11113_vm2, %v13910_v62, %v13912_v58  ;;  %v8260_v16 = vrot.slane %v8258_v17, 4  ;;  %v13948_v1 = vld [vmem:[#allocation2 + $0x80] sm:$0x1]  ;;  %v7123_v62 = vunpack.c.l.b16 %v6943_v2 }
 0x3dc   : > { %7978 = vmatmul.bf16.gmra.mxu3 %v10831_v50  ;;  %8659 = vmatmul.bf16.gmra.mxu0 %v8559_v48  ;;  %v13943_v48 = vpack.c.b16 %v8964_v49, %v8963_v13  ;;  %v8250_v58 = vrot.slane %v8248_v0, 5  ;;  %v14811_v13 = vld [vmem:[#allocation4_spill] sm:$0xff]  ;;  %v6960_v56 = vrot.slane %v6958_v30, 4  ;;  %v8881_v61 = vrot.slane %v8879_v47, 4 }
 0x3dd   : > { %v6626_v49 = vadd.f32 %v14811_v13, %v14810_v43  ;;  %v7122_v17 = vunpack.c.l.b16 %v6933_v14  ;;  %v8880_v11 = vsel %vm11415_vm5, %v10585_v55, %v8879_v47  ;;  %v8233_v0 = vsel %vm11113_vm2, %v13905_v33, %v13871_v57  ;;  %v8094_v43 = vld [vmem:[#allocation2 + $0x60] sm:$0xf] }
 0x3de   : > { %14808 = vst [vmem:[#allocation50_spill] sm:$0xff] %v13943_v48  ;;  %v5909_v29 = vpop.f32.mrf.mxu2  ;;  %v13955_v48 = vrot.slane %v6954_v60, 5  ;;  %v8261_v60 = vor.u32 %v8260_v16, %v13941_v27  ;;  %v8264_v14 = vshll.u32 %v13763_v19, 16  ;;  %v8965_v13 = vunpack.c.l.b16 %v8880_v11  ;;  %v14814_v19 = vld [vmem:[#allocation29_spill] sm:$0xff]  ;;  %v13978_v11 = vld [vmem:[#allocation2 + $0x94] sm:$0xf] }
 0x3df   : > { %v5910_v50 = vadd.f32 %v5909_v29, %v13482_v25  ;;  %v6286_v52 = vpop.f32.mrf.mxu3  ;;  %v8882_v25 = vrot.slane %v13948_v1, 5  ;;  %v6950_v29 = vrot.slane %v6948_v37, 5  ;;  %v8532_v57 = vunpack.c.l.b16 %v8233_v0  ;;  %v13980_v0 = vld [vmem:[#allocation2 + $0x88] sm:$0xf] }
 0x3e0   : > { %v6961_v55 = vor.u32 %v6960_v56, %v13955_v48  ;;  %v8251_v33 = vor.u32 %v8250_v58, %v13939_v4  ;;  %v6964_v16 = vshll.u32 %v13873_v51, 16  ;;  %v14815_v4 = vld [vmem:[#allocation7_spill] sm:$0xff]  ;;  %v14816_v58 = vld [vmem:[#allocation6_spill] sm:$0xff]  ;;  %v8278_v51 = vshll.u32 %v13804_v44, 16 }
 0x3e1   : > { %v13957_v63 = vadd.f32 %v6286_v52, %v5910_v50  ;;  %v7145_v50 = vpack.c.b16 %v7123_v62, %v7122_v17  ;;  %v8883_v47 = vsel %vm11415_vm5, %v8881_v61, %v8882_v25  ;;  %v8533_v52 = vunpack.c.l.b16 %v8243_v22 }
 0x3e2   : > { %v7230_v2 = vpop.f32.mrf.mxu1  ;;  %v6951_v37 = vor.u32 %v6950_v29, %v6947_v26  ;;  %v8262_v62 = vrot.slane %v8261_v60, 4  ;;  %v8266_v22 = vrot.slane %v8264_v14, 5  ;;  %v8269_v25 = vshrl.u32 %v8094_v43, 16  ;;  %v8766_v60 = vld [vmem:[#allocation2 + $0x84] sm:$0xe] }
 0x3e3   : > { %14812 = vst [vmem:[#allocation5_spill] sm:$0xff] %v13957_v63  ;;  %v13967_v30 = vadd.f32 %v7230_v2, %v6626_v49  ;;  %v8966_v63 = vunpack.c.l.b16 %v8883_v47  ;;  %v8560_v56 = vpack.c.b16 %v8533_v52, %v8532_v57  ;;  %v6962_v2 = vrot.slane %v6961_v55, 4  ;;  %v13988_v47 = vpop.f32.mrf.mxu0  ;;  %v10832_v52 = vld [vmem:[#allocation2 + $0x48] sm:$0xff] }
 0x3e4   : > { %v6627_v26 = vadd.f32 %v14816_v58, %v14815_v4  ;;  %14818 = vst [vmem:[#allocation7_spill] sm:$0xff] %v13988_v47  ;;  %v6952_v55 = vrot.slane %v6951_v37, 4  ;;  %v8252_v57 = vrot.slane %v8251_v33, 4  ;;  %v13997_v4 = vld [vmem:[#allocation2 + $0x8c] sm:$0x1]  ;;  %v8886_v58 = vrot.slane %v13980_v0, 5 }
 0x3e5   : > { %7269 = vmatmul.bf16.gmra.mxu1 %v7145_v50  ;;  %v13975_v49 = vpack.c.b16 %v8966_v63, %v8965_v13  ;;  %v8272_v50 = vshll.u32 %v8094_v43, 16  ;;  %v8282_v63 = vshrl.u32 %v13804_v44, 16  ;;  %v6966_v13 = vrot.slane %v6964_v16, 5 }
 0x3e6   : > { %v5911_v9 = vpop.f32.mrf.mxu2  ;;  %v8267_v43 = vsel %vm11113_vm2, %v8262_v62, %v8266_v22  ;;  %v6982_v44 = vshrl.u32 %v13978_v11, 16  ;;  %v8271_v37 = vrot.slane %v8269_v25, 4  ;;  %v10586_v62 = vrot.slane %v8766_v60, 9 }
 0x3e7   : > { %14813 = vst [vmem:[#allocation4_spill] sm:$0xff] %v13975_v49  ;;  %v5912_v17 = vadd.f32 %v5911_v9, %v14814_v19  ;;  %v6288_v61 = vpop.f32.mrf.mxu3  ;;  %v6689_v9 = vld [vmem:[#allocation2 + $0x90] sm:$0xf]  ;;  %v6967_v33 = vsel %vm11113_vm2, %v6962_v2, %v6966_v13  ;;  %v8274_v16 = vrot.slane %v8272_v50, 5  ;;  %v6957_v22 = vsel %vm11113_vm2, %v6952_v55, %v13955_v48  ;;  %v14821_v55 = vld [vmem:[#allocation8_spill] sm:$0xff] }
 0x3e8   : > { %v8889_v47 = vrot.slane %v13997_v4, 5  ;;  %v7125_v50 = vunpack.c.l.b16 %v6967_v33  ;;  %v6984_v13 = vrot.slane %v6982_v44, 4  ;;  %v14820_v48 = vld [vmem:[#allocation10_spill] sm:$0xff]  ;;  %v7124_v38 = vunpack.c.l.b16 %v6957_v22 }
 0x3e9   : > { %v13984_v29 = vadd.f32 %v6288_v61, %v5912_v17  ;;  %v14819_v17 = vld [vmem:[#allocation21_spill] sm:$0xff]  ;;  %v6978_v61 = vshll.u32 %v13978_v11, 16  ;;  %v8288_v22 = vshll.u32 %v13829_v10, 16 }
 0x3ea   : > { %v7232_v14 = vpop.f32.mrf.mxu1 }
 0x3eb   : > { %14817 = vst [vmem:[#allocation29_spill] sm:$0xff] %v13984_v29  ;;  %v13992_v19 = vadd.f32 %v7232_v14, %v6627_v26  ;;  %7669 = vmatmul.bf16.gmra.mxu2 %v14819_v17  ;;  %v6969_v26 = vshrl.u32 %v6689_v9, 16  ;;  %v14005_v14 = vrot.slane %v8278_v51, 5  ;;  %v8284_v17 = vrot.slane %v8282_v63, 4 }
 0x3ec   : > { %7983 = vmatmul.bf16.gmra.mxu3 %v10832_v52  ;;  %8664 = vmatmul.bf16.gmra.mxu0 %v8560_v56  ;;  %v6972_v29 = vshll.u32 %v6689_v9, 16  ;;  %v8887_v52 = vsel %vm11415_vm5, %v10586_v62, %v8886_v58  ;;  %v8888_v56 = vrot.slane %v8886_v58, 4  ;;  %v14011_v60 = vrot.slane %v6978_v61, 5 }
 0x3ed   : > { %v6628_v51 = vadd.f32 %v14821_v55, %v14820_v48  ;;  %v8257_v63 = vsel %vm11113_vm2, %v8252_v57, %v13941_v27  ;;  %v8535_v9 = vunpack.c.l.b16 %v8267_v43  ;;  %v6971_v44 = vrot.slane %v6969_v26, 4  ;;  %v14030_v43 = vpop.f32.mrf.mxu0 }
 0x3ee   : > { %v5914_v49 = vpop.f32.mrf.mxu2  ;;  %v8890_v58 = vsel %vm11415_vm5, %v8888_v56, %v8889_v47  ;;  %v6974_v41 = vrot.slane %v6972_v29, 5  ;;  %v8275_v48 = vor.u32 %v8274_v16, %v8271_v37  ;;  %v8285_v55 = vor.u32 %v8284_v17, %v14005_v14  ;;  %14824 = vst [vmem:[#allocation10_spill] sm:$0xff] %v14030_v43 }
 0x3ef   : > { %v5915_v25 = vadd.f32 %v5914_v49, %v13614_v7  ;;  %v6291_v2 = vpop.f32.mrf.mxu3  ;;  %v8097_v7 = vld [vmem:[#allocation2 + $0x6c] sm:$0xf]  ;;  %v8967_v49 = vunpack.c.l.b16 %v8887_v52  ;;  %v8968_v33 = vunpack.c.l.b16 %v8890_v58  ;;  %v7146_v27 = vpack.c.b16 %v7125_v50, %v7124_v38 }
 0x3f0   : > { %v6985_v57 = vor.u32 %v6984_v13, %v14011_v60  ;;  %v8293_v52 = vshrl.u32 %v8097_v7, 16  ;;  %v8296_v56 = vshll.u32 %v8097_v7, 16  ;;  %v8534_v29 = vunpack.c.l.b16 %v8257_v63  ;;  %v10861_v38 = vld [vmem:[%s14697_s3 + $0x208] sm:$0xff]  ;;  %v10833_v63 = vld [vmem:[#allocation2 + $0x54] sm:$0xff] }
 0x3f1   : > { %v14020_v62 = vadd.f32 %v6291_v2, %v5915_v25  ;;  %v14028_v47 = vpack.c.b16 %v8968_v33, %v8967_v49  ;;  %v8302_v25 = vshll.u32 %v13882_v18, 16  ;;  %v6988_v37 = vshll.u32 %v14022_v23, 16  ;;  %9067 = vmatpush.bf16.msra.mxu1 %v10861_v38  ;;  %v8767_v38 = vld [vmem:[#allocation2 + $0x90] sm:$0xe] }
 0x3f2   : > { %v7235_v61 = vpop.f32.mrf.mxu1  ;;  %v8306_v16 = vshrl.u32 %v13882_v18, 16  ;;  %v6975_v17 = vor.u32 %v6974_v41, %v6971_v44  ;;  %v14039_v2 = vrot.slane %v8285_v55, 4  ;;  %v8561_v13 = vpack.c.b16 %v8535_v9, %v8534_v29  ;;  %v14052_v41 = vld [vmem:[#allocation2 + $0x94] sm:$0xf]  ;;  %v14826_v44 = vld [vmem:[#allocation11_spill] sm:$0xff] }
 0x3f3   : > { %14822 = vst [vmem:[#allocation6_spill] sm:$0xff] %v14020_v62  ;;  %v14025_v21 = vadd.f32 %v7235_v61, %v6628_v51  ;;  %v6986_v51 = vrot.slane %v6985_v57, 4  ;;  %v14042_v58 = vrot.slane %v8275_v48, 4  ;;  %v14044_v7 = vrot.slane %v8288_v22, 5  ;;  %v14825_v61 = vld [vmem:[#allocation9_spill] sm:$0xff] }
 0x3f4   : > { %14823 = vst [vmem:[#allocation21_spill] sm:$0xff] %v14028_v47  ;;  %v14046_v49 = vrot.slane %v8293_v52, 4  ;;  %v14048_v33 = vrot.slane %v8296_v56, 5  ;;  %v14050_v18 = vrot.slane %v8302_v25, 5  ;;  %v6990_v9 = vrot.slane %v6988_v37, 5 }
 0x3f5   : > { %7274 = vmatmul.bf16.gmra.mxu1 %v7146_v27  ;;  %v14058_v48 = vld [vmem:[#allocation2 + $0xa0] sm:$0xf]  ;;  %v14060_v27 = vrot.slane %v8306_v16, 4  ;;  %v7348_v57 = vld [vmem:[#allocation2 + $0x90] sm:$0xe]  ;;  %v6976_v52 = vrot.slane %v6975_v17, 4  ;;  %v8281_v56 = vsel %vm11113_vm2, %v14042_v58, %v14005_v14  ;;  %v8291_v25 = vsel %vm11113_vm2, %v14039_v2, %v14044_v7 }
 0x3f6   : > { %v5916_v26 = vpop.f32.mrf.mxu2  ;;  %v6692_v29 = vld [vmem:[#allocation2 + $0x9c] sm:$0xf]  ;;  %v8326_v37 = vshll.u32 %v13922_v53, 16  ;;  %v14829_v16 = vld [vmem:[#allocation26_spill] sm:$0xff]  ;;  %v14831_v17 = vld [vmem:[#allocation13_spill] sm:$0xff]  ;;  %v7480_v58 = vrot.slane %v13978_v11, 5 }
 0x3f7   : > { %v5917_v10 = vadd.f32 %v5916_v26, %v13657_v42  ;;  %v6293_v50 = vpop.f32.mrf.mxu3  ;;  %v6629_v42 = vadd.f32 %v14826_v44, %v14825_v61  ;;  %v6991_v61 = vsel %vm11113_vm2, %v6986_v51, %v6990_v9  ;;  %v14078_v14 = vld [vmem:[#allocation2 + $0x98] sm:$0x1]  ;;  %v7002_v2 = vshll.u32 %v14058_v48, 16 }
 0x3f8   : > { %v7006_v7 = vshrl.u32 %v14058_v48, 16  ;;  %v10412_v44 = vrot.slane %v7348_v57, 9  ;;  %v7483_v51 = vrot.slane %v14022_v23, 5  ;;  %v10587_v9 = vrot.slane %v8767_v38, 9 }
 0x3f9   : > { %v14056_v55 = vadd.f32 %v6293_v50, %v5917_v10  ;;  %v14830_v10 = vld [vmem:[#allocation14_spill] sm:$0xff]  ;;  %v8896_v57 = vrot.slane %v14078_v14, 5  ;;  %v7127_v62 = vunpack.c.l.b16 %v6991_v61  ;;  %v6996_v43 = vshll.u32 %v6692_v29, 16 }
 0x3fa   : > { %v7237_v22 = vpop.f32.mrf.mxu1  ;;  %v6630_v50 = vadd.f32 %v14831_v17, %v14830_v10  ;;  %v14088_v10 = vpop.f32.mrf.mxu0  ;;  %v14096_v23 = vrot.slane %v7002_v2, 5 }
 0x3fb   : > { %14827 = vst [vmem:[#allocation8_spill] sm:$0xff] %v14056_v55  ;;  %v14071_v26 = vadd.f32 %v7237_v22, %v6629_v42  ;;  %7674 = vmatmul.bf16.gmra.mxu2 %v14829_v16  ;;  %v8893_v42 = vrot.slane %v14052_v41, 5  ;;  %v6981_v22 = vsel %vm11113_vm2, %v6976_v52, %v14011_v60  ;;  %v6993_v16 = vshrl.u32 %v6692_v29, 16 }
 0x3fc   : > { %7988 = vmatmul.bf16.gmra.mxu3 %v10833_v63  ;;  %8669 = vmatmul.bf16.gmra.mxu0 %v8561_v13  ;;  %14832 = vst [vmem:[#allocation11_spill] sm:$0xff] %v14088_v10  ;;  %v7481_v13 = vsel %vm11415_vm5, %v10412_v44, %v7480_v58  ;;  %v7482_v63 = vrot.slane %v7480_v58, 4  ;;  %v7008_v52 = vrot.slane %v7006_v7, 4  ;;  %v7126_v10 = vunpack.c.l.b16 %v6981_v22 }
 0x3fd   : > { %14828 = vst [vmem:[#allocation9_spill] sm:$0xff] %v14071_v26  ;;  %v8895_v17 = vrot.slane %v8893_v42, 4  ;;  %v8894_v60 = vsel %vm11415_vm5, %v10587_v9, %v8893_v42  ;;  %v7551_v26 = vunpack.c.l.b16 %v7481_v13  ;;  %v6995_v61 = vrot.slane %v6993_v16, 4  ;;  %v14107_v9 = vld [vmem:[#allocation2 + $0xa4] sm:$0x1] }
 0x3fe   : > { %v5919_v11 = vpop.f32.mrf.mxu2  ;;  %v7484_v38 = vsel %vm11415_vm5, %v7482_v63, %v7483_v51  ;;  %v8330_v29 = vshrl.u32 %v13922_v53, 16  ;;  %v8969_v6 = vunpack.c.l.b16 %v8894_v60  ;;  %v7147_v7 = vpack.c.b16 %v7127_v62, %v7126_v10  ;;  %v8100_v53 = vld [vmem:[#allocation2 + $0x78] sm:$0xf] }
 0x3ff   : > { %v5920_v47 = vadd.f32 %v5919_v11, %v13694_v31  ;;  %v6296_v55 = vpop.f32.mrf.mxu3  ;;  %v8897_v58 = vsel %vm11415_vm5, %v8895_v17, %v8896_v57  ;;  %v7552_v31 = vunpack.c.l.b16 %v7484_v38  ;;  %v6998_v51 = vrot.slane %v6996_v43, 5  ;;  %v14834_v38 = vld [vmem:[#allocation16_spill] sm:$0xff] }
 0x400   : > { %v8970_v42 = vunpack.c.l.b16 %v8897_v58  ;;  %v8309_v22 = vor.u32 %v14060_v27, %v14050_v18  ;;  %v8537_v13 = vunpack.c.l.b16 %v8291_v25  ;;  %v7012_v62 = vshll.u32 %v14107_v9, 16  ;;  %v14835_v58 = vld [vmem:[#allocation12_spill] sm:$0xff] }
 0x401   : > { %v14102_v44 = vadd.f32 %v6296_v55, %v5920_v47  ;;  %v14109_v63 = vpack.c.b16 %v7552_v31, %v7551_v26  ;;  %v7009_v47 = vor.u32 %v7008_v52, %v14096_v23  ;;  %v8299_v55 = vor.u32 %v14048_v33, %v14046_v49 }
 0x402   : > { %v7240_v11 = vpop.f32.mrf.mxu1  ;;  %v14116_v16 = vpack.c.b16 %v8970_v42, %v8969_v6  ;;  %v14119_v10 = vrot.slane %v8326_v37, 5  ;;  %v8332_v43 = vrot.slane %v8330_v29, 4  ;;  %v8536_v57 = vunpack.c.l.b16 %v8281_v56  ;;  %v14123_v33 = vpop.f32.mrf.mxu0 }
 0x403   : > { %v14105_v2 = vadd.f32 %v7240_v11, %v6630_v50  ;;  %v6999_v60 = vor.u32 %v6998_v51, %v6995_v61  ;;  %v8312_v49 = vshll.u32 %v13900_v36, 16  ;;  %v7010_v6 = vrot.slane %v7009_v47, 4  ;;  %v14133_v11 = vld [vmem:[#allocation2 + $0xac] sm:$0xf]  ;;  %v10834_v36 = vld [vmem:[#allocation2 + $0x60] sm:$0xff] }
 0x404   : > { %14833 = vst [vmem:[#allocation26_spill] sm:$0xff] %v14116_v16  ;;  %v14125_v27 = vrot.slane %v8299_v55, 4  ;;  %v14127_v52 = vrot.slane %v8309_v22, 4  ;;  %v8317_v25 = vshrl.u32 %v8100_v53, 16  ;;  %v6631_v37 = vadd.f32 %v14835_v58, %v14834_v38 }
 0x405   : > { %7279 = vmatmul.bf16.gmra.mxu1 %v7147_v7  ;;  %v8336_v56 = vshll.u32 %v13948_v1, 16  ;;  %v8562_v29 = vpack.c.b16 %v8537_v13, %v8536_v57  ;;  %v7014_v42 = vrot.slane %v7012_v62, 5  ;;  %v8333_v7 = vor.u32 %v8332_v43, %v14119_v10  ;;  %v7349_v62 = vld [vmem:[#allocation2 + $0x9c] sm:$0xe]  ;;  %v8103_v57 = vld [vmem:[#allocation2 + $0x84] sm:$0xf] }
 0x406   : > { %v5921_v50 = vpop.f32.mrf.mxu2  ;;  %v7000_v47 = vrot.slane %v6999_v60, 4  ;;  %v8305_v55 = vsel %vm11113_vm2, %v14125_v27, %v14050_v18  ;;  %v8314_v22 = vrot.slane %v8312_v49, 5  ;;  %v7030_v13 = vshrl.u32 %v14133_v11, 16 }
 0x407   : > { %v5922_v26 = vadd.f32 %v5921_v50, %v13722_v45  ;;  %v6298_v17 = vpop.f32.mrf.mxu3  ;;  %v8320_v45 = vshll.u32 %v8100_v53, 16  ;;  %v6695_v53 = vld [vmem:[#allocation2 + $0xa8] sm:$0xf]  ;;  %v7015_v1 = vsel %vm11113_vm2, %v7010_v6, %v7014_v42  ;;  %v7026_v50 = vshll.u32 %v14133_v11, 16 }
 0x408   : > { %v8315_v43 = vsel %vm11113_vm2, %v14127_v52, %v8314_v22  ;;  %v7005_v49 = vsel %vm11113_vm2, %v7000_v47, %v14096_v23  ;;  %v7017_v6 = vshrl.u32 %v6695_v53, 16  ;;  %v14161_v27 = vrot.slane %v8333_v7, 4  ;;  %v14838_v42 = vld [vmem:[#allocation17_spill] sm:$0xff]  ;;  %v14171_v47 = vld [vmem:[#allocation2 + $0xa0] sm:$0xf] }
 0x409   : > { %v14131_v31 = vadd.f32 %v6298_v17, %v5922_v26  ;;  %v14152_v26 = vrot.slane %v8317_v25, 4  ;;  %v14154_v18 = vrot.slane %v8320_v45, 5  ;;  %v14156_v17 = vrot.slane %v8336_v56, 5 }
 0x40a   : > { %v7242_v61 = vpop.f32.mrf.mxu1  ;;  %v7129_v52 = vunpack.c.l.b16 %v7015_v1  ;;  %v7020_v25 = vshll.u32 %v6695_v53, 16  ;;  %v14164_v45 = vrot.slane %v7026_v50, 5  ;;  %v7032_v56 = vrot.slane %v7030_v13, 4  ;;  %v14175_v1 = vpop.f32.mrf.mxu0  ;;  %v14177_v50 = vld [vmem:[#allocation2 + $0xb0] sm:$0x1] }
 0x40b   : > { %14836 = vst [vmem:[#allocation14_spill] sm:$0xff] %v14131_v31  ;;  %v14137_v51 = vadd.f32 %v7242_v61, %v6631_v37  ;;  %7679 = vmatmul.bf16.gmra.mxu2 %v13640_v46  ;;  %v7487_v46 = vrot.slane %v14058_v48, 5  ;;  %v10413_v37 = vrot.slane %v7349_v62, 9  ;;  %v8341_v61 = vshrl.u32 %v8103_v57, 16 }
 0x40c   : > { %7993 = vmatmul.bf16.gmra.mxu3 %v10834_v36  ;;  %8674 = vmatmul.bf16.gmra.mxu0 %v8562_v29  ;;  %v7490_v36 = vrot.slane %v14107_v9, 5  ;;  %v14837_v29 = vld [vmem:[#allocation15_spill] sm:$0xff]  ;;  %v7128_v7 = vunpack.c.l.b16 %v7005_v49  ;;  %v7019_v13 = vrot.slane %v7017_v6, 4  ;;  %v8344_v62 = vshll.u32 %v8103_v57, 16 }
 0x40d   : > { %v7489_v48 = vrot.slane %v7487_v46, 4  ;;  %v6632_v22 = vadd.f32 %v14838_v42, %v14837_v29  ;;  %v8350_v9 = vshll.u32 %v13980_v0, 16  ;;  %v7033_v42 = vor.u32 %v7032_v56, %v14164_v45 }
 0x40e   : > { %v5924_v60 = vpop.f32.mrf.mxu2  ;;  %v7148_v49 = vpack.c.b16 %v7129_v52, %v7128_v7  ;;  %v8900_v16 = vrot.slane %v14171_v47, 5  ;;  %v8538_v6 = vunpack.c.l.b16 %v8305_v55  ;;  %v7036_v57 = vshll.u32 %v14177_v50, 16  ;;  %v14193_v52 = vld [vmem:[#allocation2 + $0xa4] sm:$0x1]  ;;  %v14204_v7 = vld [vmem:[#allocation2 + $0xb8] sm:$0xf] }
 0x40f   : > { %v5925_v38 = vadd.f32 %v5924_v60, %v13757_v5  ;;  %v6301_v58 = vpop.f32.mrf.mxu3  ;;  %v7488_v5 = vsel %vm11415_vm5, %v10413_v37, %v7487_v46  ;;  %v7491_v60 = vsel %vm11415_vm5, %v7489_v48, %v7490_v36  ;;  %v8354_v46 = vshrl.u32 %v13980_v0, 16  ;;  %v10860_v48 = vld [vmem:[%s14697_s3 + $0x200] sm:$0xff] }
 0x410   : > { %v7554_v29 = vunpack.c.l.b16 %v7491_v60  ;;  %v7553_v37 = vunpack.c.l.b16 %v7488_v5  ;;  %v8539_v56 = vunpack.c.l.b16 %v8315_v43  ;;  %v8339_v0 = vsel %vm11113_vm2, %v14161_v27, %v14156_v17  ;;  %9068 = vmatpush.bf16.msra.mxu1 %v10860_v48  ;;  %v14841_v27 = vld [vmem:[#allocation22_spill] sm:$0xff] }
 0x411   : > { %v14169_v23 = vadd.f32 %v6301_v58, %v5925_v38  ;;  %v7022_v58 = vrot.slane %v7020_v25, 5  ;;  %v14199_v36 = vrot.slane %v8341_v61, 4  ;;  %v14206_v5 = vrot.slane %v8344_v62, 5  ;;  %v14842_v61 = vld [vmem:[#allocation19_spill] sm:$0xff]  ;;  %v6698_v48 = vld [vmem:[#allocation2 + $0xb4] sm:$0xf] }
 0x412   : > { %v7245_v53 = vpop.f32.mrf.mxu1  ;;  %v14201_v55 = vpack.c.b16 %v7554_v29, %v7553_v37  ;;  %v7034_v43 = vrot.slane %v7033_v42, 4  ;;  %v8356_v60 = vrot.slane %v8354_v46, 4  ;;  %v8903_v17 = vrot.slane %v14193_v52, 5  ;;  %v8768_v42 = vld [vmem:[#allocation2 + $0x9c] sm:$0xe]  ;;  %v14890_v40 = vld [vmem:[#allocation14_spill] sm:$0xff] }
 0x413   : > { %14839 = vst [vmem:[#allocation13_spill] sm:$0xff] %v14169_v23  ;;  %v14182_v38 = vadd.f32 %v7245_v53, %v6632_v22  ;;  %v8323_v23 = vor.u32 %v14154_v18, %v14152_v26  ;;  %v7023_v18 = vor.u32 %v7022_v58, %v7019_v13  ;;  %v14208_v53 = vrot.slane %v8350_v9, 5 }
 0x414   : > { %v6633_v29 = vadd.f32 %v14842_v61, %v14841_v27  ;;  %v7050_v62 = vshll.u32 %v14204_v7, 16  ;;  %v7054_v9 = vshrl.u32 %v14204_v7, 16  ;;  %v10588_v27 = vrot.slane %v8768_v42, 9 }
 0x415   : > { %14840 = vst [vmem:[#allocation16_spill] sm:$0xff] %v14182_v38  ;;  %7284 = vmatmul.bf16.gmra.mxu1 %v7148_v49  ;;  %v8902_v49 = vrot.slane %v8900_v16, 4  ;;  %v8324_v13 = vrot.slane %v8323_v23, 4  ;;  %v8563_v38 = vpack.c.b16 %v8539_v56, %v8538_v6  ;;  %v7350_v6 = vld [vmem:[#allocation2 + $0xa8] sm:$0xe]  ;;  %v14227_v56 = vpop.f32.mrf.mxu0 }
 0x416   : > { %v5926_v25 = vpop.f32.mrf.mxu2 }
 0x417   : > { %v5927_v22 = vadd.f32 %v5926_v25, %v13784_v32  ;;  %v6303_v26 = vpop.f32.mrf.mxu3  ;;  %v10835_v32 = vld [vmem:[#allocation2 + $0x6c] sm:$0xff]  ;;  %v7038_v25 = vrot.slane %v7036_v57, 5  ;;  %v8904_v46 = vsel %vm11415_vm5, %v8902_v49, %v8903_v17  ;;  %v8329_v23 = vsel %vm11113_vm2, %v8324_v13, %v14119_v10 }
 0x418   : > { %v14225_v57 = vunpack.c.l.b16 %v8339_v0  ;;  %v8347_v49 = vor.u32 %v14206_v5, %v14199_v36  ;;  %v7041_v0 = vshrl.u32 %v6698_v48, 16  ;;  %v7044_v17 = vshll.u32 %v6698_v48, 16  ;;  %v14846_v36 = vld [vmem:[#allocation23_spill] sm:$0xff] }
 0x419   : > { %v14213_v37 = vadd.f32 %v6303_v26, %v5927_v22  ;;  %v7024_v22 = vrot.slane %v7023_v18, 4  ;;  %v7039_v26 = vsel %vm11113_vm2, %v7034_v43, %v7038_v25  ;;  %v8360_v18 = vshll.u32 %v13997_v4, 16  ;;  %v14845_v25 = vld [vmem:[#allocation24_spill] sm:$0xff] }
 0x41a   : > { %v7247_v58 = vpop.f32.mrf.mxu1  ;;  %v7494_v43 = vrot.slane %v14133_v11, 5  ;;  %v6634_v5 = vadd.f32 %v14846_v36, %v14845_v25  ;;  %v7131_v13 = vunpack.c.l.b16 %v7039_v26  ;;  %v7046_v25 = vrot.slane %v7044_v17, 5  ;;  %v14263_v17 = vld [vmem:[#allocation2 + $0x90] sm:$0xf] }
 0x41b   : > { %14843 = vst [vmem:[#allocation12_spill] sm:$0xff] %v14213_v37  ;;  %v14219_v31 = vadd.f32 %v7247_v58, %v6633_v29  ;;  %7684 = vmatmul.bf16.gmra.mxu2 %v13710_v15  ;;  %v8357_v15 = vor.u32 %v8356_v60, %v14208_v53  ;;  %v7029_v10 = vsel %vm11113_vm2, %v7024_v22, %v14164_v45  ;;  %v14238_v29 = vrot.slane %v7050_v62, 5  ;;  %v14251_v22 = vld [vmem:[#allocation2 + $0xbc] sm:$0x1] }
 0x41c   : > { %7998 = vmatmul.bf16.gmra.mxu3 %v10835_v32  ;;  %8679 = vmatmul.bf16.gmra.mxu0 %v8563_v38  ;;  %v7056_v38 = vrot.slane %v7054_v9, 4  ;;  %v10414_v32 = vrot.slane %v7350_v6, 9  ;;  %v8901_v45 = vsel %vm11415_vm5, %v10588_v27, %v8900_v16  ;;  %v7496_v48 = vrot.slane %v7494_v43, 4 }
 0x41d   : > { %14844 = vst [vmem:[#allocation15_spill] sm:$0xff] %v14219_v31  ;;  %v7497_v62 = vrot.slane %v14177_v50, 5  ;;  %v8972_v9 = vunpack.c.l.b16 %v8904_v46  ;;  %v7130_v11 = vunpack.c.l.b16 %v7029_v10  ;;  %v7043_v6 = vrot.slane %v7041_v0, 4  ;;  %v14260_v46 = vld [vmem:[#allocation2 + $0xac] sm:$0xf] }
 0x41e   : > { %v5929_v61 = vpop.f32.mrf.mxu2  ;;  %v7495_v58 = vsel %vm11415_vm5, %v10414_v32, %v7494_v43  ;;  %v7057_v26 = vor.u32 %v7056_v38, %v14238_v29  ;;  %v8971_v27 = vunpack.c.l.b16 %v8901_v45  ;;  %v8540_v36 = vunpack.c.l.b16 %v8329_v23  ;;  %v14269_v45 = vld [vmem:[#allocation2 + $0xb0] sm:$0x1]  ;;  %v6701_v31 = vld [vmem:[#allocation2 + $0xc0] sm:$0xf] }
 0x41f   : > { %v5930_v60 = vadd.f32 %v5929_v61, %v13822_v3  ;;  %v6306_v4 = vpop.f32.mrf.mxu3  ;;  %v14254_v61 = vrot.slane %v8357_v15, 4  ;;  %v7498_v16 = vsel %vm11415_vm5, %v7496_v48, %v7497_v62  ;;  %v7149_v50 = vpack.c.b16 %v7131_v13, %v7130_v11  ;;  %v8769_v15 = vld [vmem:[#allocation2 + $0xa8] sm:$0xe]  ;;  %v14273_v13 = vpop.f32.mrf.mxu0 }
 0x420   : > { %v7555_v43 = vunpack.c.l.b16 %v7495_v58  ;;  %v7556_v10 = vunpack.c.l.b16 %v7498_v16  ;;  %v7060_v0 = vshll.u32 %v14251_v22, 16  ;;  %v7047_v38 = vor.u32 %v7046_v25, %v7043_v6 }
 0x421   : > { %v14249_v42 = vadd.f32 %v6306_v4, %v5930_v60  ;;  %v14265_v60 = vpack.c.b16 %v8972_v9, %v8971_v27  ;;  %v14267_v4 = vrot.slane %v8360_v18, 5  ;;  %v8564_v23 = vpack.c.b16 %v14225_v57, %v8540_v36  ;;  %v14285_v27 = vld [vmem:[#allocation2 + $0xc4] sm:$0xf] }
 0x422   : > { %v7250_v3 = vpop.f32.mrf.mxu1  ;;  %v7058_v48 = vrot.slane %v7057_v26, 4  ;;  %v14276_v62 = vrot.slane %v8347_v49, 4  ;;  %v8907_v9 = vrot.slane %v14260_v46, 5  ;;  %v10589_v25 = vrot.slane %v8769_v15, 9  ;;  %v10836_v15 = vld [vmem:[#allocation2 + $0x78] sm:$0xff] }
 0x423   : > { %14847 = vst [vmem:[#allocation17_spill] sm:$0xff] %v14249_v42  ;;  %v14258_v32 = vadd.f32 %v7250_v3, %v6634_v5  ;;  %v14271_v5 = vpack.c.b16 %v7556_v10, %v7555_v43  ;;  %v7062_v16 = vrot.slane %v7060_v0, 5  ;;  %v8910_v26 = vrot.slane %v14269_v45, 5  ;;  %v14851_v43 = vld [vmem:[#allocation25_spill] sm:$0xff]  ;;  %v14853_v0 = vld [vmem:[#allocation31_spill] sm:$0xff] }
 0x424   : > { %14849 = vst [vmem:[#allocation19_spill] sm:$0xff] %v14265_v60  ;;  %v8909_v49 = vrot.slane %v8907_v9, 4  ;;  %v7048_v36 = vrot.slane %v7047_v38, 4  ;;  %v8908_v18 = vsel %vm11415_vm5, %v10589_v25, %v8907_v9  ;;  %v8378_v60 = vshrl.u32 %v14052_v41, 16  ;;  %v14300_v42 = vld [vmem:[#allocation2 + $0xb8] sm:$0xf] }
 0x425   : > { %14848 = vst [vmem:[#allocation22_spill] sm:$0xff] %v14258_v32  ;;  %7289 = vmatmul.bf16.gmra.mxu1 %v7149_v50  ;;  %v14850_v50 = vld [vmem:[#allocation28_spill] sm:$0xff]  ;;  %v6636_v32 = vadd.f32 %v14853_v0, %v13609_v28  ;;  %v7063_v57 = vsel %vm11113_vm2, %v7058_v48, %v7062_v16  ;;  %v7074_v28 = vshll.u32 %v14285_v27, 16  ;;  %v7078_v48 = vshrl.u32 %v14285_v27, 16 }
 0x426   : > { %v5931_v58 = vpop.f32.mrf.mxu2  ;;  %v8911_v38 = vsel %vm11415_vm5, %v8909_v49, %v8910_v26  ;;  %v7053_v9 = vsel %vm11113_vm2, %v7048_v36, %v14238_v29  ;;  %v7501_v25 = vrot.slane %v14204_v7, 5  ;;  %v8973_v16 = vunpack.c.l.b16 %v8908_v18  ;;  %v8770_v49 = vld [vmem:[#allocation2 + $0xb4] sm:$0xe] }
 0x427   : > { %v5932_v11 = vadd.f32 %v5931_v58, %v13847_v59  ;;  %v6308_v3 = vpop.f32.mrf.mxu3  ;;  %v6635_v59 = vadd.f32 %v14851_v43, %v14850_v50  ;;  %v7351_v58 = vld [vmem:[#allocation2 + $0xb4] sm:$0xe]  ;;  %v8974_v50 = vunpack.c.l.b16 %v8911_v38  ;;  %v7065_v26 = vshrl.u32 %v6701_v31, 16  ;;  %v14324_v38 = vpop.f32.mrf.mxu0 }
 0x428   : > { %v7068_v43 = vshll.u32 %v6701_v31, 16  ;;  %v7503_v0 = vrot.slane %v7501_v25, 4  ;;  %v10590_v31 = vrot.slane %v8770_v49, 9 }
 0x429   : > { %v14291_v10 = vadd.f32 %v6308_v3, %v5932_v11  ;;  %v10415_v3 = vrot.slane %v7351_v58, 9  ;;  %v14319_v58 = vpack.c.b16 %v8974_v50, %v8973_v16  ;;  %v14333_v50 = vld [vmem:[#allocation2 + $0xc8] sm:$0x1] }
 0x42a   : > { %v7252_v6 = vpop.f32.mrf.mxu1  ;;  %v7070_v49 = vrot.slane %v7068_v43, 5  ;;  %v7084_v43 = vshll.u32 %v14333_v50, 16 }
 0x42b   : > { %14852 = vst [vmem:[#allocation24_spill] sm:$0xff] %v14291_v10  ;;  %v14304_v11 = vadd.f32 %v7252_v6, %v6635_v59  ;;  %7689 = vmatmul.bf16.gmra.mxu2 %v13769_v24  ;;  %v7133_v6 = vunpack.c.l.b16 %v7063_v57  ;;  %v14313_v24 = vld [vmem:[#allocation2 + $0xbc] sm:$0x1]  ;;  %v8914_v59 = vrot.slane %v14300_v42, 5  ;;  %v7502_v36 = vsel %vm11415_vm5, %v10415_v3, %v7501_v25 }
 0x42c   : > { %8003 = vmatmul.bf16.gmra.mxu3 %v10836_v15  ;;  %8684 = vmatmul.bf16.gmra.mxu0 %v8564_v23  ;;  %v7504_v23 = vrot.slane %v14251_v22, 5  ;;  %v14322_v15 = vrot.slane %v7074_v28, 5  ;;  %v7080_v57 = vrot.slane %v7078_v48, 4  ;;  %v8917_v3 = vrot.slane %v14313_v24, 5 }
 0x42d   : > { %14854 = vst [vmem:[#allocation23_spill] sm:$0xff] %v14304_v11  ;;  %v7132_v11 = vunpack.c.l.b16 %v7053_v9  ;;  %v8916_v37 = vrot.slane %v8914_v59, 4  ;;  %v7557_v22 = vunpack.c.l.b16 %v7502_v36  ;;  %v7067_v48 = vrot.slane %v7065_v26, 4 }
 0x42e   : > { %v7650_v29 = vpop.f32.mrf.mxu2  ;;  %v7505_v10 = vsel %vm11415_vm5, %v7503_v0, %v7504_v23  ;;  %v8368_v9 = vshll.u32 %v14263_v17, 16  ;;  %v8353_v26 = vsel %vm11113_vm2, %v14276_v62, %v14208_v53 }
 0x42f   : > { %v7730_v7 = vadd.f32 %v7650_v29, %v13889_v8  ;;  %v7964_v18 = vpop.f32.mrf.mxu3  ;;  %v7558_v16 = vunpack.c.l.b16 %v7505_v10  ;;  %v8915_v8 = vsel %vm11415_vm5, %v10590_v31, %v8914_v59  ;;  %v8918_v29 = vsel %vm11415_vm5, %v8916_v37, %v8917_v3 }
 0x430   : > { %v7150_v23 = vpack.c.b16 %v7133_v6, %v7132_v11  ;;  %v8975_v10 = vunpack.c.l.b16 %v8915_v8  ;;  %v14856_v59 = vshll.u32 %v14052_v41, 16  ;;  %v14857_v6 = vsel %vm11113_vm2, %v14254_v61, %v14267_v4  ;;  %v7352_v4 = vld [vmem:[#allocation2 + $0xc0] sm:$0xe] }
 0x431   : > { %v14329_v25 = vadd.f32 %v7964_v18, %v7730_v7  ;;  %v7081_v7 = vor.u32 %v7080_v57, %v14322_v15  ;;  %v14341_v36 = vpack.c.b16 %v7558_v16, %v7557_v22  ;;  %v8976_v18 = vunpack.c.l.b16 %v8918_v29  ;;  %v14860_v29 = vld [vmem:[#allocation33_spill] sm:$0xff] }
 0x432   : > { %v7255_v28 = vpop.f32.mrf.mxu1  ;;  %v14350_v37 = vrot.slane %v14856_v59, 5  ;;  %v8543_v57 = vunpack.c.l.b16 %v14857_v6  ;;  %v14858_v31 = vshrl.u32 %v14263_v17, 16  ;;  %v8370_v22 = vrot.slane %v8368_v9, 5  ;;  %v8771_v17 = vld [vmem:[#allocation2 + $0xc0] sm:$0xe]  ;;  %v14367_v6 = vpop.f32.mrf.mxu0 }
 0x433   : > { %v14338_v0 = vadd.f32 %v7255_v28, %v6636_v32  ;;  %v8380_v32 = vrot.slane %v8378_v60, 4  ;;  %v14359_v16 = vpack.c.b16 %v8976_v18, %v8975_v10  ;;  %v7071_v41 = vor.u32 %v7070_v49, %v7067_v48  ;;  %v14859_v60 = vld [vmem:[#allocation32_spill] sm:$0xff]  ;;  %v14371_v48 = vld [vmem:[#allocation2 + $0xc8] sm:$0x1] }
 0x434   : > { %v8367_v3 = vrot.slane %v14858_v31, 4  ;;  %v7082_v8 = vrot.slane %v7081_v7, 4  ;;  %v8542_v28 = vunpack.c.l.b16 %v8353_v26  ;;  %v10837_v10 = vld [vmem:[#allocation2 + $0x84] sm:$0xff]  ;;  %v10591_v31 = vrot.slane %v8771_v17, 9 }
 0x435   : > { %14855 = vst [vmem:[#allocation28_spill] sm:$0xff] %v14338_v0  ;;  %7294 = vmatmul.bf16.gmra.mxu1 %v7150_v23  ;;  %v6637_v23 = vadd.f32 %v14860_v29, %v14859_v60  ;;  %v7086_v0 = vrot.slane %v7084_v43, 5  ;;  %v8381_v61 = vor.u32 %v8380_v32, %v14350_v37  ;;  %v7072_v7 = vrot.slane %v7071_v41, 4  ;;  %v14862_v60 = vld [vmem:[#allocation36_spill] sm:$0xff] }
 0x436   : > { %v7652_v11 = vpop.f32.mrf.mxu2  ;;  %v8565_v18 = vpack.c.b16 %v8543_v57, %v8542_v28  ;;  %v8384_v43 = vshll.u32 %v14078_v14, 16  ;;  %v10416_v32 = vrot.slane %v7352_v4, 9  ;;  %v7508_v57 = vrot.slane %v14285_v27, 5  ;;  %v14861_v28 = vld [vmem:[#allocation35_spill] sm:$0xff] }
 0x437   : > { %v7731_v53 = vadd.f32 %v7652_v11, %v13927_v35  ;;  %v7966_v62 = vpop.f32.mrf.mxu3  ;;  %v8371_v35 = vor.u32 %v8370_v22, %v8367_v3  ;;  %v14369_v11 = vld [vmem:[#allocation2 + $0xc4] sm:$0xf]  ;;  %v7087_v26 = vsel %vm11113_vm2, %v7082_v8, %v7086_v0  ;;  %v7077_v22 = vsel %vm11113_vm2, %v7072_v7, %v14322_v15 }
 0x438   : > { %v8921_v3 = vrot.slane %v14369_v11, 5  ;;  %v7509_v14 = vsel %vm11415_vm5, %v10416_v32, %v7508_v57  ;;  %v7510_v41 = vrot.slane %v7508_v57, 4  ;;  %v6638_v29 = vadd.f32 %v14862_v60, %v14861_v28 }
 0x439   : > { %v14364_v59 = vadd.f32 %v7966_v62, %v7731_v53  ;;  %v8382_v53 = vrot.slane %v8381_v61, 4  ;;  %v8924_v62 = vrot.slane %v14371_v48, 5  ;;  %v7135_v61 = vunpack.c.l.b16 %v7087_v26 }
 0x43a   : > { %v7257_v9 = vpop.f32.mrf.mxu1  ;;  %v8922_v27 = vsel %vm11415_vm5, %v10591_v31, %v8921_v3  ;;  %v8923_v8 = vrot.slane %v8921_v3, 4  ;;  %v8386_v4 = vrot.slane %v8384_v43, 5  ;;  %v8372_v3 = vrot.slane %v8371_v35, 4 }
 0x43b   : > { %v14373_v49 = vadd.f32 %v7257_v9, %v6637_v23  ;;  %7694 = vmatmul.bf16.gmra.mxu2 %v13833_v54  ;;  %v7511_v54 = vrot.slane %v14333_v50, 5  ;;  %v7134_v50 = vunpack.c.l.b16 %v7077_v22  ;;  %v7559_v9 = vunpack.c.l.b16 %v7509_v14 }
 0x43c   : > { %8008 = vmatmul.bf16.gmra.mxu3 %v10837_v10  ;;  %8689 = vmatmul.bf16.gmra.mxu0 %v8565_v18  ;;  %v8925_v10 = vsel %vm11415_vm5, %v8923_v8, %v8924_v62  ;;  %v8977_v32 = vunpack.c.l.b16 %v8922_v27  ;;  %v8398_v26 = vshll.u32 %v14171_v47, 16  ;;  %v8402_v43 = vshrl.u32 %v14171_v47, 16 }
 0x43d   : > { %v7512_v17 = vsel %vm11415_vm5, %v7510_v41, %v7511_v54  ;;  %v8978_v57 = vunpack.c.l.b16 %v8925_v10  ;;  %v7151_v54 = vpack.c.b16 %v7135_v61, %v7134_v50  ;;  %v14409_v41 = vpop.f32.mrf.mxu0  ;;  %v8377_v35 = vsel %vm11113_vm2, %v8372_v3, %v14350_v37 }
 0x43e   : > { %v7655_v0 = vpop.f32.mrf.mxu2  ;;  %v7560_v7 = vunpack.c.l.b16 %v7512_v17  ;;  %v6639_v61 = vadd.f32 %v13741_v34, %v13716_v20  ;;  %v10838_v17 = vld [vmem:[#allocation2 + $0x90] sm:$0xff] }
 0x43f   : > { %v7732_v23 = vadd.f32 %v7655_v0, %v13967_v30  ;;  %v7969_v15 = vpop.f32.mrf.mxu3  ;;  %v8387_v30 = vsel %vm11113_vm2, %v8382_v53, %v8386_v4  ;;  %v8109_v0 = vld [vmem:[#allocation2 + $0x9c] sm:$0xf]  ;;  %v14407_v62 = vpack.c.b16 %v8978_v57, %v8977_v32 }
 0x440   : > { %v14405_v14 = vpack.c.b16 %v7560_v7, %v7559_v9  ;;  %v8545_v27 = vunpack.c.l.b16 %v8387_v30  ;;  %v8389_v8 = vshrl.u32 %v8109_v0, 16  ;;  %v8392_v28 = vshll.u32 %v8109_v0, 16 }
 0x441   : > { %v14397_v18 = vadd.f32 %v7969_v15, %v7732_v23  ;;  %v8404_v23 = vrot.slane %v8402_v43, 4  ;;  %v8544_v15 = vunpack.c.l.b16 %v8377_v35  ;;  %v14864_v43 = vld [vmem:[#allocation39_spill] sm:$0xff] }
 0x442   : > { %v7260_v31 = vpop.f32.mrf.mxu1  ;;  %v8391_v10 = vrot.slane %v8389_v8, 4  ;;  %v8394_v37 = vrot.slane %v8392_v28, 5  ;;  %v8112_v8 = vld [vmem:[#allocation2 + $0xa8] sm:$0xf]  ;;  %v8422_v28 = vshll.u32 %v14260_v46, 16 }
 0x443   : > { %v14403_v22 = vadd.f32 %v7260_v31, %v6638_v29  ;;  %v8400_v29 = vrot.slane %v8398_v26, 5  ;;  %v8566_v9 = vpack.c.b16 %v8545_v27, %v8544_v15  ;;  %v14863_v26 = vld [vmem:[#allocation38_spill] sm:$0xff] }
 0x444   : > { %v8395_v20 = vor.u32 %v8394_v37, %v8391_v10  ;;  %v8424_v37 = vrot.slane %v8422_v28, 5 }
 0x445   : > { %7299 = vmatmul.bf16.gmra.mxu1 %v7151_v54  ;;  %v8405_v32 = vor.u32 %v8404_v23, %v8400_v29  ;;  %v14423_v57 = vpop.f32.mrf.mxu0  ;;  %v6640_v54 = vadd.f32 %v14864_v43, %v14863_v26  ;;  %v10839_v26 = vld [vmem:[#allocation2 + $0x9c] sm:$0xff] }
 0x446   : > { %v7657_v53 = vpop.f32.mrf.mxu2 }
 0x447   : > { %v7733_v47 = vadd.f32 %v7657_v53, %v13992_v19  ;;  %v7971_v60 = vpop.f32.mrf.mxu3  ;;  %v8408_v19 = vshll.u32 %v14193_v52, 16  ;;  %v8406_v30 = vrot.slane %v8405_v32, 4  ;;  %v8396_v53 = vrot.slane %v8395_v20, 4  ;;  %v14867_v20 = vld [vmem:[#allocation40_spill] sm:$0xff] }
 0x449   : > { %v14417_v4 = vadd.f32 %v7971_v60, %v7733_v47  ;;  %v8410_v35 = vrot.slane %v8408_v19, 5  ;;  %v14865_v47 = vld [vmem:[#allocation3_spill] sm:$0xff]  ;;  %v8401_v60 = vsel %vm11113_vm2, %v8396_v53, %v8400_v29  ;;  %v8432_v53 = vshll.u32 %v14269_v45, 16 }
 0x44a   : > { %v7262_v50 = vpop.f32.mrf.mxu1 }
 0x44b   : > { %v14419_v7 = vadd.f32 %v7262_v50, %v6639_v61  ;;  %7699 = vmatmul.bf16.gmra.mxu2 %v13907_v12  ;;  %v8411_v52 = vsel %vm11113_vm2, %v8406_v30, %v8410_v35  ;;  %v8413_v61 = vshrl.u32 %v8112_v8, 16  ;;  %v8416_v50 = vshll.u32 %v8112_v8, 16 }
 0x44c   : > { %8013 = vmatmul.bf16.gmra.mxu3 %v10838_v17  ;;  %8694 = vmatmul.bf16.gmra.mxu0 %v8566_v9  ;;  %v8547_v15 = vunpack.c.l.b16 %v8411_v52  ;;  %v14866_v17 = vld [vmem:[#allocation9_spill] sm:$0xff] }
 0x44d   : > { %v14440_v19 = vpop.f32.mrf.mxu0  ;;  %v8415_v43 = vrot.slane %v8413_v61, 4 }
 0x44e   : > { %v7660_v31 = vpop.f32.mrf.mxu2 }
 0x44f   : > { %v7734_v34 = vadd.f32 %v7660_v31, %v14025_v21  ;;  %v7974_v3 = vpop.f32.mrf.mxu3  ;;  %v8426_v21 = vshrl.u32 %v14260_v46, 16  ;;  %v8546_v31 = vunpack.c.l.b16 %v8401_v60  ;;  %v14869_v60 = vld [vmem:[#allocation42_spill] sm:$0xff] }
 0x451   : > { %v14428_v0 = vadd.f32 %v7974_v3, %v7734_v34  ;;  %v8428_v32 = vrot.slane %v8426_v21, 4  ;;  %v14868_v34 = vld [vmem:[#allocation43_spill] sm:$0xff]  ;;  %v8567_v29 = vpack.c.b16 %v8547_v15, %v8546_v31  ;;  %v8450_v31 = vshrl.u32 %v14300_v42, 16 }
 0x452   : > { %v7265_v12 = vpop.f32.mrf.mxu1  ;;  %v6641_v46 = vadd.f32 %v14868_v34, %v14867_v20  ;;  %v14871_v20 = vld [vmem:[#allocation27_spill] sm:$0xff] }
 0x453   : > { %v14430_v27 = vadd.f32 %v7265_v12, %v6640_v54  ;;  %v8418_v54 = vrot.slane %v8416_v50, 5  ;;  %v8429_v12 = vor.u32 %v8428_v32, %v8424_v37  ;;  %v8434_v50 = vrot.slane %v8432_v53, 5  ;;  %v8115_v32 = vld [vmem:[#allocation2 + $0xb4] sm:$0xf] }
 0x455   : > { %9069 = vmatmul.bf16.vlgmr.msra.gmra.mxu1 %v14865_v47  ;;  %v8419_v8 = vor.u32 %v8418_v54, %v8415_v43  ;;  %v8430_v47 = vrot.slane %v8429_v12, 4  ;;  %v8452_v12 = vrot.slane %v8450_v31, 4  ;;  %v14875_v31 = vld [vmem:[#allocation51_spill] sm:$0xff] }
 0x456   : > { %v7662_v23 = vpop.f32.mrf.mxu2 }
 0x457   : > { %v7735_v9 = vadd.f32 %v7662_v23, %v14866_v17  ;;  %v7976_v10 = vpop.f32.mrf.mxu3  ;;  %v14870_v23 = vld [vmem:[#allocation45_spill] sm:$0xff]  ;;  %v14455_v17 = vpop.f32.mrf.mxu0  ;;  %v8435_v45 = vsel %vm11113_vm2, %v8430_v47, %v8434_v50 }
 0x458   : > { %v6642_v15 = vadd.f32 %v14870_v23, %v14869_v60  ;;  %v10840_v60 = vld [vmem:[#allocation2 + $0xa8] sm:$0xff] }
 0x459   : > { %v14444_v3 = vadd.f32 %v7976_v10, %v7735_v9  ;;  %v8420_v9 = vrot.slane %v8419_v8, 4  ;;  %v14872_v8 = vld [vmem:[#allocation44_spill] sm:$0xff] }
 0x45a   : > { %v7267_v30 = vpop.f32.mrf.mxu1 }
 0x45b   : > { %v14446_v35 = vadd.f32 %v7267_v30, %v6641_v46  ;;  %7704 = vmatmul.bf16.gmra.mxu2 %v14109_v63  ;;  %v8425_v34 = vsel %vm11113_vm2, %v8420_v9, %v8424_v37  ;;  %v8549_v30 = vunpack.c.l.b16 %v8435_v45  ;;  %v8456_v9 = vshll.u32 %v14313_v24, 16 }
 0x45c   : > { %8018 = vmatmul.bf16.gmra.mxu3 %v10839_v26  ;;  %8699 = vmatmul.bf16.gmra.mxu0 %v8567_v29  ;;  %v8437_v26 = vshrl.u32 %v8115_v32, 16  ;;  %v8440_v29 = vshll.u32 %v8115_v32, 16 }
 0x45e   : > { %v7665_v52 = vpop.f32.mrf.mxu2  ;;  %v8442_v37 = vrot.slane %v8440_v29, 5  ;;  %v8470_v29 = vshll.u32 %v14369_v11, 16 }
 0x45f   : > { %v7736_v28 = vadd.f32 %v7665_v52, %v14105_v2  ;;  %v7979_v21 = vpop.f32.mrf.mxu3  ;;  %v8446_v2 = vshll.u32 %v14300_v42, 16  ;;  %v8548_v52 = vunpack.c.l.b16 %v8425_v34  ;;  %v8458_v34 = vrot.slane %v8456_v9, 5 }
 0x461   : > { %v14453_v61 = vadd.f32 %v7979_v21, %v7736_v28  ;;  %v8448_v54 = vrot.slane %v8446_v2, 5  ;;  %v14873_v28 = vld [vmem:[#allocation48_spill] sm:$0xff]  ;;  %v8568_v23 = vpack.c.b16 %v8549_v30, %v8548_v52  ;;  %v14874_v2 = vld [vmem:[#allocation47_spill] sm:$0xff] }
 0x462   : > { %v7270_v63 = vpop.f32.mrf.mxu1  ;;  %v6643_v21 = vadd.f32 %v14873_v28, %v14872_v8 }
 0x463   : > { %v14457_v10 = vadd.f32 %v7270_v63, %v6642_v15  ;;  %v8439_v15 = vrot.slane %v8437_v26, 4  ;;  %v8453_v63 = vor.u32 %v8452_v12, %v8448_v54  ;;  %v8118_v12 = vld [vmem:[#allocation2 + $0xc0] sm:$0xf] }
 0x464   : > { %v8461_v28 = vshrl.u32 %v8118_v12, 16 }
 0x465   : > { %9074 = vmatmul.bf16.gmra.mxu1 %v14871_v20  ;;  %v8443_v45 = vor.u32 %v8442_v37, %v8439_v15  ;;  %v8454_v32 = vrot.slane %v8453_v63, 4  ;;  %v6644_v20 = vadd.f32 %v14875_v31, %v14874_v2  ;;  %v14877_v15 = vld [vmem:[#allocation49_spill] sm:$0xff]  ;;  %v14878_v37 = vld [vmem:[#allocation7_spill] sm:$0xff] }
 0x466   : > { %v7667_v46 = vpop.f32.mrf.mxu2  ;;  %v6645_v63 = vadd.f32 %v14878_v37, %v14877_v15  ;;  %v8463_v2 = vrot.slane %v8461_v28, 4  ;;  %v4508_v28 = vld [vmem:[#allocation2 + $0xcc] sm:$0x1] }
 0x467   : > { %v7737_v43 = vadd.f32 %v7667_v46, %v14137_v51  ;;  %v7981_v53 = vpop.f32.mrf.mxu3  ;;  %v14474_v51 = vpop.f32.mrf.mxu0  ;;  %v8444_v30 = vrot.slane %v8443_v45, 4  ;;  %v10841_v45 = vld [vmem:[#allocation2 + $0xb4] sm:$0xff] }
 0x469   : > { %v14469_v47 = vadd.f32 %v7981_v53, %v7737_v43  ;;  %v8474_v43 = vshrl.u32 %v14369_v11, 16  ;;  %v14876_v53 = vld [vmem:[#allocation30_spill] sm:$0xff]  ;;  %v8449_v24 = vsel %vm11113_vm2, %v8444_v30, %v8448_v54 }
 0x46a   : > { %v7272_v42 = vpop.f32.mrf.mxu1 }
 0x46b   : > { %v14471_v50 = vadd.f32 %v7272_v42, %v6643_v21  ;;  %7709 = vmatmul.bf16.gmra.mxu2 %v14201_v55  ;;  %v8459_v55 = vsel %vm11113_vm2, %v8454_v32, %v8458_v34  ;;  %v8464_v21 = vshll.u32 %v8118_v12, 16  ;;  %v8472_v42 = vrot.slane %v8470_v29, 5  ;;  %v14880_v29 = vld [vmem:[#allocation10_spill] sm:$0xff] }
 0x46c   : > { %8023 = vmatmul.bf16.gmra.mxu3 %v10840_v60  ;;  %8704 = vmatmul.bf16.gmra.mxu0 %v8568_v23  ;;  %v8551_v8 = vunpack.c.l.b16 %v8459_v55  ;;  %v8476_v60 = vrot.slane %v8474_v43, 4  ;;  %v8550_v23 = vunpack.c.l.b16 %v8449_v24  ;;  %v14879_v55 = vld [vmem:[#allocation5_spill] sm:$0xff] }
 0x46d   : > { %v8466_v54 = vrot.slane %v8464_v21, 5  ;;  %v6646_v43 = vadd.f32 %v14880_v29, %v14879_v55 }
 0x46e   : > { %v8569_v11 = vpack.c.b16 %v8551_v8, %v8550_v23  ;;  %v8477_v31 = vor.u32 %v8476_v60, %v8472_v42  ;;  %v4509_v60 = vsel %vm12194_vm8, 0, %v4508_v28 }
 0x46f   : > { %v14488_v52 = vpop.f32.mrf.mxu0  ;;  %v8467_v34 = vor.u32 %v8466_v54, %v8463_v2  ;;  %4510 = vst [vmem:[#allocation2 + $0xcc] sm:$0x1] %v4509_v60  ;;  %v10842_v54 = vld [vmem:[#allocation2 + $0xc0] sm:$0xff]  ;;  %v14886_v60 = vld [vmem:[#allocation6_spill] sm:$0xff] }
 0x471   : > { %v8468_v8 = vrot.slane %v8467_v34, 4  ;;  %v4564_v34 = vld [vmem:[#allocation2 + $0xd4] sm:$0x1] }
 0x472   : > { %v7275_v46 = vpop.f32.mrf.mxu1  ;;  %v4565_v55 = vsel %vm12207_vm10, 0, %v4564_v34 }
 0x473   : > { %v14479_v26 = vadd.f32 %v7275_v46, %v6644_v20  ;;  %v8480_v20 = vshll.u32 %v14371_v48, 16  ;;  %v8478_v46 = vrot.slane %v8477_v31, 4  ;;  %v14882_v48 = vld [vmem:[#allocation34_spill] sm:$0xff]  ;;  %v8473_v23 = vsel %vm11113_vm2, %v8468_v8, %v8472_v42  ;;  %4566 = vst [vmem:[#allocation2 + $0xd4] sm:$0x1] %v4565_v55 }
 0x474   : > { %v8552_v37 = vunpack.c.l.b16 %v8473_v23 }
 0x475   : > { %9079 = vmatmul.bf16.gmra.mxu1 %v14876_v53  ;;  %v8482_v12 = vrot.slane %v8480_v20, 5 }
 0x476   : > { %v8121_v29 = vld [vmem:[#allocation2 + $0xcc] sm:$0xf] }
 0x477   : > { %v14496_v30 = vpop.f32.mrf.mxu0  ;;  %v8488_v8 = vshll.u32 %v8121_v29, 16 }
 0x47a   : > { %v7277_v9 = vpop.f32.mrf.mxu1 }
 0x47b   : > { %v14492_v32 = vadd.f32 %v7277_v9, %v6645_v63  ;;  %7714 = vmatmul.bf16.gmra.mxu2 %v14271_v5  ;;  %v8483_v5 = vsel %vm11113_vm2, %v8478_v46, %v8482_v12  ;;  %v14883_v63 = vld [vmem:[#allocation29_spill] sm:$0xff]  ;;  %v14884_v9 = vld [vmem:[#allocation11_spill] sm:$0xff]  ;;  %v14516_v46 = vld [vmem:[#allocation2 + $0xd0] sm:$0xf] }
 0x47c   : > { %8028 = vmatmul.bf16.gmra.mxu3 %v10841_v45  ;;  %8709 = vmatmul.bf16.gmra.mxu0 %v8569_v11  ;;  %v8553_v15 = vunpack.c.l.b16 %v8483_v5  ;;  %v6647_v45 = vadd.f32 %v14884_v9, %v14883_v63  ;;  %v8498_v12 = vshrl.u32 %v14516_v46, 16 }
 0x47e   : > { %v8570_v31 = vpack.c.b16 %v8553_v15, %v8552_v37  ;;  %v8500_v28 = vrot.slane %v8498_v12, 4 }
 0x47f   : > { %v14511_v11 = vpop.f32.mrf.mxu0 }
 0x482   : > { %v7280_v53 = vpop.f32.mrf.mxu1 }
 0x483   : > { %v14500_v24 = vadd.f32 %v7280_v53, %v6646_v43  ;;  %v8494_v43 = vshll.u32 %v14516_v46, 16  ;;  %v8485_v53 = vshrl.u32 %v8121_v29, 16 }
 0x485   : > { %9084 = vmatmul.bf16.gmra.mxu1 %v14882_v48  ;;  %v8496_v5 = vrot.slane %v8494_v43, 5  ;;  %v8487_v21 = vrot.slane %v8485_v53, 4  ;;  %v6648_v48 = vadd.f32 %v14123_v33, %v14886_v60  ;;  %v10843_v33 = vld [vmem:[#allocation2 + $0xcc] sm:$0xff]  ;;  %v14888_v43 = vld [vmem:[#allocation8_spill] sm:$0xff]  ;;  %v6650_v60 = vadd.f32 %v14227_v56, %v14102_v44 }
 0x486   : > { %v6649_v12 = vadd.f32 %v14175_v1, %v14888_v43  ;;  %v14889_v1 = vld [vmem:[#allocation41_spill] sm:$0xff]  ;;  %v14893_v44 = vld [vmem:[#allocation12_spill] sm:$0xff] }
 0x487   : > { %v8501_v15 = vor.u32 %v8500_v28, %v8496_v5  ;;  %v6653_v56 = vadd.f32 %v14367_v6, %v14893_v44  ;;  %v8725_v6 = vadd.f32 %v14440_v19, %v14329_v25  ;;  %v7984_v25 = vpop.f32.mrf.mxu3 }
 0x489   : > { %v8502_v34 = vrot.slane %v8501_v15, 4  ;;  %v6651_v15 = vadd.f32 %v14273_v13, %v14890_v40  ;;  %v7670_v40 = vpop.f32.mrf.mxu2 }
 0x48a   : > { %v7282_v2 = vpop.f32.mrf.mxu1 }
 0x48b   : > { %v14513_v20 = vadd.f32 %v7282_v2, %v6647_v45  ;;  %7719 = vmatmul.bf16.gmra.mxu2 %v14341_v36  ;;  %v8490_v36 = vrot.slane %v8488_v8, 5  ;;  %v14526_v45 = vpop.f32.mrf.mxu0  ;;  %v14528_v2 = vld [vmem:[#allocation2 + $0xd4] sm:$0x1] }
 0x48c   : > { %8033 = vmatmul.bf16.gmra.mxu3 %v10842_v54  ;;  %8714 = vmatmul.bf16.gmra.mxu0 %v8570_v31  ;;  %v14887_v54 = vld [vmem:[#allocation37_spill] sm:$0xff]  ;;  %v8504_v42 = vshll.u32 %v14528_v2, 16 }
 0x48d   : > { %v8491_v23 = vor.u32 %v8490_v36, %v8487_v21 }
 0x48e   : > { %v8506_v55 = vrot.slane %v8504_v42, 5  ;;  %v14892_v42 = vld [vmem:[#allocation46_spill] sm:$0xff] }
 0x48f   : > { %v8492_v9 = vrot.slane %v8491_v23, 4 }
 0x490   : > { %v8507_v53 = vsel %vm11113_vm2, %v8502_v34, %v8506_v55 }
 0x491   : > { %v8497_v31 = vsel %vm11113_vm2, %v8492_v9, %v8496_v5  ;;  %v8555_v28 = vunpack.c.l.b16 %v8507_v53  ;;  %v14895_v53 = vld [vmem:[#allocation50_spill] sm:$0xff] }
 0x492   : > { %v7285_v37 = vpop.f32.mrf.mxu1  ;;  %v8554_v29 = vunpack.c.l.b16 %v8497_v31 }
 0x493   : > { %v14524_v63 = vadd.f32 %v7285_v37, %v6648_v48  ;;  %v14541_v36 = vpop.f32.mrf.mxu0 }
 0x494   : > { %v8571_v5 = vpack.c.b16 %v8555_v28, %v8554_v29  ;;  %v14894_v29 = vld [vmem:[#allocation17_spill] sm:$0xff] }
 0x495   : > { %9089 = vmatmul.bf16.gmra.mxu1 %v14887_v54  ;;  %v6654_v13 = vadd.f32 %v14409_v41, %v14894_v29  ;;  %v14576_v41 = vld [vmem:[%s14698_s4] ss:$0 sm:$0xff] }
 0x49a   : > { %v7287_v8 = vpop.f32.mrf.mxu1 }
 0x49b   : > { %v14538_v21 = vadd.f32 %v7287_v8, %v6649_v12  ;;  %7724 = vmatmul.bf16.gmra.mxu2 %v14405_v14  ;;  %v14891_v14 = vld [vmem:[#allocation13_spill] sm:$0xff] }
 0x49c   : > { %8038 = vmatmul.bf16.gmra.mxu3 %v10843_v33  ;;  %8719 = vmatmul.bf16.gmra.mxu0 %v8571_v5  ;;  %v6652_v54 = vadd.f32 %v14324_v38, %v14891_v14  ;;  %v14896_v38 = vld [vmem:[#allocation24_spill] sm:$0xff] }
 0x49d   : > { %v6655_v8 = vadd.f32 %v14423_v57, %v14896_v38 }
 0x4a2   : > { %v7290_v48 = vpop.f32.mrf.mxu1 }
 0x4a3   : > { %v14545_v23 = vadd.f32 %v7290_v48, %v6650_v60  ;;  %v14897_v48 = vld [vmem:[#allocation4_spill] sm:$0xff] }
 0x4a5   : > { %9094 = vmatmul.bf16.gmra.mxu1 %v14889_v1 }
 0x4aa   : > { %v7292_v37 = vpop.f32.mrf.mxu1 }
 0x4ab   : > { %v14550_v9 = vadd.f32 %v7292_v37, %v6651_v15  ;;  %v8726_v15 = vadd.f32 %v14455_v17, %v14364_v59  ;;  %v7672_v59 = vpop.f32.mrf.mxu2 }
 0x4b2   : > { %v7295_v31 = vpop.f32.mrf.mxu1 }
 0x4b3   : > { %v14554_v34 = vadd.f32 %v7295_v31, %v6652_v54 }
 0x4b5   : > { %9099 = vmatmul.bf16.gmra.mxu1 %v14892_v42  ;;  %v14588_v42 = vpop.f32.mrf.mxu0 }
 0x4ba   : > { %v7297_v55 = vpop.f32.mrf.mxu1 }
 0x4bb   : > { %v14559_v33 = vadd.f32 %v7297_v55, %v6653_v56  ;;  %v8727_v56 = vadd.f32 %v14474_v51, %v14397_v18  ;;  %v14898_v55 = vld [vmem:[#allocation21_spill] sm:$0xff] }
 0x4bd   : > { %v8667_v38 = vpop.f32.mrf.mxu0 }
 0x4c2   : > { %v7300_v43 = vpop.f32.mrf.mxu1 }
 0x4c3   : > { %v14563_v12 = vadd.f32 %v7300_v43, %v6654_v13  ;;  %v7986_v13 = vpop.f32.mrf.mxu3  ;;  %v8728_v43 = vadd.f32 %v14488_v52, %v14417_v4 }
 0x4c5   : > { %9104 = vmatmul.bf16.gmra.mxu1 %v14895_v53 }
 0x4ca   : > { %v7302_v28 = vpop.f32.mrf.mxu1 }
 0x4cb   : > { %v14568_v5 = vadd.f32 %v7302_v28, %v6655_v8  ;;  %v7989_v18 = vpop.f32.mrf.mxu3 }
 0x4d2   : > { %v9070_v60 = vpop.f32.mrf.mxu1 }
 0x4d3   : > { %v9150_v1 = vadd.f32 %v9070_v60, %v8725_v6  ;;  %v7675_v60 = vpop.f32.mrf.mxu2 }
 0x4d5   : > { %9109 = vmatmul.bf16.gmra.mxu1 %v14897_v48  ;;  %v9186_v37 = vadd.f32 %v14576_v41, %v9150_v1 }
 0x4d7   : > { %v9218_v19 = vmax.f32 %v9186_v37, 0.0  ;;  %v8729_v37 = vadd.f32 %v14496_v30, %v14428_v0 }
 0x4da   : > { %v9072_v57 = vpop.f32.mrf.mxu1 }
 0x4db   : > { %v9151_v14 = vadd.f32 %v9072_v57, %v8726_v15  ;;  %v8670_v57 = vpop.f32.mrf.mxu0  ;;  %v7677_v4 = vpop.f32.mrf.mxu2 }
 0x4dd   : > { %v9187_v54 = vadd.f32 %v14576_v41, %v9151_v14  ;;  %v14899_v14 = vld [vmem:[#allocation26_spill] sm:$0xff] }
 0x4df   : > { %v9219_v31 = vmax.f32 %v9187_v54, 0.0  ;;  %v8730_v54 = vadd.f32 %v14511_v11, %v14444_v3 }
 0x4e1   : > { %v10871_v44 = vpack.c.bf16 %v9219_v31, %v9218_v19 }
 0x4e2   : > { %v9075_v17 = vpop.f32.mrf.mxu1 }
 0x4e3   : > { %10872 = vst [vmem:[%s14586_s7] sm:$0xff] %v10871_v44   ;;  %v9152_v29 = vadd.f32 %v9075_v17, %v8727_v56  ;;  %v7991_v17 = vpop.f32.mrf.mxu3 }
 0x4e5   : > { %9114 = vmatmul.bf16.gmra.mxu1 %v14898_v55  ;;  %v9188_v8 = vadd.f32 %v14576_v41, %v9152_v29  ;;  %v8672_v55 = vpop.f32.mrf.mxu0 }
 0x4e7   : > { %v9220_v48 = vmax.f32 %v9188_v8, 0.0  ;;  %v8731_v8 = vadd.f32 %v14526_v45, %v14453_v61 }
 0x4ea   : > { %v9077_v53 = vpop.f32.mrf.mxu1 }
 0x4eb   : > { %v9153_v28 = vadd.f32 %v9077_v53, %v8728_v43  ;;  %v7680_v53 = vpop.f32.mrf.mxu2  ;;  %v7994_v3 = vpop.f32.mrf.mxu3 }
 0x4ed   : > { %v9189_v6 = vadd.f32 %v14576_v41, %v9153_v28  ;;  %v14900_v28 = vld [vmem:[#allocation19_spill] sm:$0xff] }
 0x4ef   : > { %v9221_v1 = vmax.f32 %v9189_v6, 0.0  ;;  %v14610_v6 = vpop.f32.mrf.mxu0 }
 0x4f1   : > { %v10876_v15 = vpack.c.bf16 %v9221_v1, %v9220_v48  ;;  %v8732_v48 = vadd.f32 %v14541_v36, %v14469_v47 }
 0x4f2   : > { %v9080_v51 = vpop.f32.mrf.mxu1 }
 0x4f3   : > { %10948 = vst [vmem:[%s14586_s7 + $0x8] sm:$0xff] %v10876_v15   ;;  %v9154_v52 = vadd.f32 %v9080_v51, %v8729_v37  ;;  %v7682_v1 = vpop.f32.mrf.mxu2 }
 0x4f5   : > { %9119 = vmatmul.bf16.gmra.mxu1 %v14899_v14  ;;  %v9190_v31 = vadd.f32 %v14576_v41, %v9154_v52  ;;  %v14901_v14 = vld [vmem:[#allocation16_spill] sm:$0xff] }
 0x4f6   : > { %v7738_v52 = vadd.f32 %v7670_v40, %v14901_v14 }
 0x4f7   : > { %v9222_v29 = vmax.f32 %v9190_v31, 0.0 }
 0x4f8   : > { %v8052_v31 = vadd.f32 %v7984_v25, %v7738_v52 }
 0x4fa   : > { %v9082_v19 = vpop.f32.mrf.mxu1 }
 0x4fb   : > { %v9155_v44 = vadd.f32 %v9082_v19, %v8730_v54  ;;  %v7996_v19 = vpop.f32.mrf.mxu3  ;;  %v7685_v47 = vpop.f32.mrf.mxu2 }
 0x4fd   : > { %v9191_v56 = vadd.f32 %v14576_v41, %v9155_v44  ;;  %v14902_v44 = vld [vmem:[#allocation15_spill] sm:$0xff] }
 0x4ff   : > { %v9223_v43 = vmax.f32 %v9191_v56, 0.0  ;;  %v7739_v56 = vadd.f32 %v7672_v59, %v14902_v44 }
 0x501   : > { %v10881_v0 = vpack.c.bf16 %v9223_v43, %v9222_v29  ;;  %v8053_v36 = vadd.f32 %v7986_v13, %v7739_v56 }
 0x502   : > { %v9085_v30 = vpop.f32.mrf.mxu1 }
 0x503   : > { %10949 = vst [vmem:[%s14586_s7 + $0x10] sm:$0xff] %v10881_v0   ;;  %v9156_v11 = vadd.f32 %v9085_v30, %v8731_v8  ;;  %v8677_v0 = vpop.f32.mrf.mxu0  ;;  %v8733_v30 = vadd.f32 %v14588_v42, %v8052_v31  ;;  %v8734_v40 = vadd.f32 %v8667_v38, %v8053_v36  ;;  %v7687_v14 = vpop.f32.mrf.mxu2 }
 0x505   : > { %9124 = vmatmul.bf16.gmra.mxu1 %v14900_v28  ;;  %v9192_v51 = vadd.f32 %v14576_v41, %v9156_v11  ;;  %v7999_v28 = vpop.f32.mrf.mxu3 }
 0x507   : > { %v9224_v61 = vmax.f32 %v9192_v51, 0.0 }
 0x50a   : > { %v9087_v15 = vpop.f32.mrf.mxu1 }
 0x50b   : > { %v9157_v37 = vadd.f32 %v9087_v15, %v8732_v48  ;;  %v14903_v15 = vld [vmem:[#allocation22_spill] sm:$0xff]  ;;  %v14623_v51 = vpop.f32.mrf.mxu0 }
 0x50c   : > { %v7740_v59 = vadd.f32 %v7675_v60, %v14903_v15 }
 0x50d   : > { %v9193_v54 = vadd.f32 %v14576_v41, %v9157_v37  ;;  %v8001_v38 = vpop.f32.mrf.mxu3 }
 0x50e   : > { %v8054_v42 = vadd.f32 %v7989_v18, %v7740_v59  ;;  %v14905_v18 = vld [vmem:[#allocation28_spill] sm:$0xff] }
 0x50f   : > { %v9225_v45 = vmax.f32 %v9193_v54, 0.0  ;;  %v14904_v54 = vld [vmem:[#allocation23_spill] sm:$0xff] }
 0x510   : > { %v8735_v44 = vadd.f32 %v8670_v57, %v8054_v42  ;;  %v7743_v57 = vadd.f32 %v7682_v1, %v14373_v49 }
 0x511   : > { %v10886_v29 = vpack.c.bf16 %v9225_v45, %v9224_v61 }
 0x512   : > { %v9090_v43 = vpop.f32.mrf.mxu1 }
 0x513   : > { %10950 = vst [vmem:[%s14586_s7 + $0x18] sm:$0xff] %v10886_v29   ;;  %v9158_v8 = vadd.f32 %v9090_v43, %v8733_v30  ;;  %v8682_v56 = vpop.f32.mrf.mxu0  ;;  %v7690_v29 = vpop.f32.mrf.mxu2 }
 0x515   : > { %9129 = vmatmul.bf16.gmra.mxu1 %v14319_v58  ;;  %v9194_v48 = vadd.f32 %v14576_v41, %v9158_v8  ;;  %v7741_v58 = vadd.f32 %v7677_v4, %v14904_v54 }
 0x517   : > { %v9226_v13 = vmax.f32 %v9194_v48, 0.0  ;;  %v8055_v31 = vadd.f32 %v7991_v17, %v7741_v58  ;;  %v8931_v58 = vrot.slane %v14528_v2, 5 }
 0x519   : > { %v8736_v43 = vadd.f32 %v8672_v55, %v8055_v31  ;;  %v8928_v55 = vrot.slane %v14516_v46, 5 }
 0x51a   : > { %v9092_v11 = vpop.f32.mrf.mxu1 }
 0x51b   : > { %v9159_v25 = vadd.f32 %v9092_v11, %v8734_v40  ;;  %v7742_v40 = vadd.f32 %v7680_v53, %v14905_v18  ;;  %v8004_v11 = vpop.f32.mrf.mxu3  ;;  %v7692_v59 = vpop.f32.mrf.mxu2  ;;  %v8930_v54 = vrot.slane %v8928_v55, 4 }
 0x51d   : > { %v9195_v37 = vadd.f32 %v14576_v41, %v9159_v25  ;;  %v8056_v17 = vadd.f32 %v7994_v3, %v7742_v40  ;;  %v8932_v46 = vsel %vm11415_vm5, %v8930_v54, %v8931_v58 }
 0x51f   : > { %v9227_v52 = vmax.f32 %v9195_v37, 0.0  ;;  %v8737_v42 = vadd.f32 %v14610_v6, %v8056_v17 }
 0x521   : > { %v10891_v61 = vpack.c.bf16 %v9227_v52, %v9226_v13  ;;  %v8772_v13 = vld [vmem:[#allocation2 + $0xcc] sm:$0xe]  ;;  %v8057_v52 = vadd.f32 %v7996_v19, %v7743_v57 }
 0x522   : > { %v9095_v45 = vpop.f32.mrf.mxu1  ;;  %v10592_v53 = vrot.slane %v8772_v13, 9 }
 0x523   : > { %10951 = vst [vmem:[%s14586_s7 + $0x20] sm:$0xff] %v10891_v61   ;;  %v9160_v60 = vadd.f32 %v9095_v45, %v8735_v44  ;;  %v8006_v61 = vpop.f32.mrf.mxu3  ;;  %v8738_v49 = vadd.f32 %v8677_v0, %v8057_v52  ;;  %v7744_v44 = vadd.f32 %v7685_v47, %v14403_v22 }
 0x524   : > { %v8929_v45 = vsel %vm11415_vm5, %v10592_v53, %v8928_v55 }
 0x525   : > { %9134 = vmatmul.bf16.gmra.mxu1 %v14359_v16  ;;  %v9196_v30 = vadd.f32 %v14576_v41, %v9160_v60  ;;  %v8685_v16 = vpop.f32.mrf.mxu0  ;;  %v8979_v60 = vunpack.c.l.b16 %v8929_v45 }
 0x527   : > { %v9228_v48 = vmax.f32 %v9196_v30, 0.0  ;;  %v8058_v30 = vadd.f32 %v7999_v28, %v7744_v44 }
 0x529   : > { %v8739_v17 = vadd.f32 %v14623_v51, %v8058_v30  ;;  %v7747_v51 = vadd.f32 %v7692_v59, %v14446_v35 }
 0x52a   : > { %v9097_v36 = vpop.f32.mrf.mxu1 }
 0x52b   : > { %v9161_v8 = vadd.f32 %v9097_v36, %v8736_v43  ;;  %v8980_v43 = vunpack.c.l.b16 %v8932_v46  ;;  %v8009_v40 = vpop.f32.mrf.mxu3 }
 0x52d   : > { %v9197_v4 = vadd.f32 %v14576_v41, %v9161_v8  ;;  %v8687_v31 = vpop.f32.mrf.mxu0  ;;  %v7745_v8 = vadd.f32 %v7687_v14, %v14419_v7  ;;  %v8996_v39 = vpack.c.b16 %v8980_v43, %v8979_v60  ;;  %v7746_v7 = vadd.f32 %v7690_v29, %v14430_v27 }
 0x52f   : > { %v9229_v25 = vmax.f32 %v9197_v4, 0.0  ;;  %v8060_v53 = vadd.f32 %v8004_v11, %v7746_v7 }
 0x531   : > { %v10896_v15 = vpack.c.bf16 %v9229_v25, %v9228_v48  ;;  %v8059_v48 = vadd.f32 %v8001_v38, %v7745_v8 }
 0x532   : > { %v9100_v37 = vpop.f32.mrf.mxu1 }
 0x533   : > { %10952 = vst [vmem:[%s14586_s7 + $0x28] sm:$0xff] %v10896_v15   ;;  %v9162_v3 = vadd.f32 %v9100_v37, %v8737_v42  ;;  %v8740_v57 = vadd.f32 %v8682_v56, %v8059_v48  ;;  %v8011_v55 = vpop.f32.mrf.mxu3  ;;  %v8061_v56 = vadd.f32 %v8006_v61, %v7747_v51 }
 0x535   : > { %9139 = vmatmul.bf16.gmra.mxu1 %v14407_v62  ;;  %v9198_v6 = vadd.f32 %v14576_v41, %v9162_v3  ;;  %v7695_v62 = vpop.f32.mrf.mxu2  ;;  %v8690_v25 = vpop.f32.mrf.mxu0  ;;  %v8741_v3 = vadd.f32 %v8685_v16, %v8060_v53  ;;  %v8742_v46 = vadd.f32 %v8687_v31, %v8061_v56 }
 0x536   : > { %v7748_v44 = vadd.f32 %v7695_v62, %v14457_v10 }
 0x537   : > { %v9230_v0 = vmax.f32 %v9198_v6, 0.0 }
 0x538   : > { %v8062_v60 = vadd.f32 %v8009_v40, %v7748_v44 }
 0x53a   : > { %v9102_v1 = vpop.f32.mrf.mxu1  ;;  %v8743_v30 = vadd.f32 %v8690_v25, %v8062_v60 }
 0x53b   : > { %v9163_v19 = vadd.f32 %v9102_v1, %v8738_v49  ;;  %v8014_v49 = vpop.f32.mrf.mxu3 }
 0x53d   : > { %v9199_v2 = vadd.f32 %v14576_v41, %v9163_v19  ;;  %v7697_v22 = vpop.f32.mrf.mxu2  ;;  %v8692_v13 = vpop.f32.mrf.mxu0 }
 0x53e   : > { %v7749_v16 = vadd.f32 %v7697_v22, %v14471_v50 }
 0x53f   : > { %v9231_v36 = vmax.f32 %v9199_v2, 0.0 }
 0x541   : > { %v10901_v18 = vpack.c.bf16 %v9231_v36, %v9230_v0  ;;  %v8063_v36 = vadd.f32 %v8011_v55, %v7749_v16 }
 0x542   : > { %v9105_v4 = vpop.f32.mrf.mxu1 }
 0x543   : > { %10953 = vst [vmem:[%s14586_s7 + $0x30] sm:$0xff] %v10901_v18   ;;  %v9164_v47 = vadd.f32 %v9105_v4, %v8739_v17  ;;  %v8016_v2 = vpop.f32.mrf.mxu3  ;;  %v8744_v18 = vadd.f32 %v8692_v13, %v8063_v36 }
 0x545   : > { %9144 = vmatmul.bf16.gmra.mxu1 %v8996_v39  ;;  %v9200_v37 = vadd.f32 %v14576_v41, %v9164_v47  ;;  %v7700_v42 = vpop.f32.mrf.mxu2  ;;  %v8695_v45 = vpop.f32.mrf.mxu0 }
 0x546   : > { %v7750_v48 = vadd.f32 %v7700_v42, %v14479_v26 }
 0x547   : > { %v9232_v52 = vmax.f32 %v9200_v37, 0.0 }
 0x54a   : > { %v9107_v15 = vpop.f32.mrf.mxu1 }
 0x54b   : > { %v9165_v28 = vadd.f32 %v9107_v15, %v8740_v57  ;;  %v8019_v39 = vpop.f32.mrf.mxu3  ;;  %v8064_v57 = vadd.f32 %v8014_v49, %v7750_v48 }
 0x54d   : > { %v9201_v14 = vadd.f32 %v14576_v41, %v9165_v28  ;;  %v7702_v27 = vpop.f32.mrf.mxu2  ;;  %v8697_v0 = vpop.f32.mrf.mxu0  ;;  %v8745_v7 = vadd.f32 %v8695_v45, %v8064_v57 }
 0x54e   : > { %v7751_v15 = vadd.f32 %v7702_v27, %v14492_v32 }
 0x54f   : > { %v9233_v38 = vmax.f32 %v9201_v14, 0.0 }
 0x550   : > { %v8065_v55 = vadd.f32 %v8016_v2, %v7751_v15 }
 0x551   : > { %v10906_v54 = vpack.c.bf16 %v9233_v38, %v9232_v52 }
 0x552   : > { %v9110_v58 = vpop.f32.mrf.mxu1  ;;  %v8746_v26 = vadd.f32 %v8697_v0, %v8065_v55 }
 0x553   : > { %10954 = vst [vmem:[%s14586_s7 + $0x38] sm:$0xff] %v10906_v54   ;;  %v9166_v1 = vadd.f32 %v9110_v58, %v8741_v3  ;;  %v8021_v28 = vpop.f32.mrf.mxu3 }
 0x555   : > { %v9202_v6 = vadd.f32 %v14576_v41, %v9166_v1  ;;  %v7705_v31 = vpop.f32.mrf.mxu2  ;;  %v8700_v40 = vpop.f32.mrf.mxu0 }
 0x556   : > { %v7752_v51 = vadd.f32 %v7705_v31, %v14500_v24 }
 0x557   : > { %v9234_v35 = vmax.f32 %v9202_v6, 0.0 }
 0x558   : > { %v8066_v3 = vadd.f32 %v8019_v39, %v7752_v51 }
 0x55a   : > { %v9112_v29 = vpop.f32.mrf.mxu1  ;;  %v8747_v6 = vadd.f32 %v8700_v40, %v8066_v3 }
 0x55b   : > { %v9167_v19 = vadd.f32 %v9112_v29, %v8742_v46  ;;  %v8024_v32 = vpop.f32.mrf.mxu3 }
 0x55d   : > { %v9203_v11 = vadd.f32 %v14576_v41, %v9167_v19  ;;  %v7707_v17 = vpop.f32.mrf.mxu2  ;;  %v8702_v14 = vpop.f32.mrf.mxu0 }
 0x55e   : > { %v7753_v49 = vadd.f32 %v7707_v17, %v14513_v20 }
 0x55f   : > { %v9235_v59 = vmax.f32 %v9203_v11, 0.0 }
 0x560   : > { %v8067_v29 = vadd.f32 %v8021_v28, %v7753_v49 }
 0x561   : > { %v10911_v61 = vpack.c.bf16 %v9235_v59, %v9234_v35 }
 0x562   : > { %v9115_v43 = vpop.f32.mrf.mxu1  ;;  %v8748_v11 = vadd.f32 %v8702_v14, %v8067_v29 }
 0x563   : > { %10955 = vst [vmem:[%s14586_s7 + $0x40] sm:$0xff] %v10911_v61   ;;  %v9168_v8 = vadd.f32 %v9115_v43, %v8743_v30  ;;  %v8026_v44 = vpop.f32.mrf.mxu3 }
 0x565   : > { %v9204_v62 = vadd.f32 %v14576_v41, %v9168_v8  ;;  %v7710_v52 = vpop.f32.mrf.mxu2  ;;  %v8705_v1 = vpop.f32.mrf.mxu0 }
 0x566   : > { %v7754_v16 = vadd.f32 %v7710_v52, %v14524_v63 }
 0x567   : > { %v9236_v22 = vmax.f32 %v9204_v62, 0.0 }
 0x568   : > { %v8068_v0 = vadd.f32 %v8024_v32, %v7754_v16 }
 0x56a   : > { %v9117_v10 = vpop.f32.mrf.mxu1 }
 0x56b   : > { %v9169_v4 = vadd.f32 %v9117_v10, %v8744_v18  ;;  %v8029_v30 = vpop.f32.mrf.mxu3  ;;  %v8749_v10 = vadd.f32 %v8705_v1, %v8068_v0 }
 0x56d   : > { %v9205_v50 = vadd.f32 %v14576_v41, %v9169_v4  ;;  %v7712_v46 = vpop.f32.mrf.mxu2  ;;  %v8707_v35 = vpop.f32.mrf.mxu0 }
 0x56e   : > { %v7755_v31 = vadd.f32 %v7712_v46, %v14538_v21 }
 0x56f   : > { %v9237_v47 = vmax.f32 %v9205_v50, 0.0 }
 0x570   : > { %v8069_v18 = vadd.f32 %v8026_v44, %v7755_v31 }
 0x571   : > { %v10916_v25 = vpack.c.bf16 %v9237_v47, %v9236_v22 }
 0x572   : > { %v9120_v37 = vpop.f32.mrf.mxu1  ;;  %v8750_v48 = vadd.f32 %v8707_v35, %v8069_v18 }
 0x573   : > { %10956 = vst [vmem:[%s14586_s7 + $0x48] sm:$0xff] %v10916_v25   ;;  %v9170_v13 = vadd.f32 %v9120_v37, %v8745_v7  ;;  %v8031_v17 = vpop.f32.mrf.mxu3 }
 0x575   : > { %v9206_v42 = vadd.f32 %v14576_v41, %v9170_v13  ;;  %v7715_v60 = vpop.f32.mrf.mxu2  ;;  %v8710_v39 = vpop.f32.mrf.mxu0 }
 0x576   : > { %v7756_v22 = vadd.f32 %v7715_v60, %v14545_v23 }
 0x577   : > { %v9238_v58 = vmax.f32 %v9206_v42, 0.0 }
 0x578   : > { %v8070_v37 = vadd.f32 %v8029_v30, %v7756_v22 }
 0x57a   : > { %v9122_v38 = vpop.f32.mrf.mxu1  ;;  %v8751_v13 = vadd.f32 %v8710_v39, %v8070_v37 }
 0x57b   : > { %v9171_v53 = vadd.f32 %v9122_v38, %v8746_v26  ;;  %v8034_v52 = vpop.f32.mrf.mxu3 }
 0x57d   : > { %v9207_v54 = vadd.f32 %v14576_v41, %v9171_v53  ;;  %v7717_v62 = vpop.f32.mrf.mxu2  ;;  %v8712_v47 = vpop.f32.mrf.mxu0 }
 0x57e   : > { %v7757_v28 = vadd.f32 %v7717_v62, %v14550_v9 }
 0x57f   : > { %v9239_v56 = vmax.f32 %v9207_v54, 0.0 }
 0x580   : > { %v8071_v14 = vadd.f32 %v8031_v17, %v7757_v28 }
 0x581   : > { %v10921_v45 = vpack.c.bf16 %v9239_v56, %v9238_v58 }
 0x582   : > { %v9125_v27 = vpop.f32.mrf.mxu1  ;;  %v8752_v42 = vadd.f32 %v8712_v47, %v8071_v14 }
 0x583   : > { %10957 = vst [vmem:[%s14586_s7 + $0x50] sm:$0xff] %v10921_v45   ;;  %v9172_v19 = vadd.f32 %v9125_v27, %v8747_v6  ;;  %v8036_v3 = vpop.f32.mrf.mxu3 }
 0x585   : > { %v9208_v59 = vadd.f32 %v14576_v41, %v9172_v19  ;;  %v7720_v25 = vpop.f32.mrf.mxu2  ;;  %v8715_v38 = vpop.f32.mrf.mxu0 }
 0x586   : > { %v7758_v32 = vadd.f32 %v7720_v25, %v14554_v34 }
 0x587   : > { %v9240_v61 = vmax.f32 %v9208_v59, 0.0 }
 0x588   : > { %v8072_v49 = vadd.f32 %v8034_v52, %v7758_v32 }
 0x58a   : > { %v9127_v24 = vpop.f32.mrf.mxu1  ;;  %v8753_v19 = vadd.f32 %v8715_v38, %v8072_v49 }
 0x58b   : > { %v9173_v2 = vadd.f32 %v9127_v24, %v8748_v11  ;;  %v8039_v11 = vpop.f32.mrf.mxu3 }
 0x58d   : > { %v9209_v20 = vadd.f32 %v14576_v41, %v9173_v2  ;;  %v7722_v23 = vpop.f32.mrf.mxu2  ;;  %v8717_v27 = vpop.f32.mrf.mxu0 }
 0x58e   : > { %v7759_v1 = vadd.f32 %v7722_v23, %v14559_v33 }
 0x58f   : > { %v9241_v43 = vmax.f32 %v9209_v20, 0.0 }
 0x590   : > { %v8073_v6 = vadd.f32 %v8036_v3, %v7759_v1 }
 0x591   : > { %v10926_v36 = vpack.c.bf16 %v9241_v43, %v9240_v61 }
 0x592   : > { %v9130_v8 = vpop.f32.mrf.mxu1  ;;  %v8754_v24 = vadd.f32 %v8717_v27, %v8073_v6 }
 0x593   : > { %10958 = vst [vmem:[%s14586_s7 + $0x58] sm:$0xff] %v10926_v36   ;;  %v9174_v4 = vadd.f32 %v9130_v8, %v8749_v10  ;;  %v8041_v36 = vpop.f32.mrf.mxu3 }
 0x595   : > { %v9210_v63 = vadd.f32 %v14576_v41, %v9174_v4  ;;  %v7725_v29 = vpop.f32.mrf.mxu2  ;;  %v8720_v2 = vpop.f32.mrf.mxu0 }
 0x596   : > { %v7760_v60 = vadd.f32 %v7725_v29, %v14563_v12 }
 0x597   : > { %v9242_v57 = vmax.f32 %v9210_v63, 0.0 }
 0x598   : > { %v8074_v43 = vadd.f32 %v8039_v11, %v7760_v60 }
 0x59a   : > { %v9132_v40 = vpop.f32.mrf.mxu1  ;;  %v8755_v8 = vadd.f32 %v8720_v2, %v8074_v43 }
 0x59b   : > { %v9175_v50 = vadd.f32 %v9132_v40, %v8750_v48 }
 0x59d   : > { %v9211_v21 = vadd.f32 %v14576_v41, %v9175_v50  ;;  %v7727_v16 = vpop.f32.mrf.mxu2  ;;  %v8722_v39 = vpop.f32.mrf.mxu0 }
 0x59e   : > { %v7761_v0 = vadd.f32 %v7727_v16, %v14568_v5 }
 0x59f   : > { %v9243_v15 = vmax.f32 %v9211_v21, 0.0 }
 0x5a0   : > { %v8075_v18 = vadd.f32 %v8041_v36, %v7761_v0 }
 0x5a1   : > { %v10931_v55 = vpack.c.bf16 %v9243_v15, %v9242_v57 }
 0x5a2   : > { %v9135_v7 = vpop.f32.mrf.mxu1  ;;  %v8756_v62 = vadd.f32 %v8722_v39, %v8075_v18 }
 0x5a3   : > { %10959 = vst [vmem:[%s14586_s7 + $0x60] sm:$0xff] %v10931_v55   ;;  %v9176_v26 = vadd.f32 %v9135_v7, %v8751_v13 }
 0x5a5   : > { %v9212_v51 = vadd.f32 %v14576_v41, %v9176_v26 }
 0x5a7   : > { %v9244_v9 = vmax.f32 %v9212_v51, 0.0 }
 0x5aa   : > { %v9137_v53 = vpop.f32.mrf.mxu1 }
 0x5ab   : > { %v9177_v54 = vadd.f32 %v9137_v53, %v8752_v42 }
 0x5ad   : > { %v9213_v58 = vadd.f32 %v14576_v41, %v9177_v54 }
 0x5af   : > { %v9245_v56 = vmax.f32 %v9213_v58, 0.0 }
 0x5b1   : > { %v10936_v45 = vpack.c.bf16 %v9245_v56, %v9244_v9 }
 0x5b2   : > { %v9140_v46 = vpop.f32.mrf.mxu1 }
 0x5b3   : > { %10960 = vst [vmem:[%s14586_s7 + $0x68] sm:$0xff] %v10936_v45   ;;  %v9178_v44 = vadd.f32 %v9140_v46, %v8753_v19 }
 0x5b5   : > { %v9214_v35 = vadd.f32 %v14576_v41, %v9178_v44 }
 0x5b7   : > { %v9246_v20 = vmax.f32 %v9214_v35, 0.0 }
 0x5ba   : > { %v9142_v34 = vpop.f32.mrf.mxu1 }
 0x5bb   : > { %v9179_v59 = vadd.f32 %v9142_v34, %v8754_v24 }
 0x5bd   : > { %v9215_v33 = vadd.f32 %v14576_v41, %v9179_v59 }
 0x5bf   : > { %v9247_v61 = vmax.f32 %v9215_v33, 0.0 }
 0x5c1   : > { %v10941_v31 = vpack.c.bf16 %v9247_v61, %v9246_v20 }
 0x5c2   : > { %v9145_v30 = vpop.f32.mrf.mxu1 }
 0x5c3   : > { %10961 = vst [vmem:[%s14586_s7 + $0x70] sm:$0xff] %v10941_v31   ;;  %v9180_v10 = vadd.f32 %v9145_v30, %v8755_v8 }
 0x5c5   : > { %v9216_v12 = vadd.f32 %v14576_v41, %v9180_v10 }
 0x5c7   : > { %v9248_v63 = vmax.f32 %v9216_v12, 0.0 }
 0x5ca   : > { %v9147_v4 = vpop.f32.mrf.mxu1 }
 0x5cb   : > { %v9181_v48 = vadd.f32 %v9147_v4, %v8756_v62 }
 0x5cd   : > { %v9217_v40 = vadd.f32 %v14576_v41, %v9181_v48 }
 0x5cf   : > { %v9249_v50 = vmax.f32 %v9217_v40, 0.0 }
 0x5d1   : > { %v10946_v17 = vpack.c.bf16 %v9249_v50, %v9248_v63 }
 0x5d3   : > { %10962 = vst [vmem:[%s14586_s7 + $0x78] sm:$0xff] %v10946_v17  }
 0x5d4 PF: > { %s15_s18 = sadd.s32 1, %s11027_s18  }
 0x5d5   : > { %p12_p4 = scmp.ge.s32.totalorder %s15_s18, 4  }
 0x5d7   :  { %14 = sbr.rel (!%p12_p4) target bundleno = 1 (0x1), region = 75 }

</bundles_post_ra>
